<compile_context>
chip_gen: v7x
topology: tpu7x:2x2x1
jax: 0.10.0
libtpu: 0.0.40
codegen_flags: <defaults>
</compile_context>

<pallas_src>
import functools

import jax
import jax.numpy as jnp
from jax.experimental import pallas as pl
from jax.experimental.pallas import tpu as pltpu

N_EMBED = 128
N_HEAD = 8
HEAD_SIZE = N_EMBED // N_HEAD   # 16
FF_HIDDEN = 4 * N_EMBED         # 512
LN_EPS = 1e-5
NEG_INF = -1e30                 # finite "masked" value (every causal row has >=1 key)


def _layernorm(x, gamma, beta):
    mu = jnp.mean(x, axis=-1, keepdims=True)
    var = jnp.mean((x - mu) ** 2, axis=-1, keepdims=True)
    return (x - mu) * jax.lax.rsqrt(var + LN_EPS) * gamma + beta


def block_kernel(x_ref,
                 wqkv_ref, wp_ref, bp_ref,
                 w1_ref, b1_ref, w2_ref, b2_ref,
                 g1_ref, be1_ref, g2_ref, be2_ref,
                 o_ref, *, compute_dtype, approx_recip):
    # x_ref block: (Bblk, T, C) -- fold (Bblk, T) into the matmul M dimension.
    Bblk, T, C = x_ref.shape
    M = Bblk * T

    x = x_ref[...].reshape(M, C).astype(jnp.float32)    # (M, C) f32 master copy
    xc = x.astype(compute_dtype)

    # ---- fused QKV projection: one (M, C) x (C, 3C) MXU matmul, f32 accumulate.
    #      (1/sqrt(head_size) is already folded into the wq columns of wqkv.)
    qkv = jnp.dot(xc, wqkv_ref[...], preferred_element_type=jnp.float32)   # (M, 3C)
    q = qkv[:, 0 * C:1 * C]        # 128-lane-aligned slices -> free
    k = qkv[:, 1 * C:2 * C]
    v = qkv[:, 2 * C:3 * C]

    # ---- causal mask, built once per block
    row = jax.lax.broadcasted_iota(jnp.int32, (T, T), 0)
    col = jax.lax.broadcasted_iota(jnp.int32, (T, T), 1)
    causal = (row >= col)[None, :, :]                                       # (1, T, T)

    wp = wp_ref[...]                                                        # (C, C)

    # ---- per-head attention, batched over all Bblk sequences at once.
    #      Head outputs are immediately projected through their 16-row slice of wp
    #      and accumulated -> no 8-way lane concat.
    att = jnp.zeros((M, C), jnp.float32)
    for h in range(N_HEAD):                           # static 8-iteration loop
        sl = slice(h * HEAD_SIZE, (h + 1) * HEAD_SIZE)
        qh = q[:, sl].reshape(Bblk, T, HEAD_SIZE)     # leading-dim reshape only
        kh = k[:, sl].reshape(Bblk, T, HEAD_SIZE)
        vh = v[:, sl].reshape(Bblk, T, HEAD_SIZE)

        s = jnp.einsum('btd,bsd->bts',
                       qh.astype(compute_dtype), kh.astype(compute_dtype),
                       preferred_element_type=jnp.float32)                  # (Bblk,T,T)
        s = jnp.where(causal, s, NEG_INF)
        # numerically-stable softmax over the key axis (f32)
        s = s - jnp.max(s, axis=-1, keepdims=True)
        e = jnp.exp(s)
        inv = pl.reciprocal(jnp.sum(e, axis=-1, keepdims=True), approx=approx_recip)
        p = e * inv
        # attention-weight dropout: identity (eval mode)
        oh = jnp.einsum('bts,bsd->btd',
                        p.astype(compute_dtype), vh.astype(compute_dtype),
                        preferred_element_type=jnp.float32)                 # (Bblk,T,D)
        oh = oh.reshape(M, HEAD_SIZE)
        att = att + jnp.dot(oh.astype(compute_dtype), wp[sl, :],
                            preferred_element_type=jnp.float32)             # (M, C)

    att = att + bp_ref[...]
    # post-proj dropout: identity (eval mode)

    # ---- residual + LayerNorm 1 (post-norm of the sum, as in the module)
    x1 = _layernorm(x + att, g1_ref[...], be1_ref[...])

    # ---- FeedForward: Linear(128->512) -> ReLU -> Linear(512->128)
    h1 = jnp.dot(x1.astype(compute_dtype), w1_ref[...],
                 preferred_element_type=jnp.float32) + b1_ref[...]
    h1 = jnp.maximum(h1, 0.0)
    ff = jnp.dot(h1.astype(compute_dtype), w2_ref[...],
                 preferred_element_type=jnp.float32) + b2_ref[...]
    # post-FFN dropout: identity (eval mode)

    # ---- residual + LayerNorm 2
    x2 = _layernorm(x1 + ff, g2_ref[...], be2_ref[...])

    o_ref[...] = x2.reshape(Bblk, T, C).astype(o_ref.dtype)


def _choose_bblk(B, T, target_rows=1024, max_rows=2048, min_steps=2):
    """Pick Bblk (divisor of B) so M = Bblk*T amortizes the per-step overhead
    (target ~1024-2048 rows) while keeping the grid length >= min_steps when
    possible (v7x has 2 TensorCores that the 'parallel' axis shards across)."""
    divisors = [d for d in range(1, B + 1) if B % d == 0 and d * T <= max_rows]
    if not divisors:
        return 1
    multi = [d for d in divisors if B // d >= min_steps]
    cands = multi if multi else divisors
    for d in cands:                       # smallest divisor that reaches the target
        if d * T >= target_rows:
            return d
    return cands[-1]                      # otherwise the largest admissible one


def prepare_params(params, compute_dtype=jnp.bfloat16):
    """Host-side, once-per-model weight prep: fuse QKV, fold the softmax scale into
    wq, and cast matmul weights to the compute dtype.  Biases / LayerNorm affine
    params stay f32 (VPU math is f32)."""
    wq, wk, wv, wp, bp, w1, b1, w2, b2, g1, be1, g2, be2 = params
    scale = jnp.float32(HEAD_SIZE ** -0.5)
    wqkv = jnp.concatenate([wq * scale, wk, wv], axis=1)        # (C, 3C)
    cast = lambda w: w.astype(compute_dtype)
    return [cast(wqkv), cast(wp), bp,
            cast(w1), b1, cast(w2), b2,
            g1, be1, g2, be2]


def transformer_block(x, kparams, compute_dtype=jnp.bfloat16):
    """kparams: output of prepare_params(...)."""
    B, T, C = x.shape
    assert C == N_EMBED

    Bblk = _choose_bblk(B, T)
    grid = (B // Bblk,)

    def full_spec(shape):
        nd = len(shape)
        # constant index map -> weight tile stays VMEM-resident across grid steps
        return pl.BlockSpec(shape, lambda b, _nd=nd: (0,) * _nd)

    seq_spec = pl.BlockSpec((Bblk, T, C), lambda b: (b, 0, 0))
    in_specs = [seq_spec] + [full_spec(p.shape) for p in kparams]

    # Advisory cost estimate for the XLA scheduler.
    flops = 24 * B * T * C * C + 4 * B * N_HEAD * T * T * HEAD_SIZE
    transcendentals = B * N_HEAD * T * T + B * N_HEAD * T + 2 * B * T
    bytes_accessed = (2 * B * T * C * x.dtype.itemsize
                      + sum(int(p.size) * p.dtype.itemsize for p in kparams))
    cost = pl.CostEstimate(flops=int(flops),
                           transcendentals=int(transcendentals),
                           bytes_accessed=int(bytes_accessed))

    kernel = functools.partial(block_kernel,
                               compute_dtype=compute_dtype,
                               approx_recip=(compute_dtype != jnp.float32))

    return pl.pallas_call(
        kernel,
        out_shape=jax.ShapeDtypeStruct((B, T, C), x.dtype),
        grid_spec=pltpu.PrefetchScalarGridSpec(
            num_scalar_prefetch=0,
            grid=grid,
            in_specs=in_specs,
            out_specs=seq_spec,
        ),
        compiler_params=pltpu.CompilerParams(
            dimension_semantics=("parallel",),
            vmem_limit_bytes=48 * 1024 * 1024),
        cost_estimate=cost,
    )(x, *kparams)


def init_params(key):
    """Deterministic synthetic params.  Linear weights stored as (in, out) so the
    kernel computes y = x @ W + b (equivalent to PyTorch's x @ W_torch.T + b)."""
    ks = jax.random.split(key, 8)
    s = N_EMBED ** -0.5
    wq = jax.random.normal(ks[0], (N_EMBED, N_EMBED), jnp.float32) * s
    wk = jax.random.normal(ks[1], (N_EMBED, N_EMBED), jnp.float32) * s
    wv = jax.random.normal(ks[2], (N_EMBED, N_EMBED), jnp.float32) * s
    wp = jax.random.normal(ks[3], (N_EMBED, N_EMBED), jnp.float32) * s
    bp = jnp.zeros((1, N_EMBED), jnp.float32)
    w1 = jax.random.normal(ks[4], (N_EMBED, FF_HIDDEN), jnp.float32) * s
    b1 = jnp.zeros((1, FF_HIDDEN), jnp.float32)
    w2 = jax.random.normal(ks[5], (FF_HIDDEN, N_EMBED), jnp.float32) * (FF_HIDDEN ** -0.5)
    b2 = jnp.zeros((1, N_EMBED), jnp.float32)
    g1 = jnp.ones((1, N_EMBED), jnp.float32)
    be1 = jnp.zeros((1, N_EMBED), jnp.float32)
    g2 = jnp.ones((1, N_EMBED), jnp.float32)
    be2 = jnp.zeros((1, N_EMBED), jnp.float32)
    return [wq, wk, wv, wp, bp, w1, b1, w2, b2, g1, be1, g2, be2]


def reference_block(x, params):
    """Pure-JAX reference (eval-mode dropout) for correctness check."""
    wq, wk, wv, wp, bp, w1, b1, w2, b2, g1, be1, g2, be2 = params
    B, T, C = x.shape
    q = x @ wq
    k = x @ wk
    v = x @ wv
    qh = q.reshape(B, T, N_HEAD, HEAD_SIZE)
    kh = k.reshape(B, T, N_HEAD, HEAD_SIZE)
    vh = v.reshape(B, T, N_HEAD, HEAD_SIZE)
    wei = jnp.einsum('bthd,bshd->bhts', qh, kh) * HEAD_SIZE ** -0.5
    mask = jnp.tril(jnp.ones((T, T), bool))
    wei = jnp.where(mask[None, None], wei, -jnp.inf)
    wei = jax.nn.softmax(wei, axis=-1)
    att = jnp.einsum('bhts,bshd->bthd', wei, vh).reshape(B, T, C)
    att = att @ wp + bp

    def ln(z, g, b):
        mu = jnp.mean(z, -1, keepdims=True)
        var = jnp.mean((z - mu) ** 2, -1, keepdims=True)
        return (z - mu) * jax.lax.rsqrt(var + LN_EPS) * g + b

    x1 = ln(x + att, g1, be1)
    ff = jnp.maximum(x1 @ w1 + b1, 0.0) @ w2 + b2
    return ln(x1 + ff, g2, be2)


if __name__ == "__main__":
    key = jax.random.PRNGKey(0)
    k_x, k_p = jax.random.split(key)

    B, T = 8, 32                        # T <= block_size (256)
    x = jax.random.normal(k_x, (B, T, N_EMBED), jnp.float32)
    params = init_params(k_p)

    # Full-precision reference (default TPU matmul precision would itself be bf16-ish,
    # which previously inflated the apparent kernel error).
    with jax.default_matmul_precision("highest"):
        ref = reference_block(x, params)

    # f32 compute path: exact softmax reciprocal + f32 MXU -> tight numerical check.
    kparams_f32 = prepare_params(params, compute_dtype=jnp.float32)
    out_f32 = jax.block_until_ready(
        transformer_block(x, kparams_f32, compute_dtype=jnp.float32))
    assert out_f32.shape == (B, T, N_EMBED)
    err32 = float(jnp.max(jnp.abs(out_f32 - ref)))
    assert err32 < 5e-3, f"f32 path max abs err {err32}"

    # bf16 compute path (default; MXU-native): sanity check only.
    kparams_bf16 = prepare_params(params, compute_dtype=jnp.bfloat16)
    out_bf16 = jax.block_until_ready(
        transformer_block(x, kparams_bf16, compute_dtype=jnp.bfloat16))
    assert out_bf16.shape == (B, T, N_EMBED)
    errbf = float(jnp.max(jnp.abs(out_bf16 - ref)))
    assert errbf < 0.25, f"bf16 path max abs err {errbf}"

    print("KERNEL_OK")
</pallas_src>

<mosaic_0001>
module attributes {stable_mosaic.version = 11 : i64} {
  func.func @block_kernel(%arg0: i32, %arg1: memref<4x32x128xf32, #tpu.memory_space<vmem>>, %arg2: memref<128x384xf32, #tpu.memory_space<vmem>>, %arg3: memref<128x128xf32, #tpu.memory_space<vmem>>, %arg4: memref<1x128xf32, #tpu.memory_space<vmem>>, %arg5: memref<128x512xf32, #tpu.memory_space<vmem>>, %arg6: memref<1x512xf32, #tpu.memory_space<vmem>>, %arg7: memref<512x128xf32, #tpu.memory_space<vmem>>, %arg8: memref<1x128xf32, #tpu.memory_space<vmem>>, %arg9: memref<1x128xf32, #tpu.memory_space<vmem>>, %arg10: memref<1x128xf32, #tpu.memory_space<vmem>>, %arg11: memref<1x128xf32, #tpu.memory_space<vmem>>, %arg12: memref<1x128xf32, #tpu.memory_space<vmem>>, %arg13: memref<4x32x128xf32, #tpu.memory_space<vmem>>) attributes {dimension_semantics = [#tpu.dimension_semantics<parallel>], iteration_bounds = array<i64: 2>, scalar_prefetch = 0 : i64, scratch_operands = 0 : i64, tpu.core_type = #tpu.core_type<tc>, window_params = [{transform_indices = @transform_0, window_bounds = array<i64: 4, 32, 128>}, {pipeline_mode = #tpu.pipeline_mode<synchronous>, transform_indices = @transform_1, window_bounds = array<i64: 128, 384>}, {pipeline_mode = #tpu.pipeline_mode<synchronous>, transform_indices = @transform_2, window_bounds = array<i64: 128, 128>}, {pipeline_mode = #tpu.pipeline_mode<synchronous>, transform_indices = @transform_3, window_bounds = array<i64: 1, 128>}, {pipeline_mode = #tpu.pipeline_mode<synchronous>, transform_indices = @transform_4, window_bounds = array<i64: 128, 512>}, {pipeline_mode = #tpu.pipeline_mode<synchronous>, transform_indices = @transform_5, window_bounds = array<i64: 1, 512>}, {pipeline_mode = #tpu.pipeline_mode<synchronous>, transform_indices = @transform_6, window_bounds = array<i64: 512, 128>}, {pipeline_mode = #tpu.pipeline_mode<synchronous>, transform_indices = @transform_7, window_bounds = array<i64: 1, 128>}, {pipeline_mode = #tpu.pipeline_mode<synchronous>, transform_indices = @transform_8, window_bounds = array<i64: 1, 128>}, {pipeline_mode = #tpu.pipeline_mode<synchronous>, transform_indices = @transform_9, window_bounds = array<i64: 1, 128>}, {pipeline_mode = #tpu.pipeline_mode<synchronous>, transform_indices = @transform_10, window_bounds = array<i64: 1, 128>}, {pipeline_mode = #tpu.pipeline_mode<synchronous>, transform_indices = @transform_11, window_bounds = array<i64: 1, 128>}, {transform_indices = @transform_12, window_bounds = array<i64: 4, 32, 128>}]} {
    %c0 = arith.constant 0 : index
    %c0_0 = arith.constant 0 : index
    %c0_1 = arith.constant 0 : index
    %0 = vector.load %arg1[%c0, %c0_0, %c0_1] : memref<4x32x128xf32, #tpu.memory_space<vmem>>, vector<4x32x128xf32>
    %1 = vector.shape_cast %0 : vector<4x32x128xf32> to vector<128x128xf32>
    %c0_2 = arith.constant 0 : index
    %c0_3 = arith.constant 0 : index
    %2 = vector.load %arg2[%c0_2, %c0_3] : memref<128x384xf32, #tpu.memory_space<vmem>>, vector<128x384xf32>
    %cst = arith.constant dense<0.000000e+00> : vector<128x384xf32>
    %3 = tpu.matmul %1, %2, %cst {dimension_numbers = #tpu.dot_dimension_numbers<[1], [0], [0], [1], [0, 0, 1, 1], [], []>} : vector<128x128xf32>, vector<128x384xf32>, vector<128x384xf32> -> vector<128x384xf32>
    %4 = vector.extract_strided_slice %3 {offsets = [0, 0], sizes = [128, 128], strides = [1, 1]} : vector<128x384xf32> to vector<128x128xf32>
    %5 = vector.extract_strided_slice %3 {offsets = [0, 128], sizes = [128, 128], strides = [1, 1]} : vector<128x384xf32> to vector<128x128xf32>
    %6 = vector.extract_strided_slice %3 {offsets = [0, 256], sizes = [128, 128], strides = [1, 1]} : vector<128x384xf32> to vector<128x128xf32>
    %7 = tpu.iota {dimensions = array<i32: 0>} : vector<32x32xi32>
    %8 = tpu.iota {dimensions = array<i32: 1>} : vector<32x32xi32>
    %9 = arith.cmpi sge, %7, %8 : vector<32x32xi32>
    %10 = vector.shape_cast %9 : vector<32x32xi1> to vector<1x32x32xi1>
    %c0_4 = arith.constant 0 : index
    %c0_5 = arith.constant 0 : index
    %11 = vector.load %arg3[%c0_4, %c0_5] : memref<128x128xf32, #tpu.memory_space<vmem>>, vector<128x128xf32>
    %cst_6 = arith.constant 0.000000e+00 : f32
    %12 = vector.broadcast %cst_6 : f32 to vector<128x128xf32>
    %13 = vector.extract_strided_slice %4 {offsets = [0, 0], sizes = [128, 16], strides = [1, 1]} : vector<128x128xf32> to vector<128x16xf32>
    %14 = vector.shape_cast %13 : vector<128x16xf32> to vector<4x32x16xf32>
    %15 = vector.extract_strided_slice %5 {offsets = [0, 0], sizes = [128, 16], strides = [1, 1]} : vector<128x128xf32> to vector<128x16xf32>
    %16 = vector.shape_cast %15 : vector<128x16xf32> to vector<4x32x16xf32>
    %17 = vector.extract_strided_slice %6 {offsets = [0, 0], sizes = [128, 16], strides = [1, 1]} : vector<128x128xf32> to vector<128x16xf32>
    %18 = vector.shape_cast %17 : vector<128x16xf32> to vector<4x32x16xf32>
    "tpu.trace_start"() <{level = 10 : i32, message = "btd,bsd->bts"}> : () -> ()
    %cst_7 = arith.constant dense<0.000000e+00> : vector<4x32x32xf32>
    %19 = tpu.matmul %14, %16, %cst_7 {dimension_numbers = #tpu.dot_dimension_numbers<[2], [2], [1], [1], [0, 0, 0, 1, 1, 1], [0], [0]>} : vector<4x32x16xf32>, vector<4x32x16xf32>, vector<4x32x32xf32> -> vector<4x32x32xf32>
    %cst_8 = arith.constant -1.000000e+30 : f32
    "tpu.trace_stop"() : () -> ()
    %20 = vector.shape_cast %10 : vector<1x32x32xi1> to vector<1x32x32xi1>
    %21 = vector.broadcast %20 : vector<1x32x32xi1> to vector<4x32x32xi1>
    %22 = vector.broadcast %cst_8 : f32 to vector<4x32x32xf32>
    %23 = arith.select %21, %19, %22 : vector<4x32x32xi1>, vector<4x32x32xf32>
    %cst_9 = arith.constant dense<0xFF800000> : vector<4x32xf32>
    %24 = vector.multi_reduction <maximumf>, %23, %cst_9 [2] : vector<4x32x32xf32> to vector<4x32xf32>
    %25 = vector.shape_cast %24 : vector<4x32xf32> to vector<4x32x1xf32>
    %26 = vector.broadcast %25 : vector<4x32x1xf32> to vector<4x32x32xf32>
    %27 = arith.subf %23, %26 : vector<4x32x32xf32>
    %28 = math.exp %27 : vector<4x32x32xf32>
    %cst_10 = arith.constant dense<0.000000e+00> : vector<4x32xf32>
    %29 = vector.multi_reduction <add>, %28, %cst_10 [2] : vector<4x32x32xf32> to vector<4x32xf32>
    %30 = vector.shape_cast %29 : vector<4x32xf32> to vector<4x32x1xf32>
    %31 = tpu.reciprocal %30 : vector<4x32x1xf32> -> vector<4x32x1xf32>
    %32 = vector.broadcast %31 : vector<4x32x1xf32> to vector<4x32x32xf32>
    %33 = arith.mulf %28, %32 : vector<4x32x32xf32>
    "tpu.trace_start"() <{level = 10 : i32, message = "bts,bsd->btd"}> : () -> ()
    %cst_11 = arith.constant dense<0.000000e+00> : vector<4x32x16xf32>
    %34 = tpu.matmul %33, %18, %cst_11 {dimension_numbers = #tpu.dot_dimension_numbers<[2], [1], [1], [2], [0, 0, 0, 1, 1, 2], [0], [0]>} : vector<4x32x32xf32>, vector<4x32x16xf32>, vector<4x32x16xf32> -> vector<4x32x16xf32>
    "tpu.trace_stop"() : () -> ()
    %35 = vector.shape_cast %34 : vector<4x32x16xf32> to vector<128x16xf32>
    %36 = vector.extract_strided_slice %11 {offsets = [0, 0], sizes = [16, 128], strides = [1, 1]} : vector<128x128xf32> to vector<16x128xf32>
    %cst_12 = arith.constant dense<0.000000e+00> : vector<128x128xf32>
    %37 = tpu.matmul %35, %36, %cst_12 {dimension_numbers = #tpu.dot_dimension_numbers<[1], [0], [0], [1], [0, 0, 1, 1], [], []>} : vector<128x16xf32>, vector<16x128xf32>, vector<128x128xf32> -> vector<128x128xf32>
    %38 = arith.addf %12, %37 : vector<128x128xf32>
    %39 = vector.extract_strided_slice %4 {offsets = [0, 16], sizes = [128, 16], strides = [1, 1]} : vector<128x128xf32> to vector<128x16xf32>
    %40 = vector.shape_cast %39 : vector<128x16xf32> to vector<4x32x16xf32>
    %41 = vector.extract_strided_slice %5 {offsets = [0, 16], sizes = [128, 16], strides = [1, 1]} : vector<128x128xf32> to vector<128x16xf32>
    %42 = vector.shape_cast %41 : vector<128x16xf32> to vector<4x32x16xf32>
    %43 = vector.extract_strided_slice %6 {offsets = [0, 16], sizes = [128, 16], strides = [1, 1]} : vector<128x128xf32> to vector<128x16xf32>
    %44 = vector.shape_cast %43 : vector<128x16xf32> to vector<4x32x16xf32>
    "tpu.trace_start"() <{level = 10 : i32, message = "btd,bsd->bts"}> : () -> ()
    %cst_13 = arith.constant dense<0.000000e+00> : vector<4x32x32xf32>
    %45 = tpu.matmul %40, %42, %cst_13 {dimension_numbers = #tpu.dot_dimension_numbers<[2], [2], [1], [1], [0, 0, 0, 1, 1, 1], [0], [0]>} : vector<4x32x16xf32>, vector<4x32x16xf32>, vector<4x32x32xf32> -> vector<4x32x32xf32>
    %cst_14 = arith.constant -1.000000e+30 : f32
    "tpu.trace_stop"() : () -> ()
    %46 = vector.shape_cast %10 : vector<1x32x32xi1> to vector<1x32x32xi1>
    %47 = vector.broadcast %46 : vector<1x32x32xi1> to vector<4x32x32xi1>
    %48 = vector.broadcast %cst_14 : f32 to vector<4x32x32xf32>
    %49 = arith.select %47, %45, %48 : vector<4x32x32xi1>, vector<4x32x32xf32>
    %cst_15 = arith.constant dense<0xFF800000> : vector<4x32xf32>
    %50 = vector.multi_reduction <maximumf>, %49, %cst_15 [2] : vector<4x32x32xf32> to vector<4x32xf32>
    %51 = vector.shape_cast %50 : vector<4x32xf32> to vector<4x32x1xf32>
    %52 = vector.broadcast %51 : vector<4x32x1xf32> to vector<4x32x32xf32>
    %53 = arith.subf %49, %52 : vector<4x32x32xf32>
    %54 = math.exp %53 : vector<4x32x32xf32>
    %cst_16 = arith.constant dense<0.000000e+00> : vector<4x32xf32>
    %55 = vector.multi_reduction <add>, %54, %cst_16 [2] : vector<4x32x32xf32> to vector<4x32xf32>
    %56 = vector.shape_cast %55 : vector<4x32xf32> to vector<4x32x1xf32>
    %57 = tpu.reciprocal %56 : vector<4x32x1xf32> -> vector<4x32x1xf32>
    %58 = vector.broadcast %57 : vector<4x32x1xf32> to vector<4x32x32xf32>
    %59 = arith.mulf %54, %58 : vector<4x32x32xf32>
    "tpu.trace_start"() <{level = 10 : i32, message = "bts,bsd->btd"}> : () -> ()
    %cst_17 = arith.constant dense<0.000000e+00> : vector<4x32x16xf32>
    %60 = tpu.matmul %59, %44, %cst_17 {dimension_numbers = #tpu.dot_dimension_numbers<[2], [1], [1], [2], [0, 0, 0, 1, 1, 2], [0], [0]>} : vector<4x32x32xf32>, vector<4x32x16xf32>, vector<4x32x16xf32> -> vector<4x32x16xf32>
    "tpu.trace_stop"() : () -> ()
    %61 = vector.shape_cast %60 : vector<4x32x16xf32> to vector<128x16xf32>
    %62 = vector.extract_strided_slice %11 {offsets = [16, 0], sizes = [16, 128], strides = [1, 1]} : vector<128x128xf32> to vector<16x128xf32>
    %cst_18 = arith.constant dense<0.000000e+00> : vector<128x128xf32>
    %63 = tpu.matmul %61, %62, %cst_18 {dimension_numbers = #tpu.dot_dimension_numbers<[1], [0], [0], [1], [0, 0, 1, 1], [], []>} : vector<128x16xf32>, vector<16x128xf32>, vector<128x128xf32> -> vector<128x128xf32>
    %64 = arith.addf %38, %63 : vector<128x128xf32>
    %65 = vector.extract_strided_slice %4 {offsets = [0, 32], sizes = [128, 16], strides = [1, 1]} : vector<128x128xf32> to vector<128x16xf32>
    %66 = vector.shape_cast %65 : vector<128x16xf32> to vector<4x32x16xf32>
    %67 = vector.extract_strided_slice %5 {offsets = [0, 32], sizes = [128, 16], strides = [1, 1]} : vector<128x128xf32> to vector<128x16xf32>
    %68 = vector.shape_cast %67 : vector<128x16xf32> to vector<4x32x16xf32>
    %69 = vector.extract_strided_slice %6 {offsets = [0, 32], sizes = [128, 16], strides = [1, 1]} : vector<128x128xf32> to vector<128x16xf32>
    %70 = vector.shape_cast %69 : vector<128x16xf32> to vector<4x32x16xf32>
    "tpu.trace_start"() <{level = 10 : i32, message = "btd,bsd->bts"}> : () -> ()
    %cst_19 = arith.constant dense<0.000000e+00> : vector<4x32x32xf32>
    %71 = tpu.matmul %66, %68, %cst_19 {dimension_numbers = #tpu.dot_dimension_numbers<[2], [2], [1], [1], [0, 0, 0, 1, 1, 1], [0], [0]>} : vector<4x32x16xf32>, vector<4x32x16xf32>, vector<4x32x32xf32> -> vector<4x32x32xf32>
    %cst_20 = arith.constant -1.000000e+30 : f32
    "tpu.trace_stop"() : () -> ()
    %72 = vector.shape_cast %10 : vector<1x32x32xi1> to vector<1x32x32xi1>
    %73 = vector.broadcast %72 : vector<1x32x32xi1> to vector<4x32x32xi1>
    %74 = vector.broadcast %cst_20 : f32 to vector<4x32x32xf32>
    %75 = arith.select %73, %71, %74 : vector<4x32x32xi1>, vector<4x32x32xf32>
    %cst_21 = arith.constant dense<0xFF800000> : vector<4x32xf32>
    %76 = vector.multi_reduction <maximumf>, %75, %cst_21 [2] : vector<4x32x32xf32> to vector<4x32xf32>
    %77 = vector.shape_cast %76 : vector<4x32xf32> to vector<4x32x1xf32>
    %78 = vector.broadcast %77 : vector<4x32x1xf32> to vector<4x32x32xf32>
    %79 = arith.subf %75, %78 : vector<4x32x32xf32>
    %80 = math.exp %79 : vector<4x32x32xf32>
    %cst_22 = arith.constant dense<0.000000e+00> : vector<4x32xf32>
    %81 = vector.multi_reduction <add>, %80, %cst_22 [2] : vector<4x32x32xf32> to vector<4x32xf32>
    %82 = vector.shape_cast %81 : vector<4x32xf32> to vector<4x32x1xf32>
    %83 = tpu.reciprocal %82 : vector<4x32x1xf32> -> vector<4x32x1xf32>
    %84 = vector.broadcast %83 : vector<4x32x1xf32> to vector<4x32x32xf32>
    %85 = arith.mulf %80, %84 : vector<4x32x32xf32>
    "tpu.trace_start"() <{level = 10 : i32, message = "bts,bsd->btd"}> : () -> ()
    %cst_23 = arith.constant dense<0.000000e+00> : vector<4x32x16xf32>
    %86 = tpu.matmul %85, %70, %cst_23 {dimension_numbers = #tpu.dot_dimension_numbers<[2], [1], [1], [2], [0, 0, 0, 1, 1, 2], [0], [0]>} : vector<4x32x32xf32>, vector<4x32x16xf32>, vector<4x32x16xf32> -> vector<4x32x16xf32>
    "tpu.trace_stop"() : () -> ()
    %87 = vector.shape_cast %86 : vector<4x32x16xf32> to vector<128x16xf32>
    %88 = vector.extract_strided_slice %11 {offsets = [32, 0], sizes = [16, 128], strides = [1, 1]} : vector<128x128xf32> to vector<16x128xf32>
    %cst_24 = arith.constant dense<0.000000e+00> : vector<128x128xf32>
    %89 = tpu.matmul %87, %88, %cst_24 {dimension_numbers = #tpu.dot_dimension_numbers<[1], [0], [0], [1], [0, 0, 1, 1], [], []>} : vector<128x16xf32>, vector<16x128xf32>, vector<128x128xf32> -> vector<128x128xf32>
    %90 = arith.addf %64, %89 : vector<128x128xf32>
    %91 = vector.extract_strided_slice %4 {offsets = [0, 48], sizes = [128, 16], strides = [1, 1]} : vector<128x128xf32> to vector<128x16xf32>
    %92 = vector.shape_cast %91 : vector<128x16xf32> to vector<4x32x16xf32>
    %93 = vector.extract_strided_slice %5 {offsets = [0, 48], sizes = [128, 16], strides = [1, 1]} : vector<128x128xf32> to vector<128x16xf32>
    %94 = vector.shape_cast %93 : vector<128x16xf32> to vector<4x32x16xf32>
    %95 = vector.extract_strided_slice %6 {offsets = [0, 48], sizes = [128, 16], strides = [1, 1]} : vector<128x128xf32> to vector<128x16xf32>
    %96 = vector.shape_cast %95 : vector<128x16xf32> to vector<4x32x16xf32>
    "tpu.trace_start"() <{level = 10 : i32, message = "btd,bsd->bts"}> : () -> ()
    %cst_25 = arith.constant dense<0.000000e+00> : vector<4x32x32xf32>
    %97 = tpu.matmul %92, %94, %cst_25 {dimension_numbers = #tpu.dot_dimension_numbers<[2], [2], [1], [1], [0, 0, 0, 1, 1, 1], [0], [0]>} : vector<4x32x16xf32>, vector<4x32x16xf32>, vector<4x32x32xf32> -> vector<4x32x32xf32>
    %cst_26 = arith.constant -1.000000e+30 : f32
    "tpu.trace_stop"() : () -> ()
    %98 = vector.shape_cast %10 : vector<1x32x32xi1> to vector<1x32x32xi1>
    %99 = vector.broadcast %98 : vector<1x32x32xi1> to vector<4x32x32xi1>
    %100 = vector.broadcast %cst_26 : f32 to vector<4x32x32xf32>
    %101 = arith.select %99, %97, %100 : vector<4x32x32xi1>, vector<4x32x32xf32>
    %cst_27 = arith.constant dense<0xFF800000> : vector<4x32xf32>
    %102 = vector.multi_reduction <maximumf>, %101, %cst_27 [2] : vector<4x32x32xf32> to vector<4x32xf32>
    %103 = vector.shape_cast %102 : vector<4x32xf32> to vector<4x32x1xf32>
    %104 = vector.broadcast %103 : vector<4x32x1xf32> to vector<4x32x32xf32>
    %105 = arith.subf %101, %104 : vector<4x32x32xf32>
    %106 = math.exp %105 : vector<4x32x32xf32>
    %cst_28 = arith.constant dense<0.000000e+00> : vector<4x32xf32>
    %107 = vector.multi_reduction <add>, %106, %cst_28 [2] : vector<4x32x32xf32> to vector<4x32xf32>
    %108 = vector.shape_cast %107 : vector<4x32xf32> to vector<4x32x1xf32>
    %109 = tpu.reciprocal %108 : vector<4x32x1xf32> -> vector<4x32x1xf32>
    %110 = vector.broadcast %109 : vector<4x32x1xf32> to vector<4x32x32xf32>
    %111 = arith.mulf %106, %110 : vector<4x32x32xf32>
    "tpu.trace_start"() <{level = 10 : i32, message = "bts,bsd->btd"}> : () -> ()
    %cst_29 = arith.constant dense<0.000000e+00> : vector<4x32x16xf32>
    %112 = tpu.matmul %111, %96, %cst_29 {dimension_numbers = #tpu.dot_dimension_numbers<[2], [1], [1], [2], [0, 0, 0, 1, 1, 2], [0], [0]>} : vector<4x32x32xf32>, vector<4x32x16xf32>, vector<4x32x16xf32> -> vector<4x32x16xf32>
    "tpu.trace_stop"() : () -> ()
    %113 = vector.shape_cast %112 : vector<4x32x16xf32> to vector<128x16xf32>
    %114 = vector.extract_strided_slice %11 {offsets = [48, 0], sizes = [16, 128], strides = [1, 1]} : vector<128x128xf32> to vector<16x128xf32>
    %cst_30 = arith.constant dense<0.000000e+00> : vector<128x128xf32>
    %115 = tpu.matmul %113, %114, %cst_30 {dimension_numbers = #tpu.dot_dimension_numbers<[1], [0], [0], [1], [0, 0, 1, 1], [], []>} : vector<128x16xf32>, vector<16x128xf32>, vector<128x128xf32> -> vector<128x128xf32>
    %116 = arith.addf %90, %115 : vector<128x128xf32>
    %117 = vector.extract_strided_slice %4 {offsets = [0, 64], sizes = [128, 16], strides = [1, 1]} : vector<128x128xf32> to vector<128x16xf32>
    %118 = vector.shape_cast %117 : vector<128x16xf32> to vector<4x32x16xf32>
    %119 = vector.extract_strided_slice %5 {offsets = [0, 64], sizes = [128, 16], strides = [1, 1]} : vector<128x128xf32> to vector<128x16xf32>
    %120 = vector.shape_cast %119 : vector<128x16xf32> to vector<4x32x16xf32>
    %121 = vector.extract_strided_slice %6 {offsets = [0, 64], sizes = [128, 16], strides = [1, 1]} : vector<128x128xf32> to vector<128x16xf32>
    %122 = vector.shape_cast %121 : vector<128x16xf32> to vector<4x32x16xf32>
    "tpu.trace_start"() <{level = 10 : i32, message = "btd,bsd->bts"}> : () -> ()
    %cst_31 = arith.constant dense<0.000000e+00> : vector<4x32x32xf32>
    %123 = tpu.matmul %118, %120, %cst_31 {dimension_numbers = #tpu.dot_dimension_numbers<[2], [2], [1], [1], [0, 0, 0, 1, 1, 1], [0], [0]>} : vector<4x32x16xf32>, vector<4x32x16xf32>, vector<4x32x32xf32> -> vector<4x32x32xf32>
    %cst_32 = arith.constant -1.000000e+30 : f32
    "tpu.trace_stop"() : () -> ()
    %124 = vector.shape_cast %10 : vector<1x32x32xi1> to vector<1x32x32xi1>
    %125 = vector.broadcast %124 : vector<1x32x32xi1> to vector<4x32x32xi1>
    %126 = vector.broadcast %cst_32 : f32 to vector<4x32x32xf32>
    %127 = arith.select %125, %123, %126 : vector<4x32x32xi1>, vector<4x32x32xf32>
    %cst_33 = arith.constant dense<0xFF800000> : vector<4x32xf32>
    %128 = vector.multi_reduction <maximumf>, %127, %cst_33 [2] : vector<4x32x32xf32> to vector<4x32xf32>
    %129 = vector.shape_cast %128 : vector<4x32xf32> to vector<4x32x1xf32>
    %130 = vector.broadcast %129 : vector<4x32x1xf32> to vector<4x32x32xf32>
    %131 = arith.subf %127, %130 : vector<4x32x32xf32>
    %132 = math.exp %131 : vector<4x32x32xf32>
    %cst_34 = arith.constant dense<0.000000e+00> : vector<4x32xf32>
    %133 = vector.multi_reduction <add>, %132, %cst_34 [2] : vector<4x32x32xf32> to vector<4x32xf32>
    %134 = vector.shape_cast %133 : vector<4x32xf32> to vector<4x32x1xf32>
    %135 = tpu.reciprocal %134 : vector<4x32x1xf32> -> vector<4x32x1xf32>
    %136 = vector.broadcast %135 : vector<4x32x1xf32> to vector<4x32x32xf32>
    %137 = arith.mulf %132, %136 : vector<4x32x32xf32>
    "tpu.trace_start"() <{level = 10 : i32, message = "bts,bsd->btd"}> : () -> ()
    %cst_35 = arith.constant dense<0.000000e+00> : vector<4x32x16xf32>
    %138 = tpu.matmul %137, %122, %cst_35 {dimension_numbers = #tpu.dot_dimension_numbers<[2], [1], [1], [2], [0, 0, 0, 1, 1, 2], [0], [0]>} : vector<4x32x32xf32>, vector<4x32x16xf32>, vector<4x32x16xf32> -> vector<4x32x16xf32>
    "tpu.trace_stop"() : () -> ()
    %139 = vector.shape_cast %138 : vector<4x32x16xf32> to vector<128x16xf32>
    %140 = vector.extract_strided_slice %11 {offsets = [64, 0], sizes = [16, 128], strides = [1, 1]} : vector<128x128xf32> to vector<16x128xf32>
    %cst_36 = arith.constant dense<0.000000e+00> : vector<128x128xf32>
    %141 = tpu.matmul %139, %140, %cst_36 {dimension_numbers = #tpu.dot_dimension_numbers<[1], [0], [0], [1], [0, 0, 1, 1], [], []>} : vector<128x16xf32>, vector<16x128xf32>, vector<128x128xf32> -> vector<128x128xf32>
    %142 = arith.addf %116, %141 : vector<128x128xf32>
    %143 = vector.extract_strided_slice %4 {offsets = [0, 80], sizes = [128, 16], strides = [1, 1]} : vector<128x128xf32> to vector<128x16xf32>
    %144 = vector.shape_cast %143 : vector<128x16xf32> to vector<4x32x16xf32>
    %145 = vector.extract_strided_slice %5 {offsets = [0, 80], sizes = [128, 16], strides = [1, 1]} : vector<128x128xf32> to vector<128x16xf32>
    %146 = vector.shape_cast %145 : vector<128x16xf32> to vector<4x32x16xf32>
    %147 = vector.extract_strided_slice %6 {offsets = [0, 80], sizes = [128, 16], strides = [1, 1]} : vector<128x128xf32> to vector<128x16xf32>
    %148 = vector.shape_cast %147 : vector<128x16xf32> to vector<4x32x16xf32>
    "tpu.trace_start"() <{level = 10 : i32, message = "btd,bsd->bts"}> : () -> ()
    %cst_37 = arith.constant dense<0.000000e+00> : vector<4x32x32xf32>
    %149 = tpu.matmul %144, %146, %cst_37 {dimension_numbers = #tpu.dot_dimension_numbers<[2], [2], [1], [1], [0, 0, 0, 1, 1, 1], [0], [0]>} : vector<4x32x16xf32>, vector<4x32x16xf32>, vector<4x32x32xf32> -> vector<4x32x32xf32>
    %cst_38 = arith.constant -1.000000e+30 : f32
    "tpu.trace_stop"() : () -> ()
    %150 = vector.shape_cast %10 : vector<1x32x32xi1> to vector<1x32x32xi1>
    %151 = vector.broadcast %150 : vector<1x32x32xi1> to vector<4x32x32xi1>
    %152 = vector.broadcast %cst_38 : f32 to vector<4x32x32xf32>
    %153 = arith.select %151, %149, %152 : vector<4x32x32xi1>, vector<4x32x32xf32>
    %cst_39 = arith.constant dense<0xFF800000> : vector<4x32xf32>
    %154 = vector.multi_reduction <maximumf>, %153, %cst_39 [2] : vector<4x32x32xf32> to vector<4x32xf32>
    %155 = vector.shape_cast %154 : vector<4x32xf32> to vector<4x32x1xf32>
    %156 = vector.broadcast %155 : vector<4x32x1xf32> to vector<4x32x32xf32>
    %157 = arith.subf %153, %156 : vector<4x32x32xf32>
    %158 = math.exp %157 : vector<4x32x32xf32>
    %cst_40 = arith.constant dense<0.000000e+00> : vector<4x32xf32>
    %159 = vector.multi_reduction <add>, %158, %cst_40 [2] : vector<4x32x32xf32> to vector<4x32xf32>
    %160 = vector.shape_cast %159 : vector<4x32xf32> to vector<4x32x1xf32>
    %161 = tpu.reciprocal %160 : vector<4x32x1xf32> -> vector<4x32x1xf32>
    %162 = vector.broadcast %161 : vector<4x32x1xf32> to vector<4x32x32xf32>
    %163 = arith.mulf %158, %162 : vector<4x32x32xf32>
    "tpu.trace_start"() <{level = 10 : i32, message = "bts,bsd->btd"}> : () -> ()
    %cst_41 = arith.constant dense<0.000000e+00> : vector<4x32x16xf32>
    %164 = tpu.matmul %163, %148, %cst_41 {dimension_numbers = #tpu.dot_dimension_numbers<[2], [1], [1], [2], [0, 0, 0, 1, 1, 2], [0], [0]>} : vector<4x32x32xf32>, vector<4x32x16xf32>, vector<4x32x16xf32> -> vector<4x32x16xf32>
    "tpu.trace_stop"() : () -> ()
    %165 = vector.shape_cast %164 : vector<4x32x16xf32> to vector<128x16xf32>
    %166 = vector.extract_strided_slice %11 {offsets = [80, 0], sizes = [16, 128], strides = [1, 1]} : vector<128x128xf32> to vector<16x128xf32>
    %cst_42 = arith.constant dense<0.000000e+00> : vector<128x128xf32>
    %167 = tpu.matmul %165, %166, %cst_42 {dimension_numbers = #tpu.dot_dimension_numbers<[1], [0], [0], [1], [0, 0, 1, 1], [], []>} : vector<128x16xf32>, vector<16x128xf32>, vector<128x128xf32> -> vector<128x128xf32>
    %168 = arith.addf %142, %167 : vector<128x128xf32>
    %169 = vector.extract_strided_slice %4 {offsets = [0, 96], sizes = [128, 16], strides = [1, 1]} : vector<128x128xf32> to vector<128x16xf32>
    %170 = vector.shape_cast %169 : vector<128x16xf32> to vector<4x32x16xf32>
    %171 = vector.extract_strided_slice %5 {offsets = [0, 96], sizes = [128, 16], strides = [1, 1]} : vector<128x128xf32> to vector<128x16xf32>
    %172 = vector.shape_cast %171 : vector<128x16xf32> to vector<4x32x16xf32>
    %173 = vector.extract_strided_slice %6 {offsets = [0, 96], sizes = [128, 16], strides = [1, 1]} : vector<128x128xf32> to vector<128x16xf32>
    %174 = vector.shape_cast %173 : vector<128x16xf32> to vector<4x32x16xf32>
    "tpu.trace_start"() <{level = 10 : i32, message = "btd,bsd->bts"}> : () -> ()
    %cst_43 = arith.constant dense<0.000000e+00> : vector<4x32x32xf32>
    %175 = tpu.matmul %170, %172, %cst_43 {dimension_numbers = #tpu.dot_dimension_numbers<[2], [2], [1], [1], [0, 0, 0, 1, 1, 1], [0], [0]>} : vector<4x32x16xf32>, vector<4x32x16xf32>, vector<4x32x32xf32> -> vector<4x32x32xf32>
    %cst_44 = arith.constant -1.000000e+30 : f32
    "tpu.trace_stop"() : () -> ()
    %176 = vector.shape_cast %10 : vector<1x32x32xi1> to vector<1x32x32xi1>
    %177 = vector.broadcast %176 : vector<1x32x32xi1> to vector<4x32x32xi1>
    %178 = vector.broadcast %cst_44 : f32 to vector<4x32x32xf32>
    %179 = arith.select %177, %175, %178 : vector<4x32x32xi1>, vector<4x32x32xf32>
    %cst_45 = arith.constant dense<0xFF800000> : vector<4x32xf32>
    %180 = vector.multi_reduction <maximumf>, %179, %cst_45 [2] : vector<4x32x32xf32> to vector<4x32xf32>
    %181 = vector.shape_cast %180 : vector<4x32xf32> to vector<4x32x1xf32>
    %182 = vector.broadcast %181 : vector<4x32x1xf32> to vector<4x32x32xf32>
    %183 = arith.subf %179, %182 : vector<4x32x32xf32>
    %184 = math.exp %183 : vector<4x32x32xf32>
    %cst_46 = arith.constant dense<0.000000e+00> : vector<4x32xf32>
    %185 = vector.multi_reduction <add>, %184, %cst_46 [2] : vector<4x32x32xf32> to vector<4x32xf32>
    %186 = vector.shape_cast %185 : vector<4x32xf32> to vector<4x32x1xf32>
    %187 = tpu.reciprocal %186 : vector<4x32x1xf32> -> vector<4x32x1xf32>
    %188 = vector.broadcast %187 : vector<4x32x1xf32> to vector<4x32x32xf32>
    %189 = arith.mulf %184, %188 : vector<4x32x32xf32>
    "tpu.trace_start"() <{level = 10 : i32, message = "bts,bsd->btd"}> : () -> ()
    %cst_47 = arith.constant dense<0.000000e+00> : vector<4x32x16xf32>
    %190 = tpu.matmul %189, %174, %cst_47 {dimension_numbers = #tpu.dot_dimension_numbers<[2], [1], [1], [2], [0, 0, 0, 1, 1, 2], [0], [0]>} : vector<4x32x32xf32>, vector<4x32x16xf32>, vector<4x32x16xf32> -> vector<4x32x16xf32>
    "tpu.trace_stop"() : () -> ()
    %191 = vector.shape_cast %190 : vector<4x32x16xf32> to vector<128x16xf32>
    %192 = vector.extract_strided_slice %11 {offsets = [96, 0], sizes = [16, 128], strides = [1, 1]} : vector<128x128xf32> to vector<16x128xf32>
    %cst_48 = arith.constant dense<0.000000e+00> : vector<128x128xf32>
    %193 = tpu.matmul %191, %192, %cst_48 {dimension_numbers = #tpu.dot_dimension_numbers<[1], [0], [0], [1], [0, 0, 1, 1], [], []>} : vector<128x16xf32>, vector<16x128xf32>, vector<128x128xf32> -> vector<128x128xf32>
    %194 = arith.addf %168, %193 : vector<128x128xf32>
    %195 = vector.extract_strided_slice %4 {offsets = [0, 112], sizes = [128, 16], strides = [1, 1]} : vector<128x128xf32> to vector<128x16xf32>
    %196 = vector.shape_cast %195 : vector<128x16xf32> to vector<4x32x16xf32>
    %197 = vector.extract_strided_slice %5 {offsets = [0, 112], sizes = [128, 16], strides = [1, 1]} : vector<128x128xf32> to vector<128x16xf32>
    %198 = vector.shape_cast %197 : vector<128x16xf32> to vector<4x32x16xf32>
    %199 = vector.extract_strided_slice %6 {offsets = [0, 112], sizes = [128, 16], strides = [1, 1]} : vector<128x128xf32> to vector<128x16xf32>
    %200 = vector.shape_cast %199 : vector<128x16xf32> to vector<4x32x16xf32>
    "tpu.trace_start"() <{level = 10 : i32, message = "btd,bsd->bts"}> : () -> ()
    %cst_49 = arith.constant dense<0.000000e+00> : vector<4x32x32xf32>
    %201 = tpu.matmul %196, %198, %cst_49 {dimension_numbers = #tpu.dot_dimension_numbers<[2], [2], [1], [1], [0, 0, 0, 1, 1, 1], [0], [0]>} : vector<4x32x16xf32>, vector<4x32x16xf32>, vector<4x32x32xf32> -> vector<4x32x32xf32>
    %cst_50 = arith.constant -1.000000e+30 : f32
    "tpu.trace_stop"() : () -> ()
    %202 = vector.shape_cast %10 : vector<1x32x32xi1> to vector<1x32x32xi1>
    %203 = vector.broadcast %202 : vector<1x32x32xi1> to vector<4x32x32xi1>
    %204 = vector.broadcast %cst_50 : f32 to vector<4x32x32xf32>
    %205 = arith.select %203, %201, %204 : vector<4x32x32xi1>, vector<4x32x32xf32>
    %cst_51 = arith.constant dense<0xFF800000> : vector<4x32xf32>
    %206 = vector.multi_reduction <maximumf>, %205, %cst_51 [2] : vector<4x32x32xf32> to vector<4x32xf32>
    %207 = vector.shape_cast %206 : vector<4x32xf32> to vector<4x32x1xf32>
    %208 = vector.broadcast %207 : vector<4x32x1xf32> to vector<4x32x32xf32>
    %209 = arith.subf %205, %208 : vector<4x32x32xf32>
    %210 = math.exp %209 : vector<4x32x32xf32>
    %cst_52 = arith.constant dense<0.000000e+00> : vector<4x32xf32>
    %211 = vector.multi_reduction <add>, %210, %cst_52 [2] : vector<4x32x32xf32> to vector<4x32xf32>
    %212 = vector.shape_cast %211 : vector<4x32xf32> to vector<4x32x1xf32>
    %213 = tpu.reciprocal %212 : vector<4x32x1xf32> -> vector<4x32x1xf32>
    %214 = vector.broadcast %213 : vector<4x32x1xf32> to vector<4x32x32xf32>
    %215 = arith.mulf %210, %214 : vector<4x32x32xf32>
    "tpu.trace_start"() <{level = 10 : i32, message = "bts,bsd->btd"}> : () -> ()
    %cst_53 = arith.constant dense<0.000000e+00> : vector<4x32x16xf32>
    %216 = tpu.matmul %215, %200, %cst_53 {dimension_numbers = #tpu.dot_dimension_numbers<[2], [1], [1], [2], [0, 0, 0, 1, 1, 2], [0], [0]>} : vector<4x32x32xf32>, vector<4x32x16xf32>, vector<4x32x16xf32> -> vector<4x32x16xf32>
    "tpu.trace_stop"() : () -> ()
    %217 = vector.shape_cast %216 : vector<4x32x16xf32> to vector<128x16xf32>
    %218 = vector.extract_strided_slice %11 {offsets = [112, 0], sizes = [16, 128], strides = [1, 1]} : vector<128x128xf32> to vector<16x128xf32>
    %cst_54 = arith.constant dense<0.000000e+00> : vector<128x128xf32>
    %219 = tpu.matmul %217, %218, %cst_54 {dimension_numbers = #tpu.dot_dimension_numbers<[1], [0], [0], [1], [0, 0, 1, 1], [], []>} : vector<128x16xf32>, vector<16x128xf32>, vector<128x128xf32> -> vector<128x128xf32>
    %220 = arith.addf %194, %219 : vector<128x128xf32>
    %c0_55 = arith.constant 0 : index
    %c0_56 = arith.constant 0 : index
    %221 = vector.load %arg4[%c0_55, %c0_56] : memref<1x128xf32, #tpu.memory_space<vmem>>, vector<1x128xf32>
    %222 = vector.broadcast %221 : vector<1x128xf32> to vector<128x128xf32>
    %223 = arith.addf %220, %222 : vector<128x128xf32>
    %224 = arith.addf %1, %223 : vector<128x128xf32>
    %c0_57 = arith.constant 0 : index
    %c0_58 = arith.constant 0 : index
    %225 = vector.load %arg9[%c0_57, %c0_58] : memref<1x128xf32, #tpu.memory_space<vmem>>, vector<1x128xf32>
    %c0_59 = arith.constant 0 : index
    %c0_60 = arith.constant 0 : index
    %226 = vector.load %arg10[%c0_59, %c0_60] : memref<1x128xf32, #tpu.memory_space<vmem>>, vector<1x128xf32>
    %cst_61 = arith.constant dense<0.000000e+00> : vector<128xf32>
    %227 = vector.multi_reduction <add>, %224, %cst_61 [1] : vector<128x128xf32> to vector<128xf32>
    %228 = vector.shape_cast %227 : vector<128xf32> to vector<128x1xf32>
    %cst_62 = arith.constant 1.280000e+02 : f32
    %229 = vector.broadcast %cst_62 : f32 to vector<128x1xf32>
    %230 = arith.divf %228, %229 : vector<128x1xf32>
    %231 = vector.broadcast %230 : vector<128x1xf32> to vector<128x128xf32>
    %232 = arith.subf %224, %231 : vector<128x128xf32>
    %233 = arith.mulf %232, %232 : vector<128x128xf32>
    %cst_63 = arith.constant dense<0.000000e+00> : vector<128xf32>
    %234 = vector.multi_reduction <add>, %233, %cst_63 [1] : vector<128x128xf32> to vector<128xf32>
    %235 = vector.shape_cast %234 : vector<128xf32> to vector<128x1xf32>
    %cst_64 = arith.constant 1.280000e+02 : f32
    %236 = vector.broadcast %cst_64 : f32 to vector<128x1xf32>
    %237 = arith.divf %235, %236 : vector<128x1xf32>
    %238 = vector.broadcast %230 : vector<128x1xf32> to vector<128x128xf32>
    %239 = arith.subf %224, %238 : vector<128x128xf32>
    %cst_65 = arith.constant 9.99999974E-6 : f32
    %240 = vector.broadcast %cst_65 : f32 to vector<128x1xf32>
    %241 = arith.addf %237, %240 : vector<128x1xf32>
    %242 = math.rsqrt %241 : vector<128x1xf32>
    %243 = vector.broadcast %242 : vector<128x1xf32> to vector<128x128xf32>
    %244 = arith.mulf %239, %243 : vector<128x128xf32>
    %245 = vector.broadcast %225 : vector<1x128xf32> to vector<128x128xf32>
    %246 = arith.mulf %244, %245 : vector<128x128xf32>
    %247 = vector.broadcast %226 : vector<1x128xf32> to vector<128x128xf32>
    %248 = arith.addf %246, %247 : vector<128x128xf32>
    %c0_66 = arith.constant 0 : index
    %c0_67 = arith.constant 0 : index
    %249 = vector.load %arg5[%c0_66, %c0_67] : memref<128x512xf32, #tpu.memory_space<vmem>>, vector<128x512xf32>
    %cst_68 = arith.constant dense<0.000000e+00> : vector<128x512xf32>
    %250 = tpu.matmul %248, %249, %cst_68 {dimension_numbers = #tpu.dot_dimension_numbers<[1], [0], [0], [1], [0, 0, 1, 1], [], []>} : vector<128x128xf32>, vector<128x512xf32>, vector<128x512xf32> -> vector<128x512xf32>
    %c0_69 = arith.constant 0 : index
    %c0_70 = arith.constant 0 : index
    %251 = vector.load %arg6[%c0_69, %c0_70] : memref<1x512xf32, #tpu.memory_space<vmem>>, vector<1x512xf32>
    %252 = vector.broadcast %251 : vector<1x512xf32> to vector<128x512xf32>
    %253 = arith.addf %250, %252 : vector<128x512xf32>
    %cst_71 = arith.constant 0.000000e+00 : f32
    %254 = vector.broadcast %cst_71 : f32 to vector<128x512xf32>
    %255 = arith.maximumf %253, %254 : vector<128x512xf32>
    %c0_72 = arith.constant 0 : index
    %c0_73 = arith.constant 0 : index
    %256 = vector.load %arg7[%c0_72, %c0_73] : memref<512x128xf32, #tpu.memory_space<vmem>>, vector<512x128xf32>
    %cst_74 = arith.constant dense<0.000000e+00> : vector<128x128xf32>
    %257 = tpu.matmul %255, %256, %cst_74 {dimension_numbers = #tpu.dot_dimension_numbers<[1], [0], [0], [1], [0, 0, 1, 1], [], []>} : vector<128x512xf32>, vector<512x128xf32>, vector<128x128xf32> -> vector<128x128xf32>
    %c0_75 = arith.constant 0 : index
    %c0_76 = arith.constant 0 : index
    %258 = vector.load %arg8[%c0_75, %c0_76] : memref<1x128xf32, #tpu.memory_space<vmem>>, vector<1x128xf32>
    %259 = vector.broadcast %258 : vector<1x128xf32> to vector<128x128xf32>
    %260 = arith.addf %257, %259 : vector<128x128xf32>
    %261 = arith.addf %248, %260 : vector<128x128xf32>
    %c0_77 = arith.constant 0 : index
    %c0_78 = arith.constant 0 : index
    %262 = vector.load %arg11[%c0_77, %c0_78] : memref<1x128xf32, #tpu.memory_space<vmem>>, vector<1x128xf32>
    %c0_79 = arith.constant 0 : index
    %c0_80 = arith.constant 0 : index
    %263 = vector.load %arg12[%c0_79, %c0_80] : memref<1x128xf32, #tpu.memory_space<vmem>>, vector<1x128xf32>
    %cst_81 = arith.constant dense<0.000000e+00> : vector<128xf32>
    %264 = vector.multi_reduction <add>, %261, %cst_81 [1] : vector<128x128xf32> to vector<128xf32>
    %265 = vector.shape_cast %264 : vector<128xf32> to vector<128x1xf32>
    %cst_82 = arith.constant 1.280000e+02 : f32
    %266 = vector.broadcast %cst_82 : f32 to vector<128x1xf32>
    %267 = arith.divf %265, %266 : vector<128x1xf32>
    %268 = vector.broadcast %267 : vector<128x1xf32> to vector<128x128xf32>
    %269 = arith.subf %261, %268 : vector<128x128xf32>
    %270 = arith.mulf %269, %269 : vector<128x128xf32>
    %cst_83 = arith.constant dense<0.000000e+00> : vector<128xf32>
    %271 = vector.multi_reduction <add>, %270, %cst_83 [1] : vector<128x128xf32> to vector<128xf32>
    %272 = vector.shape_cast %271 : vector<128xf32> to vector<128x1xf32>
    %cst_84 = arith.constant 1.280000e+02 : f32
    %273 = vector.broadcast %cst_84 : f32 to vector<128x1xf32>
    %274 = arith.divf %272, %273 : vector<128x1xf32>
    %275 = vector.broadcast %267 : vector<128x1xf32> to vector<128x128xf32>
    %276 = arith.subf %261, %275 : vector<128x128xf32>
    %cst_85 = arith.constant 9.99999974E-6 : f32
    %277 = vector.broadcast %cst_85 : f32 to vector<128x1xf32>
    %278 = arith.addf %274, %277 : vector<128x1xf32>
    %279 = math.rsqrt %278 : vector<128x1xf32>
    %280 = vector.broadcast %279 : vector<128x1xf32> to vector<128x128xf32>
    %281 = arith.mulf %276, %280 : vector<128x128xf32>
    %282 = vector.broadcast %262 : vector<1x128xf32> to vector<128x128xf32>
    %283 = arith.mulf %281, %282 : vector<128x128xf32>
    %284 = vector.broadcast %263 : vector<1x128xf32> to vector<128x128xf32>
    %285 = arith.addf %283, %284 : vector<128x128xf32>
    %286 = vector.shape_cast %285 : vector<128x128xf32> to vector<4x32x128xf32>
    %c0_86 = arith.constant 0 : index
    %c0_87 = arith.constant 0 : index
    %c0_88 = arith.constant 0 : index
    %287 = vector.load %arg13[%c0_86, %c0_87, %c0_88] : memref<4x32x128xf32, #tpu.memory_space<vmem>>, vector<4x32x128xf32>
    tpu.vector_store %arg13[%c0_86, %c0_87, %c0_88], %286 {strides = array<i32>} : memref<4x32x128xf32, #tpu.memory_space<vmem>>, vector<4x32x128xf32>,
    return
  }
  func.func @transform_0(%arg0: i32) -> (i32, i32, i32) {
    %c0_i32 = arith.constant 0 : i32
    %c0_i32_0 = arith.constant 0 : i32
    %c0_i32_1 = arith.constant 0 : i32
    return %arg0, %c0_i32, %c0_i32_0 : i32, i32, i32
  }
  func.func @transform_1(%arg0: i32) -> (i32, i32) {
    %c0_i32 = arith.constant 0 : i32
    %c0_i32_0 = arith.constant 0 : i32
    %c0_i32_1 = arith.constant 0 : i32
    return %c0_i32, %c0_i32_0 : i32, i32
  }
  func.func @transform_2(%arg0: i32) -> (i32, i32) {
    %c0_i32 = arith.constant 0 : i32
    %c0_i32_0 = arith.constant 0 : i32
    %c0_i32_1 = arith.constant 0 : i32
    return %c0_i32, %c0_i32_0 : i32, i32
  }
  func.func @transform_3(%arg0: i32) -> (i32, i32) {
    %c0_i32 = arith.constant 0 : i32
    %c0_i32_0 = arith.constant 0 : i32
    %c0_i32_1 = arith.constant 0 : i32
    return %c0_i32, %c0_i32_0 : i32, i32
  }
  func.func @transform_4(%arg0: i32) -> (i32, i32) {
    %c0_i32 = arith.constant 0 : i32
    %c0_i32_0 = arith.constant 0 : i32
    %c0_i32_1 = arith.constant 0 : i32
    return %c0_i32, %c0_i32_0 : i32, i32
  }
  func.func @transform_5(%arg0: i32) -> (i32, i32) {
    %c0_i32 = arith.constant 0 : i32
    %c0_i32_0 = arith.constant 0 : i32
    %c0_i32_1 = arith.constant 0 : i32
    return %c0_i32, %c0_i32_0 : i32, i32
  }
  func.func @transform_6(%arg0: i32) -> (i32, i32) {
    %c0_i32 = arith.constant 0 : i32
    %c0_i32_0 = arith.constant 0 : i32
    %c0_i32_1 = arith.constant 0 : i32
    return %c0_i32, %c0_i32_0 : i32, i32
  }
  func.func @transform_7(%arg0: i32) -> (i32, i32) {
    %c0_i32 = arith.constant 0 : i32
    %c0_i32_0 = arith.constant 0 : i32
    %c0_i32_1 = arith.constant 0 : i32
    return %c0_i32, %c0_i32_0 : i32, i32
  }
  func.func @transform_8(%arg0: i32) -> (i32, i32) {
    %c0_i32 = arith.constant 0 : i32
    %c0_i32_0 = arith.constant 0 : i32
    %c0_i32_1 = arith.constant 0 : i32
    return %c0_i32, %c0_i32_0 : i32, i32
  }
  func.func @transform_9(%arg0: i32) -> (i32, i32) {
    %c0_i32 = arith.constant 0 : i32
    %c0_i32_0 = arith.constant 0 : i32
    %c0_i32_1 = arith.constant 0 : i32
    return %c0_i32, %c0_i32_0 : i32, i32
  }
  func.func @transform_10(%arg0: i32) -> (i32, i32) {
    %c0_i32 = arith.constant 0 : i32
    %c0_i32_0 = arith.constant 0 : i32
    %c0_i32_1 = arith.constant 0 : i32
    return %c0_i32, %c0_i32_0 : i32, i32
  }
  func.func @transform_11(%arg0: i32) -> (i32, i32) {
    %c0_i32 = arith.constant 0 : i32
    %c0_i32_0 = arith.constant 0 : i32
    %c0_i32_1 = arith.constant 0 : i32
    return %c0_i32, %c0_i32_0 : i32, i32
  }
  func.func @transform_12(%arg0: i32) -> (i32, i32, i32) {
    %c0_i32 = arith.constant 0 : i32
    %c0_i32_0 = arith.constant 0 : i32
    %c0_i32_1 = arith.constant 0 : i32
    return %arg0, %c0_i32, %c0_i32_0 : i32, i32, i32
  }
}

</mosaic_0001>

<bundles_post_ra>
// kernel: tpu_custom_call.1
= control target key start
LH: loop header
LB: loop body
LE: loop exit
PB: predicated region body
PF: predicated region fallthrough
CT: control target
= control target key end

     0   :  { %s21698_s0 = inlined_call_operand.hbm [shape: f32[8,32,128], index: 0, kind: input, shape index: {}]   ;;  %s21699_s1 = inlined_call_operand.hbm [shape: f32[128,384], index: 1, kind: input, shape index: {}]   ;;  %s21700_s2 = inlined_call_operand.hbm [shape: f32[128,128], index: 2, kind: input, shape index: {}]   ;;  %s21701_s3 = inlined_call_operand.vmem [shape: f32[1,128], index: 3, kind: input, shape index: {}]   ;;  %s21702_s4 = inlined_call_operand.hbm [shape: f32[128,512], index: 4, kind: input, shape index: {}]   ;;  %s21703_s5 = inlined_call_operand.vmem [shape: f32[1,512], index: 5, kind: input, shape index: {}]   ;;  %s21704_s6 = inlined_call_operand.hbm [shape: f32[512,128], index: 6, kind: input, shape index: {}]   ;;  %s21705_s7 = inlined_call_operand.vmem [shape: f32[1,128], index: 7, kind: input, shape index: {}]   ;;  %s21706_s8 = inlined_call_operand.vmem [shape: f32[1,128], index: 8, kind: input, shape index: {}]   ;;  %s21707_s9 = inlined_call_operand.vmem [shape: f32[1,128], index: 9, kind: input, shape index: {}]   ;;  %s21708_s10 = inlined_call_operand.vmem [shape: f32[1,128], index: 10, kind: input, shape index: {}]   ;;  %s21709_s11 = inlined_call_operand.vmem [shape: f32[1,128], index: 11, kind: input, shape index: {}]   ;;  %s21710_s12 = inlined_call_operand.hbm [shape: f32[8,32,128], index: 12, kind: output, shape index: {}]  }
   0x1   :  { %21782 = sst [smem:[#allocation63_spill]] %s21699_s1 }
   0x2   :  { %21783 = sst [smem:[#allocation64_spill]] %s21708_s10 }
   0x3   :  { %21784 = sst [smem:[#allocation65_spill]] %s21709_s11 }
   0x4   :  { %21785 = sst [smem:[#allocation66_spill]] %s21710_s12 }
   0x5   :  { %17 = vsyncpa [#allocation3], 0 }
   0x6   :  { %19 = vsyncpa [#allocation3 + $0x1], 0 }
   0x7   :  { %20 = vsyncpa [#allocation6], 0 }
   0x8   :  { %21 = vsyncpa [#allocation9], 0 }
   0x9   :  { %22 = vsyncpa [#allocation4], 0 }
   0xa   :  { %24 = vsyncpa [#allocation4 + $0x1], 0  ;;  %s17825_s21 = smov 0   ;;  %s17827_s22 = smov 0  }
   0xb   :  { %s17829_s23 = smov 0   ;;  %s17831_s24 = smov 0  }
   0xc LB: > { %21786 = sst [smem:[#allocation16_spill]] %s17724_s21  ;;  %s17846_s25 = sadd.s32 4294967295, %s17736_s24   ;;  %s17736_s24 = sphi %s17831_s24, %s21943_s24   ;;  %s17732_s23 = sphi %s17829_s23, %s21942_s23   ;;  %s17728_s22 = sphi %s17827_s22, %s21941_s22   ;;  %s17724_s21 = sphi %s17825_s21, %s21940_s21  }
   0xd   : > { %s12719_s26 = sadd.s32 4294967294, %s17736_s24   ;;  %p50_p0 = scmp.ne.s32.totalorder %s17728_s22, %s17724_s21 }
   0xe   : > { %p21712_p1 = scmp.eq.s32.totalorder %s17846_s25, 0  ;;  %p311_p3 = scmp.eq.s32.totalorder %s12719_s26, 1 }
   0xf   : > { %p12720_p5 = scmp.ge.s32.totalorder %s17736_s24, 1  ;;  %p318_p7 = scmp.lt.s32.totalorder %s17736_s24, 3 }
  0x10   : > { %p17855_p4 = por %p21712_p1, %p50_p0  ;;  %p17860_p6 = por %p311_p3, %p50_p0 }
  0x11   : > { %p17865_p8 = pnand %p12720_p5, %p318_p7  ;;  %s17738_s30 = smov [#allocation5]  }
  0x12   : > { %s21787_s27 = scalar_select %p17855_p4, 1, 0 }
  0x13   : > { %s21788_s28 = scalar_select %p17860_p6, 1, 0 }
  0x14   : > { %s21790_s29 = scalar_select %p17865_p8, 1, 0 }
  0x15   : > { %21789 = sst [smem:[#allocation17_spill]] %s21788_s28  ;;  %s330_s13 = sshll.u32 %s17738_s30, 4  ;;  %s17869_s13 = int_to_ptr.vmem [resolvable:$true] %s330_s13 }
  0x16   : > { %p16285_p9 = pneg %p17865_p8  ;;  %s17739_s15 = smov [#allocation8]  }
  0x17   : > { %s359_s16 = sshll.u32 %s17739_s15, 4  ;;  %s21792_s1 = sld [smem:[#allocation63_spill]]  ;;  %s17880_s16 = int_to_ptr.vmem [resolvable:$true] %s359_s16 }
  0x18   : > { %p17876_p11 = pnand %p16285_p9, %p21712_p1 }
  0x1a   : > { %p17890_p13 = pneg %p17876_p11 }
  0x1d   : > { %s17520_s19 = scalar_lea.hbm %s21792_s1, 6144 }
  0x1e   : > { %p17521_p12 = scmp.ne.s32.totalorder %s21792_s1, %s17520_s19  ;;  %p17527_p5 = scmp.lt.u32.totalorder %s17520_s19, %s21792_s1 }
  0x20   : > { %p17523_p0 = pnand %p17890_p13, %p17521_p12 }
  0x22   : > { %p17524_p3 = pneg %p17523_p0 }
  0x24   : > { %p17529_p7 = pnand %p17527_p5, %p17524_p3 }
  0x26   : > { %17532 = shalt.err (!%p17529_p7)
}
  0x27   : > { %s17533_s17 = scalar_lea.vmem %s17869_s13, 6144  ;;  %p17541_p2 = scmp.lt.s32.totalorder %s17869_s13, %s17869_s13 }
  0x28   : > { %p17534_p9 = scmp.ne.s32.totalorder %s17869_s13, %s17533_s17  ;;  %p17542_p6 = scmp.lt.s32.totalorder %s17533_s17, %s17533_s17 }
  0x2a   : > { %p17536_p10 = pnand %p17534_p9, %p17890_p13  ;;  %p17543_p12 = por %p17542_p6, %p17541_p2 }
  0x2c   : > { %p17537_p1 = pneg %p17536_p10 }
  0x2e   : > { %p17544_p0 = pnand %p17543_p12, %p17537_p1 }
  0x30   : > { %17547 = shalt.err (!%p17544_p0)
}
  0x31   : > { %s17740_s18 = smov 384   ;;  %s17741_s28 = smov 24  }
  0x32   : > { %16288 = dma.hbm_to_vmem [thread:$0]  (!%p17876_p11), %s21792_s1, 6144, %s17869_s13, [#allocation6], %s17740_s18, %s17740_s18, %s17741_s28  }
  0x33   : > { %s17548_s21 = scalar_lea.hbm %s21702_s4, 8192 }
  0x34   : > { %p17549_p2 = scmp.ne.s32.totalorder %s21702_s4, %s17548_s21  ;;  %p17555_p10 = scmp.lt.u32.totalorder %s17548_s21, %s21702_s4 }
  0x36   : > { %p17551_p1 = pnand %p17549_p2, %p17890_p13 }
  0x38   : > { %p17552_p6 = pneg %p17551_p1 }
  0x3a   : > { %p17557_p3 = pnand %p17555_p10, %p17552_p6 }
  0x3c   : > { %17560 = shalt.err (!%p17557_p3)
}
  0x3d   : > { %s17561_s13 = scalar_lea.vmem %s17880_s16, 8192  ;;  %p17569_p12 = scmp.lt.s32.totalorder %s17880_s16, %s17880_s16 }
  0x3e   : > { %p17562_p5 = scmp.ne.s32.totalorder %s17880_s16, %s17561_s13  ;;  %p17570_p0 = scmp.lt.s32.totalorder %s17561_s13, %s17561_s13 }
  0x40   : > { %p17564_p7 = pnand %p17562_p5, %p17890_p13  ;;  %p17571_p2 = por %p17570_p0, %p17569_p12 }
  0x42   : > { %p17565_p9 = pneg %p17564_p7 }
  0x44   : > { %p17572_p1 = pnand %p17571_p2, %p17565_p9 }
  0x46   : > { %17575 = shalt.err (!%p17572_p1)
}
  0x47   : > { %s17742_s11 = smov 512   ;;  %s17743_s10 = smov 32  }
  0x48   : > { %16294 = dma.hbm_to_vmem [thread:$0]  (!%p17876_p11), %s21702_s4, 8192, %s17880_s16, [#allocation9], %s17742_s11, %s17742_s11, %s17743_s10  }
  0x49   : > { %s17744_s18 = smov [#allocation7]   ;;  %s17576_s26 = scalar_lea.hbm %s21700_s2, 2048 }
  0x4a   : > { %s343_s28 = sshll.u32 %s17744_s18, 4  ;;  %p17577_p6 = scmp.ne.s32.totalorder %s21700_s2, %s17576_s26  ;;  %s344_s28 = int_to_ptr.vmem [resolvable:$true] %s343_s28 }
  0x4b   : > { %p17583_p5 = scmp.lt.u32.totalorder %s17576_s26, %s21700_s2 }
  0x4c   : > { %p17579_p10 = pnand %p17577_p6, %p17890_p13 }
  0x4e   : > { %p17580_p3 = pneg %p17579_p10 }
  0x50   : > { %p17585_p7 = pnand %p17583_p5, %p17580_p3 }
  0x52   : > { %17588 = shalt.err (!%p17585_p7)
}
  0x53   : > { %s17589_s16 = scalar_lea.vmem %s344_s28, 2048  ;;  %p17597_p2 = scmp.lt.s32.totalorder %s344_s28, %s344_s28 }
  0x54   : > { %p17590_p9 = scmp.ne.s32.totalorder %s344_s28, %s17589_s16  ;;  %p17598_p1 = scmp.lt.s32.totalorder %s17589_s16, %s17589_s16 }
  0x56   : > { %p17592_p12 = pnand %p17590_p9, %p17890_p13  ;;  %p17599_p4 = por %p17598_p1, %p17597_p2 }
  0x58   : > { %p17593_p0 = pneg %p17592_p12 }
  0x5a   : > { %p17600_p8 = pnand %p17599_p4, %p17593_p0 }
  0x5c   : > { %17603 = shalt.err (!%p17600_p8)
}
  0x5d   : > { %s17745_s11 = smov 128   ;;  %s17746_s10 = smov 8  }
  0x5e   : > { %16291 = dma.hbm_to_vmem [thread:$0]  (!%p17876_p11), %s21700_s2, 2048, %s344_s28, [#allocation6], %s17745_s11, %s17745_s11, %s17746_s10  }
  0x5f   : > { %s17747_s21 = smov [#allocation10]   ;;  %s17604_s26 = scalar_lea.hbm %s21704_s6, 8192 }
  0x60   : > { %s375_s18 = sshll.u32 %s17747_s21, 4  ;;  %p17605_p4 = scmp.ne.s32.totalorder %s21704_s6, %s17604_s26  ;;  %s376_s18 = int_to_ptr.vmem [resolvable:$true] %s375_s18 }
  0x61   : > { %p17611_p10 = scmp.lt.u32.totalorder %s17604_s26, %s21704_s6 }
  0x62   : > { %p17607_p8 = pnand %p17605_p4, %p17890_p13 }
  0x64   : > { %p17608_p6 = pneg %p17607_p8 }
  0x66   : > { %p17613_p3 = pnand %p17611_p10, %p17608_p6 }
  0x68   : > { %17616 = shalt.err (!%p17613_p3)
}
  0x69   : > { %s17617_s28 = scalar_lea.vmem %s376_s18, 8192  ;;  %p17625_p12 = scmp.lt.s32.totalorder %s376_s18, %s376_s18 }
  0x6a   : > { %p17618_p5 = scmp.ne.s32.totalorder %s376_s18, %s17617_s28  ;;  %p17626_p0 = scmp.lt.s32.totalorder %s17617_s28, %s17617_s28 }
  0x6c   : > { %p17620_p7 = pnand %p17618_p5, %p17890_p13  ;;  %p17627_p2 = por %p17626_p0, %p17625_p12 }
  0x6e   : > { %p17621_p9 = pneg %p17620_p7 }
  0x70   : > { %p17628_p1 = pnand %p17627_p2, %p17621_p9 }
  0x72   : > { %17631 = shalt.err (!%p17628_p1)
}
  0x73   : > { %16297 = dma.hbm_to_vmem [thread:$0]  (!%p17876_p11), %s21704_s6, 8192, %s376_s18, [#allocation9], %s17745_s11, %s17745_s11, %s17746_s10  }
  0x74   : > { %s17977_s30 = sadd.s32 1, %s17736_s24   ;;  %s37_s14 = sadd.s32 1, %s17732_s23 }
  0x75   : > { %s34_s21 = ssub.s32 %s17736_s24, %s17977_s30  ;;  %p44_p13 = scmp.ne.s32.totalorder %s17732_s23, %s17728_s22 }
  0x76   : > { %p35_p4 = scmp.eq.s32.totalorder %s34_s21, 0  ;;  %p45_p8 = scmp.eq.s32.totalorder %s17736_s24, 0 }
  0x77   : > { %p21794_p6 = scmp.eq.s32.totalorder %s17846_s25, 1  ;;  %p16310_p3 = scmp.lt.s32.totalorder %s17736_s24, 2 }
  0x78   : > { %s17993_s20 = scalar_select %p35_p4, %s17732_s23, %s37_s14  }
  0x79   : > { %p17987_p10 = por %p21794_p6, %p44_p13  ;;  %p46_p5 = por %p45_p8, %p44_p13 }
  0x7a   : > { %s404_s26 = sand.u32 1, %s17732_s23   ;;  %s13262_s18 = sshll.u32 %s17736_s24, 11 }
  0x7b   : > { %s12726_s15 = sshll.u32 %s404_s26, 7  ;;  %s18000_s16 = scalar_lea.hbm %s21698_s0, %s13262_s18 }
  0x7c   : > { %s408_s28 = scalar_lea.vmem [#allocation2], %s12726_s15  ;;  %p18004_p11 = pnand %p16310_p3, %p46_p5 }
  0x7d   : > { %s416_s1 = sshll.u32 %s408_s28, 4  ;;  %s18008_s14 = scalar_lea.sflag [#allocation3], %s404_s26  ;;  %s18002_s1 = int_to_ptr.vmem [resolvable:$true] %s416_s1 }
  0x7e   : > { %s17632_s21 = scalar_lea.hbm %s18000_s16, 2048  ;;  %p17634_p9 = pneg %p18004_p11 }
  0x7f   : > { %p17633_p7 = scmp.ne.s32.totalorder %s18000_s16, %s17632_s21  ;;  %s17637_s17 = scalar_lea.hbm %s21698_s0, 4096 }
  0x80   : > { %p17638_p2 = scmp.lt.u32.totalorder %s18000_s16, %s21698_s0  ;;  %p17639_p1 = scmp.lt.u32.totalorder %s17637_s17, %s17632_s21 }
  0x81   : > { %p17635_p12 = pnand %p17634_p9, %p17633_p7  ;;  %p17641_p4 = scmp.lt.u32.totalorder %s17632_s21, %s18000_s16 }
  0x82   : > { %p17640_p13 = por %p17639_p1, %p17638_p2 }
  0x83   : > { %p17636_p0 = pneg %p17635_p12 }
  0x84   : > { %p17642_p8 = por %p17641_p4, %p17640_p13 }
  0x86   : > { %p17643_p6 = pnand %p17642_p8, %p17636_p0 }
  0x88   : > { %17646 = shalt.err (!%p17643_p6)
}
  0x89   : > { %s17647_s26 = scalar_lea.vmem %s18002_s1, 2048  ;;  %s17748_s15 = smov [#allocation2]  }
  0x8a   : > { %p17648_p3 = scmp.ne.s32.totalorder %s18002_s1, %s17647_s26  ;;  %s17652_s18 = sshll.u32 %s17748_s15, 4  ;;  %s17653_s18 = int_to_ptr.vmem [resolvable:$false] %s17652_s18 }
  0x8b   : > { %s17654_s13 = scalar_lea.vmem %s17653_s18, 4096  ;;  %p17655_p12 = scmp.lt.s32.totalorder %s18002_s1, %s17653_s18 }
  0x8c   : > { %p17650_p5 = pnand %p17648_p3, %p17634_p9  ;;  %p17656_p2 = scmp.lt.s32.totalorder %s17654_s13, %s17647_s26 }
  0x8e   : > { %p17651_p7 = pneg %p17650_p5  ;;  %p17657_p1 = por %p17656_p2, %p17655_p12 }
  0x90   : > { %p17658_p13 = pnand %p17657_p1, %p17651_p7 }
  0x92   : > { %17661 = shalt.err (!%p17658_p13)
}
  0x93   : > { %16301 = dma.hbm_to_vmem [thread:$0]  (!%p18004_p11), %s18000_s16, 2048, %s18002_s1, %s18008_s14, %s17745_s11, %s17745_s11, %s17746_s10  }
  0x94   : > { %p21797_p9 = scmp.ne.s32.totalorder %s21790_s29, 0 }
  0x96   : > { %428 = sbr.rel (%p21797_p9) target bundleno = 7770 (0x1e5a), region = 68 }
  0x9d   : > { %s18042_s21 = sand.u32 1, %s17728_s22   ;;  %p21798_p0 = scmp.ne.s32.totalorder %s21787_s27, 0 }
  0x9e   : > { %s12731_s17 = sshll.u32 %s18042_s21, 7  ;;  %s431_s28 = scalar_lea.sflag [#allocation3], %s18042_s21 }
  0x9f   : > { %s18048_s12 = scalar_lea.vmem [#allocation2], %s12731_s17 }
  0xa0   : > { %17707 = dma.done.wait (%p21798_p0), %s431_s28, 2048  }
  0xa1   : > { %17709 = vsyncadd (%p21798_p0), %s431_s28, 4294965248  ;;  %p21799_p11 = scmp.eq.s32.totalorder %s17846_s25, 0 }
  0xa3   : > { %17711 = dma.done.wait (%p21799_p11), [#allocation6], 8192   ;;  %p21800_p4 = pmov %p21799_p11 }
  0xa5   : > { %17713 = vsyncadd (%p21800_p4), [#allocation6], 4294959104  ;;  %p21801_p8 = pmov %p21800_p4 }
  0xa6   : > { %p21802_p6 = pmov %p21800_p4 }
  0xa7   : > { %17715 = dma.done.wait (%p21801_p8), [#allocation9], 16384  }
  0xa8   : > { %17717 = vsyncadd (%p21802_p6), [#allocation9], 4294950912  ;;  %v21717_v0 = vmov 0.0   ;;  %v510_v1 = vld [vmem:[#allocation5 + $0x8] sm:$0xff]  ;;  %v513_v2 = vld [vmem:[#allocation5 + $0x20] sm:$0xff]  ;;  %vm890_vm0 = vcmask 130048  }
  0xa9   : > { %621 = vmatprep.mubr.f32.mxu0 %v21717_v0  ;;  %v509_v3 = vld [vmem:[#allocation5] sm:$0xff]  ;;  %v15289_v4 = vpack.c.bf16 %v513_v2, %v510_v1  ;;  %v512_v5 = vld [vmem:[#allocation5 + $0x18] sm:$0xff]  ;;  %v519_v7 = vld [vmem:[#allocation5 + $0x50] sm:$0xff]  ;;  %vm1351_vm3 = vcmask 261120   ;;  %s17750_s27 = smov 112   ;;  %s17751_s29 = smov 96  }
  0xaa   : > { %v516_v6 = vld [vmem:[#allocation5 + $0x38] sm:$0xff]  ;;  %v15291_v8 = vpack.c.bf16 %v512_v5, %v509_v3  ;;  %v515_v10 = vld [vmem:[#allocation5 + $0x30] sm:$0xff]  ;;  %v518_v11 = vld [vmem:[#allocation5 + $0x48] sm:$0xff]  ;;  %s17752_s11 = smov 80   ;;  %s17753_s10 = smov 64  }
  0xab   : > { %v15293_v9 = vpack.c.bf16 %v519_v7, %v516_v6  ;;  %v522_v12 = vld [vmem:[#allocation5 + $0x68] sm:$0xff]  ;;  %15290 = vmatprep.subr.bf16.mxu0 %v15289_v4  ;;  %v525_v13 = vld [vmem:[#allocation5 + $0x80] sm:$0xff]  ;;  %v15295_v14 = vpack.c.bf16 %v518_v11, %v515_v10  ;;  %v524_v17 = vld [vmem:[#allocation5 + $0x78] sm:$0xff]  ;;  %s17754_s16 = smov 48   ;;  %s17755_s1 = smov 32  }
  0xac   : > { %15292 = vmatpush1.bf16.msra.mxu0 %v15291_v8  ;;  %v15297_v15 = vpack.c.bf16 %v525_v13, %v522_v12  ;;  %v521_v16 = vld [vmem:[#allocation5 + $0x60] sm:$0xff]  ;;  %v528_v18 = vld [vmem:[#allocation5 + $0x98] sm:$0xff]  ;;  %v531_v19 = vld [vmem:[#allocation5 + $0xb0] sm:$0xff]  ;;  %s17756_s14 = smov 16   ;;  %s21934_s18 = sld [smem:[#allocation65_spill]] }
  0xad   : > { %15294 = vmatprep.subr.bf16.mxu0 %v15293_v9  ;;  %v15299_v20 = vpack.c.bf16 %v524_v17, %v521_v16  ;;  %v15301_v21 = vpack.c.bf16 %v531_v19, %v528_v18  ;;  %v527_v22 = vld [vmem:[#allocation5 + $0x90] sm:$0xff]  ;;  %v530_v23 = vld [vmem:[#allocation5 + $0xa8] sm:$0xff]  ;;  %v537_v25 = vld [vmem:[#allocation5 + $0xe0] sm:$0xff]  ;;  %s21586_s13 = scalar_lea.vmem [#allocation11], %s12731_s17  ;;  %s13264_s17 = sshll.u32 %s17846_s25, 11 }
  0xae   : > { %v534_v24 = vld [vmem:[#allocation5 + $0xc8] sm:$0xff]  ;;  %v18064_v26 = vld [vmem:[%s18048_s12] sm:$0xff]  ;;  %v15303_v27 = vpack.c.bf16 %v530_v23, %v527_v22  ;;  %v536_v30 = vld [vmem:[#allocation5 + $0xd8] sm:$0xff]  ;;  %s12608_s28 = sshll.u32 %s21586_s13, 4  ;;  %s17757_s25 = smov [#allocation11]   ;;  %s21652_s28 = int_to_ptr.vmem [resolvable:$true] %s12608_s28 }
  0xaf   : > { %14145 = vmatprep.mubr.f32.mxu1 %v18064_v26  ;;  %v15305_v28 = vpack.c.bf16 %v537_v25, %v534_v24  ;;  %v533_v29 = vld [vmem:[#allocation5 + $0xc0] sm:$0xff]  ;;  %v540_v31 = vld [vmem:[#allocation5 + $0xf8] sm:$0xff]  ;;  %v543_v32 = vld [vmem:[#allocation5 + $0x110] sm:$0xff] }
  0xb0   : > { %15296 = vmatpush1.bf16.msra.mxu0 %v15295_v14  ;;  %v539_v33 = vld [vmem:[#allocation5 + $0xf0] sm:$0xff]  ;;  %v15307_v34 = vpack.c.bf16 %v536_v30, %v533_v29  ;;  %v514_v36 = vld [vmem:[#allocation5 + $0x28] sm:$0xff]  ;;  %v517_v37 = vld [vmem:[#allocation5 + $0x40] sm:$0xff]  ;;  %v15309_v38 = vpack.c.bf16 %v543_v32, %v540_v31 }
  0xb1   : > { %15298 = vmatprep.subr.bf16.mxu0 %v15297_v15  ;;  %v511_v35 = vld [vmem:[#allocation5 + $0x10] sm:$0xff]  ;;  %v542_v39 = vld [vmem:[#allocation5 + $0x108] sm:$0xff]  ;;  %v520_v42 = vld [vmem:[#allocation5 + $0x58] sm:$0xff] }
  0xb2   : > { %v546_v40 = vld [vmem:[#allocation5 + $0x128] sm:$0xff]  ;;  %v15321_v41 = vpack.c.bf16 %v514_v36, %v511_v35  ;;  %v549_v43 = vld [vmem:[#allocation5 + $0x140] sm:$0xff]  ;;  %v15325_v44 = vpack.c.bf16 %v520_v42, %v517_v37  ;;  %v523_v45 = vld [vmem:[#allocation5 + $0x70] sm:$0xff]  ;;  %v15311_v47 = vpack.c.bf16 %v542_v39, %v539_v33 }
  0xb3   : > { %v526_v46 = vld [vmem:[#allocation5 + $0x88] sm:$0xff]  ;;  %v15313_v48 = vpack.c.bf16 %v549_v43, %v546_v40  ;;  %v545_v49 = vld [vmem:[#allocation5 + $0x120] sm:$0xff]  ;;  %v548_v50 = vld [vmem:[#allocation5 + $0x138] sm:$0xff] }
  0xb4   : > { %15300 = vmatpush1.bf16.msra.mxu0 %v15299_v20  ;;  %15322 = vmatprep.subr.bf16.mxu1 %v15321_v41  ;;  %v552_v51 = vld [vmem:[#allocation5 + $0x158] sm:$0xff]  ;;  %v15329_v52 = vpack.c.bf16 %v526_v46, %v523_v45  ;;  %v555_v53 = vld [vmem:[#allocation5 + $0x170] sm:$0xff]  ;;  %v529_v54 = vld [vmem:[#allocation5 + $0xa0] sm:$0xff]  ;;  %v15315_v56 = vpack.c.bf16 %v548_v50, %v545_v49 }
  0xb5   : > { %15302 = vmatprep.subr.bf16.mxu0 %v15301_v21  ;;  %15324 = vmatpush3.bf16.msra.mxu1 %v15321_v41  ;;  %v532_v55 = vld [vmem:[#allocation5 + $0xb8] sm:$0xff]  ;;  %v15317_v57 = vpack.c.bf16 %v555_v53, %v552_v51  ;;  %v551_v58 = vld [vmem:[#allocation5 + $0x150] sm:$0xff]  ;;  %v554_v59 = vld [vmem:[#allocation5 + $0x168] sm:$0xff] }
  0xb6   : > { %15326 = vmatprep.subr.bf16.mxu1 %v15325_v44  ;;  %v15333_v60 = vpack.c.bf16 %v532_v55, %v529_v54  ;;  %v535_v61 = vld [vmem:[#allocation5 + $0xd0] sm:$0xff]  ;;  %v538_v62 = vld [vmem:[#allocation5 + $0xe8] sm:$0xff]  ;;  %v15319_v63 = vpack.c.bf16 %v554_v59, %v551_v58  ;;  %v541_v2 = vld [vmem:[#allocation5 + $0x100] sm:$0xff] }
  0xb7   : > { %v15337_v1 = vpack.c.bf16 %v538_v62, %v535_v61  ;;  %v544_v3 = vld [vmem:[#allocation5 + $0x118] sm:$0xff]  ;;  %v547_v5 = vld [vmem:[#allocation5 + $0x130] sm:$0xff]  ;;  %v550_v6 = vld [vmem:[#allocation5 + $0x148] sm:$0xff] }
  0xb8   : > { %15304 = vmatpush1.bf16.msra.mxu0 %v15303_v27  ;;  %v15341_v4 = vpack.c.bf16 %v544_v3, %v541_v2  ;;  %v494_v7 = vld [vmem:[%s18048_s12 + $0x8] sm:$0xff]  ;;  %v15345_v8 = vpack.c.bf16 %v550_v6, %v547_v5  ;;  %v553_v9 = vld [vmem:[#allocation5 + $0x160] sm:$0xff]  ;;  %v556_v10 = vld [vmem:[#allocation5 + $0x178] sm:$0xff] }
  0xb9   : > { %15306 = vmatprep.subr.bf16.mxu0 %v15305_v28  ;;  %15328 = vmatpush3.bf16.msra.mxu1 %v15325_v44  ;;  %v495_v11 = vld [vmem:[%s18048_s12 + $0x10] sm:$0xff]  ;;  %v15349_v12 = vpack.c.bf16 %v556_v10, %v553_v9  ;;  %v496_v13 = vld [vmem:[%s18048_s12 + $0x18] sm:$0xff]  ;;  %v497_v14 = vld [vmem:[%s18048_s12 + $0x20] sm:$0xff] }
  0xba   : > { %15330 = vmatprep.subr.bf16.mxu1 %v15329_v52  ;;  %v498_v15 = vld [vmem:[%s18048_s12 + $0x28] sm:$0xff]  ;;  %v499_v16 = vld [vmem:[%s18048_s12 + $0x30] sm:$0xff]  ;;  %v500_v17 = vld [vmem:[%s18048_s12 + $0x38] sm:$0xff] }
  0xbb   : > { %v501_v18 = vld [vmem:[%s18048_s12 + $0x40] sm:$0xff]  ;;  %v502_v19 = vld [vmem:[%s18048_s12 + $0x48] sm:$0xff]  ;;  %v503_v20 = vld [vmem:[%s18048_s12 + $0x50] sm:$0xff] }
  0xbc   : > { %15308 = vmatpush1.bf16.msra.mxu0 %v15307_v34  ;;  %v504_v21 = vld [vmem:[%s18048_s12 + $0x58] sm:$0xff]  ;;  %v505_v22 = vld [vmem:[%s18048_s12 + $0x60] sm:$0xff]  ;;  %v506_v23 = vld [vmem:[%s18048_s12 + $0x68] sm:$0xff] }
  0xbd   : > { %15310 = vmatprep.subr.bf16.mxu0 %v15309_v38  ;;  %15332 = vmatpush3.bf16.msra.mxu1 %v15329_v52  ;;  %v507_v24 = vld [vmem:[%s18048_s12 + $0x70] sm:$0xff]  ;;  %v508_v25 = vld [vmem:[%s18048_s12 + $0x78] sm:$0xff]  ;;  %vm18106_vm1 = vmpackc.low %vm890_vm0, %vm890_vm0 }
  0xbe   : > { %15334 = vmatprep.subr.bf16.mxu1 %v15333_v60 }
  0xc0   : > { %15312 = vmatpush1.bf16.msra.mxu0 %v15311_v47 }
  0xc1   : > { %15314 = vmatprep.subr.bf16.mxu0 %v15313_v48  ;;  %15336 = vmatpush3.bf16.msra.mxu1 %v15333_v60 }
  0xc2   : > { %15338 = vmatprep.subr.bf16.mxu1 %v15337_v1 }
  0xc4   : > { %15316 = vmatpush1.bf16.msra.mxu0 %v15315_v56 }
  0xc5   : > { %15318 = vmatprep.subr.bf16.mxu0 %v15317_v57  ;;  %15340 = vmatpush3.bf16.msra.mxu1 %v15337_v1 }
  0xc6   : > { %15342 = vmatprep.subr.bf16.mxu1 %v15341_v4 }
  0xc8   : > { %15320 = vmatpush1.bf16.msra.mxu0 %v15319_v63 }
  0xc9   : > { %15344 = vmatpush3.bf16.msra.mxu1 %v15341_v4 }
  0xca   : > { %15346 = vmatprep.subr.bf16.mxu1 %v15345_v8 }
  0xcb   : > { %622 = vmatmul.mubr.f32.vlgmr.msra.gmra.mrb[0].mxu0 %v18064_v26 }
  0xcc   : > { %627 = vmatprep.mubr.f32.mxu0 %v21717_v0 }
  0xcd   : > { %15348 = vmatpush3.bf16.msra.mxu1 %v15345_v8 }
  0xce   : > { %15350 = vmatprep.subr.bf16.mxu1 %v15349_v12 }
  0xcf   : > { %628 = vmatmul.mubr.f32.gmra.mrb[2].mxu0 %v494_v7 }
  0xd0   : > { %633 = vmatprep.mubr.f32.mxu0 %v21717_v0 }
  0xd1   : > { %15352 = vmatpush3.bf16.msra.mxu1 %v15349_v12 }
  0xd3   : > { %634 = vmatmul.mubr.f32.gmra.mrb[4].mxu0 %v495_v11 }
  0xd4   : > { %639 = vmatprep.mubr.f32.mxu0 %v21717_v0  ;;  %14146 = vmatmul.mubr.f32.vlgmr.msra.gmra.mrb[0].mxu1 %v494_v7 }
  0xd5   : > { %14148 = vmatprep.mubr.f32.mxu1 %v495_v11 }
  0xd7   : > { %640 = vmatmul.mubr.f32.gmra.mrb[6].mxu0 %v496_v13 }
  0xd8   : > { %645 = vmatprep.mubr.f32.mxu0 %v21717_v0  ;;  %14149 = vmatmul.mubr.f32.gmra.mrb[2].mxu1 %v496_v13 }
  0xd9   : > { %14151 = vmatprep.mubr.f32.mxu1 %v497_v14 }
  0xdb   : > { %646 = vmatmul.mubr.f32.gmra.mrb[8].mxu0 %v497_v14 }
  0xdc   : > { %651 = vmatprep.mubr.f32.mxu0 %v21717_v0  ;;  %14152 = vmatmul.mubr.f32.gmra.mrb[4].mxu1 %v498_v15 }
  0xdd   : > { %14154 = vmatprep.mubr.f32.mxu1 %v499_v16 }
  0xdf   : > { %652 = vmatmul.mubr.f32.gmra.mrb[10].mxu0 %v498_v15 }
  0xe0   : > { %657 = vmatprep.mubr.f32.mxu0 %v21717_v0  ;;  %14155 = vmatmul.mubr.f32.gmra.mrb[6].mxu1 %v500_v17 }
  0xe1   : > { %14157 = vmatprep.mubr.f32.mxu1 %v501_v18 }
  0xe3   : > { %658 = vmatmul.mubr.f32.gmra.mrb[12].mxu0 %v499_v16 }
  0xe4   : > { %663 = vmatprep.mubr.f32.mxu0 %v21717_v0  ;;  %14158 = vmatmul.mubr.f32.gmra.mrb[8].mxu1 %v502_v19 }
  0xe5   : > { %14160 = vmatprep.mubr.f32.mxu1 %v503_v20 }
  0xe7   : > { %664 = vmatmul.mubr.f32.gmra.mrb[14].mxu0 %v500_v17 }
  0xe8   : > { %669 = vmatprep.mubr.f32.mxu0 %v21717_v0  ;;  %14161 = vmatmul.mubr.f32.gmra.mrb[10].mxu1 %v504_v21 }
  0xe9   : > { %14163 = vmatprep.mubr.f32.mxu1 %v505_v22 }
  0xeb   : > { %670 = vmatmul.mubr.f32.gmra.mrb[16].mxu0 %v501_v18 }
  0xec   : > { %675 = vmatprep.mubr.f32.mxu0 %v21717_v0  ;;  %14164 = vmatmul.mubr.f32.gmra.mrb[12].mxu1 %v506_v23 }
  0xed   : > { %14166 = vmatprep.mubr.f32.mxu1 %v507_v24 }
  0xef   : > { %676 = vmatmul.mubr.f32.gmra.mrb[18].mxu0 %v502_v19 }
  0xf0   : > { %681 = vmatprep.mubr.f32.mxu0 %v21717_v0  ;;  %14167 = vmatmul.mubr.f32.gmra.mrb[14].mxu1 %v508_v25 }
  0xf3   : > { %682 = vmatmul.mubr.f32.gmra.mrb[20].mxu0 %v503_v20 }
  0xf4   : > { %687 = vmatprep.mubr.f32.mxu0 %v21717_v0 }
  0xf7   : > { %688 = vmatmul.mubr.f32.gmra.mrb[22].mxu0 %v504_v21 }
  0xf8   : > { %693 = vmatprep.mubr.f32.mxu0 %v21717_v0 }
  0xfb   : > { %694 = vmatmul.mubr.f32.gmra.mrb[24].mxu0 %v505_v22 }
  0xfc   : > { %699 = vmatprep.mubr.f32.mxu0 %v21717_v0 }
  0xff   : > { %700 = vmatmul.mubr.f32.gmra.mrb[26].mxu0 %v506_v23 }
 0x100   : > { %705 = vmatprep.mubr.f32.mxu0 %v21717_v0 }
 0x103   : > { %706 = vmatmul.mubr.f32.gmra.mrb[28].mxu0 %v507_v24 }
 0x104   : > { %711 = vmatprep.mubr.f32.mxu0 %v21717_v0 }
 0x107   : > { %712 = vmatmul.mubr.f32.gmra.mrb[30].mxu0 %v508_v25 }
 0x19e   : > { %v18098_v26 = vpop.f32.mrb[0].mxu0 }
 0x19f   : > { %21803 = vst [vmem:[#allocation18_spill] sm:$0xff] %v18098_v26  ;;  %v625_v27 = vpop.f32.mrb[1].mxu0  ;;  %14177 = vmatprep.mubr.msk.f32.mxu1 %vm890_vm0, %v18098_v26 }
 0x1a2   : > { %v18102_v28 = vpop.f32.mrb[2].mxu0 }
 0x1a3   : > { %21804 = vst [vmem:[#allocation19_spill] sm:$0xff] %v18102_v28  ;;  %v631_v29 = vpop.f32.mrb[3].mxu0 }
 0x1a4   : > { %v15353_v31 = vpack.c.bf16 %v631_v29, %v625_v27  ;;  %v18110_v32 = vpack.i.bf16 %v631_v29, %v625_v27 }
 0x1a6   : > { %21807 = vst [vmem:[#allocation20_spill] sm:$0xff] %v18110_v32  ;;  %v18112_v33 = vpop.f32.mrb[4].mxu0  ;;  %15355 = vmatprep.subr.msk.bf16.mxu1 %vm18106_vm1, %v15353_v31 }
 0x1a7   : > { %21808 = vst [vmem:[#allocation21_spill] sm:$0xff] %v18112_v33  ;;  %v637_v34 = vpop.f32.mrb[5].mxu0  ;;  %15358 = vmatpush3.bf16.xpose.msk.msra.mxu1 %vm18106_vm1, %v15353_v31  ;;  %v18126_v40 = vpop.f32.mrb[0].mxu1 }
 0x1a8   : > { %v18130_v42 = vpop.f32.mrb[1].mxu1 }
 0x1a9   : > { %v18134_v43 = vpack.c.bf16 %v18126_v40, %v18130_v42 }
 0x1aa   : > { %v18118_v35 = vpop.f32.mrb[6].mxu0 }
 0x1ab   : > { %21809 = vst [vmem:[#allocation22_spill] sm:$0xff] %v18118_v35  ;;  %v643_v36 = vpop.f32.mrb[7].mxu0  ;;  %v18138_v45 = vpop.f32.mrb[2].mxu1 }
 0x1ac   : > { %v15359_v37 = vpack.c.bf16 %v643_v36, %v637_v34  ;;  %v18120_v38 = vpack.i.bf16 %v643_v36, %v637_v34  ;;  %v18140_v47 = vpop.f32.mrb[3].mxu1 }
 0x1ad   : > { %v18144_v49 = vpack.c.bf16 %v18138_v45, %v18140_v47 }
 0x1ae   : > { %21810 = vst [vmem:[#allocation23_spill] sm:$0xff] %v18120_v38  ;;  %v18122_v39 = vpop.f32.mrb[8].mxu0  ;;  %15361 = vmatprep.subr.msk.bf16.mxu1 %vm18106_vm1, %v15359_v37 }
 0x1af   : > { %21811 = vst [vmem:[#allocation24_spill] sm:$0xff] %v18122_v39  ;;  %v649_v41 = vpop.f32.mrb[9].mxu0  ;;  %15364 = vmatpush3.bf16.xpose.msk.msra.mxu1 %vm18106_vm1, %v15359_v37  ;;  %v18154_v52 = vpop.f32.mrb[4].mxu1  ;;  %v18253_v37 = vpack.i.bf16 %v18126_v40, %v18130_v42 }
 0x1b0   : > { %v18160_v54 = vpop.f32.mrb[5].mxu1 }
 0x1b1   : > { %v18164_v55 = vpack.c.bf16 %v18154_v52, %v18160_v54  ;;  %21825 = vst [vmem:[#allocation38_spill] sm:$0xff] %v18253_v37 }
 0x1b2   : > { %v18136_v44 = vpop.f32.mrb[10].mxu0 }
 0x1b3   : > { %21812 = vst [vmem:[#allocation25_spill] sm:$0xff] %v18136_v44  ;;  %v655_v46 = vpop.f32.mrb[11].mxu0  ;;  %v18170_v57 = vpop.f32.mrb[6].mxu1 }
 0x1b4   : > { %v15365_v48 = vpack.c.bf16 %v655_v46, %v649_v41  ;;  %v18146_v50 = vpack.i.bf16 %v655_v46, %v649_v41  ;;  %v18174_v59 = vpop.f32.mrb[7].mxu1  ;;  %v18257_v41 = vpack.i.bf16 %v18138_v45, %v18140_v47 }
 0x1b5   : > { %v18265_v46 = vpack.c.bf16 %v18170_v57, %v18174_v59 }
 0x1b6   : > { %21813 = vst [vmem:[#allocation26_spill] sm:$0xff] %v18146_v50  ;;  %v18148_v51 = vpop.f32.mrb[12].mxu0  ;;  %14178 = vmatmul.mubr.msk.f32.vlgmr.msra.gmra.mrb[16].mxu1 %vm890_vm0, %v18102_v28  ;;  %15367 = vmatprep.subr.msk.bf16.mxu1 %vm18106_vm1, %v15365_v48  ;;  %21826 = vst [vmem:[#allocation39_spill] sm:$0xff] %v18257_v41 }
 0x1b7   : > { %21814 = vst [vmem:[#allocation27_spill] sm:$0xff] %v18148_v51  ;;  %v661_v53 = vpop.f32.mrb[13].mxu0  ;;  %14180 = vmatprep.mubr.msk.f32.mxu1 %vm890_vm0, %v18112_v33  ;;  %15370 = vmatpush3.bf16.xpose.msk.msra.mxu1 %vm18106_vm1, %v15365_v48  ;;  %v18182_v63 = vpop.f32.mrb[8].mxu1  ;;  %v18269_v48 = vpack.i.bf16 %v18170_v57, %v18174_v59  ;;  %v863_v57 = vlaneseq }
 0x1b8   : > { %v824_v2 = vpop.f32.mrb[9].mxu1 }
 0x1b9   : > { %21828 = vst [vmem:[#allocation41_spill] sm:$0xff] %v18269_v48  ;;  %v18273_v40 = vpack.i.bf16 %v18182_v63, %v824_v2  ;;  %v869_v59 = vand.u32 127, %v863_v57 }
 0x1ba   : > { %v18166_v56 = vpop.f32.mrb[14].mxu0  ;;  %14181 = vmatmul.mubr.msk.f32.gmra.mrb[18].mxu1 %vm890_vm0, %v18118_v35 }
 0x1bb   : > { %21815 = vst [vmem:[#allocation28_spill] sm:$0xff] %v18166_v56  ;;  %v667_v58 = vpop.f32.mrb[15].mxu0  ;;  %14191 = vmatprep.mubr.msk.f32.mxu1 %vm890_vm0, %v18122_v39  ;;  %v14162_v4 = vpop.f32.mrb[10].mxu1  ;;  %21829 = vst [vmem:[#allocation42_spill] sm:$0xff] %v18273_v40 }
 0x1bc   : > { %v15371_v60 = vpack.c.bf16 %v667_v58, %v661_v53  ;;  %v18176_v61 = vpack.i.bf16 %v667_v58, %v661_v53  ;;  %v834_v6 = vpop.f32.mrb[11].mxu1  ;;  %v18285_v58 = vshrl.u32 %v863_v57, 7 }
 0x1bd   : > { %v15421_v42 = vpack.c.bf16 %v14162_v4, %v834_v6  ;;  %v18275_v45 = vpack.i.bf16 %v14162_v4, %v834_v6 }
 0x1be   : > { %21816 = vst [vmem:[#allocation29_spill] sm:$0xff] %v18176_v61  ;;  %v18178_v62 = vpop.f32.mrb[16].mxu0  ;;  %15373 = vmatprep.subr.msk.bf16.mxu1 %vm18106_vm1, %v15371_v60  ;;  %21833 = vst [vmem:[#allocation46_spill] sm:$0xff] %v18285_v58  ;;  %vm18289_vm2 = vcmp.ge.s32.totalorder %v18285_v58, %v869_v59  ;;  %v867_v6 = vadd.s32 24, %v18285_v58 }
 0x1bf   : > { %21817 = vst [vmem:[#allocation30_spill] sm:$0xff] %v18178_v62  ;;  %v673_v1 = vpop.f32.mrb[17].mxu0  ;;  %15376 = vmatpush3.bf16.xpose.msk.msra.mxu1 %vm18106_vm1, %v15371_v60  ;;  %14205 = vmatprep.mubr.msk.f32.mxu0 %vm890_vm0, %v18178_v62  ;;  %v14165_v10 = vpop.f32.mrb[12].mxu1  ;;  %21830 = vst [vmem:[#allocation43_spill] sm:$0xff] %v18275_v45  ;;  %v865_v60 = vadd.s32 8, %v18285_v58 }
 0x1c0   : > { %v844_v12 = vpop.f32.mrb[13].mxu1  ;;  %vm18308_vm6 = vcmp.ge.s32.totalorder %v867_v6, %v869_v59 }
 0x1c1   : > { %v18277_v47 = vpack.c.bf16 %v14165_v10, %v844_v12  ;;  %vm18294_vm4 = vcmp.ge.s32.totalorder %v865_v60, %v869_v59 }
 0x1c2   : > { %v18188_v3 = vpop.f32.mrb[18].mxu0 }
 0x1c3   : > { %21818 = vst [vmem:[#allocation31_spill] sm:$0xff] %v18188_v3  ;;  %v679_v5 = vpop.f32.mrb[19].mxu0  ;;  %v14168_v14 = vpop.f32.mrb[14].mxu1 }
 0x1c4   : > { %v15377_v7 = vpack.c.bf16 %v679_v5, %v673_v1  ;;  %v18190_v8 = vpack.i.bf16 %v679_v5, %v673_v1  ;;  %v854_v16 = vpop.f32.mrb[15].mxu1  ;;  %v866_v1 = vadd.s32 16, %v18285_v58 }
 0x1c5   : > { %v18281_v53 = vpack.c.bf16 %v14168_v14, %v854_v16 }
 0x1c6   : > { %21819 = vst [vmem:[#allocation32_spill] sm:$0xff] %v18190_v8  ;;  %v18192_v9 = vpop.f32.mrb[20].mxu0  ;;  %14192 = vmatmul.mubr.msk.f32.vlgmr.msra.gmra.mrb[20].mxu1 %vm890_vm0, %v18136_v44  ;;  %15379 = vmatprep.subr.msk.bf16.mxu0 %vm18106_vm1, %v15377_v7  ;;  %vm18302_vm5 = vcmp.ge.s32.totalorder %v866_v1, %v869_v59 }
 0x1c7   : > { %v685_v11 = vpop.f32.mrb[21].mxu0  ;;  %14194 = vmatprep.mubr.msk.f32.mxu1 %vm890_vm0, %v18148_v51  ;;  %15382 = vmatpush3.bf16.xpose.msk.msra.mxu0 %vm18106_vm1, %v15377_v7 }
 0x1ca   : > { %v18202_v13 = vpop.f32.mrb[22].mxu0  ;;  %14195 = vmatmul.mubr.msk.f32.gmra.mrb[22].mxu1 %vm890_vm0, %v18166_v56 }
 0x1cb   : > { %21820 = vst [vmem:[#allocation33_spill] sm:$0xff] %v18202_v13  ;;  %v691_v15 = vpop.f32.mrb[23].mxu0 }
 0x1cc   : > { %v15383_v17 = vpack.c.bf16 %v691_v15, %v685_v11  ;;  %v18206_v18 = vpack.i.bf16 %v691_v15, %v685_v11  ;;  %v21838_v11 = vmov 0  ;;  %v21841_v15 = vmov 0 }
 0x1cd   : > { %v21839_v11 = vsel %vm18302_vm5, 4294967295, %v21838_v11  ;;  %v21842_v15 = vsel %vm18308_vm6, 4294967295, %v21841_v15 }
 0x1ce   : > { %21821 = vst [vmem:[#allocation34_spill] sm:$0xff] %v18206_v18  ;;  %v18208_v19 = vpop.f32.mrb[24].mxu0  ;;  %15385 = vmatprep.subr.msk.bf16.mxu0 %vm18106_vm1, %v15383_v17  ;;  %21840 = vst [vmem:[#allocation47_spill] sm:$0xff] %v21839_v11 }
 0x1cf   : > { %21822 = vst [vmem:[#allocation35_spill] sm:$0xff] %v18208_v19  ;;  %v697_v20 = vpop.f32.mrb[25].mxu0  ;;  %15388 = vmatpush3.bf16.xpose.msk.msra.mxu0 %vm18106_vm1, %v15383_v17  ;;  %14219 = vmatprep.mubr.msk.f32.mxu1 %vm890_vm0, %v18208_v19  ;;  %21843 = vst [vmem:[#allocation48_spill] sm:$0xff] %v21842_v15 }
 0x1d2   : > { %v18216_v21 = vpop.f32.mrb[26].mxu0 }
 0x1d3   : > { %v703_v22 = vpop.f32.mrb[27].mxu0 }
 0x1d4   : > { %v15389_v23 = vpack.c.bf16 %v703_v22, %v697_v20  ;;  %v18218_v24 = vpack.i.bf16 %v703_v22, %v697_v20 }
 0x1d6   : > { %21823 = vst [vmem:[#allocation36_spill] sm:$0xff] %v18218_v24  ;;  %v18220_v25 = vpop.f32.mrb[28].mxu0  ;;  %14206 = vmatmul.mubr.msk.f32.vlgmr.msra.gmra.mrb[32].mxu0 %vm890_vm0, %v18188_v3  ;;  %15391 = vmatprep.subr.msk.bf16.mxu1 %vm18106_vm1, %v15389_v23 }
 0x1d7   : > { %21824 = vst [vmem:[#allocation37_spill] sm:$0xff] %v18220_v25  ;;  %v709_v27 = vpop.f32.mrb[29].mxu0  ;;  %14208 = vmatprep.mubr.msk.f32.mxu0 %vm890_vm0, %v18192_v9  ;;  %15394 = vmatpush3.bf16.xpose.msk.msra.mxu1 %vm18106_vm1, %v15389_v23 }
 0x1da   : > { %v18230_v29 = vpop.f32.mrb[30].mxu0  ;;  %14209 = vmatmul.mubr.msk.f32.gmra.mrb[34].mxu0 %vm890_vm0, %v18202_v13 }
 0x1db   : > { %v715_v31 = vpop.f32.mrb[31].mxu0 }
 0x1dc   : > { %v15395_v34 = vpack.c.bf16 %v715_v31, %v709_v27  ;;  %v18234_v36 = vpack.i.bf16 %v715_v31, %v709_v27 }
 0x1de   : > { %15397 = vmatprep.subr.msk.bf16.mxu1 %vm18106_vm1, %v15395_v34 }
 0x1df   : > { %15400 = vmatpush3.bf16.xpose.msk.msra.mxu1 %vm18106_vm1, %v15395_v34 }
 0x1e0   : > { %15402 = vmatprep.subr.bf16.mxu1 %v18134_v43 }
 0x1e6   : > { %14220 = vmatmul.mubr.msk.f32.vlgmr.msra.gmra.mrb[24].mxu1 %vm890_vm0, %v18216_v21 }
 0x1e7   : > { %14222 = vmatprep.mubr.msk.f32.mxu1 %vm890_vm0, %v18220_v25  ;;  %15404 = vmatpush3.bf16.msra.mxu1 %v18134_v43  ;;  %v18261_v43 = vpack.i.bf16 %v18154_v52, %v18160_v54  ;;  %v18279_v52 = vpack.i.bf16 %v14165_v10, %v844_v12  ;;  %v18283_v54 = vpack.i.bf16 %v14168_v14, %v854_v16 }
 0x1e8   : > { %15406 = vmatprep.subr.bf16.mxu1 %v18144_v49 }
 0x1e9   : > { %21827 = vst [vmem:[#allocation40_spill] sm:$0xff] %v18261_v43  ;;  %21831 = vst [vmem:[#allocation44_spill] sm:$0xff] %v18279_v52 }
 0x1ea   : > { %14223 = vmatmul.mubr.msk.f32.gmra.mrb[26].mxu1 %vm890_vm0, %v18230_v29  ;;  %21832 = vst [vmem:[#allocation45_spill] sm:$0xff] %v18283_v54 }
 0x1eb   : > { %15408 = vmatpush3.bf16.msra.mxu1 %v18144_v49  ;;  %v15417_v49 = vpack.c.bf16 %v18182_v63, %v824_v2 }
 0x1ec   : > { %15410 = vmatprep.subr.bf16.mxu1 %v18164_v55 }
 0x1ed   : > { %15418 = vmatprep.subr.bf16.mxu0 %v15417_v49 }
 0x1ee   : > { %15420 = vmatpush3.bf16.msra.mxu0 %v15417_v49 }
 0x1ef   : > { %15422 = vmatprep.subr.bf16.mxu0 %v15421_v42 }
 0x1f2   : > { %15424 = vmatpush3.bf16.msra.mxu0 %v15421_v42 }
 0x289   : > { %v14179_v2 = vpop.f32.mrb[16].mxu1 }
 0x28a   : > { %v981_v5 = vpop.f32.mrb[17].mxu1  ;;  %v1336_v12 = vsel %vm18294_vm4, %v14179_v2, -1e+30 }
 0x28b   : > { %v1335_v7 = vsel %vm18289_vm2, %v981_v5, -1e+30  ;;  %v1355_v20 = vsel %vm1351_vm3, %v1336_v12, -inf }
 0x28c   : > { %v1352_v10 = vsel %vm1351_vm3, %v1335_v7, -inf }
 0x28d   : > { %1353 = vmax.xlane.f32.xlu0 %v1352_v10  ;;  %v14182_v14 = vpop.f32.mrb[18].mxu1 }
 0x28e   : > { %v991_v16 = vpop.f32.mrb[19].mxu1  ;;  %v1338_v23 = vsel %vm18308_vm6, %v14182_v14, -1e+30 }
 0x28f   : > { %v1337_v17 = vsel %vm18302_vm5, %v991_v16, -1e+30  ;;  %v1361_v27 = vsel %vm1351_vm3, %v1338_v23, -inf }
 0x290   : > { %v1358_v22 = vsel %vm1351_vm3, %v1337_v17, -inf }
 0x291   : > { %1356 = vmax.xlane.f32.xlu0 %v1355_v20  ;;  %1359 = vmax.xlane.f32.xlu1 %v1358_v22 }
 0x295   : > { %1362 = vmax.xlane.f32.xlu1 %v1361_v27 }
 0x299   : > { %v14193_v31 = vpop.f32.mrb[20].mxu1 }
 0x29a   : > { %v1340_v34 = vsel %vm18294_vm4, %v14193_v31, -1e+30  ;;  %v1090_v49 = vpop.f32.mrb[21].mxu1 }
 0x29b   : > { %v1339_v42 = vsel %vm18289_vm2, %v1090_v49, -1e+30  ;;  %v1367_v57 = vsel %vm1351_vm3, %v1340_v34, -inf }
 0x29c   : > { %1368 = vmax.xlane.f32.xlu1 %v1367_v57  ;;  %v1364_v59 = vsel %vm1351_vm3, %v1339_v42, -inf }
 0x29d   : > { %1365 = vmax.xlane.f32.xlu0 %v1364_v59  ;;  %v14196_v60 = vpop.f32.mrb[22].mxu1 }
 0x29e   : > { %v18327_v1 = vsel %vm18308_vm6, %v14196_v60, -1e+30  ;;  %v1100_v2 = vpop.f32.mrb[23].mxu1 }
 0x29f   : > { %v18331_v5 = vsel %vm18302_vm5, %v1100_v2, -1e+30  ;;  %v1373_v6 = vsel %vm1351_vm3, %v18327_v1, -inf }
 0x2a0   : > { %1374 = vmax.xlane.f32.xlu1 %v1373_v6  ;;  %v1370_v10 = vsel %vm1351_vm3, %v18331_v5, -inf }
 0x2a1   : > { %1371 = vmax.xlane.f32.xlu0 %v1370_v10 }
 0x2a9   : > { %v18337_v14 = vpop.f32.mrb[32].mxu0 }
 0x2aa   : > { %v18339_v16 = vpop.f32.mrb[33].mxu0 }
 0x2ad   : > { %v18341_v20 = vpop.f32.mrb[34].mxu0 }
 0x2ae   : > { %v18343_v22 = vpop.f32.mrb[35].mxu0 }
 0x2b9   : > { %v14221_v27 = vpop.f32.mrb[24].mxu1 }
 0x2ba   : > { %v18347_v31 = vsel %vm18294_vm4, %v14221_v27, -1e+30  ;;  %v1308_v49 = vpop.f32.mrb[25].mxu1 }
 0x2bb   : > { %v18351_v57 = vsel %vm18289_vm2, %v1308_v49, -1e+30  ;;  %v1391_v59 = vsel %vm1351_vm3, %v18347_v31, -inf }
 0x2bc   : > { %1392 = vmax.xlane.f32.xlu1 %v1391_v59  ;;  %v1388_v60 = vsel %vm1351_vm3, %v18351_v57, -inf }
 0x2bd   : > { %1389 = vmax.xlane.f32.xlu0 %v1388_v60  ;;  %v14224_v2 = vpop.f32.mrb[26].mxu1 }
 0x2be   : > { %v18359_v6 = vsel %vm18308_vm6, %v14224_v2, -1e+30  ;;  %v1318_v10 = vpop.f32.mrb[27].mxu1 }
 0x2bf   : > { %v18363_v27 = vsel %vm18302_vm5, %v1318_v10, -1e+30  ;;  %v1397_v49 = vsel %vm1351_vm3, %v18359_v6, -inf }
 0x2c0   : > { %1398 = vmax.xlane.f32.xlu1 %v1397_v49  ;;  %v1394_v59 = vsel %vm1351_vm3, %v18363_v27, -inf }
 0x2c1   : > { %1395 = vmax.xlane.f32.xlu0 %v1394_v59 }
 0x31a   : > { %v1354_v0 = vpop.xlane.xlu0 %1353 }
 0x31b   : > { %v1400_v60 = vsub.f32 %v1335_v7, %v1354_v0 }
 0x31d   : > { %v1416_v58 = vmul.f32 1.442695, %v1400_v60 }
 0x31e   : > { %v1357_v45 = vpop.xlane.xlu0 %1356  ;;  %v1360_v41 = vpop.xlane.xlu1 %1359 }
 0x31f   : > { %16928 = vpow2.f32 %v1416_v58  ;;  %v1401_v2 = vsub.f32 %v1336_v12, %v1357_v45  ;;  %v1402_v40 = vsub.f32 %v1337_v17, %v1360_v41 }
 0x321   : > { %v1418_v37 = vmul.f32 1.442695, %v1401_v2  ;;  %v1420_v54 = vmul.f32 1.442695, %v1402_v40 }
 0x322   : > { %v1363_v10 = vpop.xlane.xlu1 %1362 }
 0x323   : > { %16930 = vpow2.f32 %v1418_v37  ;;  %v1403_v48 = vsub.f32 %v1338_v23, %v1363_v10 }
 0x324   : > { %16932 = vpow2.f32 %v1420_v54 }
 0x325   : > { %v1422_v13 = vmul.f32 1.442695, %v1403_v48 }
 0x327   : > { %16934 = vpow2.f32 %v1422_v13 }
 0x329   : > { %v18369_v49 = vpop.eup %16928  ;;  %v1369_v52 = vpop.xlane.xlu1 %1368 }
 0x32a   : > { %v1405_v59 = vsub.f32 %v1340_v34, %v1369_v52  ;;  %v1366_v3 = vpop.xlane.xlu0 %1365  ;;  %v1448_v0 = vsel %vm1351_vm3, %v18369_v49, 0.0 }
 0x32b   : > { %v1404_v7 = vsub.f32 %v1339_v42, %v1366_v3  ;;  %1449 = vadd.xlane.f32.xlu0 %v1448_v0 }
 0x32c   : > { %v1426_v45 = vmul.f32 1.442695, %v1405_v59 }
 0x32d   : > { %v18373_v41 = vpop.eup %16930  ;;  %v1424_v40 = vmul.f32 1.442695, %v1404_v7  ;;  %v1375_v58 = vpop.xlane.xlu1 %1374 }
 0x32e   : > { %v18375_v37 = vpop.eup %16932  ;;  %16936 = vpow2.f32 %v1426_v45  ;;  %v1407_v13 = vsub.f32 %v18327_v1, %v1375_v58  ;;  %v1372_v48 = vpop.xlane.xlu0 %1371  ;;  %v1451_v52 = vsel %vm1351_vm3, %v18373_v41, 0.0 }
 0x32f   : > { %16938 = vpow2.f32 %v1424_v40  ;;  %v1406_v54 = vsub.f32 %v18331_v5, %v1372_v48  ;;  %1452 = vadd.xlane.f32.xlu1 %v1451_v52  ;;  %v1454_v3 = vsel %vm1351_vm3, %v18375_v37, 0.0 }
 0x330   : > { %v1430_v12 = vmul.f32 1.442695, %v1407_v13  ;;  %1455 = vadd.xlane.f32.xlu0 %v1454_v3 }
 0x331   : > { %v18383_v17 = vpop.eup %16934  ;;  %v1428_v23 = vmul.f32 1.442695, %v1406_v54 }
 0x332   : > { %16940 = vpow2.f32 %v1430_v12  ;;  %v1457_v34 = vsel %vm1351_vm3, %v18383_v17, 0.0 }
 0x333   : > { %16942 = vpow2.f32 %v1428_v23  ;;  %1458 = vadd.xlane.f32.xlu1 %v1457_v34 }
 0x338   : > { %v18387_v42 = vpop.eup %16936 }
 0x339   : > { %v18389_v1 = vpop.eup %16938  ;;  %v1463_v5 = vsel %vm1351_vm3, %v18387_v42, 0.0 }
 0x33a   : > { %1464 = vadd.xlane.f32.xlu1 %v1463_v5  ;;  %v1460_v60 = vsel %vm1351_vm3, %v18389_v1, 0.0 }
 0x33b   : > { %1461 = vadd.xlane.f32.xlu0 %v1460_v60 }
 0x33c   : > { %v18395_v2 = vpop.eup %16940 }
 0x33d   : > { %v18397_v10 = vpop.eup %16942  ;;  %v1469_v59 = vsel %vm1351_vm3, %v18395_v2, 0.0 }
 0x33e   : > { %1470 = vadd.xlane.f32.xlu1 %v1469_v59  ;;  %v1466_v0 = vsel %vm1351_vm3, %v18397_v10, 0.0 }
 0x33f   : > { %1467 = vadd.xlane.f32.xlu0 %v1466_v0 }
 0x349   : > { %v1393_v7 = vpop.xlane.xlu1 %1392 }
 0x34a   : > { %v1413_v45 = vsub.f32 %v18347_v31, %v1393_v7  ;;  %v1390_v40 = vpop.xlane.xlu0 %1389  ;;  %v18450_v7 = vsel %vm18289_vm2, %v18339_v16, -1e+30  ;;  %v18469_v16 = vsel %vm18308_vm6, %v18341_v20, -1e+30 }
 0x34b   : > { %v1412_v58 = vsub.f32 %v18351_v57, %v1390_v40  ;;  %v18457_v40 = vsel %vm18302_vm5, %v18343_v22, -1e+30  ;;  %v1385_v22 = vsel %vm1351_vm3, %v18469_v16, -inf }
 0x34c   : > { %v1442_v13 = vmul.f32 1.442695, %v1413_v45  ;;  %v1376_v45 = vsel %vm1351_vm3, %v18450_v7, -inf }
 0x34d   : > { %v1440_v48 = vmul.f32 1.442695, %v1412_v58  ;;  %v1399_v52 = vpop.xlane.xlu1 %1398  ;;  %v18462_v58 = vsel %vm18294_vm4, %v18337_v14, -1e+30 }
 0x34e   : > { %16944 = vpow2.f32 %v1442_v13  ;;  %v1415_v54 = vsub.f32 %v18359_v6, %v1399_v52  ;;  %v1396_v3 = vpop.xlane.xlu0 %1395  ;;  %v1382_v13 = vsel %vm1351_vm3, %v18457_v40, -inf }
 0x34f   : > { %16946 = vpow2.f32 %v1440_v48  ;;  %v1414_v12 = vsub.f32 %v18363_v27, %v1396_v3  ;;  %v1379_v48 = vsel %vm1351_vm3, %v18462_v58, -inf }
 0x350   : > { %v1446_v23 = vmul.f32 1.442695, %v1415_v54 }
 0x351   : > { %v1444_v34 = vmul.f32 1.442695, %v1414_v12 }
 0x352   : > { %16948 = vpow2.f32 %v1446_v23 }
 0x353   : > { %16950 = vpow2.f32 %v1444_v34 }
 0x358   : > { %v18407_v5 = vpop.eup %16944 }
 0x359   : > { %v18409_v31 = vpop.eup %16946  ;;  %v1487_v57 = vsel %vm1351_vm3, %v18407_v5, 0.0 }
 0x35a   : > { %1488 = vadd.xlane.f32.xlu1 %v1487_v57  ;;  %v1484_v60 = vsel %vm1351_vm3, %v18409_v31, 0.0 }
 0x35b   : > { %1485 = vadd.xlane.f32.xlu0 %v1484_v60 }
 0x35c   : > { %v18415_v6 = vpop.eup %16948 }
 0x35d   : > { %v18417_v59 = vpop.eup %16950  ;;  %v1493_v27 = vsel %vm1351_vm3, %v18415_v6, 0.0 }
 0x35e   : > { %1494 = vadd.xlane.f32.xlu1 %v1493_v27  ;;  %v1490_v0 = vsel %vm1351_vm3, %v18417_v59, 0.0 }
 0x35f   : > { %1491 = vadd.xlane.f32.xlu0 %v1490_v0 }
 0x36f   : > { %16374 = vrot.lane.b32.xlu1 %v18176_v61, %s17750_s27 }
 0x373   : > { %16379 = vrot.lane.b32.xlu1 %v18218_v24, %s17750_s27 }
 0x375   : > { %16369 = vrot.lane.b32.xlu0 %v18146_v50, %s17750_s27 }
 0x377   : > { %2033 = vrot.lane.b32.xlu1 %v18122_v39, %s17750_s27 }
 0x379   : > { %2035 = vrot.lane.b32.xlu0 %v18136_v44, %s17750_s27 }
 0x37b   : > { %16384 = vrot.lane.b32.xlu1 %v18234_v36, %s17750_s27 }
 0x37d   : > { %2037 = vrot.lane.b32.xlu0 %v18148_v51, %s17750_s27 }
 0x37f   : > { %2039 = vrot.lane.b32.xlu1 %v18166_v56, %s17750_s27 }
 0x381   : > { %2267 = vrot.lane.b32.xlu0 %v18208_v19, %s17750_s27 }
 0x383   : > { %2269 = vrot.lane.b32.xlu1 %v18216_v21, %s17750_s27 }
 0x385   : > { %2271 = vrot.lane.b32.xlu0 %v18220_v25, %s17750_s27 }
 0x387   : > { %2273 = vrot.lane.b32.xlu1 %v18230_v29, %s17750_s27 }
 0x3a4   : > { %1377 = vmax.xlane.f32.xlu0 %v1376_v45 }
 0x3a8   : > { %1383 = vmax.xlane.f32.xlu0 %v1382_v13 }
 0x3ab   : > { %1380 = vmax.xlane.f32.xlu1 %v1379_v48 }
 0x3ac   : > { %1386 = vmax.xlane.f32.xlu0 %v1385_v22 }
 0x3b8   : > { %v1450_v52 = vpop.xlane.xlu0 %1449 }
 0x3b9   : > { %16952 = vrcp.f32 %v1450_v52 }
 0x3bc   : > { %v1453_v14 = vpop.xlane.xlu1 %1452 }
 0x3bd   : > { %16954 = vrcp.f32 %v1453_v14  ;;  %v1456_v54 = vpop.xlane.xlu0 %1455 }
 0x3be   : > { %16956 = vrcp.f32 %v1456_v54 }
 0x3c0   : > { %v1459_v3 = vpop.xlane.xlu1 %1458 }
 0x3c1   : > { %16958 = vrcp.f32 %v1459_v3 }
 0x3c3   : > { %v16953_v12 = vpop.eup %16952 }
 0x3c4   : > { %v1512_v20 = vmul.f32 %v16953_v12, %v18369_v49 }
 0x3c6   : > { %14233 = vmatprep.mubr.msk.f32.mxu1 %vm1351_vm3, %v1512_v20 }
 0x3c7   : > { %v16955_v23 = vpop.eup %16954  ;;  %v1465_v34 = vpop.xlane.xlu1 %1464 }
 0x3c8   : > { %v16957_v57 = vpop.eup %16956  ;;  %v1513_v60 = vmul.f32 %v16955_v23, %v18373_v41  ;;  %16960 = vrcp.f32 %v1465_v34  ;;  %v1462_v27 = vpop.xlane.xlu0 %1461 }
 0x3c9   : > { %16962 = vrcp.f32 %v1462_v27  ;;  %v1514_v0 = vmul.f32 %v16957_v57, %v18375_v37 }
 0x3ca   : > { %14234 = vmatmul.mubr.msk.f32.vlgmr.msra.gmra.mrb[28].mxu1 %vm1351_vm3, %v1513_v60 }
 0x3cb   : > { %v16959_v45 = vpop.eup %16958  ;;  %15412 = vmatpush3.bf16.msra.mxu1 %v18164_v55  ;;  %v1471_v13 = vpop.xlane.xlu1 %1470  ;;  %14236 = vmatprep.mubr.msk.f32.mxu1 %vm1351_vm3, %v1514_v0 }
 0x3cc   : > { %16964 = vrcp.f32 %v1471_v13  ;;  %15414 = vmatprep.subr.bf16.mxu1 %v18265_v46  ;;  %v1468_v49 = vpop.xlane.xlu0 %1467  ;;  %v1515_v48 = vmul.f32 %v16959_v45, %v18383_v17 }
 0x3cd   : > { %16966 = vrcp.f32 %v1468_v49 }
 0x3ce   : > { %14237 = vmatmul.mubr.msk.f32.gmra.mrb[30].mxu1 %vm1351_vm3, %v1515_v48 }
 0x3cf   : > { %15416 = vmatpush3.bf16.msra.mxu1 %v18265_v46 }
 0x3d0   : > { %15426 = vmatprep.subr.bf16.mxu1 %v18277_v47 }
 0x3d2   : > { %v16961_v41 = vpop.eup %16960 }
 0x3d3   : > { %v16963_v37 = vpop.eup %16962  ;;  %v1517_v22 = vmul.f32 %v16961_v41, %v18387_v42 }
 0x3d4   : > { %v1516_v55 = vmul.f32 %v16963_v37, %v18389_v1 }
 0x3d6   : > { %v16965_v52 = vpop.eup %16964  ;;  %14247 = vmatprep.mubr.msk.f32.mxu1 %vm1351_vm3, %v1516_v55 }
 0x3d7   : > { %v16967_v14 = vpop.eup %16966  ;;  %14248 = vmatmul.mubr.msk.f32.vlgmr.msra.gmra.mrb[32].mxu1 %vm1351_vm3, %v1517_v22  ;;  %v1519_v46 = vmul.f32 %v16965_v52, %v18395_v2 }
 0x3d8   : > { %15428 = vmatpush3.bf16.msra.mxu1 %v18277_v47  ;;  %v1518_v17 = vmul.f32 %v16967_v14, %v18397_v10 }
 0x3d9   : > { %15430 = vmatprep.subr.bf16.mxu1 %v18281_v53 }
 0x3da   : > { %14250 = vmatprep.mubr.msk.f32.mxu1 %vm1351_vm3, %v1518_v17 }
 0x3db   : > { %14251 = vmatmul.mubr.msk.f32.gmra.mrb[34].mxu1 %vm1351_vm3, %v1519_v46 }
 0x3dc   : > { %15432 = vmatpush3.bf16.msra.mxu1 %v18281_v53 }
 0x3e7   : > { %v1489_v42 = vpop.xlane.xlu1 %1488 }
 0x3e8   : > { %16968 = vrcp.f32 %v1489_v42  ;;  %v1486_v1 = vpop.xlane.xlu0 %1485 }
 0x3e9   : > { %16970 = vrcp.f32 %v1486_v1 }
 0x3eb   : > { %v1495_v54 = vpop.xlane.xlu1 %1494 }
 0x3ec   : > { %16972 = vrcp.f32 %v1495_v54  ;;  %v1492_v3 = vpop.xlane.xlu0 %1491 }
 0x3ed   : > { %16974 = vrcp.f32 %v1492_v3 }
 0x3ef   : > { %v16375_v47 = vpop.permute.xlu1 %16374 }
 0x3f0   : > { %v16370_v10 = vpop.permute.xlu0 %16369  ;;  %v16377_v34 = vunpack.i.h.bf16 %v16375_v47  ;;  %v16376_v57 = vunpack.i.l.bf16 %v16375_v47 }
 0x3f1   : > { %v16372_v12 = vunpack.i.h.bf16 %v16370_v10  ;;  %v16371_v20 = vunpack.i.l.bf16 %v16370_v10 }
 0x3f2   : > { %v16969_v23 = vpop.eup %16968  ;;  %v15451_v49 = vpack.c.bf16 %v16377_v34, %v16376_v57 }
 0x3f3   : > { %v16971_v2 = vpop.eup %16970  ;;  %v15445_v60 = vpack.c.bf16 %v16372_v12, %v16371_v20  ;;  %v16380_v27 = vpop.permute.xlu1 %16379  ;;  %v1525_v0 = vmul.f32 %v16969_v23, %v18407_v5 }
 0x3f4   : > { %v1524_v53 = vmul.f32 %v16971_v2, %v18409_v31  ;;  %v16382_v41 = vunpack.i.h.bf16 %v16380_v27  ;;  %v16381_v37 = vunpack.i.l.bf16 %v16380_v27  ;;  %v2036_v22 = vpop.permute.xlu0 %2035 }
 0x3f5   : > { %15447 = vmatprep.subr.msk.bf16.mxu1 %vm18106_vm1, %v15445_v60 }
 0x3f6   : > { %v16973_v45 = vpop.eup %16972  ;;  %14275 = vmatprep.mubr.msk.f32.mxu1 %vm1351_vm3, %v1524_v53  ;;  %v15469_v55 = vpack.c.bf16 %v16382_v41, %v16381_v37  ;;  %v21846_v41 = vld [vmem:[#allocation33_spill] sm:$0xff] }
 0x3f7   : > { %v16975_v13 = vpop.eup %16974  ;;  %14276 = vmatmul.mubr.msk.f32.vlgmr.msra.gmra.mrb[36].mxu1 %vm1351_vm3, %v1525_v0  ;;  %v1527_v5 = vmul.f32 %v16973_v45, %v18415_v6  ;;  %v2034_v31 = vpop.permute.xlu1 %2033  ;;  %v21847_v37 = vld [vmem:[#allocation41_spill] sm:$0xff] }
 0x3f8   : > { %15450 = vmatpush3.bf16.xpose.msk.msra.mxu1 %vm18106_vm1, %v15445_v60  ;;  %v1526_v48 = vmul.f32 %v16975_v13, %v18417_v59  ;;  %v2038_v14 = vpop.permute.xlu0 %2037 }
 0x3f9   : > { %15453 = vmatprep.subr.msk.bf16.mxu1 %vm18106_vm1, %v15451_v49 }
 0x3fa   : > { %14278 = vmatprep.mubr.msk.f32.mxu1 %vm1351_vm3, %v1526_v48 }
 0x3fb   : > { %14279 = vmatmul.mubr.msk.f32.gmra.mrb[38].mxu1 %vm1351_vm3, %v1527_v5  ;;  %v16385_v52 = vpop.permute.xlu1 %16384  ;;  %v21844_v5 = vld [vmem:[#allocation31_spill] sm:$0xff] }
 0x3fc   : > { %14303 = vmatprep.mubr.msk.f32.mxu1 %vm890_vm0, %v2034_v31  ;;  %v16387_v59 = vunpack.i.h.bf16 %v16385_v52  ;;  %v16386_v6 = vunpack.i.l.bf16 %v16385_v52  ;;  %v2268_v42 = vpop.permute.xlu0 %2267  ;;  %v21845_v31 = vld [vmem:[#allocation44_spill] sm:$0xff] }
 0x3fe   : > { %v15475_v17 = vpack.c.bf16 %v16387_v59, %v16386_v6 }
 0x3ff   : > { %v2040_v46 = vpop.permute.xlu1 %2039 }
 0x400   : > { %15456 = vmatpush3.bf16.xpose.msk.msra.mxu1 %vm18106_vm1, %v15451_v49  ;;  %v2272_v54 = vpop.permute.xlu0 %2271 }
 0x401   : > { %15471 = vmatprep.subr.msk.bf16.mxu1 %vm18106_vm1, %v15469_v55 }
 0x403   : > { %v2270_v1 = vpop.permute.xlu1 %2269 }
 0x407   : > { %14304 = vmatmul.mubr.msk.f32.vlgmr.msra.gmra.mrb[40].mxu1 %vm890_vm0, %v2036_v22  ;;  %v2274_v3 = vpop.permute.xlu1 %2273 }
 0x408   : > { %14306 = vmatprep.mubr.msk.f32.mxu1 %vm890_vm0, %v2038_v14  ;;  %15474 = vmatpush3.bf16.xpose.msk.msra.mxu1 %vm18106_vm1, %v15469_v55  ;;  %v21848_v55 = vld [vmem:[#allocation45_spill] sm:$0xff] }
 0x409   : > { %15477 = vmatprep.subr.msk.bf16.mxu1 %vm18106_vm1, %v15475_v17 }
 0x40b   : > { %14307 = vmatmul.mubr.msk.f32.gmra.mrb[42].mxu1 %vm890_vm0, %v2040_v46 }
 0x40c   : > { %14331 = vmatprep.mubr.msk.f32.mxu1 %vm890_vm0, %v2268_v42 }
 0x410   : > { %15480 = vmatpush3.bf16.xpose.msk.msra.mxu1 %vm18106_vm1, %v15475_v17 }
 0x417   : > { %14332 = vmatmul.mubr.msk.f32.vlgmr.msra.gmra.mrb[44].mxu1 %vm890_vm0, %v2270_v1 }
 0x418   : > { %14334 = vmatprep.mubr.msk.f32.mxu1 %vm890_vm0, %v2272_v54 }
 0x41b   : > { %14335 = vmatmul.mubr.msk.f32.gmra.mrb[46].mxu1 %vm890_vm0, %v2274_v3 }
 0x431   : > { %v1378_v47 = vpop.xlane.xlu0 %1377 }
 0x432   : > { %v1408_v10 = vsub.f32 %v18450_v7, %v1378_v47 }
 0x434   : > { %v1432_v12 = vmul.f32 1.442695, %v1408_v10 }
 0x435   : > { %v1384_v20 = vpop.xlane.xlu0 %1383 }
 0x436   : > { %16976 = vpow2.f32 %v1432_v12  ;;  %v1410_v23 = vsub.f32 %v18457_v40, %v1384_v20 }
 0x438   : > { %v1436_v2 = vmul.f32 1.442695, %v1410_v23  ;;  %v1381_v34 = vpop.xlane.xlu1 %1380 }
 0x439   : > { %v1409_v57 = vsub.f32 %v18462_v58, %v1381_v34  ;;  %v1387_v60 = vpop.xlane.xlu0 %1386 }
 0x43a   : > { %16978 = vpow2.f32 %v1436_v2  ;;  %v1411_v27 = vsub.f32 %v18469_v16, %v1387_v60 }
 0x43b   : > { %v1434_v53 = vmul.f32 1.442695, %v1409_v57 }
 0x43c   : > { %v1438_v0 = vmul.f32 1.442695, %v1411_v27 }
 0x43d   : > { %16980 = vpow2.f32 %v1434_v53 }
 0x43e   : > { %16982 = vpow2.f32 %v1438_v0 }
 0x440   : > { %v18534_v45 = vpop.eup %16976 }
 0x441   : > { %v1472_v7 = vsel %vm1351_vm3, %v18534_v45, 0.0 }
 0x442   : > { %1473 = vadd.xlane.f32.xlu0 %v1472_v7 }
 0x444   : > { %v18538_v13 = vpop.eup %16978 }
 0x445   : > { %v1478_v40 = vsel %vm1351_vm3, %v18538_v13, 0.0 }
 0x446   : > { %1479 = vadd.xlane.f32.xlu0 %v1478_v40 }
 0x447   : > { %v18542_v58 = vpop.eup %16980 }
 0x448   : > { %v1475_v16 = vsel %vm1351_vm3, %v18542_v58, 0.0  ;;  %v18546_v49 = vpop.eup %16982 }
 0x449   : > { %1476 = vadd.xlane.f32.xlu1 %v1475_v16  ;;  %v1481_v48 = vsel %vm1351_vm3, %v18546_v49, 0.0 }
 0x44d   : > { %1482 = vadd.xlane.f32.xlu1 %v1481_v48 }
 0x45c   : > { %16389 = vrot.lane.b32.xlu0 %v18110_v32, %s17750_s27 }
 0x45e   : > { %16394 = vrot.lane.b32.xlu1 %v18120_v38, %s17750_s27 }
 0x460   : > { %1918 = vrot.lane.b32.xlu0 %v18102_v28, %s17750_s27 }
 0x462   : > { %16399 = vrot.lane.b32.xlu1 %v18190_v8, %s17750_s27 }
 0x464   : > { %1922 = vrot.lane.b32.xlu0 %v18118_v35, %s17750_s27 }
 0x466   : > { %1916 = vrot.lane.b32.xlu1 %v18098_v26, %s17750_s27 }
 0x468   : > { %2150 = vrot.lane.b32.xlu0 %v18178_v62, %s17750_s27 }
 0x46a   : > { %1920 = vrot.lane.b32.xlu1 %v18112_v33, %s17750_s27 }
 0x46c   : > { %2154 = vrot.lane.b32.xlu0 %v18192_v9, %s17750_s27 }
 0x46e   : > { %16404 = vrot.lane.b32.xlu1 %v18206_v18, %s17750_s27 }
 0x470   : > { %16409 = vrot.lane.b32.xlu0 %v18261_v43, %s17750_s27 }
 0x472   : > { %2152 = vrot.lane.b32.xlu1 %v21844_v5, %s17750_s27 }
 0x474   : > { %16419 = vrot.lane.b32.xlu0 %v21845_v31, %s17750_s27 }
 0x476   : > { %2156 = vrot.lane.b32.xlu1 %v21846_v41, %s17750_s27 }
 0x478   : > { %16429 = vrot.lane.b32.xlu0 %v18110_v32, %s17751_s29 }
 0x47a   : > { %16414 = vrot.lane.b32.xlu1 %v21847_v37, %s17750_s27 }
 0x47c   : > { %3416 = vrot.lane.b32.xlu0 %v18102_v28, %s17751_s29 }
 0x47e   : > { %16424 = vrot.lane.b32.xlu1 %v21848_v55, %s17750_s27 }
 0x480   : > { %3418 = vrot.lane.b32.xlu0 %v18112_v33, %s17751_s29 }
 0x482   : > { %16434 = vrot.lane.b32.xlu1 %v18120_v38, %s17751_s29 }
 0x484   : > { %16449 = vrot.lane.b32.xlu0 %v18190_v8, %s17751_s29 }
 0x486   : > { %16439 = vrot.lane.b32.xlu1 %v18146_v50, %s17751_s29 }
 0x48a   : > { %3414 = vrot.lane.b32.xlu1 %v18098_v26, %s17751_s29 }
 0x48e   : > { %16444 = vrot.lane.b32.xlu1 %v18176_v61, %s17751_s29 }
 0x492   : > { %3420 = vrot.lane.b32.xlu1 %v18118_v35, %s17751_s29 }
 0x49d   : > { %v18600_v22 = vpop.f32.mrb[28].mxu1 }
 0x49e   : > { %21849 = vst [vmem:[#allocation44_spill] sm:$0xff] %v18600_v22  ;;  %v18602_v52 = vpop.f32.mrb[29].mxu1 }
 0x49f   : > { %21850 = vst [vmem:[#allocation33_spill] sm:$0xff] %v18602_v52 }
 0x4a1   : > { %v18604_v59 = vpop.f32.mrb[30].mxu1 }
 0x4a2   : > { %21851 = vst [vmem:[#allocation49_spill] sm:$0xff] %v18604_v59  ;;  %v18606_v6 = vpop.f32.mrb[31].mxu1 }
 0x4a3   : > { %21852 = vst [vmem:[#allocation50_spill] sm:$0xff] %v18606_v6 }
 0x4aa   : > { %v18608_v14 = vpop.f32.mrb[32].mxu1 }
 0x4ab   : > { %21853 = vst [vmem:[#allocation51_spill] sm:$0xff] %v18608_v14  ;;  %v18610_v17 = vpop.f32.mrb[33].mxu1 }
 0x4ac   : > { %21854 = vst [vmem:[#allocation52_spill] sm:$0xff] %v18610_v17 }
 0x4ae   : > { %v18612_v46 = vpop.f32.mrb[34].mxu1 }
 0x4af   : > { %21855 = vst [vmem:[#allocation53_spill] sm:$0xff] %v18612_v46  ;;  %v18614_v42 = vpop.f32.mrb[35].mxu1 }
 0x4b0   : > { %21856 = vst [vmem:[#allocation54_spill] sm:$0xff] %v18614_v42 }
 0x4ca   : > { %v18616_v1 = vpop.f32.mrb[36].mxu1 }
 0x4cb   : > { %21857 = vst [vmem:[#allocation55_spill] sm:$0xff] %v18616_v1  ;;  %v18618_v54 = vpop.f32.mrb[37].mxu1 }
 0x4cc   : > { %21858 = vst [vmem:[#allocation56_spill] sm:$0xff] %v18618_v54 }
 0x4ce   : > { %v18620_v3 = vpop.f32.mrb[38].mxu1 }
 0x4cf   : > { %21859 = vst [vmem:[#allocation57_spill] sm:$0xff] %v18620_v3  ;;  %v18622_v47 = vpop.f32.mrb[39].mxu1  ;;  %v1474_v10 = vpop.xlane.xlu0 %1473 }
 0x4d0   : > { %21860 = vst [vmem:[#allocation58_spill] sm:$0xff] %v18622_v47  ;;  %16984 = vrcp.f32 %v1474_v10 }
 0x4d3   : > { %v1480_v12 = vpop.xlane.xlu0 %1479 }
 0x4d4   : > { %16986 = vrcp.f32 %v1480_v12 }
 0x4d6   : > { %v1477_v20 = vpop.xlane.xlu1 %1476 }
 0x4d7   : > { %16988 = vrcp.f32 %v1477_v20  ;;  %v16390_v23 = vpop.permute.xlu0 %16389 }
 0x4d8   : > { %v16392_v2 = vunpack.i.h.bf16 %v16390_v23  ;;  %v16391_v34 = vunpack.i.l.bf16 %v16390_v23 }
 0x4da   : > { %v16985_v57 = vpop.eup %16984  ;;  %v15433_v60 = vpack.c.bf16 %v16392_v2, %v16391_v34  ;;  %v14305_v27 = vpop.f32.mrb[40].mxu1 }
 0x4db   : > { %v1483_v53 = vpop.xlane.xlu1 %1482  ;;  %v18626_v0 = vsel %vm18294_vm4, %v14305_v27, -1e+30  ;;  %v2131_v7 = vpop.f32.mrb[41].mxu1  ;;  %v1520_v16 = vmul.f32 %v16985_v57, %v18534_v45 }
 0x4dc   : > { %16990 = vrcp.f32 %v1483_v53  ;;  %v18628_v40 = vpop.permute.xlu0 %1918  ;;  %v18633_v48 = vsel %vm18289_vm2, %v2131_v7, -1e+30  ;;  %v2415_v10 = vsel %vm1351_vm3, %v18626_v0, -inf  ;;  %15435 = vmatprep.subr.msk.bf16.mxu0 %vm18106_vm1, %v15433_v60 }
 0x4dd   : > { %2416 = vmax.xlane.f32.xlu1 %v2415_v10  ;;  %v2412_v12 = vsel %vm1351_vm3, %v18633_v48, -inf  ;;  %14261 = vmatprep.mubr.msk.f32.mxu0 %vm1351_vm3, %v1520_v16 }
 0x4de   : > { %v14308_v20 = vpop.f32.mrb[42].mxu1  ;;  %2413 = vmax.xlane.f32.xlu0 %v2412_v12  ;;  %v16987_v57 = vpop.eup %16986 }
 0x4df   : > { %v16395_v23 = vpop.permute.xlu1 %16394  ;;  %v18644_v45 = vsel %vm18308_vm6, %v14308_v20, -1e+30  ;;  %v2141_v2 = vpop.f32.mrb[43].mxu1  ;;  %v1522_v20 = vmul.f32 %v16987_v57, %v18538_v13 }
 0x4e0   : > { %v1923_v34 = vpop.permute.xlu0 %1922  ;;  %v16397_v27 = vunpack.i.h.bf16 %v16395_v23  ;;  %v16396_v53 = vunpack.i.l.bf16 %v16395_v23  ;;  %v2421_v7 = vsel %vm1351_vm3, %v18644_v45, -inf  ;;  %v18651_v16 = vsel %vm18302_vm5, %v2141_v2, -1e+30 }
 0x4e1   : > { %v16989_v10 = vpop.eup %16988  ;;  %v2418_v23 = vsel %vm1351_vm3, %v18651_v16, -inf }
 0x4e2   : > { %v1521_v33 = vmul.f32 %v16989_v10, %v18542_v58  ;;  %2422 = vmax.xlane.f32.xlu0 %v2421_v7  ;;  %v15439_v26 = vpack.c.bf16 %v16397_v27, %v16396_v53 }
 0x4e3   : > { %v16400_v12 = vpop.permute.xlu1 %16399 }
 0x4e4   : > { %v2151_v61 = vpop.permute.xlu0 %2150  ;;  %14262 = vmatmul.mubr.msk.f32.vlgmr.msra.gmra.mrb[36].mxu0 %vm1351_vm3, %v1521_v33  ;;  %v16402_v33 = vunpack.i.h.bf16 %v16400_v12  ;;  %v16401_v57 = vunpack.i.l.bf16 %v16400_v12 }
 0x4e5   : > { %15438 = vmatpush3.bf16.xpose.msk.msra.mxu0 %vm18106_vm1, %v15433_v60  ;;  %14264 = vmatprep.mubr.msk.f32.mxu0 %vm1351_vm3, %v1522_v20 }
 0x4e6   : > { %v16991_v38 = vpop.eup %16990  ;;  %2419 = vmax.xlane.f32.xlu0 %v2418_v23  ;;  %15441 = vmatprep.subr.msk.bf16.mxu0 %vm18106_vm1, %v15439_v26  ;;  %v15457_v55 = vpack.c.bf16 %v16402_v33, %v16401_v57 }
 0x4e7   : > { %v1917_v58 = vpop.permute.xlu1 %1916  ;;  %v1523_v2 = vmul.f32 %v16991_v38, %v18546_v49 }
 0x4e8   : > { %v2155_v13 = vpop.permute.xlu0 %2154 }
 0x4e9   : > { %14265 = vmatmul.mubr.msk.f32.gmra.mrb[38].mxu0 %vm1351_vm3, %v1523_v2 }
 0x4ea   : > { %14289 = vmatprep.mubr.msk.f32.mxu0 %vm890_vm0, %v1917_v58  ;;  %v14333_v60 = vpop.f32.mrb[44].mxu1 }
 0x4eb   : > { %v1921_v27 = vpop.permute.xlu1 %1920  ;;  %v2365_v53 = vpop.f32.mrb[45].mxu1 }
 0x4ec   : > { %v16410_v7 = vpop.permute.xlu0 %16409  ;;  %v18667_v10 = vsel %vm18289_vm2, %v2365_v53, -1e+30 }
 0x4ed   : > { %v16412_v20 = vunpack.i.h.bf16 %v16410_v7  ;;  %v16411_v23 = vunpack.i.l.bf16 %v16410_v7  ;;  %15444 = vmatpush3.bf16.xpose.msk.msra.mxu0 %vm18106_vm1, %v15439_v26  ;;  %v2436_v38 = vsel %vm1351_vm3, %v18667_v10, -inf }
 0x4ee   : > { %v14336_v49 = vpop.f32.mrb[46].mxu1  ;;  %2437 = vmax.xlane.f32.xlu0 %v2436_v38  ;;  %3531 = vrot.lane.b32.xlu1 %v18122_v39, %s17751_s29 }
 0x4ef   : > { %v16405_v12 = vpop.permute.xlu1 %16404  ;;  %v15489_v58 = vpack.c.bf16 %v16412_v20, %v16411_v23  ;;  %15459 = vmatprep.subr.msk.bf16.mxu0 %vm18106_vm1, %v15457_v55  ;;  %v2375_v2 = vpop.f32.mrb[47].mxu1 }
 0x4f0   : > { %v16407_v53 = vunpack.i.h.bf16 %v16405_v12  ;;  %v16406_v7 = vunpack.i.l.bf16 %v16405_v12  ;;  %v16420_v20 = vpop.permute.xlu0 %16419 }
 0x4f1   : > { %15490 = vmatprep.subr.bf16.mxu1 %v15489_v58  ;;  %v16422_v38 = vunpack.i.h.bf16 %v16420_v20  ;;  %v16421_v12 = vunpack.i.l.bf16 %v16420_v20 }
 0x4f2   : > { %15492 = vmatpush3.bf16.msra.mxu1 %v15489_v58  ;;  %v15463_v26 = vpack.c.bf16 %v16407_v53, %v16406_v7 }
 0x4f3   : > { %v2153_v33 = vpop.permute.xlu1 %2152 }
 0x4f4   : > { %14290 = vmatmul.mubr.msk.f32.vlgmr.msra.gmra.mrb[40].mxu0 %vm890_vm0, %v18628_v40 }
 0x4f5   : > { %14292 = vmatprep.mubr.msk.f32.mxu0 %vm890_vm0, %v1921_v27  ;;  %15462 = vmatpush3.bf16.xpose.msk.msra.mxu0 %vm18106_vm1, %v15457_v55  ;;  %v18688_v55 = vpack.c.bf16 %v16422_v38, %v16421_v12  ;;  %v18722_v38 = vsel %vm18302_vm5, %v2375_v2, -1e+30 }
 0x4f6   : > { %15465 = vmatprep.subr.msk.bf16.mxu0 %vm18106_vm1, %v15463_v26 }
 0x4f7   : > { %v2157_v57 = vpop.permute.xlu1 %2156 }
 0x4f8   : > { %14293 = vmatmul.mubr.msk.f32.gmra.mrb[42].mxu0 %vm890_vm0, %v1923_v34 }
 0x4f9   : > { %14317 = vmatprep.mubr.msk.f32.mxu0 %vm890_vm0, %v2151_v61  ;;  %v18698_v61 = vsel %vm18294_vm4, %v14333_v60, -1e+30 }
 0x4fa   : > { %v2439_v34 = vsel %vm1351_vm3, %v18698_v61, -inf }
 0x4fb   : > { %v16415_v23 = vpop.permute.xlu1 %16414 }
 0x4fc   : > { %v16417_v58 = vunpack.i.h.bf16 %v16415_v23  ;;  %v16416_v53 = vunpack.i.l.bf16 %v16415_v23 }
 0x4fd   : > { %15468 = vmatpush3.bf16.xpose.msk.msra.mxu0 %vm18106_vm1, %v15463_v26 }
 0x4fe   : > { %v15493_v40 = vpack.c.bf16 %v16417_v58, %v16416_v53  ;;  %v18728_v58 = vsel %vm18308_vm6, %v14336_v49, -1e+30 }
 0x4ff   : > { %v18734_v2 = vpop.permute.xlu1 %16424 }
 0x500   : > { %15494 = vmatprep.subr.bf16.mxu1 %v15493_v40 }
 0x501   : > { %15496 = vmatpush3.bf16.msra.mxu1 %v15493_v40 }
 0x502   : > { %15506 = vmatprep.subr.bf16.mxu1 %v18688_v55 }
 0x504   : > { %3533 = vrot.lane.b32.xlu0 %v18136_v44, %s17751_s29  ;;  %14318 = vmatmul.mubr.msk.f32.vlgmr.msra.gmra.mrb[44].mxu0 %vm890_vm0, %v2153_v33 }
 0x505   : > { %14320 = vmatprep.mubr.msk.f32.mxu0 %vm890_vm0, %v2155_v13 }
 0x508   : > { %14321 = vmatmul.mubr.msk.f32.gmra.mrb[46].mxu0 %vm890_vm0, %v2157_v57 }
 0x512   : > { %2440 = vmax.xlane.f32.xlu1 %v2439_v34  ;;  %v2442_v34 = vsel %vm1351_vm3, %v18722_v38, -inf }
 0x5b7   : > { %v18702_v27 = vpop.f32.mrb[36].mxu0 }
 0x5b8   : > { %21861 = vst [vmem:[#allocation59_spill] sm:$0xff] %v18702_v27  ;;  %v18704_v7 = vpop.f32.mrb[37].mxu0 }
 0x5b9   : > { %21862 = vst [vmem:[#allocation60_spill] sm:$0xff] %v18704_v7 }
 0x5bc   : > { %v18706_v26 = vpop.f32.mrb[38].mxu0 }
 0x5bd   : > { %21863 = vst [vmem:[#allocation61_spill] sm:$0xff] %v18706_v26  ;;  %v18708_v20 = vpop.f32.mrb[39].mxu0 }
 0x5be   : > { %21864 = vst [vmem:[#allocation62_spill] sm:$0xff] %v18708_v20 }
 0x5c7   : > { %v14291_v33 = vpop.f32.mrb[40].mxu0 }
 0x5c8   : > { %v18712_v13 = vsel %vm18294_vm4, %v14291_v33, -1e+30  ;;  %v2014_v57 = vpop.f32.mrb[41].mxu0  ;;  %v2445_v33 = vsel %vm1351_vm3, %v18728_v58, -inf }
 0x5c9   : > { %v18716_v60 = vsel %vm18289_vm2, %v2014_v57, -1e+30  ;;  %v2403_v23 = vsel %vm1351_vm3, %v18712_v13, -inf }
 0x5ca   : > { %2404 = vmax.xlane.f32.xlu0 %v2403_v23  ;;  %v2400_v12 = vsel %vm1351_vm3, %v18716_v60, -inf }
 0x5cb   : > { %2401 = vmax.xlane.f32.xlu1 %v2400_v12  ;;  %v14294_v53 = vpop.f32.mrb[42].mxu0  ;;  %v18746_v12 = vpop.permute.xlu0 %16429 }
 0x5cc   : > { %v2024_v40 = vpop.f32.mrb[43].mxu0  ;;  %v18744_v23 = vsel %vm18308_vm6, %v14294_v53, -1e+30 }
 0x5cd   : > { %v18738_v57 = vsel %vm18302_vm5, %v2024_v40, -1e+30  ;;  %v2409_v39 = vsel %vm1351_vm3, %v18744_v23, -inf }
 0x5ce   : > { %2443 = vmax.xlane.f32.xlu0 %v2442_v34  ;;  %v2406_v49 = vsel %vm1351_vm3, %v18738_v57, -inf  ;;  %v18748_v34 = vpop.permute.xlu1 %16434 }
 0x5cf   : > { %2446 = vmax.xlane.f32.xlu1 %v2445_v33  ;;  %v18756_v33 = vpop.permute.xlu0 %3416 }
 0x5d2   : > { %v18758_v47 = vpop.permute.xlu1 %16439 }
 0x5d3   : > { %2407 = vmax.xlane.f32.xlu1 %v2406_v49  ;;  %v18764_v49 = vpop.permute.xlu0 %3418 }
 0x5d6   : > { %v18766_v54 = vpop.permute.xlu1 %3414 }
 0x5d7   : > { %2410 = vmax.xlane.f32.xlu1 %v2409_v39  ;;  %v18752_v3 = vpop.f32.mrb[44].mxu0  ;;  %v18770_v39 = vpop.permute.xlu0 %16449 }
 0x5d8   : > { %v18754_v40 = vpop.f32.mrb[45].mxu0 }
 0x5da   : > { %v18772_v26 = vpop.permute.xlu1 %16444 }
 0x5db   : > { %v18760_v1 = vpop.f32.mrb[46].mxu0  ;;  %v2414_v20 = vpop.xlane.xlu0 %2413 }
 0x5dc   : > { %v18762_v53 = vpop.f32.mrb[47].mxu0 }
 0x5de   : > { %v18780_v27 = vpop.permute.xlu1 %3420 }
 0x5df   : > { %v2423_v44 = vpop.xlane.xlu0 %2422 }
 0x5e2   : > { %v2417_v7 = vpop.xlane.xlu1 %2416 }
 0x5e3   : > { %v2453_v46 = vsub.f32 %v18626_v0, %v2417_v7  ;;  %v2420_v42 = vpop.xlane.xlu0 %2419 }
 0x5e4   : > { %16454 = vrot.lane.b32.xlu0 %v18206_v18, %s17751_s29  ;;  %v2452_v18 = vsub.f32 %v18633_v48, %v2414_v20 }
 0x5e5   : > { %v2474_v17 = vmul.f32 1.442695, %v2453_v46 }
 0x5e6   : > { %v18784_v14 = vpop.permute.xlu1 %3531  ;;  %v2472_v35 = vmul.f32 1.442695, %v2452_v18 }
 0x5e7   : > { %v2438_v59 = vpop.xlane.xlu0 %2437 }
 0x5e8   : > { %3537 = vrot.lane.b32.xlu0 %v18166_v56, %s17751_s29  ;;  %3535 = vrot.lane.b32.xlu1 %v18148_v51, %s17751_s29  ;;  %v2454_v56 = vsub.f32 %v18651_v16, %v2420_v42  ;;  %v2455_v51 = vsub.f32 %v18644_v45, %v2423_v44  ;;  %16992 = vpow2.f32 %v2472_v35  ;;  %v2460_v6 = vsub.f32 %v18667_v10, %v2438_v59 }
 0x5e9   : > { %16994 = vpow2.f32 %v2474_v17 }
 0x5ea   : > { %v2441_v8 = vpop.xlane.xlu1 %2440  ;;  %v2478_v22 = vmul.f32 1.442695, %v2455_v51  ;;  %v2488_v0 = vmul.f32 1.442695, %v2460_v6 }
 0x5eb   : > { %v2461_v48 = vsub.f32 %v18698_v61, %v2441_v8  ;;  %v18814_v42 = vpop.permute.xlu0 %3533 }
 0x5ec   : > { %16459 = vrot.lane.b32.xlu0 %v18218_v24, %s17751_s29  ;;  %v2476_v24 = vmul.f32 1.442695, %v2454_v56 }
 0x5ed   : > { %v2490_v7 = vmul.f32 1.442695, %v2461_v48 }
 0x5ee   : > { %16996 = vpow2.f32 %v2476_v24 }
 0x5ef   : > { %16998 = vpow2.f32 %v2478_v22 }
 0x5f0   : > { %17000 = vpow2.f32 %v2488_v0 }
 0x5f1   : > { %17002 = vpow2.f32 %v2490_v7 }
 0x5f2   : > { %v18790_v18 = vpop.eup %16992 }
 0x5f3   : > { %v18792_v46 = vpop.eup %16994  ;;  %v2508_v35 = vsel %vm1351_vm3, %v18790_v18, 0.0 }
 0x5f4   : > { %v2511_v51 = vsel %vm1351_vm3, %v18792_v46, 0.0 }
 0x5f8   : > { %v18796_v44 = vpop.eup %16996 }
 0x5f9   : > { %v18800_v56 = vpop.eup %16998  ;;  %v2514_v8 = vsel %vm1351_vm3, %v18796_v44, 0.0 }
 0x5fa   : > { %v18804_v24 = vpop.eup %17000  ;;  %v2517_v22 = vsel %vm1351_vm3, %v18800_v56, 0.0 }
 0x5fb   : > { %v18808_v59 = vpop.eup %17002  ;;  %v2532_v6 = vsel %vm1351_vm3, %v18804_v24, 0.0 }
 0x5fc   : > { %v2535_v17 = vsel %vm1351_vm3, %v18808_v59, 0.0 }
 0x60b   : > { %2509 = vadd.xlane.f32.xlu0 %v2508_v35 }
 0x60c   : > { %2512 = vadd.xlane.f32.xlu1 %v2511_v51 }
 0x60f   : > { %2515 = vadd.xlane.f32.xlu0 %v2514_v8 }
 0x610   : > { %2518 = vadd.xlane.f32.xlu1 %v2517_v22 }
 0x613   : > { %2533 = vadd.xlane.f32.xlu0 %v2532_v6 }
 0x614   : > { %2536 = vadd.xlane.f32.xlu1 %v2535_v17 }
 0x657   : > { %v18816_v45 = vpop.xlane.xlu0 %2404 }
 0x658   : > { %v18818_v16 = vpop.xlane.xlu1 %2401 }
 0x65b   : > { %v2444_v10 = vpop.xlane.xlu0 %2443 }
 0x65c   : > { %v2462_v61 = vsub.f32 %v18722_v38, %v2444_v10  ;;  %v2447_v20 = vpop.xlane.xlu1 %2446 }
 0x65d   : > { %v2463_v48 = vsub.f32 %v18728_v58, %v2447_v20 }
 0x65e   : > { %v2492_v0 = vmul.f32 1.442695, %v2462_v61 }
 0x65f   : > { %v2494_v7 = vmul.f32 1.442695, %v2463_v48  ;;  %v18834_v38 = vpop.permute.xlu0 %16454 }
 0x660   : > { %17004 = vpow2.f32 %v2492_v0  ;;  %v18836_v58 = vpop.xlane.xlu1 %2407 }
 0x661   : > { %17006 = vpow2.f32 %v2494_v7  ;;  %v18849_v7 = vsel %vm18289_vm2, %v18754_v40, -1e+30 }
 0x663   : > { %v18838_v6 = vpop.permute.xlu0 %3537 }
 0x664   : > { %v18840_v17 = vpop.xlane.xlu1 %2410 }
 0x667   : > { %v18842_v10 = vpop.permute.xlu0 %16459 }
 0x668   : > { %v18844_v61 = vpop.permute.xlu1 %3535 }
 0x66a   : > { %v18822_v35 = vpop.eup %17004 }
 0x66b   : > { %v18824_v51 = vpop.eup %17006  ;;  %v2538_v8 = vsel %vm1351_vm3, %v18822_v35, 0.0 }
 0x66c   : > { %2539 = vadd.xlane.f32.xlu1 %v2538_v8  ;;  %v2541_v22 = vsel %vm1351_vm3, %v18824_v51, 0.0 }
 0x66d   : > { %2542 = vadd.xlane.f32.xlu0 %v2541_v22  ;;  %v18854_v22 = vsel %vm18294_vm4, %v18752_v3, -1e+30 }
 0x67d   : > { %3648 = vrot.lane.b32.xlu1 %v18178_v62, %s17751_s29  ;;  %v16426_v62 = vunpack.i.l.bf16 %v18734_v2 }
 0x683   : > { %3650 = vrot.lane.b32.xlu0 %v21844_v5, %s17751_s29  ;;  %v2424_v5 = vsel %vm1351_vm3, %v18849_v7, -inf }
 0x698   : > { %v2510_v20 = vpop.xlane.xlu0 %2509 }
 0x699   : > { %17008 = vrcp.f32 %v2510_v20  ;;  %v2513_v48 = vpop.xlane.xlu1 %2512 }
 0x69a   : > { %17010 = vrcp.f32 %v2513_v48  ;;  %v18861_v48 = vsel %vm18302_vm5, %v18762_v53, -1e+30 }
 0x69b   : > { %v2430_v52 = vsel %vm1351_vm3, %v18861_v48, -inf }
 0x69c   : > { %v2516_v0 = vpop.xlane.xlu0 %2515 }
 0x69d   : > { %17012 = vrcp.f32 %v2516_v0  ;;  %v2519_v8 = vpop.xlane.xlu1 %2518  ;;  %v2427_v0 = vsel %vm1351_vm3, %v18854_v22, -inf }
 0x69e   : > { %17014 = vrcp.f32 %v2519_v8  ;;  %v16427_v8 = vunpack.i.h.bf16 %v18734_v2  ;;  %v16431_v2 = vunpack.i.l.bf16 %v18746_v12 }
 0x6a0   : > { %v2534_v20 = vpop.xlane.xlu0 %2533  ;;  %v15509_v50 = vpack.c.bf16 %v16427_v8, %v16426_v62  ;;  %v2450_v8 = vsub.f32 %v18738_v57, %v18836_v58 }
 0x6a1   : > { %17016 = vrcp.f32 %v2534_v20  ;;  %v2537_v40 = vpop.xlane.xlu1 %2536  ;;  %2425 = vmax.xlane.f32.xlu1 %v2424_v5  ;;  %v18873_v5 = vsel %vm18308_vm6, %v18760_v1, -1e+30 }
 0x6a2   : > { %17018 = vrcp.f32 %v2537_v40  ;;  %2428 = vmax.xlane.f32.xlu0 %v2427_v0  ;;  %v16432_v0 = vunpack.i.h.bf16 %v18746_v12 }
 0x6a3   : > { %v17009_v3 = vpop.eup %17008 }
 0x6a4   : > { %v17011_v28 = vpop.eup %17010  ;;  %v2564_v53 = vmul.f32 %v17009_v3, %v18790_v18  ;;  %v2433_v18 = vsel %vm1351_vm3, %v18873_v5, -inf }
 0x6a5   : > { %v2565_v20 = vmul.f32 %v17011_v28, %v18792_v46  ;;  %2431 = vmax.xlane.f32.xlu1 %v2430_v52  ;;  %v15521_v46 = vpack.c.bf16 %v16432_v0, %v16431_v2 }
 0x6a6   : > { %14359 = vmatprep.mubr.msk.f32.mxu1 %vm1351_vm3, %v2564_v53 }
 0x6a7   : > { %v17013_v40 = vpop.eup %17012  ;;  %14360 = vmatmul.mubr.msk.f32.vlgmr.msra.gmra.mrb[48].mxu1 %vm1351_vm3, %v2565_v20  ;;  %v2468_v20 = vmul.f32 1.442695, %v2450_v8 }
 0x6a8   : > { %v17015_v32 = vpop.eup %17014  ;;  %15508 = vmatpush3.bf16.msra.mxu1 %v18688_v55  ;;  %v2566_v1 = vmul.f32 %v17013_v40, %v18796_v44  ;;  %v16436_v55 = vunpack.i.l.bf16 %v18748_v34  ;;  %v2451_v40 = vsub.f32 %v18744_v23, %v18840_v17 }
 0x6a9   : > { %15510 = vmatprep.subr.bf16.mxu1 %v15509_v50  ;;  %2434 = vmax.xlane.f32.xlu1 %v2433_v18  ;;  %v2567_v28 = vmul.f32 %v17015_v32, %v18800_v56  ;;  %v16437_v32 = vunpack.i.h.bf16 %v18748_v34  ;;  %v16441_v56 = vunpack.i.l.bf16 %v18758_v47  ;;  %v2449_v34 = vsub.f32 %v18712_v13, %v18816_v45 }
 0x6aa   : > { %14362 = vmatprep.mubr.msk.f32.mxu1 %vm1351_vm3, %v2566_v1  ;;  %v2470_v0 = vmul.f32 1.442695, %v2451_v40 }
 0x6ab   : > { %v17017_v52 = vpop.eup %17016  ;;  %14363 = vmatmul.mubr.msk.f32.gmra.mrb[50].mxu1 %vm1351_vm3, %v2567_v28  ;;  %v15527_v44 = vpack.c.bf16 %v16437_v32, %v16436_v55  ;;  %v2466_v53 = vmul.f32 1.442695, %v2449_v34 }
 0x6ac   : > { %v17019_v12 = vpop.eup %17018  ;;  %15512 = vmatpush3.bf16.msra.mxu1 %v15509_v50  ;;  %v2572_v62 = vmul.f32 %v17017_v52, %v18804_v24  ;;  %v16442_v50 = vunpack.i.h.bf16 %v18758_v47  ;;  %v2448_v47 = vsub.f32 %v18716_v60, %v18818_v16 }
 0x6ad   : > { %v2573_v3 = vmul.f32 %v17019_v12, %v18808_v59  ;;  %15523 = vmatprep.subr.msk.bf16.mxu1 %vm18106_vm1, %v15521_v46  ;;  %v16447_v12 = vunpack.i.h.bf16 %v18772_v26 }
 0x6ae   : > { %14387 = vmatprep.mubr.msk.f32.mxu1 %vm1351_vm3, %v2572_v62  ;;  %v15533_v24 = vpack.c.bf16 %v16442_v50, %v16441_v56  ;;  %v2464_v59 = vmul.f32 1.442695, %v2448_v47  ;;  %v16446_v62 = vunpack.i.l.bf16 %v18772_v26  ;;  %v16452_v26 = vunpack.i.h.bf16 %v18770_v39 }
 0x6af   : > { %14388 = vmatmul.mubr.msk.f32.vlgmr.msra.gmra.mrb[52].mxu1 %vm1351_vm3, %v2573_v3 }
 0x6b0   : > { %17020 = vpow2.f32 %v2464_v59  ;;  %v15539_v3 = vpack.c.bf16 %v16447_v12, %v16446_v62  ;;  %v21866_v12 = vld [vmem:[#allocation42_spill] sm:$0xff]  ;;  %v21867_v62 = vld [vmem:[#allocation39_spill] sm:$0xff] }
 0x6b1   : > { %17022 = vpow2.f32 %v2466_v53 }
 0x6b2   : > { %17024 = vpow2.f32 %v2468_v20 }
 0x6b3   : > { %17026 = vpow2.f32 %v2470_v0 }
 0x6b5   : > { %15526 = vmatpush3.bf16.xpose.msk.msra.mxu1 %vm18106_vm1, %v15521_v46 }
 0x6b6   : > { %15529 = vmatprep.subr.msk.bf16.mxu1 %vm18106_vm1, %v15527_v44 }
 0x6b8   : > { %16464 = vrot.lane.b32.xlu0 %v18234_v36, %s17751_s29 }
 0x6ba   : > { %3652 = vrot.lane.b32.xlu1 %v18192_v9, %s17751_s29  ;;  %v18927_v2 = vpop.eup %17020 }
 0x6bb   : > { %v18929_v60 = vpop.eup %17022  ;;  %v2496_v13 = vsel %vm1351_vm3, %v18927_v2, 0.0 }
 0x6bc   : > { %3654 = vrot.lane.b32.xlu0 %v21846_v41, %s17751_s29  ;;  %v18933_v45 = vpop.eup %17024  ;;  %v2499_v57 = vsel %vm1351_vm3, %v18929_v60, 0.0 }
 0x6bd   : > { %15532 = vmatpush3.bf16.xpose.msk.msra.mxu1 %vm18106_vm1, %v15527_v44  ;;  %v2502_v23 = vsel %vm1351_vm3, %v18933_v45, 0.0  ;;  %v18939_v16 = vpop.eup %17026 }
 0x6be   : > { %15535 = vmatprep.subr.msk.bf16.mxu1 %vm18106_vm1, %v15533_v24  ;;  %3767 = vrot.lane.b32.xlu1 %v18216_v21, %s17751_s29  ;;  %v2505_v58 = vsel %vm1351_vm3, %v18939_v16, 0.0 }
 0x6c0   : > { %3765 = vrot.lane.b32.xlu0 %v18208_v19, %s17751_s29 }
 0x6c2   : > { %3771 = vrot.lane.b32.xlu1 %v18230_v29, %s17751_s29 }
 0x6c4   : > { %3769 = vrot.lane.b32.xlu0 %v18220_v25, %s17751_s29 }
 0x6e3   : > { %2497 = vadd.xlane.f32.xlu0 %v2496_v13 }
 0x6e6   : > { %2500 = vadd.xlane.f32.xlu1 %v2499_v57 }
 0x6e7   : > { %2503 = vadd.xlane.f32.xlu0 %v2502_v23 }
 0x6eb   : > { %2506 = vadd.xlane.f32.xlu0 %v2505_v58 }
 0x6f9   : > { %v2540_v17 = vpop.xlane.xlu1 %2539 }
 0x6fa   : > { %17028 = vrcp.f32 %v2540_v17  ;;  %v2543_v18 = vpop.xlane.xlu0 %2542 }
 0x6fb   : > { %17030 = vrcp.f32 %v2543_v18 }
 0x704   : > { %v17029_v1 = vpop.eup %17028 }
 0x705   : > { %v17031_v28 = vpop.eup %17030  ;;  %v2574_v52 = vmul.f32 %v17029_v1, %v18822_v35  ;;  %v16451_v35 = vunpack.i.l.bf16 %v18770_v39  ;;  %v3649_v39 = vpop.permute.xlu1 %3648 }
 0x706   : > { %v2575_v46 = vmul.f32 %v17031_v28, %v18824_v51 }
 0x707   : > { %14390 = vmatprep.mubr.msk.f32.mxu1 %vm1351_vm3, %v2574_v52 }
 0x708   : > { %14391 = vmatmul.mubr.msk.f32.gmra.mrb[54].mxu1 %vm1351_vm3, %v2575_v46  ;;  %v21865_v46 = vld [vmem:[#allocation38_spill] sm:$0xff] }
 0x709   : > { %14457 = vmatprep.mubr.msk.f32.mxu1 %vm890_vm0, %v18766_v54  ;;  %v15545_v54 = vpack.c.bf16 %v16452_v26, %v16451_v35 }
 0x70c   : > { %14458 = vmatmul.mubr.msk.f32.vlgmr.msra.gmra.mrb[56].mxu1 %vm890_vm0, %v18756_v33  ;;  %v16457_v33 = vunpack.i.h.bf16 %v18834_v38 }
 0x70d   : > { %15538 = vmatpush3.bf16.xpose.msk.msra.mxu1 %vm18106_vm1, %v15533_v24  ;;  %14460 = vmatprep.mubr.msk.f32.mxu1 %vm890_vm0, %v18764_v49  ;;  %v16456_v49 = vunpack.i.l.bf16 %v18834_v38  ;;  %v3651_v38 = vpop.permute.xlu0 %3650 }
 0x70e   : > { %15541 = vmatprep.subr.msk.bf16.mxu1 %vm18106_vm1, %v15539_v3 }
 0x70f   : > { %v15551_v51 = vpack.c.bf16 %v16457_v33, %v16456_v49 }
 0x710   : > { %14461 = vmatmul.mubr.msk.f32.gmra.mrb[58].mxu1 %vm890_vm0, %v18780_v27  ;;  %v16461_v27 = vunpack.i.l.bf16 %v18842_v10 }
 0x711   : > { %14471 = vmatprep.mubr.msk.f32.mxu1 %vm890_vm0, %v18784_v14  ;;  %v16462_v14 = vunpack.i.h.bf16 %v18842_v10 }
 0x715   : > { %15544 = vmatpush3.bf16.xpose.msk.msra.mxu1 %vm18106_vm1, %v15539_v3  ;;  %v21868_v3 = vld [vmem:[#allocation43_spill] sm:$0xff] }
 0x716   : > { %15547 = vmatprep.subr.msk.bf16.mxu1 %vm18106_vm1, %v15545_v54 }
 0x71c   : > { %14472 = vmatmul.mubr.msk.f32.vlgmr.msra.gmra.mrb[60].mxu1 %vm890_vm0, %v18814_v42  ;;  %v15557_v42 = vpack.c.bf16 %v16462_v14, %v16461_v27 }
 0x71d   : > { %14474 = vmatprep.mubr.msk.f32.mxu1 %vm890_vm0, %v18844_v61  ;;  %15550 = vmatpush3.bf16.xpose.msk.msra.mxu1 %vm18106_vm1, %v15545_v54 }
 0x71e   : > { %15553 = vmatprep.subr.msk.bf16.mxu1 %vm18106_vm1, %v15551_v51 }
 0x720   : > { %14475 = vmatmul.mubr.msk.f32.gmra.mrb[62].mxu1 %vm890_vm0, %v18838_v6 }
 0x721   : > { %14485 = vmatprep.mubr.msk.f32.mxu1 %vm890_vm0, %v3649_v39 }
 0x725   : > { %15556 = vmatpush3.bf16.xpose.msk.msra.mxu1 %vm18106_vm1, %v15551_v51 }
 0x726   : > { %15559 = vmatprep.subr.msk.bf16.mxu1 %vm18106_vm1, %v15557_v42 }
 0x72c   : > { %14486 = vmatmul.mubr.msk.f32.vlgmr.msra.gmra.mrb[64].mxu1 %vm890_vm0, %v3651_v38 }
 0x72d   : > { %15562 = vmatpush3.bf16.xpose.msk.msra.mxu1 %vm18106_vm1, %v15557_v42 }
 0x72e   : > { %v2426_v10 = vpop.xlane.xlu1 %2425 }
 0x72f   : > { %v2456_v61 = vsub.f32 %v18849_v7, %v2426_v10  ;;  %v2429_v32 = vpop.xlane.xlu0 %2428 }
 0x730   : > { %v2457_v6 = vsub.f32 %v18854_v22, %v2429_v32 }
 0x731   : > { %v2480_v55 = vmul.f32 1.442695, %v2456_v61 }
 0x732   : > { %v2482_v44 = vmul.f32 1.442695, %v2457_v6  ;;  %v2432_v50 = vpop.xlane.xlu1 %2431 }
 0x733   : > { %17032 = vpow2.f32 %v2480_v55  ;;  %v2458_v56 = vsub.f32 %v18861_v48, %v2432_v50  ;;  %v16465_v24 = vpop.permute.xlu0 %16464 }
 0x734   : > { %17034 = vpow2.f32 %v2482_v44  ;;  %v16467_v47 = vunpack.i.h.bf16 %v16465_v24  ;;  %v16466_v34 = vunpack.i.l.bf16 %v16465_v24 }
 0x735   : > { %v2484_v59 = vmul.f32 1.442695, %v2458_v56 }
 0x736   : > { %v15563_v8 = vpack.c.bf16 %v16467_v47, %v16466_v34  ;;  %v2435_v53 = vpop.xlane.xlu1 %2434 }
 0x737   : > { %17036 = vpow2.f32 %v2484_v59  ;;  %v2459_v20 = vsub.f32 %v18873_v5, %v2435_v53  ;;  %v3655_v7 = vpop.permute.xlu0 %3654 }
 0x738   : > { %15565 = vmatprep.subr.msk.bf16.mxu1 %vm18106_vm1, %v15563_v8 }
 0x739   : > { %v2486_v22 = vmul.f32 1.442695, %v2459_v20  ;;  %15568 = vmatpush3.bf16.xpose.msk.msra.mxu1 %vm18106_vm1, %v15563_v8 }
 0x73a   : > { %v3653_v40 = vpop.permute.xlu1 %3652 }
 0x73b   : > { %17038 = vpow2.f32 %v2486_v22  ;;  %v3766_v48 = vpop.permute.xlu0 %3765  ;;  %14488 = vmatprep.mubr.msk.f32.mxu1 %vm890_vm0, %v3653_v40 }
 0x73c   : > { %14489 = vmatmul.mubr.msk.f32.gmra.mrb[66].mxu1 %vm890_vm0, %v3655_v7 }
 0x73d   : > { %v19001_v0 = vpop.eup %17032  ;;  %14499 = vmatprep.mubr.msk.f32.mxu1 %vm890_vm0, %v3766_v48 }
 0x73e   : > { %v19004_v5 = vpop.eup %17034  ;;  %v3768_v13 = vpop.permute.xlu1 %3767  ;;  %v2520_v57 = vsel %vm1351_vm3, %v19001_v0, 0.0 }
 0x73f   : > { %v3770_v23 = vpop.permute.xlu0 %3769  ;;  %2521 = vadd.xlane.f32.xlu0 %v2520_v57  ;;  %v2523_v58 = vsel %vm1351_vm3, %v19004_v5, 0.0 }
 0x740   : > { %2524 = vadd.xlane.f32.xlu1 %v2523_v58  ;;  %14500 = vmatmul.mubr.msk.f32.vlgmr.msra.gmra.mrb[68].mxu1 %vm890_vm0, %v3768_v13 }
 0x741   : > { %v19011_v17 = vpop.eup %17036  ;;  %14502 = vmatprep.mubr.msk.f32.mxu1 %vm890_vm0, %v3770_v23 }
 0x742   : > { %v3772_v18 = vpop.permute.xlu1 %3771  ;;  %v2526_v1 = vsel %vm1351_vm3, %v19011_v17, 0.0 }
 0x744   : > { %2527 = vadd.xlane.f32.xlu1 %v2526_v1  ;;  %14503 = vmatmul.mubr.msk.f32.gmra.mrb[70].mxu1 %vm890_vm0, %v3772_v18 }
 0x745   : > { %v19017_v28 = vpop.eup %17038 }
 0x746   : > { %v2529_v52 = vsel %vm1351_vm3, %v19017_v28, 0.0 }
 0x748   : > { %2530 = vadd.xlane.f32.xlu1 %v2529_v52 }
 0x755   : > { %16469 = vrot.lane.b32.xlu0 %v21865_v46, %s17750_s27 }
 0x759   : > { %16479 = vrot.lane.b32.xlu0 %v21866_v12, %s17750_s27  ;;  %16474 = vrot.lane.b32.xlu1 %v21867_v62, %s17750_s27 }
 0x75d   : > { %16489 = vrot.lane.b32.xlu0 %v21865_v46, %s17751_s29  ;;  %16484 = vrot.lane.b32.xlu1 %v21868_v3, %s17750_s27 }
 0x761   : > { %16499 = vrot.lane.b32.xlu0 %v18261_v43, %s17751_s29  ;;  %16494 = vrot.lane.b32.xlu1 %v21867_v62, %s17751_s29 }
 0x770   : > { %v2498_v26 = vpop.xlane.xlu0 %2497 }
 0x771   : > { %17040 = vrcp.f32 %v2498_v26 }
 0x773   : > { %v2501_v10 = vpop.xlane.xlu1 %2500 }
 0x774   : > { %v2504_v42 = vpop.xlane.xlu0 %2503  ;;  %17042 = vrcp.f32 %v2501_v10 }
 0x775   : > { %17044 = vrcp.f32 %v2504_v42 }
 0x778   : > { %v2507_v38 = vpop.xlane.xlu0 %2506 }
 0x779   : > { %17046 = vrcp.f32 %v2507_v38 }
 0x77a   : > { %v19035_v35 = vpop.f32.mrb[48].mxu1 }
 0x77b   : > { %v17041_v54 = vpop.eup %17040  ;;  %v19037_v33 = vpop.f32.mrb[49].mxu1 }
 0x77c   : > { %v2560_v49 = vmul.f32 %v17041_v54, %v18927_v2 }
 0x77e   : > { %14345 = vmatprep.mubr.msk.f32.mxu0 %vm1351_vm3, %v2560_v49  ;;  %v19041_v51 = vpop.f32.mrb[50].mxu1  ;;  %v17043_v13 = vpop.eup %17042 }
 0x77f   : > { %v19043_v14 = vpop.f32.mrb[51].mxu1  ;;  %v17045_v1 = vpop.eup %17044  ;;  %v2561_v42 = vmul.f32 %v17043_v13, %v18929_v60 }
 0x782   : > { %v19045_v27 = vpop.f32.mrb[52].mxu1 }
 0x783   : > { %v19047_v39 = vpop.f32.mrb[53].mxu1 }
 0x7cc   : > { %v2522_v61 = vpop.xlane.xlu0 %2521 }
 0x7cd   : > { %v2525_v32 = vpop.xlane.xlu1 %2524  ;;  %17048 = vrcp.f32 %v2522_v61  ;;  %v17047_v61 = vpop.eup %17046 }
 0x7ce   : > { %17050 = vrcp.f32 %v2525_v32 }
 0x7d0   : > { %v16470_v6 = vpop.permute.xlu0 %16469 }
 0x7d1   : > { %v16472_v55 = vunpack.i.h.bf16 %v16470_v6  ;;  %v16471_v44 = vunpack.i.l.bf16 %v16470_v6  ;;  %v2528_v50 = vpop.xlane.xlu1 %2527 }
 0x7d2   : > { %17052 = vrcp.f32 %v2528_v50 }
 0x7d3   : > { %v15481_v2 = vpack.c.bf16 %v16472_v55, %v16471_v44  ;;  %v2562_v44 = vmul.f32 %v17045_v1, %v18933_v45 }
 0x7d4   : > { %v16480_v56 = vpop.permute.xlu0 %16479 }
 0x7d5   : > { %15482 = vmatprep.subr.bf16.mxu0 %v15481_v2  ;;  %v2531_v24 = vpop.xlane.xlu1 %2530  ;;  %v16482_v59 = vunpack.i.h.bf16 %v16480_v56  ;;  %v16481_v8 = vunpack.i.l.bf16 %v16480_v56 }
 0x7d6   : > { %15484 = vmatpush3.bf16.msra.mxu0 %v15481_v2  ;;  %17054 = vrcp.f32 %v2531_v24 }
 0x7d7   : > { %v15497_v18 = vpack.c.bf16 %v16482_v59, %v16481_v8  ;;  %v17049_v55 = vpop.eup %17048 }
 0x7d8   : > { %v19049_v47 = vpop.permute.xlu0 %16489  ;;  %v2568_v45 = vmul.f32 %v17049_v55, %v19001_v0  ;;  %v17051_v8 = vpop.eup %17050 }
 0x7d9   : > { %v16475_v34 = vpop.permute.xlu1 %16474 }
 0x7da   : > { %v16477_v53 = vunpack.i.h.bf16 %v16475_v34  ;;  %v16476_v20 = vunpack.i.l.bf16 %v16475_v34  ;;  %v2563_v34 = vmul.f32 %v17047_v61, %v18939_v16  ;;  %v2569_v16 = vmul.f32 %v17051_v8, %v19004_v5 }
 0x7db   : > { %v19051_v7 = vpop.f32.mrb[54].mxu1 }
 0x7dc   : > { %v19053_v22 = vpop.f32.mrb[55].mxu1  ;;  %v16500_v40 = vpop.permute.xlu0 %16499  ;;  %v15485_v48 = vpack.c.bf16 %v16477_v53, %v16476_v20 }
 0x7dd   : > { %v16502_v57 = vunpack.i.h.bf16 %v16500_v40  ;;  %v16501_v23 = vunpack.i.l.bf16 %v16500_v40  ;;  %v16485_v58 = vpop.permute.xlu1 %16484  ;;  %v17053_v53 = vpop.eup %17052 }
 0x7de   : > { %15486 = vmatprep.subr.bf16.mxu0 %v15485_v48  ;;  %v16487_v52 = vunpack.i.h.bf16 %v16485_v58  ;;  %v16486_v26 = vunpack.i.l.bf16 %v16485_v58  ;;  %v2570_v0 = vmul.f32 %v17053_v53, %v19011_v17 }
 0x7df   : > { %15488 = vmatpush3.bf16.msra.mxu0 %v15485_v48  ;;  %v14459_v54 = vpop.f32.mrb[56].mxu1  ;;  %v15577_v49 = vpack.c.bf16 %v16502_v57, %v16501_v23 }
 0x7e0   : > { %v19058_v38 = vsel %vm18294_vm4, %v14459_v54, -1e+30  ;;  %15498 = vmatprep.subr.bf16.mxu0 %v15497_v18  ;;  %v3512_v10 = vpop.f32.mrb[57].mxu1  ;;  %v15501_v2 = vpack.c.bf16 %v16487_v52, %v16486_v26  ;;  %v17055_v40 = vpop.eup %17054 }
 0x7e1   : > { %v3901_v32 = vsel %vm1351_vm3, %v19058_v38, -inf  ;;  %v19064_v6 = vsel %vm18289_vm2, %v3512_v10, -1e+30  ;;  %15578 = vmatprep.subr.bf16.mxu1 %v15577_v49  ;;  %v2571_v13 = vmul.f32 %v17055_v40, %v19017_v28 }
 0x7e2   : > { %v3898_v60 = vsel %vm1351_vm3, %v19064_v6, -inf  ;;  %3902 = vmax.xlane.f32.xlu1 %v3901_v32  ;;  %14346 = vmatmul.mubr.msk.f32.vlgmr.msra.gmra.mrb[48].mxu0 %vm1351_vm3, %v2561_v42 }
 0x7e3   : > { %15580 = vmatpush3.bf16.msra.mxu1 %v15577_v49  ;;  %v14462_v50 = vpop.f32.mrb[58].mxu1  ;;  %3899 = vmax.xlane.f32.xlu0 %v3898_v60 }
 0x7e4   : > { %v19072_v56 = vsel %vm18308_vm6, %v14462_v50, -1e+30  ;;  %14348 = vmatprep.mubr.msk.f32.mxu0 %vm1351_vm3, %v2562_v44  ;;  %15500 = vmatpush3.bf16.msra.mxu0 %v15497_v18  ;;  %v3522_v24 = vpop.f32.mrb[59].mxu1 }
 0x7e5   : > { %v3907_v59 = vsel %vm1351_vm3, %v19072_v56, -inf  ;;  %15502 = vmatprep.subr.bf16.mxu0 %v15501_v2  ;;  %v19082_v20 = vsel %vm18302_vm5, %v3522_v24, -1e+30 }
 0x7e6   : > { %14349 = vmatmul.mubr.msk.f32.gmra.mrb[50].mxu0 %vm1351_vm3, %v2563_v34  ;;  %v3904_v48 = vsel %vm1351_vm3, %v19082_v20, -inf }
 0x7e7   : > { %3908 = vmax.xlane.f32.xlu0 %v3907_v59  ;;  %14373 = vmatprep.mubr.msk.f32.mxu0 %vm1351_vm3, %v2568_v45 }
 0x7e8   : > { %15504 = vmatpush3.bf16.msra.mxu0 %v15501_v2 }
 0x7eb   : > { %14374 = vmatmul.mubr.msk.f32.vlgmr.msra.gmra.mrb[52].mxu0 %vm1351_vm3, %v2569_v16  ;;  %3905 = vmax.xlane.f32.xlu0 %v3904_v48 }
 0x7ec   : > { %14376 = vmatprep.mubr.msk.f32.mxu0 %vm1351_vm3, %v2570_v0 }
 0x7ef   : > { %14377 = vmatmul.mubr.msk.f32.gmra.mrb[54].mxu0 %vm1351_vm3, %v2571_v13  ;;  %v14473_v57 = vpop.f32.mrb[60].mxu1 }
 0x7f0   : > { %v19095_v23 = vsel %vm18294_vm4, %v14473_v57, -1e+30  ;;  %v3629_v5 = vpop.f32.mrb[61].mxu1 }
 0x7f1   : > { %v3913_v58 = vsel %vm1351_vm3, %v19095_v23, -inf  ;;  %v19101_v17 = vsel %vm18289_vm2, %v3629_v5, -1e+30 }
 0x7f2   : > { %v3910_v18 = vsel %vm1351_vm3, %v19101_v17, -inf  ;;  %3914 = vmax.xlane.f32.xlu1 %v3913_v58  ;;  %v876_v58 = vld [vmem:[#allocation7 + $0x10] sm:$0xff] }
 0x7f3   : > { %v14476_v28 = vpop.f32.mrb[62].mxu1  ;;  %3911 = vmax.xlane.f32.xlu0 %v3910_v18  ;;  %v877_v18 = vld [vmem:[#allocation7 + $0x18] sm:$0xff] }
 0x7f4   : > { %v19107_v1 = vsel %vm18308_vm6, %v14476_v28, -1e+30  ;;  %v3639_v52 = vpop.f32.mrb[63].mxu1  ;;  %v15513_v28 = vpack.c.bf16 %v877_v18, %v876_v58 }
 0x7f5   : > { %v3919_v26 = vsel %vm1351_vm3, %v19107_v1, -inf  ;;  %v19113_v54 = vsel %vm18302_vm5, %v3639_v52, -1e+30  ;;  %v874_v52 = vld [vmem:[#allocation7] sm:$0xff] }
 0x7f6   : > { %v3916_v49 = vsel %vm1351_vm3, %v19113_v54, -inf  ;;  %3920 = vmax.xlane.f32.xlu1 %v3919_v26  ;;  %15514 = vmatprep.subr.bf16.mxu0 %v15513_v28  ;;  %v875_v26 = vld [vmem:[#allocation7 + $0x8] sm:$0xff] }
 0x7f7   : > { %3917 = vmax.xlane.f32.xlu0 %v3916_v49  ;;  %15516 = vmatpush3.bf16.msra.mxu0 %v15513_v28  ;;  %v19163_v49 = vpack.c.bf16 %v875_v26, %v874_v52 }
 0x7f9   : > { %15518 = vmatprep.subr.bf16.mxu0 %v19163_v49 }
 0x7ff   : > { %v14487_v42 = vpop.f32.mrb[64].mxu1 }
 0x800   : > { %v19119_v10 = vsel %vm18294_vm4, %v14487_v42, -1e+30  ;;  %v3746_v61 = vpop.f32.mrb[65].mxu1 }
 0x801   : > { %v3925_v32 = vsel %vm1351_vm3, %v19119_v10, -inf  ;;  %v19125_v55 = vsel %vm18289_vm2, %v3746_v61, -1e+30 }
 0x802   : > { %v3922_v60 = vsel %vm1351_vm3, %v19125_v55, -inf  ;;  %3926 = vmax.xlane.f32.xlu1 %v3925_v32  ;;  %v19174_v32 = vpop.permute.xlu1 %16494 }
 0x803   : > { %3923 = vmax.xlane.f32.xlu0 %v3922_v60 }
 0x80f   : > { %v14490_v44 = vpop.f32.mrb[66].mxu1 }
 0x810   : > { %v19131_v50 = vsel %vm18308_vm6, %v14490_v44, -1e+30  ;;  %v3756_v2 = vpop.f32.mrb[67].mxu1 }
 0x811   : > { %v3931_v24 = vsel %vm1351_vm3, %v19131_v50, -inf  ;;  %v19137_v34 = vsel %vm18302_vm5, %v3756_v2, -1e+30 }
 0x812   : > { %v3928_v59 = vsel %vm1351_vm3, %v19137_v34, -inf  ;;  %3932 = vmax.xlane.f32.xlu1 %v3931_v24 }
 0x813   : > { %3929 = vmax.xlane.f32.xlu0 %v3928_v59  ;;  %v14501_v45 = vpop.f32.mrb[68].mxu1 }
 0x814   : > { %v19143_v8 = vsel %vm18294_vm4, %v14501_v45, -1e+30  ;;  %v3863_v53 = vpop.f32.mrb[69].mxu1 }
 0x815   : > { %v3937_v16 = vsel %vm1351_vm3, %v19143_v8, -inf  ;;  %v19149_v40 = vsel %vm18289_vm2, %v3863_v53, -1e+30 }
 0x816   : > { %v3934_v48 = vsel %vm1351_vm3, %v19149_v40, -inf  ;;  %3938 = vmax.xlane.f32.xlu1 %v3937_v16 }
 0x817   : > { %3935 = vmax.xlane.f32.xlu0 %v3934_v48  ;;  %v14504_v0 = vpop.f32.mrb[70].mxu1 }
 0x818   : > { %v19155_v13 = vsel %vm18308_vm6, %v14504_v0, -1e+30  ;;  %v3873_v57 = vpop.f32.mrb[71].mxu1 }
 0x819   : > { %v3943_v5 = vsel %vm1351_vm3, %v19155_v13, -inf  ;;  %v19168_v42 = vsel %vm18302_vm5, %v3873_v57, -1e+30 }
 0x81a   : > { %3944 = vmax.xlane.f32.xlu1 %v3943_v5  ;;  %v3940_v61 = vsel %vm1351_vm3, %v19168_v42, -inf }
 0x82b   : > { %16504 = vrot.lane.b32.xlu1 %v21847_v37, %s17751_s29 }
 0x82d   : > { %16509 = vrot.lane.b32.xlu0 %v21866_v12, %s17751_s29 }
 0x84c   : > { %3941 = vmax.xlane.f32.xlu0 %v3940_v61 }
 0x862   : > { %16514 = vrot.lane.b32.xlu0 %v21868_v3, %s17751_s29 }
 0x86f   : > { %v3903_v60 = vpop.xlane.xlu1 %3902 }
 0x870   : > { %v3947_v44 = vsub.f32 %v19058_v38, %v3903_v60  ;;  %v3900_v2 = vpop.xlane.xlu0 %3899 }
 0x871   : > { %v3946_v24 = vsub.f32 %v19064_v6, %v3900_v2 }
 0x872   : > { %v3964_v59 = vmul.f32 1.442695, %v3947_v44 }
 0x873   : > { %v3962_v45 = vmul.f32 1.442695, %v3946_v24 }
 0x874   : > { %17056 = vpow2.f32 %v3964_v59  ;;  %v3909_v53 = vpop.xlane.xlu0 %3908 }
 0x875   : > { %17058 = vpow2.f32 %v3962_v45  ;;  %v3949_v16 = vsub.f32 %v19072_v56, %v3909_v53 }
 0x877   : > { %v3968_v48 = vmul.f32 1.442695, %v3949_v16 }
 0x878   : > { %v3906_v0 = vpop.xlane.xlu0 %3905 }
 0x879   : > { %17060 = vpow2.f32 %v3968_v48  ;;  %v3948_v57 = vsub.f32 %v19082_v20, %v3906_v0 }
 0x87b   : > { %v3966_v5 = vmul.f32 1.442695, %v3948_v57 }
 0x87d   : > { %17062 = vpow2.f32 %v3966_v5 }
 0x87e   : > { %v19180_v58 = vpop.eup %17056 }
 0x87f   : > { %v19182_v38 = vpop.eup %17058  ;;  %v3915_v18 = vpop.xlane.xlu1 %3914  ;;  %v3997_v6 = vsel %vm1351_vm3, %v19180_v58, 0.0 }
 0x880   : > { %v3951_v28 = vsub.f32 %v19095_v23, %v3915_v18  ;;  %v3912_v52 = vpop.xlane.xlu0 %3911  ;;  %3998 = vadd.xlane.f32.xlu1 %v3997_v6  ;;  %v3994_v56 = vsel %vm1351_vm3, %v19182_v38, 0.0 }
 0x881   : > { %v3950_v26 = vsub.f32 %v19101_v17, %v3912_v52  ;;  %3995 = vadd.xlane.f32.xlu0 %v3994_v56 }
 0x882   : > { %v3972_v20 = vmul.f32 1.442695, %v3951_v28 }
 0x883   : > { %v19190_v61 = vpop.eup %17060  ;;  %v3970_v60 = vmul.f32 1.442695, %v3950_v26  ;;  %v3921_v44 = vpop.xlane.xlu1 %3920 }
 0x884   : > { %17064 = vpow2.f32 %v3972_v20  ;;  %v3953_v2 = vsub.f32 %v19107_v1, %v3921_v44  ;;  %v3918_v24 = vpop.xlane.xlu0 %3917  ;;  %v4003_v23 = vsel %vm1351_vm3, %v19190_v61, 0.0 }
 0x885   : > { %17066 = vpow2.f32 %v3970_v60  ;;  %v3952_v59 = vsub.f32 %v19113_v54, %v3918_v24  ;;  %4004 = vadd.xlane.f32.xlu1 %v4003_v23 }
 0x886   : > { %v3976_v45 = vmul.f32 1.442695, %v3953_v2 }
 0x887   : > { %v19196_v53 = vpop.eup %17062  ;;  %v3974_v17 = vmul.f32 1.442695, %v3952_v59 }
 0x888   : > { %17068 = vpow2.f32 %v3976_v45  ;;  %v4000_v16 = vsel %vm1351_vm3, %v19196_v53, 0.0 }
 0x889   : > { %17070 = vpow2.f32 %v3974_v17  ;;  %4001 = vadd.xlane.f32.xlu0 %v4000_v16 }
 0x88e   : > { %v19200_v48 = vpop.eup %17064 }
 0x88f   : > { %v19202_v1 = vpop.eup %17066  ;;  %v3927_v0 = vpop.xlane.xlu1 %3926  ;;  %v4009_v57 = vsel %vm1351_vm3, %v19200_v48, 0.0 }
 0x890   : > { %v3955_v54 = vsub.f32 %v19119_v10, %v3927_v0  ;;  %v3924_v5 = vpop.xlane.xlu0 %3923  ;;  %4010 = vadd.xlane.f32.xlu1 %v4009_v57  ;;  %v4006_v18 = vsel %vm1351_vm3, %v19202_v1, 0.0 }
 0x891   : > { %v3954_v6 = vsub.f32 %v19125_v55, %v3924_v5  ;;  %4007 = vadd.xlane.f32.xlu0 %v4006_v18 }
 0x892   : > { %v19210_v28 = vpop.eup %17068  ;;  %v3980_v52 = vmul.f32 1.442695, %v3955_v54 }
 0x893   : > { %v19212_v56 = vpop.eup %17070  ;;  %v3978_v26 = vmul.f32 1.442695, %v3954_v6  ;;  %v4015_v20 = vsel %vm1351_vm3, %v19210_v28, 0.0 }
 0x894   : > { %17072 = vpow2.f32 %v3980_v52  ;;  %4016 = vadd.xlane.f32.xlu1 %v4015_v20  ;;  %v4012_v10 = vsel %vm1351_vm3, %v19212_v56, 0.0 }
 0x895   : > { %17074 = vpow2.f32 %v3978_v26  ;;  %4013 = vadd.xlane.f32.xlu0 %v4012_v10 }
 0x89e   : > { %v19218_v60 = vpop.eup %17072 }
 0x89f   : > { %v19220_v55 = vpop.eup %17074  ;;  %v4021_v44 = vsel %vm1351_vm3, %v19218_v60, 0.0  ;;  %v3933_v2 = vpop.xlane.xlu1 %3932 }
 0x8a0   : > { %4022 = vadd.xlane.f32.xlu1 %v4021_v44  ;;  %v3957_v24 = vsub.f32 %v19131_v50, %v3933_v2  ;;  %v3930_v23 = vpop.xlane.xlu0 %3929  ;;  %v4018_v59 = vsel %vm1351_vm3, %v19220_v55, 0.0 }
 0x8a1   : > { %v3956_v45 = vsub.f32 %v19137_v34, %v3930_v23  ;;  %4019 = vadd.xlane.f32.xlu0 %v4018_v59  ;;  %v16492_v59 = vunpack.i.h.bf16 %v19049_v47 }
 0x8a2   : > { %v3984_v17 = vmul.f32 1.442695, %v3957_v24 }
 0x8a3   : > { %v3982_v16 = vmul.f32 1.442695, %v3956_v45  ;;  %v3939_v0 = vpop.xlane.xlu1 %3938  ;;  %v16491_v45 = vunpack.i.l.bf16 %v19049_v47 }
 0x8a4   : > { %17076 = vpow2.f32 %v3984_v17  ;;  %v3959_v57 = vsub.f32 %v19143_v8, %v3939_v0  ;;  %v3936_v54 = vpop.xlane.xlu0 %3935 }
 0x8a5   : > { %v3958_v5 = vsub.f32 %v19149_v40, %v3936_v54  ;;  %17078 = vpow2.f32 %v3982_v16 }
 0x8a6   : > { %v3988_v18 = vmul.f32 1.442695, %v3959_v57 }
 0x8a7   : > { %v3986_v6 = vmul.f32 1.442695, %v3958_v5  ;;  %v3945_v50 = vpop.xlane.xlu1 %3944  ;;  %v15569_v5 = vpack.c.bf16 %v16492_v59, %v16491_v45  ;;  %v21876_v45 = vld [vmem:[#allocation49_spill] sm:$0xff] }
 0x8a8   : > { %v3961_v52 = vsub.f32 %v19155_v13, %v3945_v50 }
 0x8a9   : > { %17080 = vpow2.f32 %v3986_v6 }
 0x8aa   : > { %17082 = vpow2.f32 %v3988_v18  ;;  %v3992_v26 = vmul.f32 1.442695, %v3961_v52 }
 0x8ab   : > { %v16505_v34 = vpop.permute.xlu1 %16504 }
 0x8ac   : > { %v16507_v20 = vunpack.i.h.bf16 %v16505_v34  ;;  %v16506_v10 = vunpack.i.l.bf16 %v16505_v34  ;;  %17084 = vpow2.f32 %v3992_v26  ;;  %v21871_v34 = vld [vmem:[#allocation33_spill] sm:$0xff] }
 0x8ae   : > { %v19231_v44 = vpop.eup %17076  ;;  %v15581_v2 = vpack.c.bf16 %v16507_v20, %v16506_v10  ;;  %v21872_v20 = vld [vmem:[#allocation19_spill] sm:$0xff] }
 0x8af   : > { %v4027_v8 = vsel %vm1351_vm3, %v19231_v44, 0.0  ;;  %v19235_v40 = vpop.eup %17078 }
 0x8b0   : > { %4028 = vadd.xlane.f32.xlu1 %v4027_v8  ;;  %15582 = vmatprep.subr.bf16.mxu1 %v15581_v2  ;;  %v4024_v13 = vsel %vm1351_vm3, %v19235_v40, 0.0 }
 0x8b1   : > { %15584 = vmatpush3.bf16.msra.mxu1 %v15581_v2 }
 0x8b3   : > { %v19237_v24 = vpop.eup %17080 }
 0x8b4   : > { %v19241_v23 = vpop.eup %17082  ;;  %4025 = vadd.xlane.f32.xlu1 %v4024_v13  ;;  %v4030_v17 = vsel %vm1351_vm3, %v19237_v24, 0.0  ;;  %v21874_v13 = vld [vmem:[#allocation50_spill] sm:$0xff] }
 0x8b5   : > { %4031 = vadd.xlane.f32.xlu0 %v4030_v17  ;;  %v14347_v16 = vpop.f32.mrb[48].mxu0  ;;  %v4033_v57 = vsel %vm1351_vm3, %v19241_v23, 0.0 }
 0x8b6   : > { %v2670_v0 = vpop.f32.mrb[49].mxu0  ;;  %v19250_v54 = vpop.eup %17084 }
 0x8b7   : > { %14397 = vmatprep.mubr.msk.f32.mxu0 %vm890_vm0, %v2670_v0  ;;  %v4039_v6 = vsel %vm1351_vm3, %v19250_v54, 0.0  ;;  %v21878_v0 = vld [vmem:[#allocation22_spill] sm:$0xff] }
 0x8b8   : > { %4034 = vadd.xlane.f32.xlu1 %v4033_v57  ;;  %14398 = vmatmul.mubr.msk.f32.vlgmr.msra.gmra.mrb[56].mxu0 %vm890_vm0, %v14347_v16  ;;  %v21877_v16 = vld [vmem:[#allocation52_spill] sm:$0xff]  ;;  %v21879_v57 = vld [vmem:[#allocation51_spill] sm:$0xff] }
 0x8b9   : > { %15520 = vmatpush3.bf16.msra.mxu0 %v19163_v49  ;;  %v14350_v47 = vpop.f32.mrb[50].mxu0 }
 0x8ba   : > { %15570 = vmatprep.subr.bf16.mxu0 %v15569_v5  ;;  %v2680_v18 = vpop.f32.mrb[51].mxu0 }
 0x8bb   : > { %14400 = vmatprep.mubr.msk.f32.mxu0 %vm890_vm0, %v2680_v18  ;;  %v21883_v18 = vld [vmem:[#allocation60_spill] sm:$0xff] }
 0x8bc   : > { %4040 = vadd.xlane.f32.xlu1 %v4039_v6  ;;  %14401 = vmatmul.mubr.msk.f32.gmra.mrb[58].mxu0 %vm890_vm0, %v14350_v47  ;;  %v21882_v47 = vld [vmem:[#allocation53_spill] sm:$0xff] }
 0x8bd   : > { %14403 = vmatprep.mubr.msk.f32.mxu0 %vm890_vm0, %v19037_v33  ;;  %v21870_v33 = vld [vmem:[#allocation26_spill] sm:$0xff]  ;;  %v21884_v6 = vld [vmem:[#allocation25_spill] sm:$0xff] }
 0x8be   : > { %v14375_v50 = vpop.f32.mrb[52].mxu0 }
 0x8bf   : > { %v2896_v52 = vpop.f32.mrb[53].mxu0 }
 0x8c0   : > { %14404 = vmatmul.mubr.msk.f32.gmra.mrb[60].mxu0 %vm890_vm0, %v19035_v35  ;;  %v21869_v35 = vld [vmem:[#allocation20_spill] sm:$0xff] }
 0x8c1   : > { %14406 = vmatprep.mubr.msk.f32.mxu0 %vm890_vm0, %v19043_v14  ;;  %v16496_v14 = vunpack.i.l.bf16 %v19174_v32 }
 0x8c2   : > { %v14378_v49 = vpop.f32.mrb[54].mxu0 }
 0x8c3   : > { %v2906_v26 = vpop.f32.mrb[55].mxu0 }
 0x8c4   : > { %14407 = vmatmul.mubr.msk.f32.gmra.mrb[62].mxu0 %vm890_vm0, %v19041_v51  ;;  %v16497_v51 = vunpack.i.h.bf16 %v19174_v32  ;;  %v21875_v32 = vld [vmem:[#allocation32_spill] sm:$0xff] }
 0x8c5   : > { %14409 = vmatprep.mubr.msk.f32.mxu0 %vm890_vm0, %v2896_v52  ;;  %v21885_v52 = vld [vmem:[#allocation59_spill] sm:$0xff] }
 0x8c6   : > { %v15573_v2 = vpack.c.bf16 %v16497_v51, %v16496_v14  ;;  %v21887_v51 = vld [vmem:[#allocation28_spill] sm:$0xff]  ;;  %v21888_v14 = vld [vmem:[#allocation61_spill] sm:$0xff] }
 0x8c8   : > { %14410 = vmatmul.mubr.msk.f32.gmra.mrb[64].mxu0 %vm890_vm0, %v14375_v50 }
 0x8c9   : > { %14412 = vmatprep.mubr.msk.f32.mxu0 %vm890_vm0, %v2906_v26 }
 0x8cb   : > { %16519 = vrot.lane.b32.xlu0 %v21845_v31, %s17751_s29 }
 0x8cc   : > { %14413 = vmatmul.mubr.msk.f32.gmra.mrb[66].mxu0 %vm890_vm0, %v14378_v49  ;;  %v21886_v49 = vld [vmem:[#allocation62_spill] sm:$0xff] }
 0x8cd   : > { %14415 = vmatprep.mubr.msk.f32.mxu0 %vm890_vm0, %v19047_v39  ;;  %v16510_v39 = vpop.permute.xlu0 %16509 }
 0x8ce   : > { %v16511_v10 = vunpack.i.l.bf16 %v16510_v39 }
 0x8cf   : > { %16529 = vrot.lane.b32.xlu0 %v21869_v35, %s17752_s11 }
 0x8d0   : > { %14416 = vmatmul.mubr.msk.f32.gmra.mrb[68].mxu0 %vm890_vm0, %v19045_v27  ;;  %v16512_v27 = vunpack.i.h.bf16 %v16510_v39  ;;  %v21889_v39 = vld [vmem:[#allocation56_spill] sm:$0xff] }
 0x8d1   : > { %14418 = vmatprep.mubr.msk.f32.mxu0 %vm890_vm0, %v19053_v22  ;;  %v21873_v22 = vld [vmem:[#allocation44_spill] sm:$0xff] }
 0x8d2   : > { %v15585_v17 = vpack.c.bf16 %v16512_v27, %v16511_v10  ;;  %v21891_v27 = vld [vmem:[#allocation55_spill] sm:$0xff]  ;;  %v21892_v10 = vld [vmem:[#allocation58_spill] sm:$0xff] }
 0x8d3   : > { %16539 = vrot.lane.b32.xlu0 %v21870_v33, %s17752_s11 }
 0x8d4   : > { %14419 = vmatmul.mubr.msk.f32.gmra.mrb[70].mxu0 %vm890_vm0, %v19051_v7 }
 0x8d5   : > { %14425 = vmatprep.mubr.msk.f32.mxu0 %vm890_vm0, %v21871_v34  ;;  %v21890_v34 = vld [vmem:[#allocation30_spill] sm:$0xff] }
 0x8d7   : > { %4721 = vrot.lane.b32.xlu0 %v21872_v20, %s17752_s11 }
 0x8d8   : > { %14426 = vmatmul.mubr.msk.f32.vlgmr.msra.gmra.mrb[56].mxu0 %vm890_vm0, %v21873_v22  ;;  %v21893_v22 = vld [vmem:[#allocation57_spill] sm:$0xff] }
 0x8d9   : > { %15572 = vmatpush3.bf16.msra.mxu0 %v15569_v5  ;;  %v3942_v8 = vpop.xlane.xlu0 %3941  ;;  %14428 = vmatprep.mubr.msk.f32.mxu0 %vm890_vm0, %v21874_v13  ;;  %v21881_v5 = vld [vmem:[#allocation36_spill] sm:$0xff]  ;;  %v21896_v13 = vld [vmem:[#allocation18_spill] sm:$0xff] }
 0x8da   : > { %v3960_v7 = vsub.f32 %v19168_v42, %v3942_v8  ;;  %15574 = vmatprep.subr.bf16.mxu0 %v15573_v2  ;;  %v21880_v42 = vld [vmem:[#allocation54_spill] sm:$0xff]  ;;  %v21895_v8 = vld [vmem:[#allocation23_spill] sm:$0xff] }
 0x8db   : > { %16549 = vrot.lane.b32.xlu0 %v21875_v32, %s17752_s11 }
 0x8dc   : > { %v3990_v59 = vmul.f32 1.442695, %v3960_v7  ;;  %14429 = vmatmul.mubr.msk.f32.gmra.mrb[58].mxu0 %vm890_vm0, %v21876_v45  ;;  %v21897_v7 = vld [vmem:[#allocation29_spill] sm:$0xff] }
 0x8dd   : > { %15576 = vmatpush3.bf16.msra.mxu0 %v15573_v2  ;;  %14431 = vmatprep.mubr.msk.f32.mxu0 %vm890_vm0, %v21877_v16  ;;  %v21894_v2 = vld [vmem:[#allocation45_spill] sm:$0xff] }
 0x8de   : > { %17086 = vpow2.f32 %v3990_v59  ;;  %15586 = vmatprep.subr.bf16.mxu0 %v15585_v17  ;;  %v16515_v59 = vpop.permute.xlu0 %16514  ;;  %v21898_v45 = vld [vmem:[#allocation21_spill] sm:$0xff] }
 0x8df   : > { %4725 = vrot.lane.b32.xlu0 %v21878_v0, %s17752_s11 }
 0x8e0   : > { %14432 = vmatmul.mubr.msk.f32.gmra.mrb[60].mxu0 %vm890_vm0, %v21879_v57 }
 0x8e1   : > { %14434 = vmatprep.mubr.msk.f32.mxu0 %vm890_vm0, %v21880_v42  ;;  %v21899_v42 = vld [vmem:[#allocation34_spill] sm:$0xff] }
 0x8e3   : > { %16559 = vrot.lane.b32.xlu0 %v21881_v5, %s17752_s11 }
 0x8e4   : > { %14435 = vmatmul.mubr.msk.f32.gmra.mrb[62].mxu0 %vm890_vm0, %v21882_v47 }
 0x8e5   : > { %14437 = vmatprep.mubr.msk.f32.mxu0 %vm890_vm0, %v21883_v18  ;;  %v21900_v18 = vld [vmem:[#allocation24_spill] sm:$0xff] }
 0x8e7   : > { %4838 = vrot.lane.b32.xlu0 %v21884_v6, %s17752_s11 }
 0x8e8   : > { %v19315_v50 = vpop.eup %17086  ;;  %14438 = vmatmul.mubr.msk.f32.gmra.mrb[64].mxu0 %vm890_vm0, %v21885_v52 }
 0x8e9   : > { %14440 = vmatprep.mubr.msk.f32.mxu0 %vm890_vm0, %v21886_v49  ;;  %v4036_v26 = vsel %vm1351_vm3, %v19315_v50, 0.0  ;;  %v21901_v49 = vld [vmem:[#allocation27_spill] sm:$0xff] }
 0x8ea   : > { %4037 = vadd.xlane.f32.xlu1 %v4036_v26 }
 0x8eb   : > { %4842 = vrot.lane.b32.xlu0 %v21887_v51, %s17752_s11 }
 0x8ec   : > { %14441 = vmatmul.mubr.msk.f32.gmra.mrb[66].mxu0 %vm890_vm0, %v21888_v14 }
 0x8ed   : > { %14443 = vmatprep.mubr.msk.f32.mxu0 %vm890_vm0, %v21889_v39  ;;  %v16517_v39 = vunpack.i.h.bf16 %v16515_v59 }
 0x8ef   : > { %4953 = vrot.lane.b32.xlu0 %v21890_v34, %s17752_s11 }
 0x8f0   : > { %14444 = vmatmul.mubr.msk.f32.gmra.mrb[68].mxu0 %vm890_vm0, %v21891_v27  ;;  %v16516_v27 = vunpack.i.l.bf16 %v16515_v59 }
 0x8f1   : > { %14446 = vmatprep.mubr.msk.f32.mxu0 %vm890_vm0, %v21892_v10 }
 0x8f3   : > { %4957 = vrot.lane.b32.xlu0 %v18192_v9, %s17752_s11 }
 0x8f4   : > { %14447 = vmatmul.mubr.msk.f32.gmra.mrb[70].mxu0 %vm890_vm0, %v21893_v22 }
 0x8f7   : > { %5070 = vrot.lane.b32.xlu0 %v18208_v19, %s17752_s11 }
 0x8fb   : > { %5074 = vrot.lane.b32.xlu0 %v18220_v25, %s17752_s11  ;;  %16524 = vrot.lane.b32.xlu1 %v21894_v2, %s17751_s29  ;;  %s21935_s29 = sld [smem:[#allocation66_spill]] }
 0x8ff   : > { %16534 = vrot.lane.b32.xlu1 %v21895_v8, %s17752_s11 }
 0x903   : > { %4719 = vrot.lane.b32.xlu1 %v21896_v13, %s17752_s11 }
 0x907   : > { %16544 = vrot.lane.b32.xlu1 %v21897_v7, %s17752_s11 }
 0x90b   : > { %4723 = vrot.lane.b32.xlu1 %v21898_v45, %s17752_s11 }
 0x90d   : > { %v3999_v16 = vpop.xlane.xlu1 %3998 }
 0x90e   : > { %17088 = vrcp.f32 %v3999_v16  ;;  %v3996_v57 = vpop.xlane.xlu0 %3995  ;;  %v878_v16 = vld [vmem:[#allocation7 + $0x20] sm:$0xff] }
 0x90f   : > { %17090 = vrcp.f32 %v3996_v57  ;;  %16554 = vrot.lane.b32.xlu1 %v21899_v42, %s17752_s11  ;;  %v879_v57 = vld [vmem:[#allocation7 + $0x28] sm:$0xff] }
 0x912   : > { %v4005_v47 = vpop.xlane.xlu1 %4004 }
 0x913   : > { %4836 = vrot.lane.b32.xlu1 %v21900_v18, %s17752_s11  ;;  %17092 = vrcp.f32 %v4005_v47 }
 0x916   : > { %v4002_v52 = vpop.xlane.xlu0 %4001 }
 0x917   : > { %17094 = vrcp.f32 %v4002_v52  ;;  %4840 = vrot.lane.b32.xlu1 %v21901_v49, %s17752_s11  ;;  %v15589_v52 = vpack.c.bf16 %v16517_v39, %v16516_v27 }
 0x918   : > { %v17089_v26 = vpop.eup %17088 }
 0x919   : > { %v17091_v14 = vpop.eup %17090  ;;  %v4059_v22 = vmul.f32 %v17089_v26, %v19180_v58  ;;  %v15601_v58 = vpack.c.bf16 %v879_v57, %v878_v16 }
 0x91a   : > { %v4058_v10 = vmul.f32 %v17091_v14, %v19182_v38  ;;  %v21902_v38 = vld [vmem:[#allocation31_spill] sm:$0xff] }
 0x91b   : > { %16564 = vrot.lane.b32.xlu1 %v18234_v36, %s17752_s11 }
 0x91c   : > { %14513 = vmatprep.mubr.msk.f32.mxu0 %vm1351_vm3, %v4058_v10 }
 0x91d   : > { %v4011_v47 = vpop.xlane.xlu1 %4010  ;;  %14514 = vmatmul.mubr.msk.f32.vlgmr.msra.gmra.mrb[72].mxu0 %vm1351_vm3, %v4059_v22  ;;  %v17093_v59 = vpop.eup %17092 }
 0x91e   : > { %17096 = vrcp.f32 %v4011_v47  ;;  %v4008_v25 = vpop.xlane.xlu0 %4007  ;;  %15588 = vmatpush3.bf16.msra.mxu0 %v15585_v17  ;;  %v4061_v17 = vmul.f32 %v17093_v59, %v19190_v61 }
 0x91f   : > { %17098 = vrcp.f32 %v4008_v25  ;;  %15590 = vmatprep.subr.bf16.mxu0 %v15589_v52  ;;  %4955 = vrot.lane.b32.xlu1 %v21902_v38, %s17752_s11 }
 0x921   : > { %v17095_v26 = vpop.eup %17094  ;;  %v4017_v14 = vpop.xlane.xlu1 %4016 }
 0x922   : > { %17100 = vrcp.f32 %v4017_v14  ;;  %v4014_v10 = vpop.xlane.xlu0 %4013  ;;  %15592 = vmatpush3.bf16.msra.mxu0 %v15589_v52  ;;  %v4060_v19 = vmul.f32 %v17095_v26, %v19196_v53 }
 0x923   : > { %17102 = vrcp.f32 %v4014_v10  ;;  %4959 = vrot.lane.b32.xlu1 %v21846_v41, %s17752_s11  ;;  %15602 = vmatprep.subr.bf16.mxu0 %v15601_v58 }
 0x924   : > { %14516 = vmatprep.mubr.msk.f32.mxu0 %vm1351_vm3, %v4060_v19 }
 0x925   : > { %14517 = vmatmul.mubr.msk.f32.gmra.mrb[74].mxu0 %vm1351_vm3, %v4061_v17 }
 0x927   : > { %5072 = vrot.lane.b32.xlu1 %v18216_v21, %s17752_s11 }
 0x928   : > { %v17097_v25 = vpop.eup %17096 }
 0x929   : > { %v17099_v39 = vpop.eup %17098  ;;  %v4063_v53 = vmul.f32 %v17097_v25, %v19200_v48 }
 0x92a   : > { %v4062_v27 = vmul.f32 %v17099_v39, %v19202_v1 }
 0x92b   : > { %5076 = vrot.lane.b32.xlu1 %v18230_v29, %s17752_s11 }
 0x92c   : > { %v17101_v22 = vpop.eup %17100  ;;  %14527 = vmatprep.mubr.msk.f32.mxu1 %vm1351_vm3, %v4062_v27 }
 0x92d   : > { %v17103_v61 = vpop.eup %17102  ;;  %v4023_v16 = vpop.xlane.xlu1 %4022  ;;  %14528 = vmatmul.mubr.msk.f32.vlgmr.msra.gmra.mrb[72].mxu1 %vm1351_vm3, %v4063_v53  ;;  %v4065_v47 = vmul.f32 %v17101_v22, %v19210_v28 }
 0x92e   : > { %17104 = vrcp.f32 %v4023_v16  ;;  %v4020_v19 = vpop.xlane.xlu0 %4019  ;;  %v4064_v57 = vmul.f32 %v17103_v61, %v19212_v56 }
 0x92f   : > { %17106 = vrcp.f32 %v4020_v19 }
 0x930   : > { %14530 = vmatprep.mubr.msk.f32.mxu1 %vm1351_vm3, %v4064_v57 }
 0x931   : > { %14531 = vmatmul.mubr.msk.f32.gmra.mrb[74].mxu1 %vm1351_vm3, %v4065_v47 }
 0x938   : > { %v17105_v48 = vpop.eup %17104 }
 0x939   : > { %v17107_v1 = vpop.eup %17106  ;;  %v4067_v59 = vmul.f32 %v17105_v48, %v19218_v60 }
 0x93a   : > { %v4066_v52 = vmul.f32 %v17107_v1, %v19220_v55 }
 0x93c   : > { %14541 = vmatprep.mubr.msk.f32.mxu0 %vm1351_vm3, %v4066_v52 }
 0x93d   : > { %14542 = vmatmul.mubr.msk.f32.vlgmr.msra.gmra.mrb[76].mxu0 %vm1351_vm3, %v4067_v59  ;;  %v4029_v26 = vpop.xlane.xlu1 %4028 }
 0x93e   : > { %15604 = vmatpush3.bf16.msra.mxu0 %v15601_v58  ;;  %17108 = vrcp.f32 %v4029_v26 }
 0x941   : > { %v4026_v56 = vpop.xlane.xlu1 %4025 }
 0x942   : > { %17110 = vrcp.f32 %v4026_v56  ;;  %v4032_v28 = vpop.xlane.xlu0 %4031 }
 0x943   : > { %17112 = vrcp.f32 %v4032_v28 }
 0x946   : > { %v16520_v14 = vpop.permute.xlu0 %16519 }
 0x947   : > { %v16522_v10 = vunpack.i.h.bf16 %v16520_v14  ;;  %v16521_v17 = vunpack.i.l.bf16 %v16520_v14 }
 0x948   : > { %v17109_v27 = vpop.eup %17108 }
 0x949   : > { %v15593_v25 = vpack.c.bf16 %v16522_v10, %v16521_v17  ;;  %v4069_v58 = vmul.f32 %v17109_v27, %v19231_v44 }
 0x94a   : > { %v16530_v39 = vpop.permute.xlu0 %16529 }
 0x94b   : > { %15594 = vmatprep.subr.bf16.mxu1 %v15593_v25  ;;  %v16532_v52 = vunpack.i.h.bf16 %v16530_v39  ;;  %v16531_v59 = vunpack.i.l.bf16 %v16530_v39 }
 0x94c   : > { %v17111_v55 = vpop.eup %17110  ;;  %15596 = vmatpush3.bf16.msra.mxu1 %v15593_v25 }
 0x94d   : > { %v17113_v60 = vpop.eup %17112  ;;  %v4068_v53 = vmul.f32 %v17111_v55, %v19235_v40  ;;  %v4035_v40 = vpop.xlane.xlu1 %4034  ;;  %v15605_v17 = vpack.c.bf16 %v16532_v52, %v16531_v59 }
 0x94e   : > { %v16540_v22 = vpop.permute.xlu0 %16539  ;;  %v4070_v61 = vmul.f32 %v17113_v60, %v19237_v24  ;;  %17114 = vrcp.f32 %v4035_v40 }
 0x94f   : > { %14544 = vmatprep.mubr.msk.f32.mxu0 %vm1351_vm3, %v4068_v53  ;;  %v16541_v40 = vunpack.i.l.bf16 %v16540_v22 }
 0x950   : > { %14545 = vmatmul.mubr.msk.f32.gmra.mrb[78].mxu0 %vm1351_vm3, %v4069_v58  ;;  %14555 = vmatprep.mubr.msk.f32.mxu1 %vm1351_vm3, %v4070_v61 }
 0x951   : > { %v4041_v44 = vpop.xlane.xlu1 %4040 }
 0x952   : > { %v4722_v16 = vpop.permute.xlu0 %4721 }
 0x956   : > { %v16550_v19 = vpop.permute.xlu0 %16549 }
 0x957   : > { %v16552_v57 = vunpack.i.h.bf16 %v16550_v19  ;;  %v16551_v47 = vunpack.i.l.bf16 %v16550_v19 }
 0x958   : > { %v17115_v14 = vpop.eup %17114 }
 0x959   : > { %v19395_v48 = vpack.c.bf16 %v16552_v57, %v16551_v47  ;;  %v4071_v27 = vmul.f32 %v17115_v14, %v19241_v23 }
 0x95a   : > { %v4726_v57 = vpop.permute.xlu0 %4725 }
 0x95b   : > { %15631 = vmatprep.subr.msk.bf16.mxu0 %vm18106_vm1, %v19395_v48 }
 0x977   : > { %v4038_v24 = vpop.xlane.xlu1 %4037 }
 0x978   : > { %17116 = vrcp.f32 %v4038_v24 }
 0x979   : > { %17118 = vrcp.f32 %v4041_v44  ;;  %v16560_v44 = vpop.permute.xlu0 %16559 }
 0x97a   : > { %v16562_v14 = vunpack.i.h.bf16 %v16560_v44 }
 0x97b   : > { %v16525_v1 = vpop.permute.xlu1 %16524 }
 0x97c   : > { %v16527_v26 = vunpack.i.h.bf16 %v16525_v1  ;;  %v16526_v56 = vunpack.i.l.bf16 %v16525_v1 }
 0x97e   : > { %v15597_v28 = vpack.c.bf16 %v16527_v26, %v16526_v56 }
 0x97f   : > { %v16535_v10 = vpop.permute.xlu1 %16534 }
 0x980   : > { %15598 = vmatprep.subr.bf16.mxu1 %v15597_v28  ;;  %v16537_v39 = vunpack.i.h.bf16 %v16535_v10  ;;  %v16536_v58 = vunpack.i.l.bf16 %v16535_v10  ;;  %v16561_v10 = vunpack.i.l.bf16 %v16560_v44 }
 0x981   : > { %15600 = vmatpush3.bf16.msra.mxu1 %v15597_v28 }
 0x982   : > { %v17117_v25 = vpop.eup %17116  ;;  %15607 = vmatprep.subr.msk.bf16.mxu1 %vm18106_vm1, %v15605_v17  ;;  %v15611_v23 = vpack.c.bf16 %v16537_v39, %v16536_v58 }
 0x983   : > { %v17119_v55 = vpop.eup %17118  ;;  %v4720_v60 = vpop.permute.xlu1 %4719  ;;  %v4072_v53 = vmul.f32 %v17117_v25, %v19315_v50  ;;  %v16542_v50 = vunpack.i.h.bf16 %v16540_v22 }
 0x984   : > { %14556 = vmatmul.mubr.msk.f32.vlgmr.msra.gmra.mrb[76].mxu1 %vm1351_vm3, %v4071_v27  ;;  %v4073_v61 = vmul.f32 %v17119_v55, %v19250_v54  ;;  %v4839_v54 = vpop.permute.xlu0 %4838 }
 0x985   : > { %14558 = vmatprep.mubr.msk.f32.mxu1 %vm1351_vm3, %v4072_v53  ;;  %v15617_v1 = vpack.c.bf16 %v16542_v50, %v16541_v40 }
 0x987   : > { %v16545_v19 = vpop.permute.xlu1 %16544 }
 0x988   : > { %14559 = vmatmul.mubr.msk.f32.gmra.mrb[78].mxu1 %vm1351_vm3, %v4073_v61  ;;  %v16547_v52 = vunpack.i.h.bf16 %v16545_v19  ;;  %v16546_v59 = vunpack.i.l.bf16 %v16545_v19  ;;  %v4843_v22 = vpop.permute.xlu0 %4842 }
 0x989   : > { %14597 = vmatprep.mubr.msk.f32.mxu1 %vm890_vm0, %v4720_v60 }
 0x98a   : > { %15610 = vmatpush3.bf16.xpose.msk.msra.mxu1 %vm18106_vm1, %v15605_v17  ;;  %v15623_v56 = vpack.c.bf16 %v16547_v52, %v16546_v59  ;;  %v15641_v17 = vpack.c.bf16 %v16562_v14, %v16561_v10 }
 0x98b   : > { %v4724_v47 = vpop.permute.xlu1 %4723  ;;  %15613 = vmatprep.subr.msk.bf16.mxu1 %vm18106_vm1, %v15611_v23 }
 0x98c   : > { %v4954_v25 = vpop.permute.xlu0 %4953 }
 0x98f   : > { %v16555_v24 = vpop.permute.xlu1 %16554 }
 0x990   : > { %v4958_v60 = vpop.permute.xlu0 %4957  ;;  %v16556_v50 = vunpack.i.l.bf16 %v16555_v24 }
 0x992   : > { %15616 = vmatpush3.bf16.xpose.msk.msra.mxu1 %vm18106_vm1, %v15611_v23 }
 0x993   : > { %15619 = vmatprep.subr.msk.bf16.mxu1 %vm18106_vm1, %v15617_v1  ;;  %v4837_v26 = vpop.permute.xlu1 %4836 }
 0x994   : > { %v5071_v58 = vpop.permute.xlu0 %5070 }
 0x997   : > { %v4841_v28 = vpop.permute.xlu1 %4840 }
 0x999   : > { %14598 = vmatmul.mubr.msk.f32.vlgmr.msra.gmra.mrb[80].mxu1 %vm890_vm0, %v4722_v16 }
 0x99a   : > { %14600 = vmatprep.mubr.msk.f32.mxu1 %vm890_vm0, %v4724_v47  ;;  %15622 = vmatpush3.bf16.xpose.msk.msra.mxu1 %vm18106_vm1, %v15617_v1  ;;  %v16557_v47 = vunpack.i.h.bf16 %v16555_v24 }
 0x99b   : > { %15625 = vmatprep.subr.msk.bf16.mxu1 %vm18106_vm1, %v15623_v56  ;;  %v16565_v27 = vpop.permute.xlu1 %16564 }
 0x99c   : > { %v16567_v16 = vunpack.i.h.bf16 %v16565_v27  ;;  %v16566_v55 = vunpack.i.l.bf16 %v16565_v27  ;;  %v15635_v1 = vpack.c.bf16 %v16557_v47, %v16556_v50 }
 0x99d   : > { %14601 = vmatmul.mubr.msk.f32.gmra.mrb[82].mxu1 %vm890_vm0, %v4726_v57  ;;  %v5075_v57 = vpop.permute.xlu0 %5074 }
 0x99e   : > { %14611 = vmatprep.mubr.msk.f32.mxu1 %vm890_vm0, %v4837_v26  ;;  %v15647_v53 = vpack.c.bf16 %v16567_v16, %v16566_v55 }
 0x99f   : > { %v4956_v39 = vpop.permute.xlu1 %4955 }
 0x9a2   : > { %15628 = vmatpush3.bf16.xpose.msk.msra.mxu1 %vm18106_vm1, %v15623_v56 }
 0x9a3   : > { %15643 = vmatprep.subr.msk.bf16.mxu1 %vm18106_vm1, %v15641_v17  ;;  %v4960_v61 = vpop.permute.xlu1 %4959 }
 0x9a7   : > { %v5073_v19 = vpop.permute.xlu1 %5072 }
 0x9a9   : > { %14612 = vmatmul.mubr.msk.f32.vlgmr.msra.gmra.mrb[84].mxu1 %vm890_vm0, %v4839_v54 }
 0x9aa   : > { %14614 = vmatprep.mubr.msk.f32.mxu1 %vm890_vm0, %v4841_v28  ;;  %15646 = vmatpush3.bf16.xpose.msk.msra.mxu1 %vm18106_vm1, %v15641_v17 }
 0x9ab   : > { %15649 = vmatprep.subr.msk.bf16.mxu1 %vm18106_vm1, %v15647_v53  ;;  %v5077_v23 = vpop.permute.xlu1 %5076 }
 0x9ad   : > { %14615 = vmatmul.mubr.msk.f32.gmra.mrb[86].mxu1 %vm890_vm0, %v4843_v22 }
 0x9ae   : > { %14639 = vmatprep.mubr.msk.f32.mxu1 %vm890_vm0, %v5071_v58 }
 0x9b2   : > { %15652 = vmatpush3.bf16.xpose.msk.msra.mxu1 %vm18106_vm1, %v15647_v53 }
 0x9b9   : > { %14640 = vmatmul.mubr.msk.f32.vlgmr.msra.gmra.mrb[88].mxu1 %vm890_vm0, %v5073_v19 }
 0x9ba   : > { %14642 = vmatprep.mubr.msk.f32.mxu1 %vm890_vm0, %v5075_v57 }
 0x9bd   : > { %14643 = vmatmul.mubr.msk.f32.gmra.mrb[90].mxu1 %vm890_vm0, %v5077_v23 }
 0x9f0   : > { %v14515_v40 = vpop.f32.mrb[72].mxu0 }
 0x9f1   : > { %v4164_v44 = vpop.f32.mrb[73].mxu0 }
 0x9f2   : > { %14565 = vmatprep.mubr.msk.f32.mxu0 %vm890_vm0, %v4164_v44 }
 0x9f3   : > { %14566 = vmatmul.mubr.msk.f32.vlgmr.msra.gmra.mrb[56].mxu0 %vm890_vm0, %v14515_v40 }
 0x9f4   : > { %15634 = vmatpush3.bf16.xpose.msk.msra.mxu0 %vm18106_vm1, %v19395_v48 }
 0x9f5   : > { %15637 = vmatprep.subr.msk.bf16.mxu0 %vm18106_vm1, %v15635_v1 }
 0x9f8   : > { %v14518_v54 = vpop.f32.mrb[74].mxu0 }
 0x9f9   : > { %v4174_v52 = vpop.f32.mrb[75].mxu0 }
 0x9fa   : > { %14568 = vmatprep.mubr.msk.f32.mxu0 %vm890_vm0, %v4174_v52 }
 0x9fb   : > { %14569 = vmatmul.mubr.msk.f32.gmra.mrb[58].mxu0 %vm890_vm0, %v14518_v54 }
 0x9fc   : > { %15640 = vmatpush3.bf16.xpose.msk.msra.mxu0 %vm18106_vm1, %v15635_v1 }
 0xa00   : > { %v14529_v24 = vpop.f32.mrb[72].mxu1 }
 0xa01   : > { %v4273_v59 = vpop.f32.mrb[73].mxu1 }
 0xa02   : > { %14571 = vmatprep.mubr.msk.f32.mxu0 %vm890_vm0, %v4273_v59 }
 0xa03   : > { %14572 = vmatmul.mubr.msk.f32.gmra.mrb[60].mxu0 %vm890_vm0, %v14529_v24 }
 0xa04   : > { %v14532_v26 = vpop.f32.mrb[74].mxu1 }
 0xa05   : > { %v4283_v48 = vpop.f32.mrb[75].mxu1 }
 0xa06   : > { %14574 = vmatprep.mubr.msk.f32.mxu0 %vm890_vm0, %v4283_v48 }
 0xa07   : > { %14575 = vmatmul.mubr.msk.f32.gmra.mrb[62].mxu0 %vm890_vm0, %v14532_v26 }
 0xa10   : > { %v14543_v56 = vpop.f32.mrb[76].mxu0 }
 0xa11   : > { %v4382_v22 = vpop.f32.mrb[77].mxu0 }
 0xa12   : > { %14577 = vmatprep.mubr.msk.f32.mxu0 %vm890_vm0, %v4382_v22 }
 0xa13   : > { %14578 = vmatmul.mubr.msk.f32.gmra.mrb[64].mxu0 %vm890_vm0, %v14543_v56 }
 0xa23   : > { %v14546_v28 = vpop.f32.mrb[78].mxu0 }
 0xa24   : > { %v4392_v14 = vpop.f32.mrb[79].mxu0 }
 0xa25   : > { %14580 = vmatprep.mubr.msk.f32.mxu0 %vm890_vm0, %v4392_v14 }
 0xa26   : > { %14581 = vmatmul.mubr.msk.f32.gmra.mrb[66].mxu0 %vm890_vm0, %v14546_v28 }
 0xa57   : > { %v14557_v10 = vpop.f32.mrb[76].mxu1 }
 0xa58   : > { %v4491_v17 = vpop.f32.mrb[77].mxu1 }
 0xa59   : > { %14583 = vmatprep.mubr.msk.f32.mxu0 %vm890_vm0, %v4491_v17 }
 0xa5a   : > { %14584 = vmatmul.mubr.msk.f32.gmra.mrb[68].mxu0 %vm890_vm0, %v14557_v10 }
 0xa5b   : > { %v14560_v27 = vpop.f32.mrb[78].mxu1 }
 0xa5c   : > { %v4501_v16 = vpop.f32.mrb[79].mxu1 }
 0xa5d   : > { %14586 = vmatprep.mubr.msk.f32.mxu0 %vm890_vm0, %v4501_v16 }
 0xa5e   : > { %14587 = vmatmul.mubr.msk.f32.gmra.mrb[70].mxu0 %vm890_vm0, %v14560_v27 }
 0xa5f   : > { %14625 = vmatprep.mubr.msk.f32.mxu0 %vm890_vm0, %v4954_v25 }
 0xa62   : > { %14626 = vmatmul.mubr.msk.f32.vlgmr.msra.gmra.mrb[80].mxu0 %vm890_vm0, %v4956_v39 }
 0xa63   : > { %14628 = vmatprep.mubr.msk.f32.mxu0 %vm890_vm0, %v4958_v60 }
 0xa66   : > { %14629 = vmatmul.mubr.msk.f32.gmra.mrb[82].mxu0 %vm890_vm0, %v4960_v61 }
 0xa6c   : > { %v14599_v55 = vpop.f32.mrb[80].mxu1 }
 0xa6d   : > { %v5188_v53 = vsel %vm18294_vm4, %v14599_v55, -1e+30  ;;  %v4817_v58 = vpop.f32.mrb[81].mxu1 }
 0xa6e   : > { %v5206_v19 = vsel %vm1351_vm3, %v5188_v53, -inf  ;;  %v5187_v57 = vsel %vm18289_vm2, %v4817_v58, -1e+30 }
 0xa6f   : > { %v5203_v23 = vsel %vm1351_vm3, %v5187_v57, -inf  ;;  %5207 = vmax.xlane.f32.xlu1 %v5206_v19 }
 0xa70   : > { %5204 = vmax.xlane.f32.xlu0 %v5203_v23  ;;  %v14602_v25 = vpop.f32.mrb[82].mxu1 }
 0xa71   : > { %v5190_v60 = vsel %vm18308_vm6, %v14602_v25, -1e+30  ;;  %v4827_v39 = vpop.f32.mrb[83].mxu1 }
 0xa72   : > { %v5212_v61 = vsel %vm1351_vm3, %v5190_v60, -inf  ;;  %v5189_v47 = vsel %vm18302_vm5, %v4827_v39, -1e+30 }
 0xa73   : > { %v5209_v50 = vsel %vm1351_vm3, %v5189_v47, -inf }
 0xa74   : > { %5213 = vmax.xlane.f32.xlu0 %v5212_v61 }
 0xa78   : > { %5210 = vmax.xlane.f32.xlu0 %v5209_v50 }
 0xa7c   : > { %v14613_v40 = vpop.f32.mrb[84].mxu1 }
 0xa7d   : > { %v5192_v44 = vsel %vm18294_vm4, %v14613_v40, -1e+30  ;;  %v4934_v1 = vpop.f32.mrb[85].mxu1 }
 0xa7e   : > { %v5218_v54 = vsel %vm1351_vm3, %v5192_v44, -inf  ;;  %v5191_v52 = vsel %vm18289_vm2, %v4934_v1, -1e+30 }
 0xa7f   : > { %v5215_v24 = vsel %vm1351_vm3, %v5191_v52, -inf  ;;  %5219 = vmax.xlane.f32.xlu1 %v5218_v54 }
 0xa80   : > { %5216 = vmax.xlane.f32.xlu0 %v5215_v24  ;;  %v14616_v59 = vpop.f32.mrb[86].mxu1 }
 0xa81   : > { %v5194_v26 = vsel %vm18308_vm6, %v14616_v59, -1e+30  ;;  %v4944_v48 = vpop.f32.mrb[87].mxu1 }
 0xa82   : > { %v5224_v56 = vsel %vm1351_vm3, %v5194_v26, -inf  ;;  %v5193_v22 = vsel %vm18302_vm5, %v4944_v48, -1e+30 }
 0xa83   : > { %v5221_v28 = vsel %vm1351_vm3, %v5193_v22, -inf  ;;  %5225 = vmax.xlane.f32.xlu1 %v5224_v56 }
 0xa84   : > { %5222 = vmax.xlane.f32.xlu0 %v5221_v28 }
 0xa8c   : > { %v14641_v14 = vpop.f32.mrb[88].mxu1 }
 0xa8d   : > { %v19495_v10 = vsel %vm18294_vm4, %v14641_v14, -1e+30  ;;  %v5168_v17 = vpop.f32.mrb[89].mxu1 }
 0xa8e   : > { %v5242_v27 = vsel %vm1351_vm3, %v19495_v10, -inf  ;;  %v19501_v16 = vsel %vm18289_vm2, %v5168_v17, -1e+30 }
 0xa8f   : > { %v5239_v55 = vsel %vm1351_vm3, %v19501_v16, -inf  ;;  %5243 = vmax.xlane.f32.xlu1 %v5242_v27 }
 0xa90   : > { %5240 = vmax.xlane.f32.xlu0 %v5239_v55  ;;  %v14644_v58 = vpop.f32.mrb[90].mxu1 }
 0xa91   : > { %v19507_v19 = vsel %vm18308_vm6, %v14644_v58, -1e+30  ;;  %v5178_v23 = vpop.f32.mrb[91].mxu1 }
 0xa92   : > { %v5248_v25 = vsel %vm1351_vm3, %v19507_v19, -inf  ;;  %v19513_v39 = vsel %vm18302_vm5, %v5178_v23, -1e+30 }
 0xa93   : > { %v5245_v61 = vsel %vm1351_vm3, %v19513_v39, -inf  ;;  %5249 = vmax.xlane.f32.xlu1 %v5248_v25 }
 0xa94   : > { %5246 = vmax.xlane.f32.xlu0 %v5245_v61 }
 0xafc   : > { %v5208_v50 = vpop.xlane.xlu1 %5207 }
 0xafd   : > { %v5252_v40 = vsub.f32 %v5188_v53, %v5208_v50  ;;  %v5205_v1 = vpop.xlane.xlu0 %5204 }
 0xafe   : > { %v5251_v54 = vsub.f32 %v5187_v57, %v5205_v1 }
 0xaff   : > { %v5269_v24 = vmul.f32 1.442695, %v5252_v40 }
 0xb00   : > { %v5267_v59 = vmul.f32 1.442695, %v5251_v54 }
 0xb01   : > { %17120 = vpow2.f32 %v5269_v24  ;;  %v5214_v48 = vpop.xlane.xlu0 %5213 }
 0xb02   : > { %17122 = vpow2.f32 %v5267_v59  ;;  %v5254_v56 = vsub.f32 %v5190_v60, %v5214_v48 }
 0xb04   : > { %v5273_v28 = vmul.f32 1.442695, %v5254_v56 }
 0xb05   : > { %v5211_v14 = vpop.xlane.xlu0 %5210 }
 0xb06   : > { %17124 = vpow2.f32 %v5273_v28  ;;  %v5253_v17 = vsub.f32 %v5189_v47, %v5211_v14 }
 0xb08   : > { %v5271_v27 = vmul.f32 1.442695, %v5253_v17 }
 0xb0a   : > { %17126 = vpow2.f32 %v5271_v27 }
 0xb0b   : > { %v19517_v55 = vpop.eup %17120 }
 0xb0c   : > { %v19519_v58 = vpop.eup %17122  ;;  %v5220_v23 = vpop.xlane.xlu1 %5219  ;;  %v5302_v53 = vsel %vm1351_vm3, %v19517_v55, 0.0 }
 0xb0d   : > { %v5256_v57 = vsub.f32 %v5192_v44, %v5220_v23  ;;  %v5217_v25 = vpop.xlane.xlu0 %5216  ;;  %5303 = vadd.xlane.f32.xlu1 %v5302_v53  ;;  %v5299_v60 = vsel %vm1351_vm3, %v19519_v58, 0.0 }
 0xb0e   : > { %v5255_v61 = vsub.f32 %v5191_v52, %v5217_v25  ;;  %5300 = vadd.xlane.f32.xlu0 %v5299_v60 }
 0xb0f   : > { %v5277_v50 = vmul.f32 1.442695, %v5256_v57 }
 0xb10   : > { %v19525_v47 = vpop.eup %17124  ;;  %v5275_v40 = vmul.f32 1.442695, %v5255_v61  ;;  %v5226_v1 = vpop.xlane.xlu1 %5225 }
 0xb11   : > { %17128 = vpow2.f32 %v5277_v50  ;;  %v5258_v54 = vsub.f32 %v5194_v26, %v5226_v1  ;;  %v5223_v24 = vpop.xlane.xlu0 %5222  ;;  %v5308_v59 = vsel %vm1351_vm3, %v19525_v47, 0.0 }
 0xb12   : > { %17130 = vpow2.f32 %v5275_v40  ;;  %v5257_v44 = vsub.f32 %v5193_v22, %v5223_v24  ;;  %5309 = vadd.xlane.f32.xlu1 %v5308_v59 }
 0xb13   : > { %v5281_v48 = vmul.f32 1.442695, %v5258_v54 }
 0xb14   : > { %v19529_v56 = vpop.eup %17126  ;;  %v5279_v28 = vmul.f32 1.442695, %v5257_v44 }
 0xb15   : > { %17132 = vpow2.f32 %v5281_v48  ;;  %v5305_v52 = vsel %vm1351_vm3, %v19529_v56, 0.0 }
 0xb16   : > { %17134 = vpow2.f32 %v5279_v28  ;;  %5306 = vadd.xlane.f32.xlu0 %v5305_v52 }
 0xb1b   : > { %v19533_v14 = vpop.eup %17128 }
 0xb1c   : > { %v19535_v26 = vpop.eup %17130  ;;  %v5314_v17 = vsel %vm1351_vm3, %v19533_v14, 0.0 }
 0xb1d   : > { %5315 = vadd.xlane.f32.xlu1 %v5314_v17  ;;  %v5311_v22 = vsel %vm1351_vm3, %v19535_v26, 0.0  ;;  %v5241_v52 = vpop.xlane.xlu0 %5240  ;;  %v5244_v17 = vpop.xlane.xlu1 %5243 }
 0xb1e   : > { %5312 = vadd.xlane.f32.xlu0 %v5311_v22  ;;  %v5264_v22 = vsub.f32 %v19495_v10, %v5244_v17 }
 0xb1f   : > { %v19541_v27 = vpop.eup %17132 }
 0xb20   : > { %v19543_v23 = vpop.eup %17134  ;;  %v5320_v53 = vsel %vm1351_vm3, %v19541_v27, 0.0 }
 0xb21   : > { %5321 = vadd.xlane.f32.xlu1 %v5320_v53  ;;  %v5317_v57 = vsel %vm1351_vm3, %v19543_v23, 0.0  ;;  %v5263_v53 = vsub.f32 %v19501_v16, %v5241_v52 }
 0xb22   : > { %5318 = vadd.xlane.f32.xlu0 %v5317_v57  ;;  %v5247_v57 = vpop.xlane.xlu0 %5246 }
 0xb35   : > { %v14627_v25 = vpop.f32.mrb[80].mxu0 }
 0xb36   : > { %v19551_v60 = vsel %vm18294_vm4, %v14627_v25, -1e+30  ;;  %v5051_v61 = vpop.f32.mrb[81].mxu0  ;;  %v5293_v25 = vmul.f32 1.442695, %v5264_v22 }
 0xb37   : > { %v5230_v50 = vsel %vm1351_vm3, %v19551_v60, -inf  ;;  %v19557_v40 = vsel %vm18289_vm2, %v5051_v61, -1e+30  ;;  %v5265_v61 = vsub.f32 %v19513_v39, %v5247_v57 }
 0xb38   : > { %v5227_v1 = vsel %vm1351_vm3, %v19557_v40, -inf  ;;  %5231 = vmax.xlane.f32.xlu1 %v5230_v50  ;;  %v5291_v50 = vmul.f32 1.442695, %v5263_v53  ;;  %17136 = vpow2.f32 %v5293_v25 }
 0xb39   : > { %5228 = vmax.xlane.f32.xlu0 %v5227_v1  ;;  %v14630_v54 = vpop.f32.mrb[82].mxu0  ;;  %v5250_v1 = vpop.xlane.xlu1 %5249 }
 0xb3a   : > { %v19563_v24 = vsel %vm18308_vm6, %v14630_v54, -1e+30  ;;  %v5061_v59 = vpop.f32.mrb[83].mxu0  ;;  %v5266_v54 = vsub.f32 %v19507_v19, %v5250_v1  ;;  %17138 = vpow2.f32 %v5291_v50 }
 0xb3b   : > { %v5236_v44 = vsel %vm1351_vm3, %v19563_v24, -inf  ;;  %v19569_v48 = vsel %vm18302_vm5, %v5061_v59, -1e+30  ;;  %v5295_v59 = vmul.f32 1.442695, %v5265_v61 }
 0xb3c   : > { %v5233_v28 = vsel %vm1351_vm3, %v19569_v48, -inf  ;;  %5237 = vmax.xlane.f32.xlu1 %v5236_v44  ;;  %v5297_v44 = vmul.f32 1.442695, %v5266_v54 }
 0xb3d   : > { %5234 = vmax.xlane.f32.xlu0 %v5233_v28  ;;  %17140 = vpow2.f32 %v5295_v59 }
 0xb3e   : > { %17142 = vpow2.f32 %v5297_v44 }
 0xb42   : > { %v19581_v28 = vpop.eup %17136 }
 0xb43   : > { %v5338_v10 = vsel %vm1351_vm3, %v19581_v28, 0.0 }
 0xb4d   : > { %16574 = vrot.lane.b32.xlu1 %v21867_v62, %s17752_s11 }
 0xb53   : > { %16569 = vrot.lane.b32.xlu0 %v21865_v46, %s17752_s11  ;;  %v19583_v46 = vpop.eup %17138 }
 0xb54   : > { %v19587_v16 = vpop.eup %17140  ;;  %v5335_v39 = vsel %vm1351_vm3, %v19583_v46, 0.0 }
 0xb55   : > { %v5341_v19 = vsel %vm1351_vm3, %v19587_v16, 0.0  ;;  %v19593_v52 = vpop.eup %17142 }
 0xb56   : > { %v5344_v17 = vsel %vm1351_vm3, %v19593_v52, 0.0 }
 0xb71   : > { %5339 = vadd.xlane.f32.xlu1 %v5338_v10 }
 0xb72   : > { %5336 = vadd.xlane.f32.xlu0 %v5335_v39 }
 0xb75   : > { %5342 = vadd.xlane.f32.xlu1 %v5341_v19 }
 0xb79   : > { %5345 = vadd.xlane.f32.xlu1 %v5344_v17 }
 0xb88   : > { %16579 = vrot.lane.b32.xlu0 %v18261_v43, %s17752_s11 }
 0xb8a   : > { %16584 = vrot.lane.b32.xlu1 %v21847_v37, %s17752_s11 }
 0xb8c   : > { %16589 = vrot.lane.b32.xlu0 %v21866_v12, %s17752_s11 }
 0xb90   : > { %16594 = vrot.lane.b32.xlu0 %v21868_v3, %s17752_s11 }
 0xb9a   : > { %v5304_v25 = vpop.xlane.xlu1 %5303 }
 0xb9b   : > { %v5301_v22 = vpop.xlane.xlu0 %5300 }
 0xb9c   : > { %17144 = vrcp.f32 %v5301_v22 }
 0xb9d   : > { %17146 = vrcp.f32 %v5304_v25 }
 0xb9f   : > { %v5310_v61 = vpop.xlane.xlu1 %5309 }
 0xba3   : > { %v5307_v50 = vpop.xlane.xlu0 %5306 }
 0xba6   : > { %v17145_v53 = vpop.eup %17144 }
 0xba7   : > { %v5363_v57 = vmul.f32 %v17145_v53, %v19519_v58 }
 0xba9   : > { %14653 = vmatprep.mubr.msk.f32.mxu0 %vm1351_vm3, %v5363_v57 }
 0xbaa   : > { %v19607_v1 = vpop.xlane.xlu1 %5315 }
 0xbab   : > { %v5313_v54 = vpop.xlane.xlu0 %5312 }
 0xbae   : > { %v19609_v59 = vpop.xlane.xlu1 %5321 }
 0xbaf   : > { %v19611_v44 = vpop.xlane.xlu0 %5318 }
 0xbc5   : > { %v5232_v10 = vpop.xlane.xlu1 %5231 }
 0xbc6   : > { %v5260_v39 = vsub.f32 %v19551_v60, %v5232_v10  ;;  %v5229_v19 = vpop.xlane.xlu0 %5228 }
 0xbc7   : > { %v5259_v17 = vsub.f32 %v19557_v40, %v5229_v19 }
 0xbc8   : > { %v5285_v22 = vmul.f32 1.442695, %v5260_v39 }
 0xbc9   : > { %v5283_v58 = vmul.f32 1.442695, %v5259_v17  ;;  %v5238_v53 = vpop.xlane.xlu1 %5237  ;;  %v17147_v17 = vpop.eup %17146 }
 0xbca   : > { %17148 = vpow2.f32 %v5285_v22  ;;  %v5262_v57 = vsub.f32 %v19563_v24, %v5238_v53  ;;  %v5235_v3 = vpop.xlane.xlu0 %5234 }
 0xbcb   : > { %17150 = vpow2.f32 %v5283_v58  ;;  %v5261_v12 = vsub.f32 %v19569_v48, %v5235_v3 }
 0xbcc   : > { %17152 = vrcp.f32 %v5310_v61  ;;  %v5289_v37 = vmul.f32 1.442695, %v5262_v57  ;;  %v5364_v61 = vmul.f32 %v17147_v17, %v19517_v55 }
 0xbcd   : > { %17154 = vrcp.f32 %v5307_v50  ;;  %v5287_v43 = vmul.f32 1.442695, %v5261_v12  ;;  %v16575_v62 = vpop.permute.xlu1 %16574 }
 0xbce   : > { %17156 = vpow2.f32 %v5289_v37  ;;  %v16570_v60 = vpop.permute.xlu0 %16569  ;;  %v16577_v10 = vunpack.i.h.bf16 %v16575_v62  ;;  %v16576_v40 = vunpack.i.l.bf16 %v16575_v62 }
 0xbcf   : > { %v16572_v39 = vunpack.i.h.bf16 %v16570_v60  ;;  %v16571_v25 = vunpack.i.l.bf16 %v16570_v60  ;;  %17158 = vpow2.f32 %v5287_v43 }
 0xbd0   : > { %17160 = vrcp.f32 %v5313_v54  ;;  %v15657_v24 = vpack.c.bf16 %v16577_v10, %v16576_v40 }
 0xbd1   : > { %v15653_v19 = vpack.c.bf16 %v16572_v39, %v16571_v25  ;;  %17162 = vrcp.f32 %v19607_v1 }
 0xbd2   : > { %17164 = vrcp.f32 %v19611_v44 }
 0xbd3   : > { %15654 = vmatprep.subr.bf16.mxu0 %v15653_v19  ;;  %17166 = vrcp.f32 %v19609_v59 }
 0xbd4   : > { %v19617_v22 = vpop.eup %17148  ;;  %15656 = vmatpush3.bf16.msra.mxu0 %v15653_v19 }
 0xbd5   : > { %v19619_v3 = vpop.eup %17150  ;;  %15658 = vmatprep.subr.bf16.mxu0 %v15657_v24  ;;  %v5326_v37 = vsel %vm1351_vm3, %v19617_v22, 0.0 }
 0xbd6   : > { %v17153_v12 = vpop.eup %17152  ;;  %5327 = vadd.xlane.f32.xlu1 %v5326_v37  ;;  %v5323_v62 = vsel %vm1351_vm3, %v19619_v3, 0.0 }
 0xbd7   : > { %v17155_v43 = vpop.eup %17154  ;;  %5324 = vadd.xlane.f32.xlu0 %v5323_v62  ;;  %v5366_v60 = vmul.f32 %v17153_v12, %v19525_v47 }
 0xbd8   : > { %v19625_v48 = vpop.eup %17156  ;;  %15660 = vmatpush3.bf16.msra.mxu0 %v15657_v24  ;;  %v5365_v58 = vmul.f32 %v17155_v43, %v19529_v56 }
 0xbd9   : > { %v5332_v50 = vsel %vm1351_vm3, %v19625_v48, 0.0  ;;  %v19630_v54 = vpop.eup %17158 }
 0xbda   : > { %5333 = vadd.xlane.f32.xlu1 %v5332_v50  ;;  %v17161_v53 = vpop.eup %17160  ;;  %v5329_v57 = vsel %vm1351_vm3, %v19630_v54, 0.0 }
 0xbdb   : > { %14654 = vmatmul.mubr.msk.f32.vlgmr.msra.gmra.mrb[84].mxu0 %vm1351_vm3, %v5364_v61  ;;  %v5367_v55 = vmul.f32 %v17161_v53, %v19535_v26 }
 0xbdc   : > { %14656 = vmatprep.mubr.msk.f32.mxu0 %vm1351_vm3, %v5365_v58  ;;  %v17163_v58 = vpop.eup %17162 }
 0xbde   : > { %5330 = vadd.xlane.f32.xlu1 %v5329_v57  ;;  %v17165_v57 = vpop.eup %17164 }
 0xbdf   : > { %14657 = vmatmul.mubr.msk.f32.gmra.mrb[86].mxu0 %vm1351_vm3, %v5366_v60  ;;  %v5368_v60 = vmul.f32 %v17163_v58, %v19533_v14 }
 0xbe0   : > { %14667 = vmatprep.mubr.msk.f32.mxu0 %vm1351_vm3, %v5367_v55  ;;  %v17167_v55 = vpop.eup %17166 }
 0xbe1   : > { %v5370_v14 = vmul.f32 %v17167_v55, %v19541_v27 }
 0xbed   : > { %16599 = vrot.lane.b32.xlu0 %v21845_v31, %s17752_s11 }
 0xbef   : > { %16604 = vrot.lane.b32.xlu1 %v21894_v2, %s17752_s11  ;;  %s21650_s11 = scalar_lea.hbm %s21935_s29, %s13264_s17 }
 0xbf1   : > { %16609 = vrot.lane.b32.xlu0 %v21869_v35, %s17753_s10 }
 0xbf3   : > { %16614 = vrot.lane.b32.xlu1 %v21895_v8, %s17753_s10 }
 0xbf5   : > { %16619 = vrot.lane.b32.xlu0 %v21870_v33, %s17753_s10 }
 0xbf7   : > { %6024 = vrot.lane.b32.xlu1 %v21896_v13, %s17753_s10 }
 0xbf9   : > { %6026 = vrot.lane.b32.xlu0 %v21872_v20, %s17753_s10 }
 0xbfb   : > { %16624 = vrot.lane.b32.xlu1 %v21897_v7, %s17753_s10 }
 0xbfd   : > { %16629 = vrot.lane.b32.xlu0 %v21875_v32, %s17753_s10 }
 0xbfe   : > { %v19659_v47 = vpop.xlane.xlu1 %5339 }
 0xbff   : > { %6028 = vrot.lane.b32.xlu1 %v21898_v45, %s17753_s10  ;;  %v5337_v56 = vpop.xlane.xlu0 %5336 }
 0xc00   : > { %17168 = vrcp.f32 %v5337_v56  ;;  %v5369_v56 = vmul.f32 %v17165_v57, %v19543_v23  ;;  %v21903_v23 = vld [vmem:[#allocation35_spill] sm:$0xff] }
 0xc01   : > { %6030 = vrot.lane.b32.xlu0 %v21878_v0, %s17753_s10 }
 0xc02   : > { %v19665_v26 = vpop.xlane.xlu1 %5342 }
 0xc03   : > { %16634 = vrot.lane.b32.xlu1 %v21899_v42, %s17753_s10  ;;  %v16580_v10 = vpop.permute.xlu0 %16579 }
 0xc04   : > { %v16582_v40 = vunpack.i.h.bf16 %v16580_v10  ;;  %v16581_v39 = vunpack.i.l.bf16 %v16580_v10 }
 0xc05   : > { %16639 = vrot.lane.b32.xlu0 %v21881_v5, %s17753_s10 }
 0xc06   : > { %v19673_v25 = vpop.xlane.xlu1 %5345  ;;  %v15661_v19 = vpack.c.bf16 %v16582_v40, %v16581_v39  ;;  %v21904_v39 = vld [vmem:[#allocation37_spill] sm:$0xff] }
 0xc07   : > { %6141 = vrot.lane.b32.xlu1 %v21900_v18, %s17753_s10  ;;  %v16590_v17 = vpop.permute.xlu0 %16589 }
 0xc08   : > { %v16592_v24 = vunpack.i.h.bf16 %v16590_v17  ;;  %v16591_v37 = vunpack.i.l.bf16 %v16590_v17  ;;  %15662 = vmatprep.subr.bf16.mxu0 %v15661_v19 }
 0xc09   : > { %6143 = vrot.lane.b32.xlu0 %v21884_v6, %s17753_s10  ;;  %15664 = vmatpush3.bf16.msra.mxu0 %v15661_v19 }
 0xc0a   : > { %v16585_v1 = vpop.permute.xlu1 %16584  ;;  %v15669_v44 = vpack.c.bf16 %v16592_v24, %v16591_v37  ;;  %v17169_v10 = vpop.eup %17168 }
 0xc0b   : > { %v16587_v12 = vunpack.i.h.bf16 %v16585_v1  ;;  %v16586_v62 = vunpack.i.l.bf16 %v16585_v1  ;;  %6145 = vrot.lane.b32.xlu1 %v21901_v49, %s17753_s10  ;;  %v16595_v43 = vpop.permute.xlu0 %16594  ;;  %v5375_v40 = vmul.f32 %v17169_v10, %v19583_v46 }
 0xc0c   : > { %v16597_v61 = vunpack.i.h.bf16 %v16595_v43  ;;  %v16596_v50 = vunpack.i.l.bf16 %v16595_v43  ;;  %15670 = vmatprep.subr.bf16.mxu1 %v15669_v44 }
 0xc0d   : > { %6147 = vrot.lane.b32.xlu0 %v21887_v51, %s17753_s10  ;;  %15672 = vmatpush3.bf16.msra.mxu1 %v15669_v44  ;;  %v15665_v59 = vpack.c.bf16 %v16587_v12, %v16586_v62 }
 0xc0e   : > { %v15673_v53 = vpack.c.bf16 %v16597_v61, %v16596_v50 }
 0xc0f   : > { %16644 = vrot.lane.b32.xlu1 %v18234_v36, %s17753_s10  ;;  %15666 = vmatprep.subr.bf16.mxu0 %v15665_v59 }
 0xc10   : > { %15668 = vmatpush3.bf16.msra.mxu0 %v15665_v59  ;;  %15674 = vmatprep.subr.bf16.mxu1 %v15673_v53 }
 0xc11   : > { %6258 = vrot.lane.b32.xlu0 %v21890_v34, %s17753_s10  ;;  %15676 = vmatpush3.bf16.msra.mxu1 %v15673_v53  ;;  %v881_v53 = vld [vmem:[#allocation7 + $0x38] sm:$0xff] }
 0xc13   : > { %6260 = vrot.lane.b32.xlu1 %v21902_v38, %s17753_s10  ;;  %14668 = vmatmul.mubr.msk.f32.vlgmr.msra.gmra.mrb[88].mxu0 %vm1351_vm3, %v5368_v60 }
 0xc14   : > { %14670 = vmatprep.mubr.msk.f32.mxu0 %vm1351_vm3, %v5369_v56 }
 0xc15   : > { %6262 = vrot.lane.b32.xlu0 %v18192_v9, %s17753_s10 }
 0xc17   : > { %6264 = vrot.lane.b32.xlu1 %v21846_v41, %s17753_s10  ;;  %14671 = vmatmul.mubr.msk.f32.gmra.mrb[90].mxu0 %vm1351_vm3, %v5370_v14 }
 0xc18   : > { %14695 = vmatprep.mubr.msk.f32.mxu0 %vm1351_vm3, %v5375_v40 }
 0xc19   : > { %6375 = vrot.lane.b32.xlu0 %v21903_v23, %s17753_s10 }
 0xc1b   : > { %6377 = vrot.lane.b32.xlu1 %v18216_v21, %s17753_s10 }
 0xc1d   : > { %6379 = vrot.lane.b32.xlu0 %v21904_v39, %s17753_s10 }
 0xc1f   : > { %6381 = vrot.lane.b32.xlu1 %v18230_v29, %s17753_s10 }
 0xc63   : > { %v5328_v46 = vpop.xlane.xlu1 %5327 }
 0xc64   : > { %17170 = vrcp.f32 %v5328_v46  ;;  %v5325_v27 = vpop.xlane.xlu0 %5324 }
 0xc65   : > { %17172 = vrcp.f32 %v5325_v27 }
 0xc66   : > { %17174 = vrcp.f32 %v19659_v47  ;;  %v880_v47 = vld [vmem:[#allocation7 + $0x30] sm:$0xff] }
 0xc67   : > { %v5334_v19 = vpop.xlane.xlu1 %5333  ;;  %17176 = vrcp.f32 %v19665_v26  ;;  %v15685_v10 = vpack.c.bf16 %v881_v53, %v880_v47 }
 0xc68   : > { %v16600_v17 = vpop.permute.xlu0 %16599  ;;  %17178 = vrcp.f32 %v5334_v19 }
 0xc69   : > { %v16602_v24 = vunpack.i.h.bf16 %v16600_v17  ;;  %v16601_v37 = vunpack.i.l.bf16 %v16600_v17 }
 0xc6b   : > { %v5331_v1 = vpop.xlane.xlu1 %5330  ;;  %v15677_v44 = vpack.c.bf16 %v16602_v24, %v16601_v37 }
 0xc6c   : > { %17180 = vrcp.f32 %v5331_v1  ;;  %v16610_v12 = vpop.permute.xlu0 %16609 }
 0xc6d   : > { %17182 = vrcp.f32 %v19673_v25  ;;  %v16612_v62 = vunpack.i.h.bf16 %v16610_v12  ;;  %v16611_v43 = vunpack.i.l.bf16 %v16610_v12  ;;  %15678 = vmatprep.subr.bf16.mxu0 %v15677_v44 }
 0xc6e   : > { %v17171_v61 = vpop.eup %17170  ;;  %15680 = vmatpush3.bf16.msra.mxu0 %v15677_v44 }
 0xc6f   : > { %v17173_v50 = vpop.eup %17172  ;;  %v15689_v59 = vpack.c.bf16 %v16612_v62, %v16611_v43  ;;  %v16605_v58 = vpop.permute.xlu1 %16604  ;;  %v5372_v56 = vmul.f32 %v17171_v61, %v19617_v22 }
 0xc70   : > { %v16607_v57 = vunpack.i.h.bf16 %v16605_v58  ;;  %v16606_v60 = vunpack.i.l.bf16 %v16605_v58  ;;  %v16620_v26 = vpop.permute.xlu0 %16619  ;;  %v5371_v55 = vmul.f32 %v17173_v50, %v19619_v3  ;;  %v17175_v14 = vpop.eup %17174 }
 0xc71   : > { %15691 = vmatprep.subr.msk.bf16.mxu1 %vm18106_vm1, %v15689_v59  ;;  %v17177_v46 = vpop.eup %17176  ;;  %v5376_v24 = vmul.f32 %v17175_v14, %v19581_v28  ;;  %v16622_v44 = vunpack.i.h.bf16 %v16620_v26  ;;  %v16621_v12 = vunpack.i.l.bf16 %v16620_v26 }
 0xc72   : > { %14681 = vmatprep.mubr.msk.f32.mxu1 %vm1351_vm3, %v5371_v55  ;;  %v15681_v25 = vpack.c.bf16 %v16607_v57, %v16606_v60  ;;  %v17179_v22 = vpop.eup %17178  ;;  %v5377_v61 = vmul.f32 %v17177_v46, %v19587_v16 }
 0xc73   : > { %v16615_v40 = vpop.permute.xlu1 %16614  ;;  %14682 = vmatmul.mubr.msk.f32.vlgmr.msra.gmra.mrb[92].mxu1 %vm1351_vm3, %v5372_v56  ;;  %v15701_v16 = vpack.c.bf16 %v16622_v44, %v16621_v12 }
 0xc74   : > { %v16617_v27 = vunpack.i.h.bf16 %v16615_v40  ;;  %v16616_v19 = vunpack.i.l.bf16 %v16615_v40  ;;  %15694 = vmatpush3.bf16.xpose.msk.msra.mxu1 %vm18106_vm1, %v15689_v59  ;;  %v6027_v3 = vpop.permute.xlu0 %6026  ;;  %15682 = vmatprep.subr.bf16.mxu0 %v15681_v25  ;;  %v5374_v59 = vmul.f32 %v17179_v22, %v19625_v48 }
 0xc75   : > { %15684 = vmatpush3.bf16.msra.mxu0 %v15681_v25 }
 0xc76   : > { %v17181_v17 = vpop.eup %17180  ;;  %v15695_v37 = vpack.c.bf16 %v16617_v27, %v16616_v19  ;;  %15686 = vmatprep.subr.bf16.mxu0 %v15685_v10 }
 0xc77   : > { %v17183_v1 = vpop.eup %17182  ;;  %v6025_v62 = vpop.permute.xlu1 %6024  ;;  %v5373_v43 = vmul.f32 %v17181_v17, %v19630_v54 }
 0xc78   : > { %v16630_v50 = vpop.permute.xlu0 %16629  ;;  %14696 = vmatmul.mubr.msk.f32.vlgmr.msra.gmra.mrb[92].mxu0 %vm1351_vm3, %v5376_v24  ;;  %15697 = vmatprep.subr.msk.bf16.mxu1 %vm18106_vm1, %v15695_v37  ;;  %v5378_v54 = vmul.f32 %v17183_v1, %v19593_v52 }
 0xc79   : > { %v16632_v58 = vunpack.i.h.bf16 %v16630_v50  ;;  %v16631_v28 = vunpack.i.l.bf16 %v16630_v50  ;;  %14684 = vmatprep.mubr.msk.f32.mxu1 %vm1351_vm3, %v5373_v43  ;;  %14698 = vmatprep.mubr.msk.f32.mxu0 %vm1351_vm3, %v5377_v61 }
 0xc7a   : > { %14685 = vmatmul.mubr.msk.f32.gmra.mrb[94].mxu1 %vm1351_vm3, %v5374_v59  ;;  %15688 = vmatpush3.bf16.msra.mxu0 %v15685_v10 }
 0xc7b   : > { %v15713_v47 = vpack.c.bf16 %v16632_v58, %v16631_v28  ;;  %v16625_v53 = vpop.permute.xlu1 %16624  ;;  %14737 = vmatprep.mubr.msk.f32.mxu1 %vm890_vm0, %v6025_v62 }
 0xc7c   : > { %15700 = vmatpush3.bf16.xpose.msk.msra.mxu1 %vm18106_vm1, %v15695_v37  ;;  %v6031_v48 = vpop.permute.xlu0 %6030  ;;  %14699 = vmatmul.mubr.msk.f32.gmra.mrb[94].mxu0 %vm1351_vm3, %v5378_v54  ;;  %v16627_v57 = vunpack.i.h.bf16 %v16625_v53  ;;  %v16626_v52 = vunpack.i.l.bf16 %v16625_v53 }
 0xc7d   : > { %15703 = vmatprep.subr.msk.bf16.mxu1 %vm18106_vm1, %v15701_v16  ;;  %15715 = vmatprep.subr.msk.bf16.mxu0 %vm18106_vm1, %v15713_v47 }
 0xc7e   : > { %v15707_v55 = vpack.c.bf16 %v16627_v57, %v16626_v52 }
 0xc7f   : > { %v6029_v60 = vpop.permute.xlu1 %6028 }
 0xc80   : > { %v16640_v26 = vpop.permute.xlu0 %16639 }
 0xc81   : > { %v16642_v10 = vunpack.i.h.bf16 %v16640_v26  ;;  %v16641_v14 = vunpack.i.l.bf16 %v16640_v26 }
 0xc83   : > { %14738 = vmatmul.mubr.msk.f32.vlgmr.msra.gmra.mrb[96].mxu1 %vm890_vm0, %v6027_v3  ;;  %v16635_v56 = vpop.permute.xlu1 %16634  ;;  %v15725_v27 = vpack.c.bf16 %v16642_v10, %v16641_v14 }
 0xc84   : > { %14740 = vmatprep.mubr.msk.f32.mxu1 %vm890_vm0, %v6029_v60  ;;  %15706 = vmatpush3.bf16.xpose.msk.msra.mxu1 %vm18106_vm1, %v15701_v16  ;;  %v6144_v25 = vpop.permute.xlu0 %6143  ;;  %v16637_v59 = vunpack.i.h.bf16 %v16635_v56  ;;  %v16636_v58 = vunpack.i.l.bf16 %v16635_v56 }
 0xc85   : > { %15709 = vmatprep.subr.msk.bf16.mxu1 %vm18106_vm1, %v15707_v55 }
 0xc86   : > { %v15719_v16 = vpack.c.bf16 %v16637_v59, %v16636_v58 }
 0xc87   : > { %14741 = vmatmul.mubr.msk.f32.gmra.mrb[98].mxu1 %vm890_vm0, %v6031_v48  ;;  %v6142_v40 = vpop.permute.xlu1 %6141 }
 0xc88   : > { %v6148_v46 = vpop.permute.xlu0 %6147  ;;  %14751 = vmatprep.mubr.msk.f32.mxu1 %vm890_vm0, %v6142_v40 }
 0xc8b   : > { %v6146_v19 = vpop.permute.xlu1 %6145 }
 0xc8c   : > { %15712 = vmatpush3.bf16.xpose.msk.msra.mxu1 %vm18106_vm1, %v15707_v55  ;;  %v19750_v3 = vpop.permute.xlu0 %6258 }
 0xc8d   : > { %15727 = vmatprep.subr.msk.bf16.mxu1 %vm18106_vm1, %v15725_v27 }
 0xc8f   : > { %v16645_v22 = vpop.permute.xlu1 %16644 }
 0xc90   : > { %v16647_v17 = vunpack.i.h.bf16 %v16645_v22  ;;  %v16646_v24 = vunpack.i.l.bf16 %v16645_v22  ;;  %v19754_v37 = vpop.permute.xlu0 %6262 }
 0xc92   : > { %v15731_v1 = vpack.c.bf16 %v16647_v17, %v16646_v24 }
 0xc93   : > { %14752 = vmatmul.mubr.msk.f32.vlgmr.msra.gmra.mrb[100].mxu1 %vm890_vm0, %v6144_v25  ;;  %v19757_v44 = vpop.permute.xlu1 %6260 }
 0xc94   : > { %14754 = vmatprep.mubr.msk.f32.mxu1 %vm890_vm0, %v6146_v19  ;;  %15730 = vmatpush3.bf16.xpose.msk.msra.mxu1 %vm18106_vm1, %v15725_v27  ;;  %v6376_v12 = vpop.permute.xlu0 %6375 }
 0xc95   : > { %15733 = vmatprep.subr.msk.bf16.mxu1 %vm18106_vm1, %v15731_v1 }
 0xc97   : > { %14755 = vmatmul.mubr.msk.f32.gmra.mrb[102].mxu1 %vm890_vm0, %v6148_v46  ;;  %v19766_v62 = vpop.permute.xlu1 %6264 }
 0xc98   : > { %14779 = vmatprep.mubr.msk.f32.mxu1 %vm890_vm0, %v6376_v12  ;;  %v6380_v61 = vpop.permute.xlu0 %6379 }
 0xc9b   : > { %v6378_v43 = vpop.permute.xlu1 %6377 }
 0xc9c   : > { %15736 = vmatpush3.bf16.xpose.msk.msra.mxu1 %vm18106_vm1, %v15731_v1 }
 0xc9f   : > { %v6382_v50 = vpop.permute.xlu1 %6381 }
 0xca3   : > { %14780 = vmatmul.mubr.msk.f32.vlgmr.msra.gmra.mrb[104].mxu1 %vm890_vm0, %v6378_v43 }
 0xca4   : > { %14782 = vmatprep.mubr.msk.f32.mxu1 %vm890_vm0, %v6380_v61 }
 0xca7   : > { %14783 = vmatmul.mubr.msk.f32.gmra.mrb[106].mxu1 %vm890_vm0, %v6382_v50 }
 0xcae   : > { %v14655_v28 = vpop.f32.mrb[84].mxu0 }
 0xcaf   : > { %v5469_v54 = vpop.f32.mrb[85].mxu0 }
 0xcb0   : > { %14705 = vmatprep.mubr.msk.f32.mxu0 %vm890_vm0, %v5469_v54 }
 0xcb1   : > { %14706 = vmatmul.mubr.msk.f32.vlgmr.msra.gmra.mrb[56].mxu0 %vm890_vm0, %v14655_v28 }
 0xcb2   : > { %15718 = vmatpush3.bf16.xpose.msk.msra.mxu0 %vm18106_vm1, %v15713_v47  ;;  %v14658_v53 = vpop.f32.mrb[86].mxu0 }
 0xcb3   : > { %15721 = vmatprep.subr.msk.bf16.mxu0 %vm18106_vm1, %v15719_v16  ;;  %v5479_v48 = vpop.f32.mrb[87].mxu0 }
 0xcb4   : > { %14708 = vmatprep.mubr.msk.f32.mxu0 %vm890_vm0, %v5479_v48 }
 0xcb5   : > { %14709 = vmatmul.mubr.msk.f32.gmra.mrb[58].mxu0 %vm890_vm0, %v14658_v53 }
 0xcba   : > { %15724 = vmatpush3.bf16.xpose.msk.msra.mxu0 %vm18106_vm1, %v15719_v16 }
 0xce6   : > { %v14669_v57 = vpop.f32.mrb[88].mxu0 }
 0xce7   : > { %v5578_v52 = vpop.f32.mrb[89].mxu0 }
 0xce8   : > { %14711 = vmatprep.mubr.msk.f32.mxu0 %vm890_vm0, %v5578_v52 }
 0xce9   : > { %14712 = vmatmul.mubr.msk.f32.gmra.mrb[60].mxu0 %vm890_vm0, %v14669_v57 }
 0xcea   : > { %v14672_v60 = vpop.f32.mrb[90].mxu0 }
 0xceb   : > { %v5588_v47 = vpop.f32.mrb[91].mxu0 }
 0xcec   : > { %14714 = vmatprep.mubr.msk.f32.mxu0 %vm890_vm0, %v5588_v47 }
 0xced   : > { %14715 = vmatmul.mubr.msk.f32.gmra.mrb[62].mxu0 %vm890_vm0, %v14672_v60 }
 0xd46   : > { %v14683_v26 = vpop.f32.mrb[92].mxu1 }
 0xd47   : > { %v5687_v55 = vpop.f32.mrb[93].mxu1 }
 0xd48   : > { %14717 = vmatprep.mubr.msk.f32.mxu0 %vm890_vm0, %v5687_v55 }
 0xd49   : > { %14718 = vmatmul.mubr.msk.f32.gmra.mrb[64].mxu0 %vm890_vm0, %v14683_v26 }
 0xd4b   : > { %v14697_v56 = vpop.f32.mrb[92].mxu0 }
 0xd4c   : > { %v5796_v25 = vpop.f32.mrb[93].mxu0 }
 0xd4d   : > { %v14686_v10 = vpop.f32.mrb[94].mxu1 }
 0xd4e   : > { %v5697_v14 = vpop.f32.mrb[95].mxu1 }
 0xd4f   : > { %v14700_v40 = vpop.f32.mrb[94].mxu0  ;;  %14720 = vmatprep.mubr.msk.f32.mxu0 %vm890_vm0, %v5697_v14 }
 0xd50   : > { %v5806_v46 = vpop.f32.mrb[95].mxu0  ;;  %14721 = vmatmul.mubr.msk.f32.gmra.mrb[66].mxu0 %vm890_vm0, %v14686_v10 }
 0xd51   : > { %14723 = vmatprep.mubr.msk.f32.mxu0 %vm890_vm0, %v5796_v25 }
 0xd54   : > { %14724 = vmatmul.mubr.msk.f32.gmra.mrb[68].mxu0 %vm890_vm0, %v14697_v56 }
 0xd55   : > { %14726 = vmatprep.mubr.msk.f32.mxu0 %vm890_vm0, %v5806_v46 }
 0xd56   : > { %v14739_v27 = vpop.f32.mrb[96].mxu1 }
 0xd57   : > { %v6493_v19 = vsel %vm18294_vm4, %v14739_v27, -1e+30  ;;  %v6122_v22 = vpop.f32.mrb[97].mxu1 }
 0xd58   : > { %v6511_v17 = vsel %vm1351_vm3, %v6493_v19, -inf  ;;  %v6492_v24 = vsel %vm18289_vm2, %v6122_v22, -1e+30  ;;  %14727 = vmatmul.mubr.msk.f32.gmra.mrb[70].mxu0 %vm890_vm0, %v14700_v40 }
 0xd59   : > { %v6508_v1 = vsel %vm1351_vm3, %v6492_v24, -inf  ;;  %6512 = vmax.xlane.f32.xlu1 %v6511_v17  ;;  %14765 = vmatprep.mubr.msk.f32.mxu0 %vm890_vm0, %v19750_v3 }
 0xd5a   : > { %6509 = vmax.xlane.f32.xlu0 %v6508_v1  ;;  %v14742_v12 = vpop.f32.mrb[98].mxu1 }
 0xd5b   : > { %v6495_v43 = vsel %vm18308_vm6, %v14742_v12, -1e+30  ;;  %v6132_v61 = vpop.f32.mrb[99].mxu1 }
 0xd5c   : > { %v6517_v50 = vsel %vm1351_vm3, %v6495_v43, -inf  ;;  %14766 = vmatmul.mubr.msk.f32.vlgmr.msra.gmra.mrb[96].mxu0 %vm890_vm0, %v19757_v44  ;;  %v6494_v59 = vsel %vm18302_vm5, %v6132_v61, -1e+30 }
 0xd5d   : > { %14768 = vmatprep.mubr.msk.f32.mxu0 %vm890_vm0, %v19754_v37  ;;  %v6514_v3 = vsel %vm1351_vm3, %v6494_v59, -inf }
 0xd5e   : > { %6518 = vmax.xlane.f32.xlu0 %v6517_v50 }
 0xd60   : > { %14769 = vmatmul.mubr.msk.f32.gmra.mrb[98].mxu0 %vm890_vm0, %v19766_v62 }
 0xd62   : > { %6515 = vmax.xlane.f32.xlu0 %v6514_v3 }
 0xd66   : > { %v14753_v58 = vpop.f32.mrb[100].mxu1 }
 0xd67   : > { %v6497_v28 = vsel %vm18294_vm4, %v14753_v58, -1e+30  ;;  %v6239_v54 = vpop.f32.mrb[101].mxu1 }
 0xd68   : > { %v6523_v44 = vsel %vm1351_vm3, %v6497_v28, -inf  ;;  %v6496_v37 = vsel %vm18289_vm2, %v6239_v54, -1e+30 }
 0xd69   : > { %v6520_v16 = vsel %vm1351_vm3, %v6496_v37, -inf  ;;  %6524 = vmax.xlane.f32.xlu1 %v6523_v44 }
 0xd6a   : > { %6521 = vmax.xlane.f32.xlu0 %v6520_v16  ;;  %v14756_v53 = vpop.f32.mrb[102].mxu1 }
 0xd6b   : > { %v6499_v62 = vsel %vm18308_vm6, %v14756_v53, -1e+30  ;;  %v6249_v48 = vpop.f32.mrb[103].mxu1 }
 0xd6c   : > { %v6529_v57 = vsel %vm1351_vm3, %v6499_v62, -inf  ;;  %v6498_v52 = vsel %vm18302_vm5, %v6249_v48, -1e+30 }
 0xd6d   : > { %v6526_v60 = vsel %vm1351_vm3, %v6498_v52, -inf  ;;  %6530 = vmax.xlane.f32.xlu1 %v6529_v57 }
 0xd6e   : > { %6527 = vmax.xlane.f32.xlu0 %v6526_v60 }
 0xd76   : > { %v14781_v47 = vpop.f32.mrb[104].mxu1 }
 0xd77   : > { %v19829_v26 = vsel %vm18294_vm4, %v14781_v47, -1e+30  ;;  %v6473_v55 = vpop.f32.mrb[105].mxu1 }
 0xd78   : > { %v6547_v56 = vsel %vm1351_vm3, %v19829_v26, -inf  ;;  %v19835_v25 = vsel %vm18289_vm2, %v6473_v55, -1e+30 }
 0xd79   : > { %v6544_v10 = vsel %vm1351_vm3, %v19835_v25, -inf  ;;  %6548 = vmax.xlane.f32.xlu1 %v6547_v56 }
 0xd7a   : > { %6545 = vmax.xlane.f32.xlu0 %v6544_v10  ;;  %v14784_v14 = vpop.f32.mrb[106].mxu1 }
 0xd7b   : > { %v19841_v40 = vsel %vm18308_vm6, %v14784_v14, -1e+30  ;;  %v6483_v46 = vpop.f32.mrb[107].mxu1 }
 0xd7c   : > { %v6553_v27 = vsel %vm1351_vm3, %v19841_v40, -inf  ;;  %v19847_v22 = vsel %vm18302_vm5, %v6483_v46, -1e+30 }
 0xd7d   : > { %v6550_v17 = vsel %vm1351_vm3, %v19847_v22, -inf  ;;  %6554 = vmax.xlane.f32.xlu1 %v6553_v27 }
 0xd7e   : > { %6551 = vmax.xlane.f32.xlu0 %v6550_v17 }
 0xde6   : > { %v6513_v1 = vpop.xlane.xlu1 %6512 }
 0xde7   : > { %v6557_v12 = vsub.f32 %v6493_v19, %v6513_v1  ;;  %v6510_v61 = vpop.xlane.xlu0 %6509 }
 0xde8   : > { %v6556_v50 = vsub.f32 %v6492_v24, %v6510_v61 }
 0xde9   : > { %v6574_v3 = vmul.f32 1.442695, %v6557_v12 }
 0xdea   : > { %v6572_v58 = vmul.f32 1.442695, %v6556_v50 }
 0xdeb   : > { %17184 = vpow2.f32 %v6574_v3  ;;  %v6519_v54 = vpop.xlane.xlu0 %6518 }
 0xdec   : > { %17186 = vpow2.f32 %v6572_v58  ;;  %v6559_v44 = vsub.f32 %v6495_v43, %v6519_v54 }
 0xdee   : > { %v6578_v16 = vmul.f32 1.442695, %v6559_v44 }
 0xdef   : > { %v6516_v53 = vpop.xlane.xlu0 %6515 }
 0xdf0   : > { %17188 = vpow2.f32 %v6578_v16  ;;  %v6558_v48 = vsub.f32 %v6494_v59, %v6516_v53 }
 0xdf2   : > { %v6576_v57 = vmul.f32 1.442695, %v6558_v48 }
 0xdf4   : > { %17190 = vpow2.f32 %v6576_v57 }
 0xdf5   : > { %v19851_v60 = vpop.eup %17184 }
 0xdf6   : > { %v19853_v47 = vpop.eup %17186  ;;  %v6525_v55 = vpop.xlane.xlu1 %6524  ;;  %v6607_v19 = vsel %vm1351_vm3, %v19851_v60, 0.0 }
 0xdf7   : > { %v6561_v24 = vsub.f32 %v6497_v28, %v6525_v55  ;;  %v6522_v56 = vpop.xlane.xlu0 %6521  ;;  %6608 = vadd.xlane.f32.xlu1 %v6607_v19  ;;  %v6604_v43 = vsel %vm1351_vm3, %v19853_v47, 0.0 }
 0xdf8   : > { %v6560_v10 = vsub.f32 %v6496_v37, %v6522_v56  ;;  %6605 = vadd.xlane.f32.xlu0 %v6604_v43 }
 0xdf9   : > { %v6582_v14 = vmul.f32 1.442695, %v6561_v24 }
 0xdfa   : > { %v19859_v59 = vpop.eup %17188  ;;  %v6580_v46 = vmul.f32 1.442695, %v6560_v10  ;;  %v6531_v27 = vpop.xlane.xlu1 %6530 }
 0xdfb   : > { %17192 = vpow2.f32 %v6582_v14  ;;  %v6563_v17 = vsub.f32 %v6499_v62, %v6531_v27  ;;  %v6528_v1 = vpop.xlane.xlu0 %6527  ;;  %v6613_v12 = vsel %vm1351_vm3, %v19859_v59, 0.0 }
 0xdfc   : > { %17194 = vpow2.f32 %v6580_v46  ;;  %v6562_v28 = vsub.f32 %v6498_v52, %v6528_v1  ;;  %6614 = vadd.xlane.f32.xlu1 %v6613_v12  ;;  %v21905_v12 = vld [vmem:[#allocation39_spill] sm:$0xff] }
 0xdfd   : > { %v6586_v61 = vmul.f32 1.442695, %v6563_v17 }
 0xdfe   : > { %v19863_v50 = vpop.eup %17190  ;;  %v6584_v3 = vmul.f32 1.442695, %v6562_v28  ;;  %v21906_v28 = vld [vmem:[#allocation38_spill] sm:$0xff] }
 0xdff   : > { %17196 = vpow2.f32 %v6586_v61  ;;  %v6610_v37 = vsel %vm1351_vm3, %v19863_v50, 0.0 }
 0xe00   : > { %17198 = vpow2.f32 %v6584_v3  ;;  %6611 = vadd.xlane.f32.xlu0 %v6610_v37 }
 0xe05   : > { %v19867_v58 = vpop.eup %17192 }
 0xe06   : > { %v19869_v62 = vpop.eup %17194  ;;  %v6619_v54 = vsel %vm1351_vm3, %v19867_v58, 0.0  ;;  %v6549_v3 = vpop.xlane.xlu1 %6548 }
 0xe07   : > { %6620 = vadd.xlane.f32.xlu1 %v6619_v54  ;;  %v6616_v52 = vsel %vm1351_vm3, %v19869_v62, 0.0  ;;  %v6546_v61 = vpop.xlane.xlu0 %6545  ;;  %v6569_v37 = vsub.f32 %v19829_v26, %v6549_v3  ;;  %v21907_v3 = vld [vmem:[#allocation40_spill] sm:$0xff] }
 0xe08   : > { %6617 = vadd.xlane.f32.xlu0 %v6616_v52  ;;  %v6568_v54 = vsub.f32 %v19835_v25, %v6546_v61 }
 0xe09   : > { %v19875_v44 = vpop.eup %17196 }
 0xe0a   : > { %v19877_v16 = vpop.eup %17198  ;;  %v6625_v53 = vsel %vm1351_vm3, %v19875_v44, 0.0 }
 0xe0b   : > { %6626 = vadd.xlane.f32.xlu1 %v6625_v53  ;;  %v6622_v48 = vsel %vm1351_vm3, %v19877_v16, 0.0  ;;  %v6552_v52 = vpop.xlane.xlu0 %6551  ;;  %v6598_v53 = vmul.f32 1.442695, %v6569_v37  ;;  %v21908_v37 = vld [vmem:[#allocation41_spill] sm:$0xff] }
 0xe0c   : > { %6623 = vadd.xlane.f32.xlu0 %v6622_v48  ;;  %v6570_v48 = vsub.f32 %v19847_v22, %v6552_v52  ;;  %v21909_v52 = vld [vmem:[#allocation42_spill] sm:$0xff] }
 0xe0d   : > { %17200 = vpow2.f32 %v6598_v53  ;;  %v21910_v53 = vld [vmem:[#allocation43_spill] sm:$0xff] }
 0xe2f   : > { %v14767_v57 = vpop.f32.mrb[96].mxu0 }
 0xe30   : > { %v19885_v55 = vsel %vm18294_vm4, %v14767_v57, -1e+30  ;;  %v6356_v19 = vpop.f32.mrb[97].mxu0  ;;  %v6596_v57 = vmul.f32 1.442695, %v6568_v54 }
 0xe31   : > { %v6535_v24 = vsel %vm1351_vm3, %v19885_v55, -inf  ;;  %v19891_v56 = vsel %vm18289_vm2, %v6356_v19, -1e+30  ;;  %v6555_v19 = vpop.xlane.xlu1 %6554 }
 0xe32   : > { %v6532_v43 = vsel %vm1351_vm3, %v19891_v56, -inf  ;;  %6536 = vmax.xlane.f32.xlu1 %v6535_v24  ;;  %v6571_v24 = vsub.f32 %v19841_v40, %v6555_v19  ;;  %17202 = vpow2.f32 %v6596_v57 }
 0xe33   : > { %6533 = vmax.xlane.f32.xlu0 %v6532_v43  ;;  %v14770_v10 = vpop.f32.mrb[98].mxu0  ;;  %v6600_v43 = vmul.f32 1.442695, %v6570_v48 }
 0xe34   : > { %v19897_v14 = vsel %vm18308_vm6, %v14770_v10, -1e+30  ;;  %v6366_v46 = vpop.f32.mrb[99].mxu0  ;;  %v6602_v10 = vmul.f32 1.442695, %v6571_v24 }
 0xe35   : > { %v6541_v27 = vsel %vm1351_vm3, %v19897_v14, -inf  ;;  %v19903_v17 = vsel %vm18302_vm5, %v6366_v46, -1e+30  ;;  %17204 = vpow2.f32 %v6600_v43  ;;  %v19915_v46 = vpop.eup %17200 }
 0xe36   : > { %v6538_v1 = vsel %vm1351_vm3, %v19903_v17, -inf  ;;  %6542 = vmax.xlane.f32.xlu1 %v6541_v27  ;;  %17206 = vpow2.f32 %v6602_v10  ;;  %v6643_v26 = vsel %vm1351_vm3, %v19915_v46, 0.0 }
 0xe37   : > { %6539 = vmax.xlane.f32.xlu0 %v6538_v1 }
 0xe3c   : > { %v19917_v27 = vpop.eup %17202 }
 0xe3d   : > { %v6640_v22 = vsel %vm1351_vm3, %v19917_v27, 0.0 }
 0xe3f   : > { %v19921_v25 = vpop.eup %17204 }
 0xe40   : > { %v6646_v40 = vsel %vm1351_vm3, %v19921_v25, 0.0  ;;  %v19927_v1 = vpop.eup %17206 }
 0xe41   : > { %v6649_v61 = vsel %vm1351_vm3, %v19927_v1, 0.0 }
 0xe47   : > { %16654 = vrot.lane.b32.xlu1 %v21905_v12, %s17753_s10 }
 0xe4d   : > { %16649 = vrot.lane.b32.xlu0 %v21906_v28, %s17753_s10 }
 0xe6b   : > { %6644 = vadd.xlane.f32.xlu1 %v6643_v26 }
 0xe6c   : > { %6641 = vadd.xlane.f32.xlu0 %v6640_v22 }
 0xe6f   : > { %6647 = vadd.xlane.f32.xlu1 %v6646_v40 }
 0xe73   : > { %6650 = vadd.xlane.f32.xlu1 %v6649_v61 }
 0xe82   : > { %16659 = vrot.lane.b32.xlu0 %v21907_v3, %s17753_s10 }
 0xe84   : > { %16664 = vrot.lane.b32.xlu1 %v21908_v37, %s17753_s10  ;;  %v6609_v26 = vpop.xlane.xlu1 %6608 }
 0xe85   : > { %v6606_v54 = vpop.xlane.xlu0 %6605 }
 0xe86   : > { %17208 = vrcp.f32 %v6606_v54  ;;  %16669 = vrot.lane.b32.xlu0 %v21909_v52, %s17753_s10 }
 0xe89   : > { %v6615_v22 = vpop.xlane.xlu1 %6614 }
 0xe8a   : > { %16674 = vrot.lane.b32.xlu0 %v21910_v53, %s17753_s10 }
 0xe8d   : > { %v6612_v57 = vpop.xlane.xlu0 %6611 }
 0xe90   : > { %v17209_v48 = vpop.eup %17208 }
 0xe91   : > { %v6668_v19 = vmul.f32 %v17209_v48, %v19853_v47 }
 0xe93   : > { %14793 = vmatprep.mubr.msk.f32.mxu0 %vm1351_vm3, %v6668_v19 }
 0xe94   : > { %v19943_v40 = vpop.xlane.xlu1 %6620 }
 0xe95   : > { %v6618_v24 = vpop.xlane.xlu0 %6617 }
 0xe96   : > { %17210 = vrcp.f32 %v6618_v24 }
 0xe97   : > { %17212 = vrcp.f32 %v6609_v26 }
 0xe98   : > { %v19945_v61 = vpop.xlane.xlu1 %6626 }
 0xe99   : > { %v19947_v54 = vpop.xlane.xlu0 %6623 }
 0xea0   : > { %v17211_v43 = vpop.eup %17210 }
 0xea1   : > { %v6672_v10 = vmul.f32 %v17211_v43, %v19869_v62 }
 0xea3   : > { %14807 = vmatprep.mubr.msk.f32.mxu1 %vm1351_vm3, %v6672_v10 }
 0xebf   : > { %v6537_v53 = vpop.xlane.xlu1 %6536 }
 0xec0   : > { %v6565_v47 = vsub.f32 %v19885_v55, %v6537_v53  ;;  %v6534_v48 = vpop.xlane.xlu0 %6533 }
 0xec1   : > { %v6564_v19 = vsub.f32 %v19891_v56, %v6534_v48 }
 0xec2   : > { %v6590_v24 = vmul.f32 1.442695, %v6565_v47 }
 0xec3   : > { %v6588_v52 = vmul.f32 1.442695, %v6564_v19  ;;  %v6543_v62 = vpop.xlane.xlu1 %6542  ;;  %v17213_v19 = vpop.eup %17212 }
 0xec4   : > { %17214 = vpow2.f32 %v6590_v24  ;;  %v6567_v43 = vsub.f32 %v19897_v14, %v6543_v62  ;;  %v6540_v10 = vpop.xlane.xlu0 %6539 }
 0xec5   : > { %17216 = vpow2.f32 %v6588_v52  ;;  %v6566_v37 = vsub.f32 %v19903_v17, %v6540_v10 }
 0xec6   : > { %17218 = vrcp.f32 %v6615_v22  ;;  %v6594_v3 = vmul.f32 1.442695, %v6567_v43 }
 0xec7   : > { %17220 = vrcp.f32 %v6612_v57  ;;  %v6592_v28 = vmul.f32 1.442695, %v6566_v37  ;;  %v16655_v12 = vpop.permute.xlu1 %16654  ;;  %v6669_v57 = vmul.f32 %v17213_v19, %v19851_v60 }
 0xec8   : > { %17222 = vpow2.f32 %v6594_v3  ;;  %v16650_v55 = vpop.permute.xlu0 %16649  ;;  %v16657_v53 = vunpack.i.h.bf16 %v16655_v12  ;;  %v16656_v56 = vunpack.i.l.bf16 %v16655_v12 }
 0xec9   : > { %v16652_v47 = vunpack.i.h.bf16 %v16650_v55  ;;  %v16651_v26 = vunpack.i.l.bf16 %v16650_v55  ;;  %17224 = vpow2.f32 %v6592_v28 }
 0xeca   : > { %v15741_v14 = vpack.c.bf16 %v16657_v53, %v16656_v56  ;;  %17226 = vrcp.f32 %v19943_v40 }
 0xecb   : > { %v15737_v48 = vpack.c.bf16 %v16652_v47, %v16651_v26  ;;  %17228 = vrcp.f32 %v19947_v54 }
 0xecc   : > { %17230 = vrcp.f32 %v19945_v61 }
 0xecd   : > { %15738 = vmatprep.subr.bf16.mxu0 %v15737_v48 }
 0xece   : > { %v19953_v24 = vpop.eup %17214  ;;  %15740 = vmatpush3.bf16.msra.mxu0 %v15737_v48 }
 0xecf   : > { %v19955_v17 = vpop.eup %17216  ;;  %15742 = vmatprep.subr.bf16.mxu0 %v15741_v14  ;;  %v6631_v37 = vsel %vm1351_vm3, %v19953_v24, 0.0 }
 0xed0   : > { %v17219_v3 = vpop.eup %17218  ;;  %6632 = vadd.xlane.f32.xlu1 %v6631_v37  ;;  %v6628_v12 = vsel %vm1351_vm3, %v19955_v17, 0.0 }
 0xed1   : > { %v17221_v52 = vpop.eup %17220  ;;  %6629 = vadd.xlane.f32.xlu0 %v6628_v12  ;;  %v6671_v55 = vmul.f32 %v17219_v3, %v19859_v59 }
 0xed2   : > { %v19961_v28 = vpop.eup %17222  ;;  %15744 = vmatpush3.bf16.msra.mxu0 %v15741_v14  ;;  %v6670_v43 = vmul.f32 %v17221_v52, %v19863_v50 }
 0xed3   : > { %v6637_v22 = vsel %vm1351_vm3, %v19961_v28, 0.0  ;;  %v19966_v62 = vpop.eup %17224 }
 0xed4   : > { %6638 = vadd.xlane.f32.xlu1 %v6637_v22  ;;  %v6634_v10 = vsel %vm1351_vm3, %v19966_v62, 0.0  ;;  %v883_v22 = vld [vmem:[#allocation7 + $0x48] sm:$0xff] }
 0xed5   : > { %14794 = vmatmul.mubr.msk.f32.vlgmr.msra.gmra.mrb[100].mxu0 %vm1351_vm3, %v6669_v57  ;;  %v882_v57 = vld [vmem:[#allocation7 + $0x40] sm:$0xff] }
 0xed6   : > { %14796 = vmatprep.mubr.msk.f32.mxu0 %vm1351_vm3, %v6670_v43 }
 0xed8   : > { %6635 = vadd.xlane.f32.xlu1 %v6634_v10 }
 0xed9   : > { %14797 = vmatmul.mubr.msk.f32.gmra.mrb[102].mxu0 %vm1351_vm3, %v6671_v55  ;;  %v17227_v55 = vpop.eup %17226 }
 0xee7   : > { %16679 = vrot.lane.b32.xlu0 %v21845_v31, %s17753_s10 }
 0xee9   : > { %16684 = vrot.lane.b32.xlu1 %v21894_v2, %s17753_s10  ;;  %s12594_s10 = scalar_lea.sflag [#allocation4], %s18042_s21 }
 0xeeb   : > { %16689 = vrot.lane.b32.xlu0 %v21869_v35, %s17754_s16 }
 0xeed   : > { %16694 = vrot.lane.b32.xlu1 %v21895_v8, %s17754_s16 }
 0xeef   : > { %16699 = vrot.lane.b32.xlu0 %v21870_v33, %s17754_s16 }
 0xef1   : > { %7329 = vrot.lane.b32.xlu1 %v21896_v13, %s17754_s16 }
 0xef3   : > { %7331 = vrot.lane.b32.xlu0 %v21872_v20, %s17754_s16 }
 0xef5   : > { %16704 = vrot.lane.b32.xlu1 %v21897_v7, %s17754_s16 }
 0xef7   : > { %16709 = vrot.lane.b32.xlu0 %v21875_v32, %s17754_s16 }
 0xef8   : > { %v19993_v60 = vpop.xlane.xlu1 %6644 }
 0xef9   : > { %7333 = vrot.lane.b32.xlu1 %v21898_v45, %s17754_s16  ;;  %v6642_v59 = vpop.xlane.xlu0 %6641 }
 0xefa   : > { %17232 = vrcp.f32 %v6642_v59 }
 0xefb   : > { %7335 = vrot.lane.b32.xlu0 %v21878_v0, %s17754_s16 }
 0xefc   : > { %v19999_v50 = vpop.xlane.xlu1 %6647 }
 0xefd   : > { %16714 = vrot.lane.b32.xlu1 %v21899_v42, %s17754_s16  ;;  %v16660_v53 = vpop.permute.xlu0 %16659 }
 0xefe   : > { %v16662_v56 = vunpack.i.h.bf16 %v16660_v53  ;;  %v16661_v47 = vunpack.i.l.bf16 %v16660_v53  ;;  %v15769_v53 = vpack.c.bf16 %v883_v22, %v882_v57 }
 0xeff   : > { %16719 = vrot.lane.b32.xlu0 %v21881_v5, %s17754_s16 }
 0xf00   : > { %v20007_v26 = vpop.xlane.xlu1 %6650  ;;  %v15745_v48 = vpack.c.bf16 %v16662_v56, %v16661_v47  ;;  %v17229_v56 = vpop.eup %17228  ;;  %v6673_v47 = vmul.f32 %v17227_v55, %v19867_v58 }
 0xf01   : > { %7446 = vrot.lane.b32.xlu1 %v21900_v18, %s17754_s16  ;;  %v16670_v19 = vpop.permute.xlu0 %16669 }
 0xf02   : > { %v16672_v14 = vunpack.i.h.bf16 %v16670_v19  ;;  %v16671_v37 = vunpack.i.l.bf16 %v16670_v19  ;;  %15746 = vmatprep.subr.bf16.mxu1 %v15745_v48  ;;  %v6674_v19 = vmul.f32 %v17229_v56, %v19877_v16 }
 0xf03   : > { %7448 = vrot.lane.b32.xlu0 %v21884_v6, %s17754_s16  ;;  %15748 = vmatpush3.bf16.msra.mxu1 %v15745_v48  ;;  %v17231_v48 = vpop.eup %17230 }
 0xf04   : > { %v16665_v40 = vpop.permute.xlu1 %16664  ;;  %v15753_v54 = vpack.c.bf16 %v16672_v14, %v16671_v37  ;;  %v17233_v14 = vpop.eup %17232  ;;  %v6675_v58 = vmul.f32 %v17231_v48, %v19875_v44 }
 0xf05   : > { %v16667_v3 = vunpack.i.h.bf16 %v16665_v40  ;;  %v16666_v12 = vunpack.i.l.bf16 %v16665_v40  ;;  %7450 = vrot.lane.b32.xlu1 %v21901_v49, %s17754_s16  ;;  %v16675_v52 = vpop.permute.xlu0 %16674  ;;  %v6680_v37 = vmul.f32 %v17233_v14, %v19917_v27 }
 0xf06   : > { %v16677_v43 = vunpack.i.h.bf16 %v16675_v52  ;;  %v16676_v61 = vunpack.i.l.bf16 %v16675_v52  ;;  %15754 = vmatprep.subr.bf16.mxu0 %v15753_v54 }
 0xf07   : > { %7452 = vrot.lane.b32.xlu0 %v21887_v51, %s17754_s16  ;;  %15756 = vmatpush3.bf16.msra.mxu0 %v15753_v54  ;;  %v15749_v10 = vpack.c.bf16 %v16667_v3, %v16666_v12 }
 0xf08   : > { %v15757_v59 = vpack.c.bf16 %v16677_v43, %v16676_v61 }
 0xf09   : > { %16724 = vrot.lane.b32.xlu1 %v18234_v36, %s17754_s16  ;;  %15750 = vmatprep.subr.bf16.mxu1 %v15749_v10 }
 0xf0a   : > { %15752 = vmatpush3.bf16.msra.mxu1 %v15749_v10  ;;  %15758 = vmatprep.subr.bf16.mxu0 %v15757_v59 }
 0xf0b   : > { %7563 = vrot.lane.b32.xlu0 %v21890_v34, %s17754_s16  ;;  %15760 = vmatpush3.bf16.msra.mxu0 %v15757_v59 }
 0xf0c   : > { %15770 = vmatprep.subr.bf16.mxu0 %v15769_v53 }
 0xf0d   : > { %7565 = vrot.lane.b32.xlu1 %v21902_v38, %s17754_s16  ;;  %14808 = vmatmul.mubr.msk.f32.vlgmr.msra.gmra.mrb[108].mxu1 %vm1351_vm3, %v6673_v47 }
 0xf0e   : > { %14810 = vmatprep.mubr.msk.f32.mxu1 %vm1351_vm3, %v6674_v19 }
 0xf0f   : > { %7567 = vrot.lane.b32.xlu0 %v18192_v9, %s17754_s16 }
 0xf11   : > { %7569 = vrot.lane.b32.xlu1 %v21846_v41, %s17754_s16  ;;  %14811 = vmatmul.mubr.msk.f32.gmra.mrb[110].mxu1 %vm1351_vm3, %v6675_v58 }
 0xf12   : > { %14835 = vmatprep.mubr.msk.f32.mxu1 %vm1351_vm3, %v6680_v37 }
 0xf13   : > { %7680 = vrot.lane.b32.xlu0 %v21903_v23, %s17754_s16 }
 0xf15   : > { %7682 = vrot.lane.b32.xlu1 %v18216_v21, %s17754_s16 }
 0xf17   : > { %7684 = vrot.lane.b32.xlu0 %v21904_v39, %s17754_s16 }
 0xf19   : > { %7686 = vrot.lane.b32.xlu1 %v18230_v29, %s17754_s16 }
 0xf5d   : > { %v6633_v44 = vpop.xlane.xlu1 %6632 }
 0xf5e   : > { %17234 = vrcp.f32 %v6633_v44  ;;  %v6630_v16 = vpop.xlane.xlu0 %6629 }
 0xf5f   : > { %17236 = vrcp.f32 %v6630_v16 }
 0xf60   : > { %17238 = vrcp.f32 %v19993_v60 }
 0xf61   : > { %v6639_v27 = vpop.xlane.xlu1 %6638  ;;  %17240 = vrcp.f32 %v19999_v50 }
 0xf62   : > { %v16680_v40 = vpop.permute.xlu0 %16679  ;;  %17242 = vrcp.f32 %v6639_v27 }
 0xf63   : > { %v16682_v54 = vunpack.i.h.bf16 %v16680_v40  ;;  %v16681_v3 = vunpack.i.l.bf16 %v16680_v40 }
 0xf65   : > { %v6636_v12 = vpop.xlane.xlu1 %6635  ;;  %v15761_v52 = vpack.c.bf16 %v16682_v54, %v16681_v3 }
 0xf66   : > { %17244 = vrcp.f32 %v6636_v12  ;;  %v16690_v57 = vpop.permute.xlu0 %16689 }
 0xf67   : > { %17246 = vrcp.f32 %v20007_v26  ;;  %15762 = vmatprep.subr.bf16.mxu1 %v15761_v52  ;;  %v16692_v61 = vunpack.i.h.bf16 %v16690_v57  ;;  %v16691_v55 = vunpack.i.l.bf16 %v16690_v57 }
 0xf68   : > { %v17235_v22 = vpop.eup %17234  ;;  %15764 = vmatpush3.bf16.msra.mxu1 %v15761_v52 }
 0xf69   : > { %v17237_v43 = vpop.eup %17236  ;;  %v16685_v10 = vpop.permute.xlu1 %16684  ;;  %v6677_v50 = vmul.f32 %v17235_v22, %v19953_v24  ;;  %v15773_v58 = vpack.c.bf16 %v16692_v61, %v16691_v55 }
 0xf6a   : > { %v16687_v59 = vunpack.i.h.bf16 %v16685_v10  ;;  %v16686_v60 = vunpack.i.l.bf16 %v16685_v10  ;;  %v16700_v56 = vpop.permute.xlu0 %16699  ;;  %v6676_v47 = vmul.f32 %v17237_v43, %v19955_v17  ;;  %v17239_v19 = vpop.eup %17238 }
 0xf6b   : > { %v17241_v26 = vpop.eup %17240  ;;  %v6681_v27 = vmul.f32 %v17239_v19, %v19915_v46  ;;  %v16701_v10 = vunpack.i.l.bf16 %v16700_v56 }
 0xf6c   : > { %14821 = vmatprep.mubr.msk.f32.mxu0 %vm1351_vm3, %v6676_v47  ;;  %v15765_v48 = vpack.c.bf16 %v16687_v59, %v16686_v60  ;;  %v17243_v44 = vpop.eup %17242  ;;  %v6682_v54 = vmul.f32 %v17241_v26, %v19921_v25 }
 0xf6d   : > { %v16695_v14 = vpop.permute.xlu1 %16694  ;;  %14822 = vmatmul.mubr.msk.f32.vlgmr.msra.gmra.mrb[104].mxu0 %vm1351_vm3, %v6677_v50  ;;  %v6679_v12 = vmul.f32 %v17243_v44, %v19961_v28 }
 0xf6e   : > { %v7332_v37 = vpop.permute.xlu0 %7331  ;;  %15766 = vmatprep.subr.bf16.mxu1 %v15765_v48  ;;  %15772 = vmatpush3.bf16.msra.mxu0 %v15769_v53  ;;  %v16697_v53 = vunpack.i.h.bf16 %v16695_v14  ;;  %v16696_v52 = vunpack.i.l.bf16 %v16695_v14 }
 0xf6f   : > { %15768 = vmatpush3.bf16.msra.mxu1 %v15765_v48 }
 0xf70   : > { %v17245_v16 = vpop.eup %17244  ;;  %15775 = vmatprep.subr.msk.bf16.mxu1 %vm18106_vm1, %v15773_v58  ;;  %v15779_v43 = vpack.c.bf16 %v16697_v53, %v16696_v52 }
 0xf71   : > { %v17247_v24 = vpop.eup %17246  ;;  %v7330_v17 = vpop.permute.xlu1 %7329  ;;  %v6678_v40 = vmul.f32 %v17245_v16, %v19966_v62 }
 0xf72   : > { %v16710_v3 = vpop.permute.xlu0 %16709  ;;  %14836 = vmatmul.mubr.msk.f32.vlgmr.msra.gmra.mrb[112].mxu1 %vm1351_vm3, %v6681_v27  ;;  %v6683_v46 = vmul.f32 %v17247_v24, %v19927_v1  ;;  %v16702_v1 = vunpack.i.h.bf16 %v16700_v56 }
 0xf73   : > { %v16712_v57 = vunpack.i.h.bf16 %v16710_v3  ;;  %v16711_v22 = vunpack.i.l.bf16 %v16710_v3  ;;  %14824 = vmatprep.mubr.msk.f32.mxu0 %vm1351_vm3, %v6678_v40  ;;  %14838 = vmatprep.mubr.msk.f32.mxu1 %vm1351_vm3, %v6682_v54 }
 0xf74   : > { %14825 = vmatmul.mubr.msk.f32.gmra.mrb[106].mxu0 %vm1351_vm3, %v6679_v12  ;;  %v15785_v60 = vpack.c.bf16 %v16702_v1, %v16701_v10 }
 0xf75   : > { %v20062_v62 = vpack.c.bf16 %v16712_v57, %v16711_v22  ;;  %v16705_v25 = vpop.permute.xlu1 %16704 }
 0xf76   : > { %14839 = vmatmul.mubr.msk.f32.gmra.mrb[114].mxu1 %vm1351_vm3, %v6683_v46  ;;  %v7336_v61 = vpop.permute.xlu0 %7335  ;;  %v16707_v47 = vunpack.i.h.bf16 %v16705_v25  ;;  %v16706_v50 = vunpack.i.l.bf16 %v16705_v25 }
 0xf77   : > { %14877 = vmatprep.mubr.msk.f32.mxu1 %vm890_vm0, %v7330_v17  ;;  %15799 = vmatprep.subr.msk.bf16.mxu0 %vm18106_vm1, %v20062_v62 }
 0xf78   : > { %15778 = vmatpush3.bf16.xpose.msk.msra.mxu1 %vm18106_vm1, %v15773_v58  ;;  %v15791_v14 = vpack.c.bf16 %v16707_v47, %v16706_v50 }
 0xf79   : > { %v7334_v28 = vpop.permute.xlu1 %7333  ;;  %15781 = vmatprep.subr.msk.bf16.mxu1 %vm18106_vm1, %v15779_v43 }
 0xf7a   : > { %v16720_v55 = vpop.permute.xlu0 %16719 }
 0xf7b   : > { %v16722_v58 = vunpack.i.h.bf16 %v16720_v55  ;;  %v16721_v44 = vunpack.i.l.bf16 %v16720_v55 }
 0xf7d   : > { %v16715_v59 = vpop.permute.xlu1 %16714  ;;  %v15809_v16 = vpack.c.bf16 %v16722_v58, %v16721_v44 }
 0xf7e   : > { %v7449_v48 = vpop.permute.xlu0 %7448  ;;  %v16717_v57 = vunpack.i.h.bf16 %v16715_v59  ;;  %v16716_v22 = vunpack.i.l.bf16 %v16715_v59 }
 0xf80   : > { %15784 = vmatpush3.bf16.xpose.msk.msra.mxu1 %vm18106_vm1, %v15779_v43 }
 0xf81   : > { %15787 = vmatprep.subr.msk.bf16.mxu1 %vm18106_vm1, %v15785_v60  ;;  %v7447_v19 = vpop.permute.xlu1 %7446 }
 0xf82   : > { %v7453_v56 = vpop.permute.xlu0 %7452 }
 0xf85   : > { %v7451_v26 = vpop.permute.xlu1 %7450 }
 0xf86   : > { %v7564_v27 = vpop.permute.xlu0 %7563 }
 0xf87   : > { %14878 = vmatmul.mubr.msk.f32.vlgmr.msra.gmra.mrb[116].mxu1 %vm890_vm0, %v7332_v37 }
 0xf88   : > { %14880 = vmatprep.mubr.msk.f32.mxu1 %vm890_vm0, %v7334_v28  ;;  %15790 = vmatpush3.bf16.xpose.msk.msra.mxu1 %vm18106_vm1, %v15785_v60  ;;  %v15803_v28 = vpack.c.bf16 %v16717_v57, %v16716_v22 }
 0xf89   : > { %15793 = vmatprep.subr.msk.bf16.mxu1 %vm18106_vm1, %v15791_v14  ;;  %v16725_v24 = vpop.permute.xlu1 %16724 }
 0xf8a   : > { %v16727_v37 = vunpack.i.h.bf16 %v16725_v24  ;;  %v16726_v17 = vunpack.i.l.bf16 %v16725_v24  ;;  %v7568_v40 = vpop.permute.xlu0 %7567 }
 0xf8b   : > { %14881 = vmatmul.mubr.msk.f32.gmra.mrb[118].mxu1 %vm890_vm0, %v7336_v61 }
 0xf8c   : > { %14891 = vmatprep.mubr.msk.f32.mxu1 %vm890_vm0, %v7447_v19  ;;  %v15815_v54 = vpack.c.bf16 %v16727_v37, %v16726_v17 }
 0xf8d   : > { %v7566_v3 = vpop.permute.xlu1 %7565 }
 0xf8e   : > { %v7681_v12 = vpop.permute.xlu0 %7680 }
 0xf90   : > { %15796 = vmatpush3.bf16.xpose.msk.msra.mxu1 %vm18106_vm1, %v15791_v14 }
 0xf91   : > { %15811 = vmatprep.subr.msk.bf16.mxu1 %vm18106_vm1, %v15809_v16  ;;  %v7570_v53 = vpop.permute.xlu1 %7569 }
 0xf92   : > { %v7685_v46 = vpop.permute.xlu0 %7684 }
 0xf95   : > { %v7683_v52 = vpop.permute.xlu1 %7682 }
 0xf97   : > { %14892 = vmatmul.mubr.msk.f32.vlgmr.msra.gmra.mrb[120].mxu1 %vm890_vm0, %v7449_v48 }
 0xf98   : > { %14894 = vmatprep.mubr.msk.f32.mxu1 %vm890_vm0, %v7451_v26  ;;  %15814 = vmatpush3.bf16.xpose.msk.msra.mxu1 %vm18106_vm1, %v15809_v16 }
 0xf99   : > { %15817 = vmatprep.subr.msk.bf16.mxu1 %vm18106_vm1, %v15815_v54  ;;  %v7687_v61 = vpop.permute.xlu1 %7686 }
 0xf9b   : > { %14895 = vmatmul.mubr.msk.f32.gmra.mrb[122].mxu1 %vm890_vm0, %v7453_v56 }
 0xf9c   : > { %14919 = vmatprep.mubr.msk.f32.mxu1 %vm890_vm0, %v7681_v12 }
 0xfa0   : > { %15820 = vmatpush3.bf16.xpose.msk.msra.mxu1 %vm18106_vm1, %v15815_v54 }
 0xfa7   : > { %14920 = vmatmul.mubr.msk.f32.vlgmr.msra.gmra.mrb[124].mxu1 %vm890_vm0, %v7683_v52 }
 0xfa8   : > { %v14795_v25 = vpop.f32.mrb[100].mxu0  ;;  %14922 = vmatprep.mubr.msk.f32.mxu1 %vm890_vm0, %v7685_v46 }
 0xfa9   : > { %v6774_v43 = vpop.f32.mrb[101].mxu0 }
 0xfaa   : > { %14845 = vmatprep.mubr.msk.f32.mxu0 %vm890_vm0, %v6774_v43 }
 0xfab   : > { %14846 = vmatmul.mubr.msk.f32.vlgmr.msra.gmra.mrb[56].mxu0 %vm890_vm0, %v14795_v25  ;;  %14923 = vmatmul.mubr.msk.f32.gmra.mrb[126].mxu1 %vm890_vm0, %v7687_v61 }
 0xfac   : > { %15802 = vmatpush3.bf16.xpose.msk.msra.mxu0 %vm18106_vm1, %v20062_v62  ;;  %v14798_v1 = vpop.f32.mrb[102].mxu0 }
 0xfad   : > { %15805 = vmatprep.subr.msk.bf16.mxu0 %vm18106_vm1, %v15803_v28  ;;  %v6784_v10 = vpop.f32.mrb[103].mxu0 }
 0xfae   : > { %14848 = vmatprep.mubr.msk.f32.mxu0 %vm890_vm0, %v6784_v10 }
 0xfaf   : > { %14849 = vmatmul.mubr.msk.f32.gmra.mrb[58].mxu0 %vm890_vm0, %v14798_v1 }
 0xfb4   : > { %15808 = vmatpush3.bf16.xpose.msk.msra.mxu0 %vm18106_vm1, %v15803_v28 }
 0xfe0   : > { %v14809_v55 = vpop.f32.mrb[108].mxu1 }
 0xfe1   : > { %v6883_v59 = vpop.f32.mrb[109].mxu1 }
 0xfe2   : > { %14851 = vmatprep.mubr.msk.f32.mxu0 %vm890_vm0, %v6883_v59 }
 0xfe3   : > { %14852 = vmatmul.mubr.msk.f32.gmra.mrb[60].mxu0 %vm890_vm0, %v14809_v55 }
 0xfe4   : > { %v14812_v60 = vpop.f32.mrb[110].mxu1 }
 0xfe5   : > { %v6893_v62 = vpop.f32.mrb[111].mxu1 }
 0xfe6   : > { %14854 = vmatprep.mubr.msk.f32.mxu0 %vm890_vm0, %v6893_v62 }
 0xfe7   : > { %14855 = vmatmul.mubr.msk.f32.gmra.mrb[62].mxu0 %vm890_vm0, %v14812_v60 }
0x1040   : > { %v14823_v47 = vpop.f32.mrb[104].mxu0 }
0x1041   : > { %v6992_v50 = vpop.f32.mrb[105].mxu0 }
0x1042   : > { %14857 = vmatprep.mubr.msk.f32.mxu0 %vm890_vm0, %v6992_v50 }
0x1043   : > { %14858 = vmatmul.mubr.msk.f32.gmra.mrb[64].mxu0 %vm890_vm0, %v14823_v47 }
0x1045   : > { %v14837_v48 = vpop.f32.mrb[112].mxu1 }
0x1046   : > { %v7101_v19 = vpop.f32.mrb[113].mxu1 }
0x1047   : > { %v14826_v14 = vpop.f32.mrb[106].mxu0 }
0x1048   : > { %v7002_v56 = vpop.f32.mrb[107].mxu0 }
0x1049   : > { %v14840_v26 = vpop.f32.mrb[114].mxu1  ;;  %14860 = vmatprep.mubr.msk.f32.mxu0 %vm890_vm0, %v7002_v56 }
0x104a   : > { %v7111_v58 = vpop.f32.mrb[115].mxu1  ;;  %14861 = vmatmul.mubr.msk.f32.gmra.mrb[66].mxu0 %vm890_vm0, %v14826_v14 }
0x104b   : > { %14863 = vmatprep.mubr.msk.f32.mxu0 %vm890_vm0, %v7101_v19 }
0x104e   : > { %14864 = vmatmul.mubr.msk.f32.gmra.mrb[68].mxu0 %vm890_vm0, %v14837_v48 }
0x104f   : > { %14866 = vmatprep.mubr.msk.f32.mxu0 %vm890_vm0, %v7111_v58 }
0x1052   : > { %14867 = vmatmul.mubr.msk.f32.gmra.mrb[70].mxu0 %vm890_vm0, %v14840_v26 }
0x1053   : > { %14905 = vmatprep.mubr.msk.f32.mxu0 %vm890_vm0, %v7564_v27 }
0x1056   : > { %14906 = vmatmul.mubr.msk.f32.vlgmr.msra.gmra.mrb[108].mxu0 %vm890_vm0, %v7566_v3 }
0x1057   : > { %14908 = vmatprep.mubr.msk.f32.mxu0 %vm890_vm0, %v7568_v40 }
0x105a   : > { %v14879_v44 = vpop.f32.mrb[116].mxu1  ;;  %14909 = vmatmul.mubr.msk.f32.gmra.mrb[110].mxu0 %vm890_vm0, %v7570_v53 }
0x105b   : > { %v7798_v16 = vsel %vm18294_vm4, %v14879_v44, -1e+30  ;;  %v7427_v24 = vpop.f32.mrb[117].mxu1 }
0x105c   : > { %v7816_v37 = vsel %vm1351_vm3, %v7798_v16, -inf  ;;  %v7797_v17 = vsel %vm18289_vm2, %v7427_v24, -1e+30 }
0x105d   : > { %v7813_v54 = vsel %vm1351_vm3, %v7797_v17, -inf  ;;  %7817 = vmax.xlane.f32.xlu1 %v7816_v37 }
0x105e   : > { %7814 = vmax.xlane.f32.xlu0 %v7813_v54  ;;  %v14882_v27 = vpop.f32.mrb[118].mxu1 }
0x105f   : > { %v7800_v40 = vsel %vm18308_vm6, %v14882_v27, -1e+30  ;;  %v7437_v3 = vpop.f32.mrb[119].mxu1 }
0x1060   : > { %v7822_v12 = vsel %vm1351_vm3, %v7800_v40, -inf  ;;  %v7799_v53 = vsel %vm18302_vm5, %v7437_v3, -1e+30 }
0x1061   : > { %v7819_v52 = vsel %vm1351_vm3, %v7799_v53, -inf }
0x1062   : > { %7823 = vmax.xlane.f32.xlu0 %v7822_v12 }
0x1066   : > { %7820 = vmax.xlane.f32.xlu0 %v7819_v52 }
0x106a   : > { %v14893_v57 = vpop.f32.mrb[120].mxu1 }
0x106b   : > { %v7802_v22 = vsel %vm18294_vm4, %v14893_v57, -1e+30  ;;  %v7544_v46 = vpop.f32.mrb[121].mxu1 }
0x106c   : > { %v7828_v25 = vsel %vm1351_vm3, %v7802_v22, -inf  ;;  %v7801_v43 = vsel %vm18289_vm2, %v7544_v46, -1e+30 }
0x106d   : > { %v7825_v61 = vsel %vm1351_vm3, %v7801_v43, -inf  ;;  %7829 = vmax.xlane.f32.xlu1 %v7828_v25 }
0x106e   : > { %7826 = vmax.xlane.f32.xlu0 %v7825_v61  ;;  %v14896_v28 = vpop.f32.mrb[122].mxu1 }
0x106f   : > { %v7804_v1 = vsel %vm18308_vm6, %v14896_v28, -1e+30  ;;  %v7554_v10 = vpop.f32.mrb[123].mxu1 }
0x1070   : > { %v7834_v55 = vsel %vm1351_vm3, %v7804_v1, -inf  ;;  %v7803_v59 = vsel %vm18302_vm5, %v7554_v10, -1e+30 }
0x1071   : > { %v7831_v60 = vsel %vm1351_vm3, %v7803_v59, -inf  ;;  %7835 = vmax.xlane.f32.xlu1 %v7834_v55 }
0x1072   : > { %7832 = vmax.xlane.f32.xlu0 %v7831_v60 }
0x107a   : > { %v14921_v62 = vpop.f32.mrb[124].mxu1 }
0x107b   : > { %v20155_v47 = vsel %vm18294_vm4, %v14921_v62, -1e+30  ;;  %v7778_v50 = vpop.f32.mrb[125].mxu1 }
0x107c   : > { %v7852_v48 = vsel %vm1351_vm3, %v20155_v47, -inf  ;;  %v20161_v19 = vsel %vm18289_vm2, %v7778_v50, -1e+30 }
0x107d   : > { %v7849_v14 = vsel %vm1351_vm3, %v20161_v19, -inf  ;;  %7853 = vmax.xlane.f32.xlu1 %v7852_v48 }
0x107e   : > { %7850 = vmax.xlane.f32.xlu0 %v7849_v14  ;;  %v14924_v56 = vpop.f32.mrb[126].mxu1 }
0x107f   : > { %v20167_v26 = vsel %vm18308_vm6, %v14924_v56, -1e+30  ;;  %v7788_v58 = vpop.f32.mrb[127].mxu1 }
0x1080   : > { %v7858_v44 = vsel %vm1351_vm3, %v20167_v26, -inf  ;;  %v20173_v24 = vsel %vm18302_vm5, %v7788_v58, -1e+30 }
0x1081   : > { %v7855_v37 = vsel %vm1351_vm3, %v20173_v24, -inf  ;;  %7859 = vmax.xlane.f32.xlu1 %v7858_v44 }
0x1082   : > { %7856 = vmax.xlane.f32.xlu0 %v7855_v37 }
0x10ea   : > { %v7818_v54 = vpop.xlane.xlu1 %7817 }
0x10eb   : > { %v7862_v27 = vsub.f32 %v7798_v16, %v7818_v54  ;;  %v7815_v3 = vpop.xlane.xlu0 %7814 }
0x10ec   : > { %v7861_v12 = vsub.f32 %v7797_v17, %v7815_v3 }
0x10ed   : > { %v7879_v52 = vmul.f32 1.442695, %v7862_v27 }
0x10ee   : > { %v7877_v57 = vmul.f32 1.442695, %v7861_v12 }
0x10ef   : > { %17248 = vpow2.f32 %v7879_v52  ;;  %v7824_v46 = vpop.xlane.xlu0 %7823 }
0x10f0   : > { %17250 = vpow2.f32 %v7877_v57  ;;  %v7864_v25 = vsub.f32 %v7800_v40, %v7824_v46 }
0x10f2   : > { %v7883_v61 = vmul.f32 1.442695, %v7864_v25 }
0x10f3   : > { %v7821_v28 = vpop.xlane.xlu0 %7820 }
0x10f4   : > { %17252 = vpow2.f32 %v7883_v61  ;;  %v7863_v10 = vsub.f32 %v7799_v53, %v7821_v28 }
0x10f6   : > { %v7881_v55 = vmul.f32 1.442695, %v7863_v10 }
0x10f8   : > { %17254 = vpow2.f32 %v7881_v55 }
0x10f9   : > { %v20177_v60 = vpop.eup %17248 }
0x10fa   : > { %v20179_v62 = vpop.eup %17250  ;;  %v7830_v50 = vpop.xlane.xlu1 %7829  ;;  %v7912_v16 = vsel %vm1351_vm3, %v20177_v60, 0.0 }
0x10fb   : > { %v7866_v17 = vsub.f32 %v7802_v22, %v7830_v50  ;;  %v7827_v48 = vpop.xlane.xlu0 %7826  ;;  %7913 = vadd.xlane.f32.xlu1 %v7912_v16  ;;  %v7909_v40 = vsel %vm1351_vm3, %v20179_v62, 0.0 }
0x10fc   : > { %v7865_v14 = vsub.f32 %v7801_v43, %v7827_v48  ;;  %7910 = vadd.xlane.f32.xlu0 %v7909_v40 }
0x10fd   : > { %v7887_v56 = vmul.f32 1.442695, %v7866_v17 }
0x10fe   : > { %v20185_v53 = vpop.eup %17252  ;;  %v7885_v58 = vmul.f32 1.442695, %v7865_v14  ;;  %v7836_v44 = vpop.xlane.xlu1 %7835 }
0x10ff   : > { %17256 = vpow2.f32 %v7887_v56  ;;  %v7868_v37 = vsub.f32 %v7804_v1, %v7836_v44  ;;  %v7833_v54 = vpop.xlane.xlu0 %7832  ;;  %v7918_v27 = vsel %vm1351_vm3, %v20185_v53, 0.0 }
0x1100   : > { %17258 = vpow2.f32 %v7885_v58  ;;  %v7867_v22 = vsub.f32 %v7803_v59, %v7833_v54  ;;  %7919 = vadd.xlane.f32.xlu1 %v7918_v27  ;;  %v21911_v27 = vld [vmem:[#allocation39_spill] sm:$0xff] }
0x1101   : > { %v7891_v3 = vmul.f32 1.442695, %v7868_v37 }
0x1102   : > { %v20189_v12 = vpop.eup %17254  ;;  %v7889_v52 = vmul.f32 1.442695, %v7867_v22  ;;  %v21912_v22 = vld [vmem:[#allocation38_spill] sm:$0xff] }
0x1103   : > { %17260 = vpow2.f32 %v7891_v3  ;;  %v7915_v43 = vsel %vm1351_vm3, %v20189_v12, 0.0 }
0x1104   : > { %17262 = vpow2.f32 %v7889_v52  ;;  %7916 = vadd.xlane.f32.xlu0 %v7915_v43 }
0x1109   : > { %v20193_v57 = vpop.eup %17256 }
0x110a   : > { %v20195_v1 = vpop.eup %17258  ;;  %v7924_v46 = vsel %vm1351_vm3, %v20193_v57, 0.0  ;;  %v7854_v52 = vpop.xlane.xlu1 %7853 }
0x110b   : > { %7925 = vadd.xlane.f32.xlu1 %v7924_v46  ;;  %v7921_v59 = vsel %vm1351_vm3, %v20195_v1, 0.0  ;;  %v7851_v3 = vpop.xlane.xlu0 %7850  ;;  %v7874_v43 = vsub.f32 %v20155_v47, %v7854_v52  ;;  %v21913_v52 = vld [vmem:[#allocation40_spill] sm:$0xff] }
0x110c   : > { %7922 = vadd.xlane.f32.xlu0 %v7921_v59  ;;  %v7873_v46 = vsub.f32 %v20161_v19, %v7851_v3 }
0x110d   : > { %v20201_v25 = vpop.eup %17260 }
0x110e   : > { %v20203_v61 = vpop.eup %17262  ;;  %v7930_v28 = vsel %vm1351_vm3, %v20201_v25, 0.0 }
0x110f   : > { %7931 = vadd.xlane.f32.xlu1 %v7930_v28  ;;  %v7927_v10 = vsel %vm1351_vm3, %v20203_v61, 0.0  ;;  %v7857_v59 = vpop.xlane.xlu0 %7856  ;;  %v7903_v28 = vmul.f32 1.442695, %v7874_v43  ;;  %v21914_v43 = vld [vmem:[#allocation41_spill] sm:$0xff] }
0x1110   : > { %7928 = vadd.xlane.f32.xlu0 %v7927_v10  ;;  %v7875_v10 = vsub.f32 %v20173_v24, %v7857_v59  ;;  %v21916_v59 = vld [vmem:[#allocation43_spill] sm:$0xff] }
0x1111   : > { %17264 = vpow2.f32 %v7903_v28 }
0x1129   : > { %v14907_v55 = vpop.f32.mrb[108].mxu0 }
0x112a   : > { %v20211_v50 = vsel %vm18294_vm4, %v14907_v55, -1e+30  ;;  %v7661_v16 = vpop.f32.mrb[109].mxu0  ;;  %v7901_v55 = vmul.f32 1.442695, %v7873_v46  ;;  %v21915_v46 = vld [vmem:[#allocation42_spill] sm:$0xff] }
0x112b   : > { %v7840_v17 = vsel %vm1351_vm3, %v20211_v50, -inf  ;;  %v20217_v48 = vsel %vm18289_vm2, %v7661_v16, -1e+30  ;;  %v7860_v16 = vpop.xlane.xlu1 %7859 }
0x112c   : > { %v7837_v40 = vsel %vm1351_vm3, %v20217_v48, -inf  ;;  %7841 = vmax.xlane.f32.xlu1 %v7840_v17  ;;  %v7876_v17 = vsub.f32 %v20167_v26, %v7860_v16  ;;  %17266 = vpow2.f32 %v7901_v55 }
0x112d   : > { %7838 = vmax.xlane.f32.xlu0 %v7837_v40  ;;  %v14910_v14 = vpop.f32.mrb[110].mxu0  ;;  %v7905_v40 = vmul.f32 1.442695, %v7875_v10 }
0x112e   : > { %v20223_v56 = vsel %vm18308_vm6, %v14910_v14, -1e+30  ;;  %v7671_v58 = vpop.f32.mrb[111].mxu0  ;;  %v7907_v14 = vmul.f32 1.442695, %v7876_v17 }
0x112f   : > { %v7846_v44 = vsel %vm1351_vm3, %v20223_v56, -inf  ;;  %v20229_v37 = vsel %vm18302_vm5, %v7671_v58, -1e+30  ;;  %17268 = vpow2.f32 %v7905_v40  ;;  %v20241_v58 = vpop.eup %17264 }
0x1130   : > { %v7843_v54 = vsel %vm1351_vm3, %v20229_v37, -inf  ;;  %7847 = vmax.xlane.f32.xlu1 %v7846_v44  ;;  %17270 = vpow2.f32 %v7907_v14  ;;  %v7948_v47 = vsel %vm1351_vm3, %v20241_v58, 0.0 }
0x1131   : > { %7844 = vmax.xlane.f32.xlu0 %v7843_v54 }
0x1136   : > { %v20243_v44 = vpop.eup %17266 }
0x1137   : > { %v7945_v24 = vsel %vm1351_vm3, %v20243_v44, 0.0 }
0x1139   : > { %v20247_v19 = vpop.eup %17268 }
0x113a   : > { %v7951_v26 = vsel %vm1351_vm3, %v20247_v19, 0.0  ;;  %v20253_v54 = vpop.eup %17270 }
0x113b   : > { %v7954_v3 = vsel %vm1351_vm3, %v20253_v54, 0.0 }
0x1141   : > { %16734 = vrot.lane.b32.xlu1 %v21911_v27, %s17754_s16 }
0x1147   : > { %16729 = vrot.lane.b32.xlu0 %v21912_v22, %s17754_s16 }
0x1165   : > { %7949 = vadd.xlane.f32.xlu1 %v7948_v47 }
0x1166   : > { %7946 = vadd.xlane.f32.xlu0 %v7945_v24 }
0x1169   : > { %7952 = vadd.xlane.f32.xlu1 %v7951_v26 }
0x116d   : > { %7955 = vadd.xlane.f32.xlu1 %v7954_v3 }
0x117c   : > { %16739 = vrot.lane.b32.xlu0 %v21913_v52, %s17754_s16 }
0x117e   : > { %16744 = vrot.lane.b32.xlu1 %v21914_v43, %s17754_s16 }
0x1180   : > { %16749 = vrot.lane.b32.xlu0 %v21915_v46, %s17754_s16 }
0x1184   : > { %16754 = vrot.lane.b32.xlu0 %v21916_v59, %s17754_s16 }
0x1188   : > { %v7914_v16 = vpop.xlane.xlu1 %7913 }
0x1189   : > { %v7911_v28 = vpop.xlane.xlu0 %7910 }
0x118a   : > { %17272 = vrcp.f32 %v7911_v28 }
0x118b   : > { %17274 = vrcp.f32 %v7914_v16 }
0x118d   : > { %v7920_v17 = vpop.xlane.xlu1 %7919 }
0x1191   : > { %v7917_v40 = vpop.xlane.xlu0 %7916 }
0x1194   : > { %v17273_v10 = vpop.eup %17272 }
0x1195   : > { %v7973_v55 = vmul.f32 %v17273_v10, %v20179_v62  ;;  %v17275_v16 = vpop.eup %17274 }
0x1197   : > { %14933 = vmatprep.mubr.msk.f32.mxu0 %vm1351_vm3, %v7973_v55 }
0x1198   : > { %v20267_v14 = vpop.xlane.xlu1 %7925 }
0x1199   : > { %v7923_v47 = vpop.xlane.xlu0 %7922 }
0x119c   : > { %v20269_v24 = vpop.xlane.xlu1 %7931 }
0x119d   : > { %v20271_v26 = vpop.xlane.xlu0 %7928 }
0x11b9   : > { %v7842_v3 = vpop.xlane.xlu1 %7841 }
0x11ba   : > { %v7870_v59 = vsub.f32 %v20211_v50, %v7842_v3  ;;  %v7839_v46 = vpop.xlane.xlu0 %7838 }
0x11bb   : > { %v7869_v28 = vsub.f32 %v20217_v48, %v7839_v46 }
0x11bc   : > { %v7895_v43 = vmul.f32 1.442695, %v7870_v59 }
0x11bd   : > { %v7893_v62 = vmul.f32 1.442695, %v7869_v28  ;;  %v7848_v10 = vpop.xlane.xlu1 %7847 }
0x11be   : > { %17276 = vpow2.f32 %v7895_v43  ;;  %v7872_v55 = vsub.f32 %v20223_v56, %v7848_v10  ;;  %v7845_v52 = vpop.xlane.xlu0 %7844 }
0x11bf   : > { %17278 = vpow2.f32 %v7893_v62  ;;  %v7871_v22 = vsub.f32 %v20229_v37, %v7845_v52 }
0x11c0   : > { %17280 = vrcp.f32 %v7920_v17  ;;  %v7899_v27 = vmul.f32 1.442695, %v7872_v55  ;;  %v7974_v17 = vmul.f32 %v17275_v16, %v20177_v60 }
0x11c1   : > { %17282 = vrcp.f32 %v7917_v40  ;;  %v7897_v11 = vmul.f32 1.442695, %v7871_v22  ;;  %v16735_v15 = vpop.permute.xlu1 %16734 }
0x11c2   : > { %17284 = vpow2.f32 %v7899_v27  ;;  %v16730_v50 = vpop.permute.xlu0 %16729  ;;  %v16737_v3 = vunpack.i.h.bf16 %v16735_v15  ;;  %v16736_v48 = vunpack.i.l.bf16 %v16735_v15 }
0x11c3   : > { %v16732_v46 = vunpack.i.h.bf16 %v16730_v50  ;;  %v16731_v59 = vunpack.i.l.bf16 %v16730_v50  ;;  %17286 = vpow2.f32 %v7897_v11 }
0x11c4   : > { %17288 = vrcp.f32 %v7923_v47  ;;  %v15825_v56 = vpack.c.bf16 %v16737_v3, %v16736_v48 }
0x11c5   : > { %v15821_v43 = vpack.c.bf16 %v16732_v46, %v16731_v59  ;;  %17290 = vrcp.f32 %v20267_v14 }
0x11c6   : > { %17292 = vrcp.f32 %v20271_v26 }
0x11c7   : > { %15822 = vmatprep.subr.bf16.mxu0 %v15821_v43  ;;  %17294 = vrcp.f32 %v20269_v24 }
0x11c8   : > { %v20277_v28 = vpop.eup %17276  ;;  %15824 = vmatpush3.bf16.msra.mxu0 %v15821_v43 }
0x11c9   : > { %v20279_v37 = vpop.eup %17278  ;;  %15826 = vmatprep.subr.bf16.mxu0 %v15825_v56  ;;  %v7936_v27 = vsel %vm1351_vm3, %v20277_v28, 0.0 }
0x11ca   : > { %v17281_v22 = vpop.eup %17280  ;;  %7937 = vadd.xlane.f32.xlu1 %v7936_v27  ;;  %v7933_v15 = vsel %vm1351_vm3, %v20279_v37, 0.0 }
0x11cb   : > { %v17283_v11 = vpop.eup %17282  ;;  %7934 = vadd.xlane.f32.xlu0 %v7933_v15  ;;  %v7976_v50 = vmul.f32 %v17281_v22, %v20185_v53 }
0x11cc   : > { %v20285_v52 = vpop.eup %17284  ;;  %15828 = vmatpush3.bf16.msra.mxu0 %v15825_v56  ;;  %v7975_v62 = vmul.f32 %v17283_v11, %v20189_v12 }
0x11cd   : > { %v7942_v40 = vsel %vm1351_vm3, %v20285_v52, 0.0  ;;  %v20290_v47 = vpop.eup %17286 }
0x11ce   : > { %7943 = vadd.xlane.f32.xlu1 %v7942_v40  ;;  %v17289_v10 = vpop.eup %17288  ;;  %v7939_v55 = vsel %vm1351_vm3, %v20290_v47, 0.0 }
0x11cf   : > { %14934 = vmatmul.mubr.msk.f32.vlgmr.msra.gmra.mrb[112].mxu0 %vm1351_vm3, %v7974_v17  ;;  %v7977_v60 = vmul.f32 %v17289_v10, %v20195_v1 }
0x11d0   : > { %14936 = vmatprep.mubr.msk.f32.mxu0 %vm1351_vm3, %v7975_v62  ;;  %v17291_v62 = vpop.eup %17290 }
0x11d2   : > { %7940 = vadd.xlane.f32.xlu1 %v7939_v55  ;;  %v17293_v55 = vpop.eup %17292 }
0x11d3   : > { %14937 = vmatmul.mubr.msk.f32.gmra.mrb[114].mxu0 %vm1351_vm3, %v7976_v50  ;;  %v7978_v50 = vmul.f32 %v17291_v62, %v20193_v57 }
0x11d4   : > { %14947 = vmatprep.mubr.msk.f32.mxu0 %vm1351_vm3, %v7977_v60  ;;  %v17295_v60 = vpop.eup %17294 }
0x11d5   : > { %v7980_v57 = vmul.f32 %v17295_v60, %v20201_v25 }
0x11e1   : > { %16759 = vrot.lane.b32.xlu0 %v21845_v31, %s17754_s16 }
0x11e3   : > { %16764 = vrot.lane.b32.xlu1 %v21894_v2, %s17754_s16  ;;  %s17662_s16 = scalar_lea.vmem %s21652_s28, 2048 }
0x11e4   : > { %p17663_p3 = scmp.ne.s32.totalorder %s21652_s28, %s17662_s16 }
0x11e5   : > { %16769 = vrot.lane.b32.xlu0 %v21869_v35, %s17755_s1 }
0x11e6   : > { %p17664_p5 = pnand %p17663_p3, %p17987_p10 }
0x11e7   : > { %16774 = vrot.lane.b32.xlu1 %v21895_v8, %s17755_s1 }
0x11e8   : > { %p17665_p7 = pneg %p17664_p5 }
0x11e9   : > { %16779 = vrot.lane.b32.xlu0 %v21870_v33, %s17755_s1 }
0x11eb   : > { %8634 = vrot.lane.b32.xlu1 %v21896_v13, %s17755_s1 }
0x11ed   : > { %8636 = vrot.lane.b32.xlu0 %v21872_v20, %s17755_s1 }
0x11ef   : > { %16784 = vrot.lane.b32.xlu1 %v21897_v7, %s17755_s1 }
0x11f1   : > { %16789 = vrot.lane.b32.xlu0 %v21875_v32, %s17755_s1 }
0x11f2   : > { %v20319_v53 = vpop.xlane.xlu1 %7949 }
0x11f3   : > { %8638 = vrot.lane.b32.xlu1 %v21898_v45, %s17755_s1  ;;  %v7947_v12 = vpop.xlane.xlu0 %7946 }
0x11f4   : > { %17296 = vrcp.f32 %v7947_v12  ;;  %v7979_v12 = vmul.f32 %v17293_v55, %v20203_v61 }
0x11f5   : > { %8640 = vrot.lane.b32.xlu0 %v21878_v0, %s17755_s1 }
0x11f6   : > { %v20325_v1 = vpop.xlane.xlu1 %7952 }
0x11f7   : > { %16794 = vrot.lane.b32.xlu1 %v21899_v42, %s17755_s1  ;;  %v16740_v3 = vpop.permute.xlu0 %16739 }
0x11f8   : > { %v16742_v48 = vunpack.i.h.bf16 %v16740_v3  ;;  %v16741_v46 = vunpack.i.l.bf16 %v16740_v3 }
0x11f9   : > { %16799 = vrot.lane.b32.xlu0 %v21881_v5, %s17755_s1 }
0x11fa   : > { %v20333_v59 = vpop.xlane.xlu1 %7955  ;;  %v15829_v43 = vpack.c.bf16 %v16742_v48, %v16741_v46 }
0x11fb   : > { %8751 = vrot.lane.b32.xlu1 %v21900_v18, %s17755_s1  ;;  %v16750_v16 = vpop.permute.xlu0 %16749 }
0x11fc   : > { %v16752_v56 = vunpack.i.h.bf16 %v16750_v16  ;;  %v16751_v27 = vunpack.i.l.bf16 %v16750_v16  ;;  %15830 = vmatprep.subr.bf16.mxu0 %v15829_v43 }
0x11fd   : > { %8753 = vrot.lane.b32.xlu0 %v21884_v6, %s17755_s1  ;;  %15832 = vmatpush3.bf16.msra.mxu0 %v15829_v43 }
0x11fe   : > { %v16745_v14 = vpop.permute.xlu1 %16744  ;;  %v15837_v26 = vpack.c.bf16 %v16752_v56, %v16751_v27  ;;  %v17297_v3 = vpop.eup %17296 }
0x11ff   : > { %v16747_v22 = vunpack.i.h.bf16 %v16745_v14  ;;  %v16746_v15 = vunpack.i.l.bf16 %v16745_v14  ;;  %8755 = vrot.lane.b32.xlu1 %v21901_v49, %s17755_s1  ;;  %v16755_v11 = vpop.permute.xlu0 %16754  ;;  %v7985_v48 = vmul.f32 %v17297_v3, %v20243_v44 }
0x1200   : > { %v16757_v17 = vunpack.i.h.bf16 %v16755_v11  ;;  %v16756_v40 = vunpack.i.l.bf16 %v16755_v11  ;;  %15838 = vmatprep.subr.bf16.mxu1 %v15837_v26 }
0x1201   : > { %8757 = vrot.lane.b32.xlu0 %v21887_v51, %s17755_s1  ;;  %15840 = vmatpush3.bf16.msra.mxu1 %v15837_v26  ;;  %v15833_v24 = vpack.c.bf16 %v16747_v22, %v16746_v15 }
0x1202   : > { %v15841_v10 = vpack.c.bf16 %v16757_v17, %v16756_v40 }
0x1203   : > { %16804 = vrot.lane.b32.xlu1 %v18234_v36, %s17755_s1  ;;  %15834 = vmatprep.subr.bf16.mxu0 %v15833_v24 }
0x1204   : > { %15836 = vmatpush3.bf16.msra.mxu0 %v15833_v24  ;;  %15842 = vmatprep.subr.bf16.mxu1 %v15841_v10  ;;  %v885_v24 = vld [vmem:[#allocation7 + $0x58] sm:$0xff] }
0x1205   : > { %8868 = vrot.lane.b32.xlu0 %v21890_v34, %s17755_s1  ;;  %15844 = vmatpush3.bf16.msra.mxu1 %v15841_v10 }
0x1207   : > { %8870 = vrot.lane.b32.xlu1 %v21902_v38, %s17755_s1  ;;  %14948 = vmatmul.mubr.msk.f32.vlgmr.msra.gmra.mrb[116].mxu0 %vm1351_vm3, %v7978_v50 }
0x1208   : > { %14950 = vmatprep.mubr.msk.f32.mxu0 %vm1351_vm3, %v7979_v12 }
0x1209   : > { %8872 = vrot.lane.b32.xlu0 %v18192_v9, %s17755_s1 }
0x120b   : > { %8874 = vrot.lane.b32.xlu1 %v21846_v41, %s17755_s1  ;;  %14951 = vmatmul.mubr.msk.f32.gmra.mrb[118].mxu0 %vm1351_vm3, %v7980_v57 }
0x120c   : > { %14975 = vmatprep.mubr.msk.f32.mxu0 %vm1351_vm3, %v7985_v48 }
0x120d   : > { %8985 = vrot.lane.b32.xlu0 %v21903_v23, %s17755_s1 }
0x120f   : > { %8987 = vrot.lane.b32.xlu1 %v18216_v21, %s17755_s1 }
0x1211   : > { %8989 = vrot.lane.b32.xlu0 %v21904_v39, %s17755_s1 }
0x1213   : > { %8991 = vrot.lane.b32.xlu1 %v18230_v29, %s17755_s1 }
0x1257   : > { %v7938_v25 = vpop.xlane.xlu1 %7937 }
0x1258   : > { %17298 = vrcp.f32 %v7938_v25  ;;  %v7935_v61 = vpop.xlane.xlu0 %7934 }
0x1259   : > { %17300 = vrcp.f32 %v7935_v61 }
0x125a   : > { %17302 = vrcp.f32 %v20319_v53  ;;  %v884_v53 = vld [vmem:[#allocation7 + $0x50] sm:$0xff] }
0x125b   : > { %v7944_v44 = vpop.xlane.xlu1 %7943  ;;  %17304 = vrcp.f32 %v20325_v1  ;;  %v15853_v60 = vpack.c.bf16 %v885_v24, %v884_v53 }
0x125c   : > { %v16760_v46 = vpop.permute.xlu0 %16759  ;;  %17306 = vrcp.f32 %v7944_v44 }
0x125d   : > { %v16762_v43 = vunpack.i.h.bf16 %v16760_v46  ;;  %v16761_v16 = vunpack.i.l.bf16 %v16760_v46 }
0x125f   : > { %v7941_v56 = vpop.xlane.xlu1 %7940  ;;  %v15845_v27 = vpack.c.bf16 %v16762_v43, %v16761_v16 }
0x1260   : > { %17308 = vrcp.f32 %v7941_v56  ;;  %v16770_v14 = vpop.permute.xlu0 %16769 }
0x1261   : > { %17310 = vrcp.f32 %v20333_v59  ;;  %v16772_v26 = vunpack.i.h.bf16 %v16770_v14  ;;  %v16771_v22 = vunpack.i.l.bf16 %v16770_v14  ;;  %15846 = vmatprep.subr.bf16.mxu0 %v15845_v27 }
0x1262   : > { %v17299_v15 = vpop.eup %17298  ;;  %15848 = vmatpush3.bf16.msra.mxu0 %v15845_v27 }
0x1263   : > { %v17301_v11 = vpop.eup %17300  ;;  %v15857_v17 = vpack.c.bf16 %v16772_v26, %v16771_v22  ;;  %v16765_v40 = vpop.permute.xlu1 %16764  ;;  %v7982_v50 = vmul.f32 %v17299_v15, %v20277_v28 }
0x1264   : > { %v16767_v62 = vunpack.i.h.bf16 %v16765_v40  ;;  %v16766_v10 = vunpack.i.l.bf16 %v16765_v40  ;;  %v16780_v1 = vpop.permute.xlu0 %16779  ;;  %v7981_v55 = vmul.f32 %v17301_v11, %v20279_v37  ;;  %v17303_v12 = vpop.eup %17302 }
0x1265   : > { %15859 = vmatprep.subr.msk.bf16.mxu1 %vm18106_vm1, %v15857_v17  ;;  %v17305_v57 = vpop.eup %17304  ;;  %v7986_v44 = vmul.f32 %v17303_v12, %v20241_v58  ;;  %v16782_v16 = vunpack.i.h.bf16 %v16780_v1  ;;  %v16781_v56 = vunpack.i.l.bf16 %v16780_v1 }
0x1266   : > { %14961 = vmatprep.mubr.msk.f32.mxu1 %vm1351_vm3, %v7981_v55  ;;  %v15849_v59 = vpack.c.bf16 %v16767_v62, %v16766_v10  ;;  %v17307_v28 = vpop.eup %17306  ;;  %v7987_v26 = vmul.f32 %v17305_v57, %v20247_v19 }
0x1267   : > { %v16775_v3 = vpop.permute.xlu1 %16774  ;;  %14962 = vmatmul.mubr.msk.f32.vlgmr.msra.gmra.mrb[128].mxu1 %vm1351_vm3, %v7982_v50  ;;  %v7984_v15 = vmul.f32 %v17307_v28, %v20285_v52  ;;  %v15869_v19 = vpack.c.bf16 %v16782_v16, %v16781_v56 }
0x1268   : > { %v16777_v48 = vunpack.i.h.bf16 %v16775_v3  ;;  %v16776_v25 = vunpack.i.l.bf16 %v16775_v3  ;;  %15862 = vmatpush3.bf16.xpose.msk.msra.mxu1 %vm18106_vm1, %v15857_v17  ;;  %v8637_v37 = vpop.permute.xlu0 %8636  ;;  %15850 = vmatprep.subr.bf16.mxu0 %v15849_v59 }
0x1269   : > { %15852 = vmatpush3.bf16.msra.mxu0 %v15849_v59 }
0x126a   : > { %v17309_v61 = vpop.eup %17308  ;;  %v15863_v46 = vpack.c.bf16 %v16777_v48, %v16776_v25  ;;  %15854 = vmatprep.subr.bf16.mxu0 %v15853_v60 }
0x126b   : > { %v17311_v43 = vpop.eup %17310  ;;  %v8635_v27 = vpop.permute.xlu1 %8634  ;;  %v7983_v14 = vmul.f32 %v17309_v61, %v20290_v47 }
0x126c   : > { %v16790_v22 = vpop.permute.xlu0 %16789  ;;  %14976 = vmatmul.mubr.msk.f32.vlgmr.msra.gmra.mrb[120].mxu0 %vm1351_vm3, %v7986_v44  ;;  %15865 = vmatprep.subr.msk.bf16.mxu1 %vm18106_vm1, %v15863_v46  ;;  %v7988_v47 = vmul.f32 %v17311_v43, %v20253_v54 }
0x126d   : > { %v16792_v11 = vunpack.i.h.bf16 %v16790_v22  ;;  %v16791_v58 = vunpack.i.l.bf16 %v16790_v22  ;;  %14964 = vmatprep.mubr.msk.f32.mxu1 %vm1351_vm3, %v7983_v14  ;;  %14978 = vmatprep.mubr.msk.f32.mxu0 %vm1351_vm3, %v7987_v26 }
0x126e   : > { %14965 = vmatmul.mubr.msk.f32.gmra.mrb[130].mxu1 %vm1351_vm3, %v7984_v15  ;;  %15856 = vmatpush3.bf16.msra.mxu0 %v15853_v60 }
0x126f   : > { %v15881_v17 = vpack.c.bf16 %v16792_v11, %v16791_v58  ;;  %v16785_v40 = vpop.permute.xlu1 %16784  ;;  %15017 = vmatprep.mubr.msk.f32.mxu1 %vm890_vm0, %v8635_v27 }
0x1270   : > { %15868 = vmatpush3.bf16.xpose.msk.msra.mxu1 %vm18106_vm1, %v15863_v46  ;;  %v8641_v52 = vpop.permute.xlu0 %8640  ;;  %14979 = vmatmul.mubr.msk.f32.gmra.mrb[122].mxu0 %vm1351_vm3, %v7988_v47  ;;  %v16787_v53 = vunpack.i.h.bf16 %v16785_v40  ;;  %v16786_v54 = vunpack.i.l.bf16 %v16785_v40 }
0x1271   : > { %15871 = vmatprep.subr.msk.bf16.mxu1 %vm18106_vm1, %v15869_v19  ;;  %15883 = vmatprep.subr.msk.bf16.mxu0 %vm18106_vm1, %v15881_v17 }
0x1272   : > { %v15875_v10 = vpack.c.bf16 %v16787_v53, %v16786_v54 }
0x1273   : > { %v8639_v24 = vpop.permute.xlu1 %8638 }
0x1274   : > { %v16800_v62 = vpop.permute.xlu0 %16799 }
0x1275   : > { %v16802_v50 = vunpack.i.h.bf16 %v16800_v62  ;;  %v16801_v59 = vunpack.i.l.bf16 %v16800_v62 }
0x1277   : > { %15018 = vmatmul.mubr.msk.f32.vlgmr.msra.gmra.mrb[132].mxu1 %vm890_vm0, %v8637_v37  ;;  %v16795_v1 = vpop.permute.xlu1 %16794  ;;  %v15893_v3 = vpack.c.bf16 %v16802_v50, %v16801_v59 }
0x1278   : > { %15020 = vmatprep.mubr.msk.f32.mxu1 %vm890_vm0, %v8639_v24  ;;  %15874 = vmatpush3.bf16.xpose.msk.msra.mxu1 %vm18106_vm1, %v15869_v19  ;;  %v8754_v55 = vpop.permute.xlu0 %8753  ;;  %v16797_v26 = vunpack.i.h.bf16 %v16795_v1  ;;  %v16796_v22 = vunpack.i.l.bf16 %v16795_v1 }
0x1279   : > { %15877 = vmatprep.subr.msk.bf16.mxu1 %vm18106_vm1, %v15875_v10 }
0x127a   : > { %v15887_v58 = vpack.c.bf16 %v16797_v26, %v16796_v22 }
0x127b   : > { %15021 = vmatmul.mubr.msk.f32.gmra.mrb[134].mxu1 %vm890_vm0, %v8641_v52  ;;  %v8752_v60 = vpop.permute.xlu1 %8751 }
0x127c   : > { %v8758_v12 = vpop.permute.xlu0 %8757  ;;  %15031 = vmatprep.mubr.msk.f32.mxu1 %vm890_vm0, %v8752_v60 }
0x127f   : > { %v8756_v57 = vpop.permute.xlu1 %8755 }
0x1280   : > { %15880 = vmatpush3.bf16.xpose.msk.msra.mxu1 %vm18106_vm1, %v15875_v10  ;;  %v20410_v48 = vpop.permute.xlu0 %8868 }
0x1281   : > { %15895 = vmatprep.subr.msk.bf16.mxu1 %vm18106_vm1, %v15893_v3 }
0x1283   : > { %v16805_v25 = vpop.permute.xlu1 %16804 }
0x1284   : > { %v16807_v37 = vunpack.i.h.bf16 %v16805_v25  ;;  %v16806_v28 = vunpack.i.l.bf16 %v16805_v25  ;;  %v20414_v61 = vpop.permute.xlu0 %8872 }
0x1286   : > { %v15899_v44 = vpack.c.bf16 %v16807_v37, %v16806_v28 }
0x1287   : > { %15032 = vmatmul.mubr.msk.f32.vlgmr.msra.gmra.mrb[136].mxu1 %vm890_vm0, %v8754_v55  ;;  %v20417_v46 = vpop.permute.xlu1 %8870 }
0x1288   : > { %15034 = vmatprep.mubr.msk.f32.mxu1 %vm890_vm0, %v8756_v57  ;;  %15898 = vmatpush3.bf16.xpose.msk.msra.mxu1 %vm18106_vm1, %v15893_v3  ;;  %v8986_v43 = vpop.permute.xlu0 %8985 }
0x1289   : > { %15901 = vmatprep.subr.msk.bf16.mxu1 %vm18106_vm1, %v15899_v44 }
0x128b   : > { %15035 = vmatmul.mubr.msk.f32.gmra.mrb[138].mxu1 %vm890_vm0, %v8758_v12  ;;  %v20426_v16 = vpop.permute.xlu1 %8874 }
0x128c   : > { %15059 = vmatprep.mubr.msk.f32.mxu1 %vm890_vm0, %v8986_v43  ;;  %v8990_v27 = vpop.permute.xlu0 %8989 }
0x128f   : > { %v8988_v56 = vpop.permute.xlu1 %8987 }
0x1290   : > { %15904 = vmatpush3.bf16.xpose.msk.msra.mxu1 %vm18106_vm1, %v15899_v44 }
0x1293   : > { %v8992_v14 = vpop.permute.xlu1 %8991 }
0x1297   : > { %15060 = vmatmul.mubr.msk.f32.vlgmr.msra.gmra.mrb[140].mxu1 %vm890_vm0, %v8988_v56 }
0x1298   : > { %15062 = vmatprep.mubr.msk.f32.mxu1 %vm890_vm0, %v8990_v27 }
0x129b   : > { %15063 = vmatmul.mubr.msk.f32.gmra.mrb[142].mxu1 %vm890_vm0, %v8992_v14 }
0x12a2   : > { %v14935_v15 = vpop.f32.mrb[112].mxu0 }
0x12a3   : > { %v8079_v11 = vpop.f32.mrb[113].mxu0 }
0x12a4   : > { %14985 = vmatprep.mubr.msk.f32.mxu0 %vm890_vm0, %v8079_v11 }
0x12a5   : > { %14986 = vmatmul.mubr.msk.f32.vlgmr.msra.gmra.mrb[56].mxu0 %vm890_vm0, %v14935_v15 }
0x12a6   : > { %15886 = vmatpush3.bf16.xpose.msk.msra.mxu0 %vm18106_vm1, %v15881_v17  ;;  %v14938_v47 = vpop.f32.mrb[114].mxu0 }
0x12a7   : > { %15889 = vmatprep.subr.msk.bf16.mxu0 %vm18106_vm1, %v15887_v58  ;;  %v8089_v19 = vpop.f32.mrb[115].mxu0 }
0x12a8   : > { %14988 = vmatprep.mubr.msk.f32.mxu0 %vm890_vm0, %v8089_v19 }
0x12a9   : > { %14989 = vmatmul.mubr.msk.f32.gmra.mrb[58].mxu0 %vm890_vm0, %v14938_v47 }
0x12ae   : > { %15892 = vmatpush3.bf16.xpose.msk.msra.mxu0 %vm18106_vm1, %v15887_v58 }
0x12da   : > { %v14949_v40 = vpop.f32.mrb[116].mxu0 }
0x12db   : > { %v8188_v52 = vpop.f32.mrb[117].mxu0 }
0x12dc   : > { %14991 = vmatprep.mubr.msk.f32.mxu0 %vm890_vm0, %v8188_v52 }
0x12dd   : > { %14992 = vmatmul.mubr.msk.f32.gmra.mrb[60].mxu0 %vm890_vm0, %v14949_v40 }
0x12de   : > { %v14952_v53 = vpop.f32.mrb[118].mxu0 }
0x12df   : > { %v8198_v17 = vpop.f32.mrb[119].mxu0 }
0x12e0   : > { %14994 = vmatprep.mubr.msk.f32.mxu0 %vm890_vm0, %v8198_v17 }
0x12e1   : > { %14995 = vmatmul.mubr.msk.f32.gmra.mrb[62].mxu0 %vm890_vm0, %v14952_v53 }
0x133a   : > { %v14963_v54 = vpop.f32.mrb[128].mxu1 }
0x133b   : > { %v8297_v24 = vpop.f32.mrb[129].mxu1 }
0x133c   : > { %14997 = vmatprep.mubr.msk.f32.mxu0 %vm890_vm0, %v8297_v24 }
0x133d   : > { %14998 = vmatmul.mubr.msk.f32.gmra.mrb[64].mxu0 %vm890_vm0, %v14963_v54 }
0x133f   : > { %v14977_v62 = vpop.f32.mrb[120].mxu0 }
0x1340   : > { %v8406_v10 = vpop.f32.mrb[121].mxu0 }
0x1341   : > { %v14966_v1 = vpop.f32.mrb[130].mxu1 }
0x1342   : > { %v8307_v55 = vpop.f32.mrb[131].mxu1 }
0x1343   : > { %v14980_v50 = vpop.f32.mrb[122].mxu0  ;;  %15000 = vmatprep.mubr.msk.f32.mxu0 %vm890_vm0, %v8307_v55 }
0x1344   : > { %v8416_v59 = vpop.f32.mrb[123].mxu0  ;;  %15001 = vmatmul.mubr.msk.f32.gmra.mrb[66].mxu0 %vm890_vm0, %v14966_v1 }
0x1345   : > { %15003 = vmatprep.mubr.msk.f32.mxu0 %vm890_vm0, %v8406_v10 }
0x1348   : > { %15004 = vmatmul.mubr.msk.f32.gmra.mrb[68].mxu0 %vm890_vm0, %v14977_v62 }
0x1349   : > { %15006 = vmatprep.mubr.msk.f32.mxu0 %vm890_vm0, %v8416_v59 }
0x134a   : > { %v15019_v60 = vpop.f32.mrb[132].mxu1 }
0x134b   : > { %v9103_v12 = vsel %vm18294_vm4, %v15019_v60, -1e+30  ;;  %v8732_v3 = vpop.f32.mrb[133].mxu1 }
0x134c   : > { %v9121_v57 = vsel %vm1351_vm3, %v9103_v12, -inf  ;;  %v9102_v25 = vsel %vm18289_vm2, %v8732_v3, -1e+30  ;;  %15007 = vmatmul.mubr.msk.f32.gmra.mrb[70].mxu0 %vm890_vm0, %v14980_v50 }
0x134d   : > { %v9118_v37 = vsel %vm1351_vm3, %v9102_v25, -inf  ;;  %9122 = vmax.xlane.f32.xlu1 %v9121_v57  ;;  %15045 = vmatprep.mubr.msk.f32.mxu0 %vm890_vm0, %v20410_v48 }
0x134e   : > { %9119 = vmax.xlane.f32.xlu0 %v9118_v37  ;;  %v15022_v28 = vpop.f32.mrb[134].mxu1 }
0x134f   : > { %v9105_v43 = vsel %vm18308_vm6, %v15022_v28, -1e+30  ;;  %v8742_v56 = vpop.f32.mrb[135].mxu1 }
0x1350   : > { %v9127_v27 = vsel %vm1351_vm3, %v9105_v43, -inf  ;;  %15046 = vmatmul.mubr.msk.f32.vlgmr.msra.gmra.mrb[124].mxu0 %vm890_vm0, %v20417_v46  ;;  %v9104_v26 = vsel %vm18302_vm5, %v8742_v56, -1e+30 }
0x1351   : > { %15048 = vmatprep.mubr.msk.f32.mxu0 %vm890_vm0, %v20414_v61  ;;  %v9124_v48 = vsel %vm1351_vm3, %v9104_v26, -inf }
0x1352   : > { %9128 = vmax.xlane.f32.xlu0 %v9127_v27 }
0x1354   : > { %15049 = vmatmul.mubr.msk.f32.gmra.mrb[126].mxu0 %vm890_vm0, %v20426_v16 }
0x1356   : > { %9125 = vmax.xlane.f32.xlu0 %v9124_v48 }
0x135a   : > { %v15033_v22 = vpop.f32.mrb[136].mxu1 }
0x135b   : > { %v9107_v15 = vsel %vm18294_vm4, %v15033_v22, -1e+30  ;;  %v8849_v11 = vpop.f32.mrb[137].mxu1 }
0x135c   : > { %v9133_v46 = vsel %vm1351_vm3, %v9107_v15, -inf  ;;  %v9106_v61 = vsel %vm18289_vm2, %v8849_v11, -1e+30 }
0x135d   : > { %v9130_v58 = vsel %vm1351_vm3, %v9106_v61, -inf  ;;  %9134 = vmax.xlane.f32.xlu1 %v9133_v46 }
0x135e   : > { %9131 = vmax.xlane.f32.xlu0 %v9130_v58  ;;  %v15036_v47 = vpop.f32.mrb[138].mxu1 }
0x135f   : > { %v9109_v16 = vsel %vm18308_vm6, %v15036_v47, -1e+30  ;;  %v8859_v19 = vpop.f32.mrb[139].mxu1 }
0x1360   : > { %v9139_v40 = vsel %vm1351_vm3, %v9109_v16, -inf  ;;  %v9108_v52 = vsel %vm18302_vm5, %v8859_v19, -1e+30 }
0x1361   : > { %v9136_v53 = vsel %vm1351_vm3, %v9108_v52, -inf  ;;  %9140 = vmax.xlane.f32.xlu1 %v9139_v40 }
0x1362   : > { %9137 = vmax.xlane.f32.xlu0 %v9136_v53 }
0x136a   : > { %v15061_v17 = vpop.f32.mrb[140].mxu1 }
0x136b   : > { %v20489_v54 = vsel %vm18294_vm4, %v15061_v17, -1e+30  ;;  %v9083_v24 = vpop.f32.mrb[141].mxu1 }
0x136c   : > { %v9157_v62 = vsel %vm1351_vm3, %v20489_v54, -inf  ;;  %v20495_v10 = vsel %vm18289_vm2, %v9083_v24, -1e+30 }
0x136d   : > { %v9154_v1 = vsel %vm1351_vm3, %v20495_v10, -inf  ;;  %9158 = vmax.xlane.f32.xlu1 %v9157_v62 }
0x136e   : > { %9155 = vmax.xlane.f32.xlu0 %v9154_v1  ;;  %v15064_v55 = vpop.f32.mrb[142].mxu1 }
0x136f   : > { %v20501_v50 = vsel %vm18308_vm6, %v15064_v55, -1e+30  ;;  %v9093_v59 = vpop.f32.mrb[143].mxu1 }
0x1370   : > { %v9163_v60 = vsel %vm1351_vm3, %v20501_v50, -inf  ;;  %v20507_v3 = vsel %vm18302_vm5, %v9093_v59, -1e+30 }
0x1371   : > { %v9160_v57 = vsel %vm1351_vm3, %v20507_v3, -inf  ;;  %9164 = vmax.xlane.f32.xlu1 %v9163_v60 }
0x1372   : > { %9161 = vmax.xlane.f32.xlu0 %v9160_v57 }
0x13da   : > { %v9123_v37 = vpop.xlane.xlu1 %9122 }
0x13db   : > { %v9167_v28 = vsub.f32 %v9103_v12, %v9123_v37  ;;  %v9120_v56 = vpop.xlane.xlu0 %9119 }
0x13dc   : > { %v9166_v27 = vsub.f32 %v9102_v25, %v9120_v56 }
0x13dd   : > { %v9184_v48 = vmul.f32 1.442695, %v9167_v28 }
0x13de   : > { %v9182_v22 = vmul.f32 1.442695, %v9166_v27 }
0x13df   : > { %17312 = vpow2.f32 %v9184_v48  ;;  %v9129_v11 = vpop.xlane.xlu0 %9128 }
0x13e0   : > { %17314 = vpow2.f32 %v9182_v22  ;;  %v9169_v46 = vsub.f32 %v9105_v43, %v9129_v11 }
0x13e2   : > { %v9188_v58 = vmul.f32 1.442695, %v9169_v46 }
0x13e3   : > { %v9126_v47 = vpop.xlane.xlu0 %9125 }
0x13e4   : > { %17316 = vpow2.f32 %v9188_v58  ;;  %v9168_v19 = vsub.f32 %v9104_v26, %v9126_v47 }
0x13e6   : > { %v9186_v40 = vmul.f32 1.442695, %v9168_v19 }
0x13e8   : > { %17318 = vpow2.f32 %v9186_v40 }
0x13e9   : > { %v20511_v53 = vpop.eup %17312 }
0x13ea   : > { %v20513_v17 = vpop.eup %17314  ;;  %v9135_v24 = vpop.xlane.xlu1 %9134  ;;  %v9217_v12 = vsel %vm1351_vm3, %v20511_v53, 0.0 }
0x13eb   : > { %v9171_v25 = vsub.f32 %v9107_v15, %v9135_v24  ;;  %v9132_v62 = vpop.xlane.xlu0 %9131  ;;  %9218 = vadd.xlane.f32.xlu1 %v9217_v12  ;;  %v9214_v43 = vsel %vm1351_vm3, %v20513_v17, 0.0 }
0x13ec   : > { %v9170_v1 = vsub.f32 %v9106_v61, %v9132_v62  ;;  %9215 = vadd.xlane.f32.xlu0 %v9214_v43 }
0x13ed   : > { %v9192_v55 = vmul.f32 1.442695, %v9171_v25 }
0x13ee   : > { %v20519_v26 = vpop.eup %17316  ;;  %v9190_v59 = vmul.f32 1.442695, %v9170_v1  ;;  %v9141_v60 = vpop.xlane.xlu1 %9140 }
0x13ef   : > { %17320 = vpow2.f32 %v9192_v55  ;;  %v9173_v57 = vsub.f32 %v9109_v16, %v9141_v60  ;;  %v9138_v37 = vpop.xlane.xlu0 %9137  ;;  %v9223_v28 = vsel %vm1351_vm3, %v20519_v26, 0.0 }
0x13f0   : > { %17322 = vpow2.f32 %v9190_v59  ;;  %v9172_v15 = vsub.f32 %v9108_v52, %v9138_v37  ;;  %9224 = vadd.xlane.f32.xlu1 %v9223_v28  ;;  %v21919_v28 = vld [vmem:[#allocation39_spill] sm:$0xff] }
0x13f1   : > { %v9196_v56 = vmul.f32 1.442695, %v9173_v57 }
0x13f2   : > { %v20523_v27 = vpop.eup %17318  ;;  %v9194_v48 = vmul.f32 1.442695, %v9172_v15  ;;  %v21920_v15 = vld [vmem:[#allocation38_spill] sm:$0xff] }
0x13f3   : > { %17324 = vpow2.f32 %v9196_v56  ;;  %v9220_v61 = vsel %vm1351_vm3, %v20523_v27, 0.0 }
0x13f4   : > { %17326 = vpow2.f32 %v9194_v48  ;;  %9221 = vadd.xlane.f32.xlu0 %v9220_v61 }
0x13f9   : > { %v20527_v22 = vpop.eup %17320 }
0x13fa   : > { %v20529_v16 = vpop.eup %17322  ;;  %v9229_v11 = vsel %vm1351_vm3, %v20527_v22, 0.0  ;;  %v9159_v48 = vpop.xlane.xlu1 %9158 }
0x13fb   : > { %9230 = vadd.xlane.f32.xlu1 %v9229_v11  ;;  %v9226_v52 = vsel %vm1351_vm3, %v20529_v16, 0.0  ;;  %v9156_v56 = vpop.xlane.xlu0 %9155  ;;  %v9179_v61 = vsub.f32 %v20489_v54, %v9159_v48  ;;  %v21921_v48 = vld [vmem:[#allocation40_spill] sm:$0xff] }
0x13fc   : > { %9227 = vadd.xlane.f32.xlu0 %v9226_v52  ;;  %v9178_v11 = vsub.f32 %v20495_v10, %v9156_v56 }
0x13fd   : > { %v20535_v46 = vpop.eup %17324 }
0x13fe   : > { %v20537_v58 = vpop.eup %17326  ;;  %v9235_v47 = vsel %vm1351_vm3, %v20535_v46, 0.0 }
0x13ff   : > { %9236 = vadd.xlane.f32.xlu1 %v9235_v47  ;;  %v9232_v19 = vsel %vm1351_vm3, %v20537_v58, 0.0  ;;  %v9162_v52 = vpop.xlane.xlu0 %9161  ;;  %v9208_v47 = vmul.f32 1.442695, %v9179_v61  ;;  %v21922_v61 = vld [vmem:[#allocation41_spill] sm:$0xff] }
0x1400   : > { %9233 = vadd.xlane.f32.xlu0 %v9232_v19  ;;  %v9180_v19 = vsub.f32 %v20507_v3, %v9162_v52  ;;  %v21923_v52 = vld [vmem:[#allocation42_spill] sm:$0xff] }
0x1401   : > { %17328 = vpow2.f32 %v9208_v47  ;;  %v21924_v47 = vld [vmem:[#allocation43_spill] sm:$0xff] }
0x1423   : > { %v15047_v40 = vpop.f32.mrb[124].mxu0 }
0x1424   : > { %v20545_v24 = vsel %vm18294_vm4, %v15047_v40, -1e+30  ;;  %v8966_v12 = vpop.f32.mrb[125].mxu0  ;;  %v9206_v40 = vmul.f32 1.442695, %v9178_v11 }
0x1425   : > { %v9145_v25 = vsel %vm1351_vm3, %v20545_v24, -inf  ;;  %v20551_v62 = vsel %vm18289_vm2, %v8966_v12, -1e+30  ;;  %v9165_v12 = vpop.xlane.xlu1 %9164 }
0x1426   : > { %v9142_v43 = vsel %vm1351_vm3, %v20551_v62, -inf  ;;  %9146 = vmax.xlane.f32.xlu1 %v9145_v25  ;;  %v9181_v25 = vsub.f32 %v20501_v50, %v9165_v12  ;;  %17330 = vpow2.f32 %v9206_v40 }
0x1427   : > { %9143 = vmax.xlane.f32.xlu0 %v9142_v43  ;;  %v15050_v1 = vpop.f32.mrb[126].mxu0  ;;  %v9210_v43 = vmul.f32 1.442695, %v9180_v19 }
0x1428   : > { %v20557_v55 = vsel %vm18308_vm6, %v15050_v1, -1e+30  ;;  %v8976_v59 = vpop.f32.mrb[127].mxu0  ;;  %v9212_v1 = vmul.f32 1.442695, %v9181_v25 }
0x1429   : > { %v9151_v60 = vsel %vm1351_vm3, %v20557_v55, -inf  ;;  %v20563_v57 = vsel %vm18302_vm5, %v8976_v59, -1e+30  ;;  %17332 = vpow2.f32 %v9210_v43  ;;  %v20575_v59 = vpop.eup %17328 }
0x142a   : > { %v9148_v37 = vsel %vm1351_vm3, %v20563_v57, -inf  ;;  %9152 = vmax.xlane.f32.xlu1 %v9151_v60  ;;  %17334 = vpow2.f32 %v9212_v1  ;;  %v9253_v54 = vsel %vm1351_vm3, %v20575_v59, 0.0 }
0x142b   : > { %9149 = vmax.xlane.f32.xlu0 %v9148_v37 }
0x1430   : > { %v20577_v60 = vpop.eup %17330 }
0x1431   : > { %v9250_v3 = vsel %vm1351_vm3, %v20577_v60, 0.0 }
0x1433   : > { %v20581_v10 = vpop.eup %17332 }
0x1434   : > { %v9256_v50 = vsel %vm1351_vm3, %v20581_v10, 0.0  ;;  %v20587_v37 = vpop.eup %17334 }
0x1435   : > { %v9259_v56 = vsel %vm1351_vm3, %v20587_v37, 0.0 }
0x143b   : > { %16814 = vrot.lane.b32.xlu1 %v21919_v28, %s17755_s1 }
0x1441   : > { %16809 = vrot.lane.b32.xlu0 %v21920_v15, %s17755_s1 }
0x145f   : > { %9254 = vadd.xlane.f32.xlu1 %v9253_v54 }
0x1460   : > { %9251 = vadd.xlane.f32.xlu0 %v9250_v3 }
0x1463   : > { %9257 = vadd.xlane.f32.xlu1 %v9256_v50 }
0x1467   : > { %9260 = vadd.xlane.f32.xlu1 %v9259_v56 }
0x1476   : > { %16819 = vrot.lane.b32.xlu0 %v21921_v48, %s17755_s1 }
0x1478   : > { %16824 = vrot.lane.b32.xlu1 %v21922_v61, %s17755_s1  ;;  %v9219_v54 = vpop.xlane.xlu1 %9218 }
0x1479   : > { %v9216_v11 = vpop.xlane.xlu0 %9215 }
0x147a   : > { %17336 = vrcp.f32 %v9216_v11  ;;  %16829 = vrot.lane.b32.xlu0 %v21923_v52, %s17755_s1 }
0x147d   : > { %v9225_v3 = vpop.xlane.xlu1 %9224 }
0x147e   : > { %16834 = vrot.lane.b32.xlu0 %v21924_v47, %s17755_s1 }
0x1481   : > { %v9222_v40 = vpop.xlane.xlu0 %9221 }
0x1484   : > { %v17337_v19 = vpop.eup %17336 }
0x1485   : > { %v9278_v12 = vmul.f32 %v17337_v19, %v20513_v17 }
0x1487   : > { %15073 = vmatprep.mubr.msk.f32.mxu0 %vm1351_vm3, %v9278_v12 }
0x1488   : > { %v20603_v50 = vpop.xlane.xlu1 %9230 }
0x1489   : > { %v9228_v25 = vpop.xlane.xlu0 %9227 }
0x148a   : > { %17338 = vrcp.f32 %v9228_v25 }
0x148b   : > { %17340 = vrcp.f32 %v9219_v54 }
0x148c   : > { %v20605_v56 = vpop.xlane.xlu1 %9236 }
0x148d   : > { %v20607_v11 = vpop.xlane.xlu0 %9233 }
0x1494   : > { %v17339_v43 = vpop.eup %17338 }
0x1495   : > { %v9282_v1 = vmul.f32 %v17339_v43, %v20529_v16 }
0x1497   : > { %15087 = vmatprep.mubr.msk.f32.mxu1 %vm1351_vm3, %v9282_v1 }
0x14b3   : > { %v9147_v52 = vpop.xlane.xlu1 %9146 }
0x14b4   : > { %v9175_v17 = vsub.f32 %v20545_v24, %v9147_v52  ;;  %v9144_v19 = vpop.xlane.xlu0 %9143 }
0x14b5   : > { %v9174_v12 = vsub.f32 %v20551_v62, %v9144_v19 }
0x14b6   : > { %v9200_v25 = vmul.f32 1.442695, %v9175_v17 }
0x14b7   : > { %v9198_v47 = vmul.f32 1.442695, %v9174_v12  ;;  %v9153_v16 = vpop.xlane.xlu1 %9152  ;;  %v17341_v12 = vpop.eup %17340 }
0x14b8   : > { %17342 = vpow2.f32 %v9200_v25  ;;  %v9177_v43 = vsub.f32 %v20557_v55, %v9153_v16  ;;  %v9150_v1 = vpop.xlane.xlu0 %9149 }
0x14b9   : > { %17344 = vpow2.f32 %v9198_v47  ;;  %v9176_v48 = vsub.f32 %v20563_v57, %v9150_v1 }
0x14ba   : > { %17346 = vrcp.f32 %v9225_v3  ;;  %v9204_v61 = vmul.f32 1.442695, %v9177_v43 }
0x14bb   : > { %17348 = vrcp.f32 %v9222_v40  ;;  %v9202_v14 = vmul.f32 1.442695, %v9176_v48  ;;  %v16815_v44 = vpop.permute.xlu1 %16814  ;;  %v9279_v40 = vmul.f32 %v17341_v12, %v20511_v53 }
0x14bc   : > { %17350 = vpow2.f32 %v9204_v61  ;;  %v16810_v24 = vpop.permute.xlu0 %16809  ;;  %v16817_v52 = vunpack.i.h.bf16 %v16815_v44  ;;  %v16816_v62 = vunpack.i.l.bf16 %v16815_v44 }
0x14bd   : > { %v16812_v17 = vunpack.i.h.bf16 %v16810_v24  ;;  %v16811_v54 = vunpack.i.l.bf16 %v16810_v24  ;;  %17352 = vpow2.f32 %v9202_v14 }
0x14be   : > { %v15909_v55 = vpack.c.bf16 %v16817_v52, %v16816_v62  ;;  %17354 = vrcp.f32 %v20603_v50  ;;  %v887_v52 = vld [vmem:[#allocation7 + $0x68] sm:$0xff] }
0x14bf   : > { %v15905_v19 = vpack.c.bf16 %v16812_v17, %v16811_v54  ;;  %17356 = vrcp.f32 %v20607_v11 }
0x14c0   : > { %17358 = vrcp.f32 %v20605_v56 }
0x14c1   : > { %15906 = vmatprep.subr.bf16.mxu0 %v15905_v19 }
0x14c2   : > { %v20613_v25 = vpop.eup %17342  ;;  %15908 = vmatpush3.bf16.msra.mxu0 %v15905_v19 }
0x14c3   : > { %v20615_v57 = vpop.eup %17344  ;;  %15910 = vmatprep.subr.bf16.mxu0 %v15909_v55  ;;  %v9241_v48 = vsel %vm1351_vm3, %v20613_v25, 0.0 }
0x14c4   : > { %v17347_v61 = vpop.eup %17346  ;;  %9242 = vadd.xlane.f32.xlu1 %v9241_v48  ;;  %v9238_v44 = vsel %vm1351_vm3, %v20615_v57, 0.0 }
0x14c5   : > { %v17349_v47 = vpop.eup %17348  ;;  %9239 = vadd.xlane.f32.xlu0 %v9238_v44  ;;  %v9281_v24 = vmul.f32 %v17347_v61, %v20519_v26 }
0x14c6   : > { %v20621_v14 = vpop.eup %17350  ;;  %15912 = vmatpush3.bf16.msra.mxu0 %v15909_v55  ;;  %v9280_v43 = vmul.f32 %v17349_v47, %v20523_v27 }
0x14c7   : > { %v9247_v3 = vsel %vm1351_vm3, %v20621_v14, 0.0  ;;  %v20626_v16 = vpop.eup %17352 }
0x14c8   : > { %9248 = vadd.xlane.f32.xlu1 %v9247_v3  ;;  %v9244_v1 = vsel %vm1351_vm3, %v20626_v16, 0.0 }
0x14c9   : > { %15074 = vmatmul.mubr.msk.f32.vlgmr.msra.gmra.mrb[128].mxu0 %vm1351_vm3, %v9279_v40 }
0x14ca   : > { %15076 = vmatprep.mubr.msk.f32.mxu0 %vm1351_vm3, %v9280_v43 }
0x14cc   : > { %9245 = vadd.xlane.f32.xlu1 %v9244_v1 }
0x14cd   : > { %15077 = vmatmul.mubr.msk.f32.gmra.mrb[130].mxu0 %vm1351_vm3, %v9281_v24 }
0x14db   : > { %16839 = vrot.lane.b32.xlu0 %v21845_v31, %s17755_s1 }
0x14dd   : > { %16844 = vrot.lane.b32.xlu1 %v21894_v2, %s17755_s1  ;;  %s17666_s1 = sshll.u32 %s17757_s25, 4  ;;  %s17667_s1 = int_to_ptr.vmem [resolvable:$false] %s17666_s1 }
0x14de   : > { %p17669_p12 = scmp.lt.s32.totalorder %s21652_s28, %s17667_s1 }
0x14df   : > { %16849 = vrot.lane.b32.xlu0 %v21869_v35, %s17756_s14 }
0x14e1   : > { %16854 = vrot.lane.b32.xlu1 %v21895_v8, %s17756_s14 }
0x14e3   : > { %16859 = vrot.lane.b32.xlu0 %v21870_v33, %s17756_s14 }
0x14e5   : > { %9939 = vrot.lane.b32.xlu1 %v21896_v13, %s17756_s14 }
0x14e7   : > { %9941 = vrot.lane.b32.xlu0 %v21872_v20, %s17756_s14 }
0x14e9   : > { %16864 = vrot.lane.b32.xlu1 %v21897_v7, %s17756_s14 }
0x14eb   : > { %9943 = vrot.lane.b32.xlu0 %v21898_v45, %s17756_s14 }
0x14ec   : > { %v20653_v53 = vpop.xlane.xlu1 %9254 }
0x14ed   : > { %9945 = vrot.lane.b32.xlu1 %v21878_v0, %s17756_s14  ;;  %v9252_v35 = vpop.xlane.xlu0 %9251 }
0x14ee   : > { %17360 = vrcp.f32 %v9252_v35 }
0x14ef   : > { %16869 = vrot.lane.b32.xlu0 %v21875_v32, %s17756_s14 }
0x14f0   : > { %v20659_v33 = vpop.xlane.xlu1 %9257 }
0x14f1   : > { %10056 = vrot.lane.b32.xlu1 %v21900_v18, %s17756_s14  ;;  %v16820_v20 = vpop.permute.xlu0 %16819 }
0x14f2   : > { %v16822_v8 = vunpack.i.h.bf16 %v16820_v20  ;;  %v16821_v13 = vunpack.i.l.bf16 %v16820_v20 }
0x14f3   : > { %10058 = vrot.lane.b32.xlu0 %v21884_v6, %s17756_s14 }
0x14f4   : > { %v20667_v0 = vpop.xlane.xlu1 %9260  ;;  %v15913_v7 = vpack.c.bf16 %v16822_v8, %v16821_v13 }
0x14f5   : > { %16874 = vrot.lane.b32.xlu1 %v21899_v42, %s17756_s14  ;;  %v16830_v32 = vpop.permute.xlu0 %16829  ;;  %v886_v42 = vld [vmem:[#allocation7 + $0x60] sm:$0xff] }
0x14f6   : > { %v16832_v45 = vunpack.i.h.bf16 %v16830_v32  ;;  %v16831_v18 = vunpack.i.l.bf16 %v16830_v32  ;;  %15914 = vmatprep.subr.bf16.mxu1 %v15913_v7  ;;  %v20678_v19 = vpack.c.bf16 %v887_v52, %v886_v42 }
0x14f7   : > { %10060 = vrot.lane.b32.xlu0 %v21901_v49, %s17756_s14  ;;  %15916 = vmatpush3.bf16.msra.mxu1 %v15913_v7  ;;  %v17355_v49 = vpop.eup %17354 }
0x14f8   : > { %v16825_v26 = vpop.permute.xlu1 %16824  ;;  %v15921_v27 = vpack.c.bf16 %v16832_v45, %v16831_v18  ;;  %v17357_v12 = vpop.eup %17356 }
0x14f9   : > { %v16827_v6 = vunpack.i.h.bf16 %v16825_v26  ;;  %v16826_v50 = vunpack.i.l.bf16 %v16825_v26  ;;  %10062 = vrot.lane.b32.xlu1 %v21887_v51, %s17756_s14  ;;  %v16835_v11 = vpop.permute.xlu0 %16834  ;;  %v9283_v51 = vmul.f32 %v17355_v49, %v20527_v22  ;;  %v9284_v55 = vmul.f32 %v17357_v12, %v20537_v58 }
0x14fa   : > { %v16837_v62 = vunpack.i.h.bf16 %v16835_v11  ;;  %v16836_v56 = vunpack.i.l.bf16 %v16835_v11  ;;  %15922 = vmatprep.subr.bf16.mxu0 %v15921_v27 }
0x14fb   : > { %16879 = vrot.lane.b32.xlu0 %v21881_v5, %s17756_s14  ;;  %15924 = vmatpush3.bf16.msra.mxu0 %v15921_v27  ;;  %v15917_v17 = vpack.c.bf16 %v16827_v6, %v16826_v50  ;;  %v17359_v5 = vpop.eup %17358 }
0x14fc   : > { %v15925_v54 = vpack.c.bf16 %v16837_v62, %v16836_v56  ;;  %v17361_v48 = vpop.eup %17360 }
0x14fd   : > { %10173 = vrot.lane.b32.xlu1 %v21890_v34, %s17756_s14  ;;  %15918 = vmatprep.subr.bf16.mxu1 %v15917_v17  ;;  %v9285_v34 = vmul.f32 %v17359_v5, %v20535_v46 }
0x14fe   : > { %15920 = vmatpush3.bf16.msra.mxu1 %v15917_v17  ;;  %15926 = vmatprep.subr.bf16.mxu0 %v15925_v54 }
0x14ff   : > { %10175 = vrot.lane.b32.xlu0 %v21902_v38, %s17756_s14  ;;  %15928 = vmatpush3.bf16.msra.mxu0 %v15925_v54  ;;  %v9290_v38 = vmul.f32 %v17361_v48, %v20577_v60 }
0x1500   : > { %15938 = vmatprep.subr.bf16.mxu0 %v20678_v19 }
0x1501   : > { %16884 = vrot.lane.b32.xlu1 %v18234_v36, %s17756_s14  ;;  %15088 = vmatmul.mubr.msk.f32.vlgmr.msra.gmra.mrb[144].mxu1 %vm1351_vm3, %v9283_v51 }
0x1502   : > { %15090 = vmatprep.mubr.msk.f32.mxu1 %vm1351_vm3, %v9284_v55 }
0x1503   : > { %10177 = vrot.lane.b32.xlu0 %v18192_v9, %s17756_s14 }
0x1505   : > { %10179 = vrot.lane.b32.xlu1 %v21846_v41, %s17756_s14  ;;  %15091 = vmatmul.mubr.msk.f32.gmra.mrb[146].mxu1 %vm1351_vm3, %v9285_v34 }
0x1506   : > { %15115 = vmatprep.mubr.msk.f32.mxu1 %vm1351_vm3, %v9290_v38 }
0x1507   : > { %10290 = vrot.lane.b32.xlu0 %v21903_v23, %s17756_s14 }
0x1509   : > { %10292 = vrot.lane.b32.xlu1 %v18216_v21, %s17756_s14 }
0x150b   : > { %10294 = vrot.lane.b32.xlu0 %v21904_v39, %s17756_s14 }
0x150d   : > { %10296 = vrot.lane.b32.xlu1 %v18230_v29, %s17756_s14 }
0x150f   : > { %16889 = vrot.lane.b32.xlu0 %v21920_v15, %s17756_s14 }
0x1511   : > { %16894 = vrot.lane.b32.xlu1 %v21919_v28, %s17756_s14 }
0x1551   : > { %v9243_v9 = vpop.xlane.xlu1 %9242 }
0x1552   : > { %17362 = vrcp.f32 %v9243_v9  ;;  %v9240_v36 = vpop.xlane.xlu0 %9239 }
0x1553   : > { %17364 = vrcp.f32 %v9240_v36 }
0x1554   : > { %17366 = vrcp.f32 %v20653_v53 }
0x1555   : > { %v9249_v41 = vpop.xlane.xlu1 %9248  ;;  %17368 = vrcp.f32 %v20659_v33 }
0x1556   : > { %v16840_v23 = vpop.permute.xlu0 %16839  ;;  %17370 = vrcp.f32 %v9249_v41 }
0x1557   : > { %v16842_v21 = vunpack.i.h.bf16 %v16840_v23  ;;  %v16841_v22 = vunpack.i.l.bf16 %v16840_v23 }
0x1559   : > { %v9246_v29 = vpop.xlane.xlu1 %9245  ;;  %v15929_v39 = vpack.c.bf16 %v16842_v21, %v16841_v22 }
0x155a   : > { %17372 = vrcp.f32 %v9246_v29  ;;  %v16850_v46 = vpop.permute.xlu0 %16849 }
0x155b   : > { %17374 = vrcp.f32 %v20667_v0  ;;  %15930 = vmatprep.subr.bf16.mxu1 %v15929_v39  ;;  %v16852_v15 = vunpack.i.h.bf16 %v16850_v46  ;;  %v16851_v61 = vunpack.i.l.bf16 %v16850_v46 }
0x155c   : > { %v17363_v58 = vpop.eup %17362  ;;  %15932 = vmatpush3.bf16.msra.mxu1 %v15929_v39 }
0x155d   : > { %v17365_v28 = vpop.eup %17364  ;;  %v16845_v60 = vpop.permute.xlu1 %16844  ;;  %v9287_v43 = vmul.f32 %v17363_v58, %v20613_v25  ;;  %v15941_v33 = vpack.c.bf16 %v16852_v15, %v16851_v61 }
0x155e   : > { %v16847_v44 = vunpack.i.h.bf16 %v16845_v60  ;;  %v16846_v47 = vunpack.i.l.bf16 %v16845_v60  ;;  %v16860_v40 = vpop.permute.xlu0 %16859  ;;  %v9286_v3 = vmul.f32 %v17365_v28, %v20615_v57  ;;  %v17367_v24 = vpop.eup %17366 }
0x155f   : > { %v17369_v35 = vpop.eup %17368  ;;  %v9291_v57 = vmul.f32 %v17367_v24, %v20575_v59  ;;  %v16862_v52 = vunpack.i.h.bf16 %v16860_v40  ;;  %v16861_v62 = vunpack.i.l.bf16 %v16860_v40 }
0x1560   : > { %15101 = vmatprep.mubr.msk.f32.mxu0 %vm1351_vm3, %v9286_v3  ;;  %v15933_v1 = vpack.c.bf16 %v16847_v44, %v16846_v47  ;;  %v17371_v8 = vpop.eup %17370  ;;  %v9292_v32 = vmul.f32 %v17369_v35, %v20581_v10 }
0x1561   : > { %v16855_v53 = vpop.permute.xlu1 %16854  ;;  %15102 = vmatmul.mubr.msk.f32.vlgmr.msra.gmra.mrb[132].mxu0 %vm1351_vm3, %v9287_v43  ;;  %v9289_v18 = vmul.f32 %v17371_v8, %v20621_v14  ;;  %v15953_v17 = vpack.c.bf16 %v16862_v52, %v16861_v62  ;;  %v21928_v62 = vld [vmem:[#allocation40_spill] sm:$0xff] }
0x1562   : > { %v9942_v20 = vpop.permute.xlu0 %9941  ;;  %15934 = vmatprep.subr.bf16.mxu1 %v15933_v1  ;;  %15940 = vmatpush3.bf16.msra.mxu0 %v20678_v19  ;;  %v16857_v26 = vunpack.i.h.bf16 %v16855_v53  ;;  %v16856_v27 = vunpack.i.l.bf16 %v16855_v53 }
0x1563   : > { %15936 = vmatpush3.bf16.msra.mxu1 %v15933_v1 }
0x1564   : > { %v17373_v13 = vpop.eup %17372  ;;  %15943 = vmatprep.subr.msk.bf16.mxu1 %vm18106_vm1, %v15941_v33  ;;  %v15947_v10 = vpack.c.bf16 %v16857_v26, %v16856_v27 }
0x1565   : > { %v17375_v25 = vpop.eup %17374  ;;  %v9940_v0 = vpop.permute.xlu1 %9939  ;;  %v9288_v7 = vmul.f32 %v17373_v13, %v20626_v16 }
0x1566   : > { %v9944_v45 = vpop.permute.xlu0 %9943  ;;  %15116 = vmatmul.mubr.msk.f32.vlgmr.msra.gmra.mrb[148].mxu1 %vm1351_vm3, %v9291_v57  ;;  %v9293_v59 = vmul.f32 %v17375_v25, %v20587_v37 }
0x1567   : > { %15104 = vmatprep.mubr.msk.f32.mxu0 %vm1351_vm3, %v9288_v7  ;;  %15118 = vmatprep.mubr.msk.f32.mxu1 %vm1351_vm3, %v9292_v32 }
0x1568   : > { %15105 = vmatmul.mubr.msk.f32.gmra.mrb[134].mxu0 %vm1351_vm3, %v9289_v18 }
0x1569   : > { %v16865_v6 = vpop.permute.xlu1 %16864 }
0x156a   : > { %v16870_v50 = vpop.permute.xlu0 %16869  ;;  %15119 = vmatmul.mubr.msk.f32.gmra.mrb[150].mxu1 %vm1351_vm3, %v9293_v59  ;;  %v16867_v19 = vunpack.i.h.bf16 %v16865_v6  ;;  %v16866_v12 = vunpack.i.l.bf16 %v16865_v6 }
0x156b   : > { %v16872_v16 = vunpack.i.h.bf16 %v16870_v50  ;;  %v16871_v11 = vunpack.i.l.bf16 %v16870_v50  ;;  %15157 = vmatprep.mubr.msk.f32.mxu1 %vm890_vm0, %v9940_v0 }
0x156c   : > { %15946 = vmatpush3.bf16.xpose.msk.msra.mxu1 %vm18106_vm1, %v15941_v33  ;;  %v15959_v5 = vpack.c.bf16 %v16867_v19, %v16866_v12 }
0x156d   : > { %v15965_v14 = vpack.c.bf16 %v16872_v16, %v16871_v11  ;;  %v9946_v42 = vpop.permute.xlu1 %9945  ;;  %15949 = vmatprep.subr.msk.bf16.mxu1 %vm18106_vm1, %v15947_v10 }
0x156e   : > { %v10059_v37 = vpop.permute.xlu0 %10058 }
0x156f   : > { %15967 = vmatprep.subr.msk.bf16.mxu0 %vm18106_vm1, %v15965_v14 }
0x1571   : > { %v10057_v56 = vpop.permute.xlu1 %10056 }
0x1572   : > { %v10061_v54 = vpop.permute.xlu0 %10060 }
0x1574   : > { %15952 = vmatpush3.bf16.xpose.msk.msra.mxu1 %vm18106_vm1, %v15947_v10 }
0x1575   : > { %v16875_v49 = vpop.permute.xlu1 %16874  ;;  %15955 = vmatprep.subr.msk.bf16.mxu1 %vm18106_vm1, %v15953_v17 }
0x1576   : > { %v16880_v55 = vpop.permute.xlu0 %16879  ;;  %v16877_v15 = vunpack.i.h.bf16 %v16875_v49  ;;  %v16876_v60 = vunpack.i.l.bf16 %v16875_v49 }
0x1577   : > { %v16882_v34 = vunpack.i.h.bf16 %v16880_v55  ;;  %v16881_v38 = vunpack.i.l.bf16 %v16880_v55 }
0x1578   : > { %v15971_v40 = vpack.c.bf16 %v16877_v15, %v16876_v60 }
0x1579   : > { %v10063_v51 = vpop.permute.xlu1 %10062  ;;  %v15977_v9 = vpack.c.bf16 %v16882_v34, %v16881_v38 }
0x157a   : > { %v20752_v36 = vpop.permute.xlu0 %10175 }
0x157b   : > { %15158 = vmatmul.mubr.msk.f32.vlgmr.msra.gmra.mrb[152].mxu1 %vm890_vm0, %v9942_v20 }
0x157c   : > { %15160 = vmatprep.mubr.msk.f32.mxu1 %vm890_vm0, %v9944_v45  ;;  %15958 = vmatpush3.bf16.xpose.msk.msra.mxu1 %vm18106_vm1, %v15953_v17 }
0x157d   : > { %15961 = vmatprep.subr.msk.bf16.mxu1 %vm18106_vm1, %v15959_v5  ;;  %v20748_v48 = vpop.permute.xlu1 %10173 }
0x157e   : > { %v20758_v22 = vpop.permute.xlu0 %10177 }
0x157f   : > { %15161 = vmatmul.mubr.msk.f32.gmra.mrb[154].mxu1 %vm890_vm0, %v9946_v42 }
0x1580   : > { %15171 = vmatprep.mubr.msk.f32.mxu1 %vm890_vm0, %v10057_v56 }
0x1581   : > { %v16885_v41 = vpop.permute.xlu1 %16884 }
0x1582   : > { %v16887_v23 = vunpack.i.h.bf16 %v16885_v41  ;;  %v16886_v21 = vunpack.i.l.bf16 %v16885_v41  ;;  %v10291_v39 = vpop.permute.xlu0 %10290 }
0x1584   : > { %15964 = vmatpush3.bf16.xpose.msk.msra.mxu1 %vm18106_vm1, %v15959_v5  ;;  %v15983_v29 = vpack.c.bf16 %v16887_v23, %v16886_v21 }
0x1585   : > { %15979 = vmatprep.subr.msk.bf16.mxu1 %vm18106_vm1, %v15977_v9  ;;  %v10180_v46 = vpop.permute.xlu1 %10179 }
0x1586   : > { %v10295_v28 = vpop.permute.xlu0 %10294 }
0x1589   : > { %v10293_v58 = vpop.permute.xlu1 %10292 }
0x158a   : > { %v16890_v3 = vpop.permute.xlu0 %16889 }
0x158b   : > { %15172 = vmatmul.mubr.msk.f32.vlgmr.msra.gmra.mrb[156].mxu1 %vm890_vm0, %v10059_v37  ;;  %v16892_v24 = vunpack.i.h.bf16 %v16890_v3  ;;  %v16891_v53 = vunpack.i.l.bf16 %v16890_v3 }
0x158c   : > { %15174 = vmatprep.mubr.msk.f32.mxu1 %vm890_vm0, %v10061_v54  ;;  %15982 = vmatpush3.bf16.xpose.msk.msra.mxu1 %vm18106_vm1, %v15977_v9 }
0x158d   : > { %15985 = vmatprep.subr.msk.bf16.mxu1 %vm18106_vm1, %v15983_v29  ;;  %v10297_v47 = vpop.permute.xlu1 %10296  ;;  %v15989_v35 = vpack.c.bf16 %v16892_v24, %v16891_v53 }
0x158f   : > { %15175 = vmatmul.mubr.msk.f32.gmra.mrb[158].mxu1 %vm890_vm0, %v10063_v51 }
0x1590   : > { %15199 = vmatprep.mubr.msk.f32.mxu1 %vm890_vm0, %v10291_v39 }
0x1591   : > { %v16895_v26 = vpop.permute.xlu1 %16894 }
0x1592   : > { %v16897_v27 = vunpack.i.h.bf16 %v16895_v26  ;;  %v16896_v59 = vunpack.i.l.bf16 %v16895_v26 }
0x1594   : > { %15988 = vmatpush3.bf16.xpose.msk.msra.mxu1 %vm18106_vm1, %v15983_v29  ;;  %v15993_v6 = vpack.c.bf16 %v16897_v27, %v16896_v59 }
0x159b   : > { %15200 = vmatmul.mubr.msk.f32.vlgmr.msra.gmra.mrb[160].mxu1 %vm890_vm0, %v10293_v58 }
0x159c   : > { %v15075_v61 = vpop.f32.mrb[128].mxu0  ;;  %15202 = vmatprep.mubr.msk.f32.mxu1 %vm890_vm0, %v10295_v28 }
0x159d   : > { %v9384_v44 = vpop.f32.mrb[129].mxu0 }
0x159e   : > { %15125 = vmatprep.mubr.msk.f32.mxu0 %vm890_vm0, %v9384_v44 }
0x159f   : > { %15126 = vmatmul.mubr.msk.f32.vlgmr.msra.gmra.mrb[56].mxu0 %vm890_vm0, %v15075_v61  ;;  %15203 = vmatmul.mubr.msk.f32.gmra.mrb[162].mxu1 %vm890_vm0, %v10297_v47 }
0x15a0   : > { %15970 = vmatpush3.bf16.xpose.msk.msra.mxu0 %vm18106_vm1, %v15965_v14  ;;  %v15078_v43 = vpop.f32.mrb[130].mxu0 }
0x15a1   : > { %15973 = vmatprep.subr.msk.bf16.mxu0 %vm18106_vm1, %v15971_v40  ;;  %v9394_v1 = vpop.f32.mrb[131].mxu0 }
0x15a2   : > { %15128 = vmatprep.mubr.msk.f32.mxu0 %vm890_vm0, %v9394_v1 }
0x15a3   : > { %15129 = vmatmul.mubr.msk.f32.gmra.mrb[58].mxu0 %vm890_vm0, %v15078_v43 }
0x15a8   : > { %15976 = vmatpush3.bf16.xpose.msk.msra.mxu0 %vm18106_vm1, %v15971_v40 }
0x15a9   : > { %15990 = vmatprep.subr.bf16.mxu0 %v15989_v35 }
0x15d4   : > { %v15089_v33 = vpop.f32.mrb[144].mxu1 }
0x15d5   : > { %v9493_v20 = vpop.f32.mrb[145].mxu1 }
0x15d6   : > { %15131 = vmatprep.mubr.msk.f32.mxu0 %vm890_vm0, %v9493_v20 }
0x15d7   : > { %15132 = vmatmul.mubr.msk.f32.gmra.mrb[60].mxu0 %vm890_vm0, %v15089_v33 }
0x15d8   : > { %v15092_v8 = vpop.f32.mrb[146].mxu1 }
0x15d9   : > { %v9503_v13 = vpop.f32.mrb[147].mxu1 }
0x15da   : > { %15134 = vmatprep.mubr.msk.f32.mxu0 %vm890_vm0, %v9503_v13 }
0x15db   : > { %15135 = vmatmul.mubr.msk.f32.gmra.mrb[62].mxu0 %vm890_vm0, %v15092_v8 }
0x1634   : > { %v15103_v57 = vpop.f32.mrb[132].mxu0 }
0x1635   : > { %v9602_v25 = vpop.f32.mrb[133].mxu0 }
0x1636   : > { %15137 = vmatprep.mubr.msk.f32.mxu0 %vm890_vm0, %v9602_v25 }
0x1637   : > { %15138 = vmatmul.mubr.msk.f32.gmra.mrb[64].mxu0 %vm890_vm0, %v15103_v57 }
0x1639   : > { %v15117_v30 = vpop.f32.mrb[148].mxu1 }
0x163a   : > { %v9711_v0 = vpop.f32.mrb[149].mxu1 }
0x163b   : > { %v15106_v7 = vpop.f32.mrb[134].mxu0 }
0x163c   : > { %v9612_v32 = vpop.f32.mrb[135].mxu0 }
0x163d   : > { %v15120_v45 = vpop.f32.mrb[150].mxu1  ;;  %15140 = vmatprep.mubr.msk.f32.mxu0 %vm890_vm0, %v9612_v32 }
0x163e   : > { %v9721_v18 = vpop.f32.mrb[151].mxu1  ;;  %15141 = vmatmul.mubr.msk.f32.gmra.mrb[66].mxu0 %vm890_vm0, %v15106_v7 }
0x163f   : > { %15143 = vmatprep.mubr.msk.f32.mxu0 %vm890_vm0, %v9711_v0 }
0x1642   : > { %15144 = vmatmul.mubr.msk.f32.gmra.mrb[68].mxu0 %vm890_vm0, %v15117_v30 }
0x1643   : > { %15146 = vmatprep.mubr.msk.f32.mxu0 %vm890_vm0, %v9721_v18 }
0x1646   : > { %15147 = vmatmul.mubr.msk.f32.gmra.mrb[70].mxu0 %vm890_vm0, %v15120_v45 }
0x1647   : > { %15185 = vmatprep.mubr.msk.f32.mxu0 %vm890_vm0, %v20748_v48 }
0x164a   : > { %15186 = vmatmul.mubr.msk.f32.vlgmr.msra.gmra.mrb[136].mxu0 %vm890_vm0, %v20752_v36 }
0x164b   : > { %15992 = vmatpush3.bf16.msra.mxu0 %v15989_v35  ;;  %15188 = vmatprep.mubr.msk.f32.mxu0 %vm890_vm0, %v20758_v22 }
0x164c   : > { %15994 = vmatprep.subr.bf16.mxu0 %v15993_v6 }
0x164e   : > { %v15159_v50 = vpop.f32.mrb[152].mxu1  ;;  %15189 = vmatmul.mubr.msk.f32.gmra.mrb[138].mxu0 %vm890_vm0, %v10180_v46 }
0x164f   : > { %v10408_v10 = vsel %vm18294_vm4, %v15159_v50, -1e+30  ;;  %15996 = vmatpush3.bf16.msra.mxu0 %v15993_v6  ;;  %v10037_v16 = vpop.f32.mrb[153].mxu1 }
0x1650   : > { %v10426_v11 = vsel %vm1351_vm3, %v10408_v10, -inf  ;;  %v10407_v14 = vsel %vm18289_vm2, %v10037_v16, -1e+30 }
0x1651   : > { %v10423_v42 = vsel %vm1351_vm3, %v10407_v14, -inf  ;;  %10427 = vmax.xlane.f32.xlu1 %v10426_v11 }
0x1652   : > { %10424 = vmax.xlane.f32.xlu0 %v10423_v42  ;;  %v15162_v52 = vpop.f32.mrb[154].mxu1 }
0x1653   : > { %v10410_v37 = vsel %vm18308_vm6, %v15162_v52, -1e+30  ;;  %v10047_v56 = vpop.f32.mrb[155].mxu1 }
0x1654   : > { %v10432_v17 = vsel %vm1351_vm3, %v10410_v37, -inf  ;;  %v10409_v54 = vsel %vm18302_vm5, %v10047_v56, -1e+30 }
0x1655   : > { %v10429_v19 = vsel %vm1351_vm3, %v10409_v54, -inf }
0x1656   : > { %10433 = vmax.xlane.f32.xlu0 %v10432_v17 }
0x165a   : > { %10430 = vmax.xlane.f32.xlu0 %v10429_v19 }
0x165e   : > { %v15173_v12 = vpop.f32.mrb[156].mxu1 }
0x165f   : > { %v10412_v51 = vsel %vm18294_vm4, %v15173_v12, -1e+30  ;;  %v10154_v5 = vpop.f32.mrb[157].mxu1 }
0x1660   : > { %v10438_v55 = vsel %vm1351_vm3, %v10412_v51, -inf  ;;  %v10411_v48 = vsel %vm18289_vm2, %v10154_v5, -1e+30 }
0x1661   : > { %v10435_v34 = vsel %vm1351_vm3, %v10411_v48, -inf  ;;  %10439 = vmax.xlane.f32.xlu1 %v10438_v55 }
0x1662   : > { %10436 = vmax.xlane.f32.xlu0 %v10435_v34  ;;  %v15176_v38 = vpop.f32.mrb[158].mxu1 }
0x1663   : > { %v10414_v9 = vsel %vm18308_vm6, %v15176_v38, -1e+30  ;;  %v10164_v36 = vpop.f32.mrb[159].mxu1 }
0x1664   : > { %v10444_v41 = vsel %vm1351_vm3, %v10414_v9, -inf  ;;  %v10413_v23 = vsel %vm18302_vm5, %v10164_v36, -1e+30 }
0x1665   : > { %v10441_v21 = vsel %vm1351_vm3, %v10413_v23, -inf  ;;  %10445 = vmax.xlane.f32.xlu1 %v10444_v41 }
0x1666   : > { %10442 = vmax.xlane.f32.xlu0 %v10441_v21 }
0x166e   : > { %v15201_v22 = vpop.f32.mrb[160].mxu1 }
0x166f   : > { %v20828_v29 = vsel %vm18294_vm4, %v15201_v22, -1e+30  ;;  %v10388_v39 = vpop.f32.mrb[161].mxu1 }
0x1670   : > { %v10462_v46 = vsel %vm1351_vm3, %v20828_v29, -inf  ;;  %v20834_v58 = vsel %vm18289_vm2, %v10388_v39, -1e+30 }
0x1671   : > { %v10459_v28 = vsel %vm1351_vm3, %v20834_v58, -inf  ;;  %10463 = vmax.xlane.f32.xlu1 %v10462_v46 }
0x1672   : > { %10460 = vmax.xlane.f32.xlu0 %v10459_v28  ;;  %v15204_v15 = vpop.f32.mrb[162].mxu1 }
0x1673   : > { %v20840_v60 = vsel %vm18308_vm6, %v15204_v15, -1e+30  ;;  %v10398_v61 = vpop.f32.mrb[163].mxu1  ;;  %v21927_v15 = vld [vmem:[#allocation41_spill] sm:$0xff] }
0x1674   : > { %v10468_v44 = vsel %vm1351_vm3, %v20840_v60, -inf  ;;  %v20846_v47 = vsel %vm18302_vm5, %v10398_v61, -1e+30 }
0x1675   : > { %v10465_v40 = vsel %vm1351_vm3, %v20846_v47, -inf  ;;  %10469 = vmax.xlane.f32.xlu1 %v10468_v44 }
0x1676   : > { %10466 = vmax.xlane.f32.xlu0 %v10465_v40 }
0x16de   : > { %v10428_v3 = vpop.xlane.xlu1 %10427 }
0x16df   : > { %v10472_v43 = vsub.f32 %v10408_v10, %v10428_v3  ;;  %v10425_v1 = vpop.xlane.xlu0 %10424 }
0x16e0   : > { %v10471_v24 = vsub.f32 %v10407_v14, %v10425_v1 }
0x16e1   : > { %v10489_v53 = vmul.f32 1.442695, %v10472_v43 }
0x16e2   : > { %v10487_v35 = vmul.f32 1.442695, %v10471_v24 }
0x16e3   : > { %17376 = vpow2.f32 %v10489_v53  ;;  %v10434_v33 = vpop.xlane.xlu0 %10433 }
0x16e4   : > { %17378 = vpow2.f32 %v10487_v35  ;;  %v10474_v20 = vsub.f32 %v10410_v37, %v10434_v33 }
0x16e6   : > { %v10493_v8 = vmul.f32 1.442695, %v10474_v20 }
0x16e7   : > { %v10431_v13 = vpop.xlane.xlu0 %10430 }
0x16e8   : > { %17380 = vpow2.f32 %v10493_v8  ;;  %v10473_v57 = vsub.f32 %v10409_v54, %v10431_v13 }
0x16ea   : > { %v10491_v25 = vmul.f32 1.442695, %v10473_v57 }
0x16ec   : > { %17382 = vpow2.f32 %v10491_v25 }
0x16ed   : > { %v20850_v30 = vpop.eup %17376 }
0x16ee   : > { %v20852_v0 = vpop.eup %17378  ;;  %v10440_v7 = vpop.xlane.xlu1 %10439  ;;  %v10522_v32 = vsel %vm1351_vm3, %v20850_v30, 0.0 }
0x16ef   : > { %v10476_v45 = vsub.f32 %v10412_v51, %v10440_v7  ;;  %v10437_v18 = vpop.xlane.xlu0 %10436  ;;  %10523 = vadd.xlane.f32.xlu1 %v10522_v32  ;;  %v10519_v26 = vsel %vm1351_vm3, %v20852_v0, 0.0 }
0x16f0   : > { %v10475_v27 = vsub.f32 %v10411_v48, %v10437_v18  ;;  %10520 = vadd.xlane.f32.xlu0 %v10519_v26 }
0x16f1   : > { %v10497_v59 = vmul.f32 1.442695, %v10476_v45 }
0x16f2   : > { %v20858_v6 = vpop.eup %17380  ;;  %v10495_v50 = vmul.f32 1.442695, %v10475_v27  ;;  %v10446_v10 = vpop.xlane.xlu1 %10445 }
0x16f3   : > { %17384 = vpow2.f32 %v10497_v59  ;;  %v10478_v16 = vsub.f32 %v10414_v9, %v10446_v10  ;;  %v10443_v11 = vpop.xlane.xlu0 %10442  ;;  %v10528_v14 = vsel %vm1351_vm3, %v20858_v6, 0.0 }
0x16f4   : > { %17386 = vpow2.f32 %v10495_v50  ;;  %v10477_v42 = vsub.f32 %v10413_v23, %v10443_v11  ;;  %10529 = vadd.xlane.f32.xlu1 %v10528_v14 }
0x16f5   : > { %v10501_v52 = vmul.f32 1.442695, %v10478_v16 }
0x16f6   : > { %v20862_v37 = vpop.eup %17382  ;;  %v10499_v56 = vmul.f32 1.442695, %v10477_v42 }
0x16f7   : > { %17388 = vpow2.f32 %v10501_v52  ;;  %v10525_v17 = vsel %vm1351_vm3, %v20862_v37, 0.0 }
0x16f8   : > { %17390 = vpow2.f32 %v10499_v56  ;;  %10526 = vadd.xlane.f32.xlu0 %v10525_v17 }
0x16fd   : > { %v20866_v54 = vpop.eup %17384 }
0x16fe   : > { %v20868_v19 = vpop.eup %17386  ;;  %v10534_v12 = vsel %vm1351_vm3, %v20866_v54, 0.0  ;;  %v10464_v61 = vpop.xlane.xlu1 %10463 }
0x16ff   : > { %10535 = vadd.xlane.f32.xlu1 %v10534_v12  ;;  %v10531_v51 = vsel %vm1351_vm3, %v20868_v19, 0.0  ;;  %v10461_v44 = vpop.xlane.xlu0 %10460  ;;  %v10484_v40 = vsub.f32 %v20828_v29, %v10464_v61  ;;  %v21929_v29 = vld [vmem:[#allocation43_spill] sm:$0xff] }
0x1700   : > { %10532 = vadd.xlane.f32.xlu0 %v10531_v51  ;;  %v10483_v3 = vsub.f32 %v20834_v58, %v10461_v44  ;;  %v21930_v58 = vld [vmem:[#allocation42_spill] sm:$0xff] }
0x1701   : > { %v20874_v5 = vpop.eup %17388  ;;  %v10513_v49 = vmul.f32 1.442695, %v10484_v40 }
0x1702   : > { %v20876_v55 = vpop.eup %17390  ;;  %v10540_v48 = vsel %vm1351_vm3, %v20874_v5, 0.0  ;;  %v10511_v43 = vmul.f32 1.442695, %v10483_v3  ;;  %v10470_v20 = vpop.xlane.xlu1 %10469 }
0x1703   : > { %v10537_v34 = vsel %vm1351_vm3, %v20876_v55, 0.0  ;;  %17392 = vpow2.f32 %v10513_v49  ;;  %v10467_v33 = vpop.xlane.xlu0 %10466  ;;  %v10486_v13 = vsub.f32 %v20840_v60, %v10470_v20 }
0x1704   : > { %10538 = vadd.xlane.f32.xlu1 %v10537_v34  ;;  %10541 = vadd.xlane.f32.xlu0 %v10540_v48  ;;  %17394 = vpow2.f32 %v10511_v43  ;;  %v10485_v8 = vsub.f32 %v20846_v47, %v10467_v33 }
0x1705   : > { %v10517_v7 = vmul.f32 1.442695, %v10486_v13 }
0x1706   : > { %v10515_v57 = vmul.f32 1.442695, %v10485_v8 }
0x170d   : > { %v20912_v1 = vpop.eup %17392 }
0x170e   : > { %v20914_v24 = vpop.eup %17394  ;;  %v10558_v53 = vsel %vm1351_vm3, %v20912_v1, 0.0 }
0x170f   : > { %v10555_v35 = vsel %vm1351_vm3, %v20914_v24, 0.0 }
0x171d   : > { %v15187_v38 = vpop.f32.mrb[136].mxu0 }
0x171e   : > { %v20884_v9 = vsel %vm18294_vm4, %v15187_v38, -1e+30  ;;  %v10271_v36 = vpop.f32.mrb[137].mxu0 }
0x171f   : > { %v10450_v41 = vsel %vm1351_vm3, %v20884_v9, -inf  ;;  %v20890_v23 = vsel %vm18289_vm2, %v10271_v36, -1e+30 }
0x1720   : > { %v10447_v21 = vsel %vm1351_vm3, %v20890_v23, -inf  ;;  %10451 = vmax.xlane.f32.xlu1 %v10450_v41 }
0x1721   : > { %10448 = vmax.xlane.f32.xlu0 %v10447_v21  ;;  %v15190_v22 = vpop.f32.mrb[138].mxu0 }
0x1722   : > { %v20896_v39 = vsel %vm18308_vm6, %v15190_v22, -1e+30  ;;  %v10281_v4 = vpop.f32.mrb[139].mxu0 }
0x1723   : > { %v10456_v46 = vsel %vm1351_vm3, %v20896_v39, -inf  ;;  %v20902_v28 = vsel %vm18302_vm5, %v10281_v4, -1e+30 }
0x1724   : > { %v10453_v63 = vsel %vm1351_vm3, %v20902_v28, -inf  ;;  %10457 = vmax.xlane.f32.xlu1 %v10456_v46 }
0x1725   : > { %10454 = vmax.xlane.f32.xlu0 %v10453_v63 }
0x1735   : > { %16904 = vrot.lane.b32.xlu1 %v21927_v15, %s17756_s14 }
0x173b   : > { %16899 = vrot.lane.b32.xlu0 %v21928_v62, %s17756_s14 }
0x1759   : > { %10559 = vadd.xlane.f32.xlu1 %v10558_v53 }
0x175a   : > { %10556 = vadd.xlane.f32.xlu0 %v10555_v35 }
0x176a   : > { %16914 = vrot.lane.b32.xlu1 %v21929_v29, %s17756_s14 }
0x1770   : > { %16909 = vrot.lane.b32.xlu0 %v21930_v58, %s17756_s14 }
0x177c   : > { %v10524_v25 = vpop.xlane.xlu1 %10523 }
0x177d   : > { %17396 = vrcp.f32 %v10524_v25  ;;  %v10521_v32 = vpop.xlane.xlu0 %10520 }
0x177e   : > { %17398 = vrcp.f32 %v10521_v32 }
0x177f   : > { %17400 = vpow2.f32 %v10515_v57 }
0x1780   : > { %17402 = vpow2.f32 %v10517_v7 }
0x1781   : > { %v10530_v45 = vpop.xlane.xlu1 %10529 }
0x1782   : > { %17404 = vrcp.f32 %v10530_v45 }
0x1785   : > { %v10527_v18 = vpop.xlane.xlu0 %10526 }
0x1786   : > { %17406 = vrcp.f32 %v10527_v18 }
0x1787   : > { %v17397_v26 = vpop.eup %17396 }
0x1788   : > { %v17399_v27 = vpop.eup %17398  ;;  %v10584_v60 = vmul.f32 %v17397_v26, %v20850_v30 }
0x1789   : > { %v10583_v59 = vmul.f32 %v17399_v27, %v20852_v0  ;;  %v20927_v50 = vpop.eup %17400 }
0x178a   : > { %v20930_v47 = vpop.eup %17402  ;;  %v10561_v16 = vsel %vm1351_vm3, %v20927_v50, 0.0 }
0x178b   : > { %15213 = vmatprep.mubr.msk.f32.mxu0 %vm1351_vm3, %v10583_v59  ;;  %v10564_v11 = vsel %vm1351_vm3, %v20930_v47, 0.0 }
0x178c   : > { %15214 = vmatmul.mubr.msk.f32.vlgmr.msra.gmra.mrb[140].mxu0 %vm1351_vm3, %v10584_v60  ;;  %v17405_v0 = vpop.eup %17404  ;;  %v10536_v17 = vpop.xlane.xlu1 %10535 }
0x178d   : > { %v10533_v10 = vpop.xlane.xlu0 %10532  ;;  %v10586_v42 = vmul.f32 %v17405_v0, %v20858_v6 }
0x178e   : > { %17408 = vrcp.f32 %v10533_v10  ;;  %10562 = vadd.xlane.f32.xlu1 %v10561_v16 }
0x178f   : > { %10565 = vadd.xlane.f32.xlu0 %v10564_v11 }
0x1790   : > { %v17407_v14 = vpop.eup %17406 }
0x1791   : > { %v10585_v30 = vmul.f32 %v17407_v14, %v20862_v37  ;;  %v10539_v12 = vpop.xlane.xlu1 %10538  ;;  %v10542_v51 = vpop.xlane.xlu0 %10541 }
0x1793   : > { %15216 = vmatprep.mubr.msk.f32.mxu0 %vm1351_vm3, %v10585_v30 }
0x1794   : > { %15217 = vmatmul.mubr.msk.f32.gmra.mrb[142].mxu0 %vm1351_vm3, %v10586_v42 }
0x1798   : > { %v17409_v52 = vpop.eup %17408 }
0x1799   : > { %v10587_v56 = vmul.f32 %v17409_v52, %v20868_v19 }
0x179b   : > { %15227 = vmatprep.mubr.msk.f32.mxu0 %vm1351_vm3, %v10587_v56 }
0x17ad   : > { %v10452_v48 = vpop.xlane.xlu1 %10451 }
0x17ae   : > { %v10480_v34 = vsub.f32 %v20884_v9, %v10452_v48  ;;  %v10449_v38 = vpop.xlane.xlu0 %10448 }
0x17af   : > { %v10479_v37 = vsub.f32 %v20890_v23, %v10449_v38  ;;  %v889_v38 = vld [vmem:[#allocation7 + $0x78] sm:$0xff] }
0x17b0   : > { %v10505_v36 = vmul.f32 1.442695, %v10480_v34  ;;  %v888_v34 = vld [vmem:[#allocation7 + $0x70] sm:$0xff] }
0x17b1   : > { %v10503_v6 = vmul.f32 1.442695, %v10479_v37  ;;  %v10458_v41 = vpop.xlane.xlu1 %10457 }
0x17b2   : > { %17410 = vpow2.f32 %v10505_v36  ;;  %v10482_v21 = vsub.f32 %v20896_v39, %v10458_v41  ;;  %v10455_v22 = vpop.xlane.xlu0 %10454 }
0x17b3   : > { %17412 = vpow2.f32 %v10503_v6  ;;  %v10481_v19 = vsub.f32 %v20902_v28, %v10455_v22 }
0x17b4   : > { %17414 = vrcp.f32 %v10536_v17  ;;  %v10509_v4 = vmul.f32 1.442695, %v10482_v21  ;;  %v16021_v21 = vpack.c.bf16 %v889_v38, %v888_v34 }
0x17b5   : > { %17416 = vrcp.f32 %v10539_v12  ;;  %v10507_v46 = vmul.f32 1.442695, %v10481_v19  ;;  %v16905_v63 = vpop.permute.xlu1 %16904 }
0x17b6   : > { %17418 = vpow2.f32 %v10509_v4  ;;  %v16907_v9 = vunpack.i.h.bf16 %v16905_v63  ;;  %v16900_v15 = vpop.permute.xlu0 %16899  ;;  %v16906_v23 = vunpack.i.l.bf16 %v16905_v63 }
0x17b7   : > { %17420 = vpow2.f32 %v10507_v46  ;;  %v16902_v62 = vunpack.i.h.bf16 %v16900_v15  ;;  %v16901_v61 = vunpack.i.l.bf16 %v16900_v15 }
0x17b8   : > { %17422 = vrcp.f32 %v10542_v51  ;;  %v16001_v40 = vpack.c.bf16 %v16907_v9, %v16906_v23 }
0x17b9   : > { %v15997_v44 = vpack.c.bf16 %v16902_v62, %v16901_v61  ;;  %v21931_v61 = vmov 0.0  }
0x17bb   : > { %15998 = vmatprep.subr.bf16.mxu0 %v15997_v44 }
0x17bc   : > { %v20948_v39 = vpop.eup %17410  ;;  %16000 = vmatpush3.bf16.msra.mxu0 %v15997_v44 }
0x17bd   : > { %v20950_v28 = vpop.eup %17412  ;;  %16002 = vmatprep.subr.bf16.mxu0 %v16001_v40  ;;  %v10546_v3 = vsel %vm1351_vm3, %v20948_v39, 0.0 }
0x17be   : > { %v17415_v49 = vpop.eup %17414  ;;  %10547 = vadd.xlane.f32.xlu1 %v10546_v3  ;;  %v10543_v43 = vsel %vm1351_vm3, %v20950_v28, 0.0 }
0x17bf   : > { %v17417_v53 = vpop.eup %17416  ;;  %10544 = vadd.xlane.f32.xlu0 %v10543_v43  ;;  %v10588_v33 = vmul.f32 %v17415_v49, %v20866_v54 }
0x17c0   : > { %v20956_v35 = vpop.eup %17418  ;;  %16004 = vmatpush3.bf16.msra.mxu0 %v16001_v40  ;;  %v10589_v13 = vmul.f32 %v17417_v53, %v20876_v55 }
0x17c1   : > { %v20958_v29 = vpop.eup %17420  ;;  %v10552_v58 = vsel %vm1351_vm3, %v20956_v35, 0.0 }
0x17c2   : > { %v10549_v20 = vsel %vm1351_vm3, %v20958_v29, 0.0  ;;  %v17423_v8 = vpop.eup %17422 }
0x17c3   : > { %10553 = vadd.xlane.f32.xlu0 %v10552_v58  ;;  %10550 = vadd.xlane.f32.xlu1 %v10549_v20  ;;  %v10590_v57 = vmul.f32 %v17423_v8, %v20874_v5  ;;  %v21009_v20 = vld [vmem:[%s21701_s3] ss:$0 sm:$0xff] }
0x17c4   : > { %15228 = vmatmul.mubr.msk.f32.vlgmr.msra.gmra.mrb[144].mxu0 %vm1351_vm3, %v10588_v33 }
0x17c5   : > { %15230 = vmatprep.mubr.msk.f32.mxu0 %vm1351_vm3, %v10589_v13 }
0x17c8   : > { %15231 = vmatmul.mubr.msk.f32.gmra.mrb[146].mxu0 %vm1351_vm3, %v10590_v57 }
0x17d4   : > { %16924 = vrot.lane.b32.xlu1 %v21894_v2, %s17756_s14 }
0x17d9   : > { %16919 = vrot.lane.b32.xlu0 %v21845_v31, %s17756_s14  ;;  %s21933_s14 = sld [smem:[#allocation64_spill]] }
0x17e6   : > { %v10560_v54 = vpop.xlane.xlu1 %10559 }
0x17e7   : > { %v10557_v25 = vpop.xlane.xlu0 %10556 }
0x17e8   : > { %17424 = vrcp.f32 %v10557_v25  ;;  %v17504_v25 = vld [vmem:[%s18048_s12 + $0x8] sm:$0xff] }
0x17ea   : > { %v16915_v7 = vpop.permute.xlu1 %16914 }
0x17eb   : > { %v16910_v32 = vpop.permute.xlu0 %16909  ;;  %v16917_v55 = vunpack.i.h.bf16 %v16915_v7  ;;  %v16916_v45 = vunpack.i.l.bf16 %v16915_v7 }
0x17ec   : > { %v16912_v18 = vunpack.i.h.bf16 %v16910_v32  ;;  %v16911_v26 = vunpack.i.l.bf16 %v16910_v32  ;;  %v17505_v32 = vld [vmem:[%s18048_s12] sm:$0xff] }
0x17ed   : > { %v16009_v59 = vpack.c.bf16 %v16917_v55, %v16916_v45 }
0x17ee   : > { %v16005_v27 = vpack.c.bf16 %v16912_v18, %v16911_v26 }
0x17f0   : > { %16006 = vmatprep.subr.bf16.mxu1 %v16005_v27 }
0x17f1   : > { %16008 = vmatpush3.bf16.msra.mxu1 %v16005_v27 }
0x17f2   : > { %v17425_v5 = vpop.eup %17424  ;;  %16010 = vmatprep.subr.bf16.mxu1 %v16009_v59 }
0x17f3   : > { %v10595_v2 = vmul.f32 %v17425_v5, %v20914_v24 }
0x17f5   : > { %16012 = vmatpush3.bf16.msra.mxu1 %v16009_v59  ;;  %15255 = vmatprep.mubr.msk.f32.mxu0 %vm1351_vm3, %v10595_v2  ;;  %v17506_v59 = vld [vmem:[%s18048_s12 + $0x18] sm:$0xff]  ;;  %v17507_v2 = vld [vmem:[%s18048_s12 + $0x10] sm:$0xff] }
0x181b   : > { %v10563_v31 = vpop.xlane.xlu1 %10562 }
0x181c   : > { %v10566_v60 = vpop.xlane.xlu0 %10565 }
0x184b   : > { %v10548_v10 = vpop.xlane.xlu1 %10547 }
0x184c   : > { %17426 = vrcp.f32 %v10548_v10  ;;  %v10545_v16 = vpop.xlane.xlu0 %10544 }
0x184d   : > { %17428 = vrcp.f32 %v10545_v16 }
0x184e   : > { %17430 = vrcp.f32 %v10560_v54 }
0x1850   : > { %v10551_v11 = vpop.xlane.xlu1 %10550  ;;  %v10554_v0 = vpop.xlane.xlu0 %10553 }
0x1851   : > { %17432 = vrcp.f32 %v10551_v11 }
0x1852   : > { %17434 = vrcp.f32 %v10554_v0  ;;  %v17508_v0 = vld [vmem:[%s18048_s12 + $0x28] sm:$0xff] }
0x1853   : > { %17436 = vrcp.f32 %v10563_v31 }
0x1854   : > { %v16925_v14 = vpop.permute.xlu1 %16924  ;;  %v16920_v30 = vpop.permute.xlu0 %16919  ;;  %17438 = vrcp.f32 %v10566_v60 }
0x1855   : > { %v16927_v42 = vunpack.i.h.bf16 %v16925_v14  ;;  %v16926_v52 = vunpack.i.l.bf16 %v16925_v14  ;;  %v16922_v24 = vunpack.i.h.bf16 %v16920_v30  ;;  %v16921_v56 = vunpack.i.l.bf16 %v16920_v30  ;;  %v17509_v30 = vld [vmem:[%s18048_s12 + $0x20] sm:$0xff] }
0x1856   : > { %v17427_v17 = vpop.eup %17426 }
0x1857   : > { %v17429_v12 = vpop.eup %17428  ;;  %v16013_v51 = vpack.c.bf16 %v16922_v24, %v16921_v56  ;;  %v10592_v37 = vmul.f32 %v17427_v17, %v20948_v39  ;;  %v16017_v36 = vpack.c.bf16 %v16927_v42, %v16926_v52 }
0x1858   : > { %v10591_v48 = vmul.f32 %v17429_v12, %v20950_v28  ;;  %v17431_v6 = vpop.eup %17430  ;;  %v17510_v12 = vld [vmem:[%s18048_s12 + $0x38] sm:$0xff] }
0x1859   : > { %16014 = vmatprep.subr.bf16.mxu0 %v16013_v51  ;;  %v10596_v63 = vmul.f32 %v17431_v6, %v20912_v1 }
0x185a   : > { %15241 = vmatprep.mubr.msk.f32.mxu1 %vm1351_vm3, %v10591_v48  ;;  %16016 = vmatpush3.bf16.msra.mxu0 %v16013_v51  ;;  %v17511_v48 = vld [vmem:[%s18048_s12 + $0x30] sm:$0xff] }
0x185b   : > { %v17433_v41 = vpop.eup %17432  ;;  %15242 = vmatmul.mubr.msk.f32.vlgmr.msra.gmra.mrb[164].mxu1 %vm1351_vm3, %v10592_v37  ;;  %16018 = vmatprep.subr.bf16.mxu0 %v16017_v36 }
0x185c   : > { %v17435_v22 = vpop.eup %17434  ;;  %v10593_v19 = vmul.f32 %v17433_v41, %v20958_v29  ;;  %v17512_v41 = vld [vmem:[%s18048_s12 + $0x48] sm:$0xff] }
0x185d   : > { %v17437_v4 = vpop.eup %17436  ;;  %v10594_v46 = vmul.f32 %v17435_v22, %v20956_v35 }
0x185e   : > { %15244 = vmatprep.mubr.msk.f32.mxu1 %vm1351_vm3, %v10593_v19  ;;  %16020 = vmatpush3.bf16.msra.mxu0 %v16017_v36  ;;  %v17439_v15 = vpop.eup %17438  ;;  %v10597_v62 = vmul.f32 %v17437_v4, %v20927_v50  ;;  %v17513_v19 = vld [vmem:[%s18048_s12 + $0x40] sm:$0xff] }
0x185f   : > { %v15215_v9 = vpop.f32.mrb[140].mxu0  ;;  %15245 = vmatmul.mubr.msk.f32.gmra.mrb[166].mxu1 %vm1351_vm3, %v10594_v46  ;;  %16022 = vmatprep.subr.bf16.mxu0 %v16021_v21  ;;  %v10598_v44 = vmul.f32 %v17439_v15, %v20930_v47 }
0x1860   : > { %v10689_v23 = vpop.f32.mrb[141].mxu0  ;;  %11656 = vmatprep.mubr.f32.mxu1 %v21931_v61 }
0x1861   : > { %15256 = vmatmul.mubr.msk.f32.vlgmr.msra.gmra.mrb[148].mxu0 %vm1351_vm3, %v10596_v63 }
0x1862   : > { %15258 = vmatprep.mubr.msk.f32.mxu0 %vm1351_vm3, %v10597_v62  ;;  %16024 = vmatpush3.bf16.msra.mxu0 %v16021_v21  ;;  %v17514_v62 = vld [vmem:[%s18048_s12 + $0x58] sm:$0xff] }
0x1865   : > { %15259 = vmatmul.mubr.msk.f32.gmra.mrb[150].mxu0 %vm1351_vm3, %v10598_v44 }
0x1866   : > { %15265 = vmatprep.mubr.msk.f32.mxu0 %vm890_vm0, %v10689_v23 }
0x1867   : > { %v15218_v1 = vpop.f32.mrb[142].mxu0 }
0x1868   : > { %v10699_v40 = vpop.f32.mrb[143].mxu0 }
0x1869   : > { %15266 = vmatmul.mubr.msk.f32.vlgmr.msra.gmra.mrb[56].mxu0 %vm890_vm0, %v15215_v9 }
0x186a   : > { %15268 = vmatprep.mubr.msk.f32.mxu0 %vm890_vm0, %v10699_v40 }
0x186d   : > { %15269 = vmatmul.mubr.msk.f32.gmra.mrb[58].mxu0 %vm890_vm0, %v15218_v1  ;;  %v17515_v1 = vld [vmem:[%s18048_s12 + $0x50] sm:$0xff] }
0x1897   : > { %v15229_v50 = vpop.f32.mrb[144].mxu0 }
0x1898   : > { %v10798_v39 = vpop.f32.mrb[145].mxu0 }
0x1899   : > { %15271 = vmatprep.mubr.msk.f32.mxu0 %vm890_vm0, %v10798_v39 }
0x189a   : > { %15272 = vmatmul.mubr.msk.f32.gmra.mrb[60].mxu0 %vm890_vm0, %v15229_v50 }
0x189b   : > { %v15232_v28 = vpop.f32.mrb[146].mxu0 }
0x189c   : > { %v10808_v47 = vpop.f32.mrb[147].mxu0 }
0x189d   : > { %15274 = vmatprep.mubr.msk.f32.mxu0 %vm890_vm0, %v10808_v47 }
0x189e   : > { %15275 = vmatmul.mubr.msk.f32.gmra.mrb[62].mxu0 %vm890_vm0, %v15232_v28 }
0x192e   : > { %v15243_v3 = vpop.f32.mrb[164].mxu1 }
0x192f   : > { %v10907_v49 = vpop.f32.mrb[165].mxu1 }
0x1930   : > { %15277 = vmatprep.mubr.msk.f32.mxu0 %vm890_vm0, %v10907_v49 }
0x1931   : > { %15278 = vmatmul.mubr.msk.f32.gmra.mrb[64].mxu0 %vm890_vm0, %v15243_v3 }
0x1932   : > { %v15246_v43 = vpop.f32.mrb[166].mxu1 }
0x1933   : > { %v10917_v53 = vpop.f32.mrb[167].mxu1 }
0x1934   : > { %v15257_v35 = vpop.f32.mrb[148].mxu0  ;;  %15280 = vmatprep.mubr.msk.f32.mxu0 %vm890_vm0, %v10917_v53  ;;  %v17516_v53 = vld [vmem:[%s18048_s12 + $0x68] sm:$0xff] }
0x1935   : > { %v11016_v29 = vpop.f32.mrb[149].mxu0  ;;  %15281 = vmatmul.mubr.msk.f32.gmra.mrb[66].mxu0 %vm890_vm0, %v15246_v43 }
0x1936   : > { %15283 = vmatprep.mubr.msk.f32.mxu0 %vm890_vm0, %v11016_v29 }
0x1938   : > { %v15260_v58 = vpop.f32.mrb[150].mxu0 }
0x1939   : > { %v11026_v33 = vpop.f32.mrb[151].mxu0  ;;  %15284 = vmatmul.mubr.msk.f32.gmra.mrb[68].mxu0 %vm890_vm0, %v15257_v35 }
0x193a   : > { %15286 = vmatprep.mubr.msk.f32.mxu0 %vm890_vm0, %v11026_v33 }
0x193c   : > { %v15267_v8 = vpop.f32.mrb[56].mxu0 }
0x193d   : > { %v11252_v13 = vadd.f32 %v15267_v8, %v21009_v20  ;;  %v11149_v57 = vpop.f32.mrb[57].mxu0  ;;  %15287 = vmatmul.mubr.msk.f32.gmra.mrb[70].mxu0 %vm890_vm0, %v15260_v58  ;;  %v17517_v58 = vld [vmem:[%s18048_s12 + $0x60] sm:$0xff] }
0x193e   : > { %v11251_v54 = vadd.f32 %v21009_v20, %v11149_v57  ;;  %11817 = vmatprep.mubr.f32.mxu0 %v21931_v61 }
0x193f   : > { %v21016_v7 = vadd.f32 %v17504_v25, %v11252_v13 }
0x1940   : > { %v21019_v55 = vadd.f32 %v17505_v32, %v11251_v54  ;;  %v15270_v45 = vpop.f32.mrb[58].mxu0 }
0x1941   : > { %v11254_v18 = vadd.f32 %v15270_v45, %v21009_v20  ;;  %11287 = vadd.xlane.f32.xlu0 %v21016_v7  ;;  %v11159_v26 = vpop.f32.mrb[59].mxu0 }
0x1942   : > { %v11253_v27 = vadd.f32 %v21009_v20, %v11159_v26  ;;  %11285 = vadd.xlane.f32.xlu1 %v21019_v55  ;;  %v17518_v26 = vld [vmem:[%s18048_s12 + $0x78] sm:$0xff] }
0x1943   : > { %v21026_v5 = vadd.f32 %v17506_v59, %v11254_v18 }
0x1944   : > { %v21029_v31 = vadd.f32 %v17507_v2, %v11253_v27 }
0x1946   : > { %11291 = vadd.xlane.f32.xlu1 %v21026_v5  ;;  %11289 = vadd.xlane.f32.xlu0 %v21029_v31 }
0x196d   : > { %v15273_v60 = vpop.f32.mrb[60].mxu0 }
0x196e   : > { %v11256_v10 = vadd.f32 %v15273_v60, %v21009_v20  ;;  %v11169_v16 = vpop.f32.mrb[61].mxu0  ;;  %v17519_v60 = vld [vmem:[%s18048_s12 + $0x70] sm:$0xff] }
0x196f   : > { %v11255_v11 = vadd.f32 %v21009_v20, %v11169_v16 }
0x1970   : > { %v21036_v14 = vadd.f32 %v17508_v0, %v11256_v10 }
0x1971   : > { %v21039_v42 = vadd.f32 %v17509_v30, %v11255_v11  ;;  %v15276_v52 = vpop.f32.mrb[62].mxu0 }
0x1972   : > { %v11258_v24 = vadd.f32 %v15276_v52, %v21009_v20  ;;  %11295 = vadd.xlane.f32.xlu1 %v21036_v14  ;;  %v11179_v56 = vpop.f32.mrb[63].mxu0 }
0x1973   : > { %v11257_v17 = vadd.f32 %v21009_v20, %v11179_v56  ;;  %11293 = vadd.xlane.f32.xlu0 %v21039_v42 }
0x1974   : > { %v21046_v51 = vadd.f32 %v17510_v12, %v11258_v24  ;;  %v11511_v12 = vld [vmem:[#allocation8 + $0x28] sm:$0xff] }
0x1975   : > { %v21049_v34 = vadd.f32 %v17511_v48, %v11257_v17  ;;  %v11507_v17 = vld [vmem:[#allocation8 + $0x8] sm:$0xff]  ;;  %v11509_v48 = vld [vmem:[#allocation8 + $0x18] sm:$0xff] }
0x1976   : > { %11299 = vadd.xlane.f32.xlu1 %v21046_v51 }
0x1977   : > { %11297 = vadd.xlane.f32.xlu0 %v21049_v34 }
0x19ce   : > { %v11288_v63 = vpop.xlane.xlu0 %11287 }
0x19cf   : > { %v11286_v22 = vpop.xlane.xlu1 %11285  ;;  %v11319_v49 = vmul.f32 0.0078125, %v11288_v63  ;;  %v11512_v63 = vld [vmem:[#allocation8 + $0x30] sm:$0xff] }
0x19d0   : > { %v11318_v29 = vmul.f32 0.0078125, %v11286_v22  ;;  %v11510_v22 = vld [vmem:[#allocation8 + $0x20] sm:$0xff] }
0x19d1   : > { %v21086_v32 = vsub.f32 %v21016_v7, %v11319_v49 }
0x19d2   : > { %v21092_v59 = vsub.f32 %v21019_v55, %v11318_v29  ;;  %v11520_v29 = vld [vmem:[#allocation8 + $0x70] sm:$0xff] }
0x19d3   : > { %v11292_v47 = vpop.xlane.xlu1 %11291  ;;  %v11290_v43 = vpop.xlane.xlu0 %11289  ;;  %v11351_v16 = vmul.f32 %v21086_v32, %v21086_v32 }
0x19d4   : > { %v11321_v45 = vmul.f32 0.0078125, %v11292_v47  ;;  %v11320_v2 = vmul.f32 0.0078125, %v11290_v43  ;;  %v11350_v30 = vmul.f32 %v21092_v59, %v21092_v59  ;;  %v11521_v47 = vld [vmem:[#allocation8 + $0x78] sm:$0xff] }
0x19d6   : > { %v21105_v11 = vsub.f32 %v21029_v31, %v11320_v2 }
0x19ff   : > { %v11296_v54 = vpop.xlane.xlu1 %11295 }
0x1a00   : > { %v11294_v18 = vpop.xlane.xlu0 %11293  ;;  %v11323_v7 = vmul.f32 0.0078125, %v11296_v54 }
0x1a01   : > { %v11322_v55 = vmul.f32 0.0078125, %v11294_v18  ;;  %v11522_v18 = vld [vmem:[#allocation8 + $0x80] sm:$0xff] }
0x1a02   : > { %v21110_v24 = vsub.f32 %v21036_v14, %v11323_v7  ;;  %v11524_v7 = vld [vmem:[#allocation8 + $0x90] sm:$0xff] }
0x1a03   : > { %v11300_v0 = vpop.xlane.xlu1 %11299  ;;  %v21115_v31 = vsub.f32 %v21039_v42, %v11322_v55 }
0x1a04   : > { %v15279_v38 = vpop.f32.mrb[64].mxu0  ;;  %v11298_v52 = vpop.xlane.xlu0 %11297  ;;  %v11355_v42 = vmul.f32 %v21110_v24, %v21110_v24 }
0x1a05   : > { %v11260_v37 = vadd.f32 %v15279_v38, %v21009_v20  ;;  %v11189_v36 = vpop.f32.mrb[65].mxu0  ;;  %v11324_v38 = vmul.f32 0.0078125, %v11298_v52  ;;  %v11533_v52 = vld [vmem:[#allocation8 + $0xd8] sm:$0xff] }
0x1a06   : > { %v11259_v6 = vadd.f32 %v21009_v20, %v11189_v36  ;;  %v16025_v36 = vpack.c.bf16 %v11511_v12, %v11507_v17  ;;  %v11530_v17 = vld [vmem:[#allocation8 + $0xc0] sm:$0xff] }
0x1a07   : > { %v21056_v21 = vadd.f32 %v17512_v41, %v11260_v37  ;;  %v11352_v37 = vmul.f32 %v21105_v11, %v21105_v11  ;;  %v11506_v41 = vld [vmem:[#allocation8] sm:$0xff] }
0x1a08   : > { %v21059_v4 = vadd.f32 %v17513_v19, %v11259_v6  ;;  %v15282_v46 = vpop.f32.mrb[66].mxu0  ;;  %v11513_v6 = vld [vmem:[#allocation8 + $0x38] sm:$0xff]  ;;  %v16027_v19 = vpack.c.bf16 %v11510_v22, %v11506_v41  ;;  %16026 = vmatprep.subr.bf16.mxu1 %v16025_v36  ;;  %v11534_v12 = vld [vmem:[#allocation8 + $0xe0] sm:$0xff]  ;;  %v11536_v36 = vld [vmem:[#allocation8 + $0xf0] sm:$0xff] }
0x1a09   : > { %v11262_v9 = vadd.f32 %v15282_v46, %v21009_v20  ;;  %11303 = vadd.xlane.f32.xlu1 %v21056_v21  ;;  %v11199_v15 = vpop.f32.mrb[67].mxu0  ;;  %v16057_v14 = vpack.c.bf16 %v11513_v6, %v11509_v48  ;;  %v11508_v46 = vld [vmem:[#allocation8 + $0x10] sm:$0xff]  ;;  %v11539_v41 = vld [vmem:[#allocation8 + $0x108] sm:$0xff] }
0x1a0a   : > { %v11261_v23 = vadd.f32 %v21009_v20, %v11199_v15  ;;  %11301 = vadd.xlane.f32.xlu0 %v21059_v4  ;;  %16028 = vmatpush1.bf16.msra.mxu1 %v16027_v19  ;;  %v11543_v22 = vld [vmem:[#allocation8 + $0x128] sm:$0xff] }
0x1a0b   : > { %v21066_v44 = vadd.f32 %v17514_v62, %v11262_v9  ;;  %v16059_v9 = vpack.c.bf16 %v11512_v63, %v11508_v46  ;;  %16058 = vmatprep.subr.bf16.mxu0 %v16057_v14  ;;  %v11519_v62 = vld [vmem:[#allocation8 + $0x68] sm:$0xff]  ;;  %v11541_v14 = vld [vmem:[#allocation8 + $0x118] sm:$0xff]  ;;  %v16041_v19 = vpack.c.bf16 %v11543_v22, %v11539_v41  ;;  %v11538_v63 = vld [vmem:[#allocation8 + $0x100] sm:$0xff] }
0x1a0c   : > { %v21069_v40 = vadd.f32 %v17515_v1, %v11261_v23  ;;  %v15285_v50 = vpop.f32.mrb[68].mxu0  ;;  %v11515_v23 = vld [vmem:[#allocation8 + $0x48] sm:$0xff]  ;;  %v11517_v1 = vld [vmem:[#allocation8 + $0x58] sm:$0xff] }
0x1a0d   : > { %v11264_v39 = vadd.f32 %v15285_v50, %v21009_v20  ;;  %11307 = vadd.xlane.f32.xlu1 %v21066_v44  ;;  %v11209_v28 = vpop.f32.mrb[69].mxu0  ;;  %v21125_v50 = vsub.f32 %v21049_v34, %v11324_v38  ;;  %16060 = vmatpush1.bf16.msra.mxu0 %v16059_v9  ;;  %v16061_v49 = vpack.c.bf16 %v11521_v47, %v11517_v1  ;;  %v11545_v46 = vld [vmem:[#allocation8 + $0x138] sm:$0xff]  ;;  %v11542_v9 = vld [vmem:[#allocation8 + $0x120] sm:$0xff]  ;;  %v11544_v1 = vld [vmem:[#allocation8 + $0x130] sm:$0xff] }
0x1a0e   : > { %v11263_v3 = vadd.f32 %v21009_v20, %v11209_v28  ;;  %11305 = vadd.xlane.f32.xlu0 %v21069_v40  ;;  %v16029_v28 = vpack.c.bf16 %v11519_v62, %v11515_v23  ;;  %v16039_v38 = vpack.c.bf16 %v11534_v12, %v11530_v17  ;;  %v16043_v23 = vpack.c.bf16 %v11542_v9, %v11538_v63  ;;  %v11540_v62 = vld [vmem:[#allocation8 + $0x110] sm:$0xff]  ;;  %v11551_v47 = vld [vmem:[#allocation8 + $0x168] sm:$0xff]  ;;  %v11569_v17 = vld [vmem:[#allocation8 + $0x1f8] sm:$0xff] }
0x1a0f   : > { %v21076_v35 = vadd.f32 %v17516_v53, %v11264_v39  ;;  %v11354_v39 = vmul.f32 %v21115_v31, %v21115_v31  ;;  %v11516_v53 = vld [vmem:[#allocation8 + $0x50] sm:$0xff]  ;;  %16062 = vmatprep.subr.bf16.mxu0 %v16061_v49  ;;  %v11356_v54 = vmul.f32 %v21125_v50, %v21125_v50  ;;  %v11553_v49 = vld [vmem:[#allocation8 + $0x178] sm:$0xff]  ;;  %v11562_v12 = vld [vmem:[#allocation8 + $0x1c0] sm:$0xff] }
0x1a10   : > { %v21079_v33 = vadd.f32 %v17517_v58, %v11263_v3  ;;  %v15288_v8 = vpop.f32.mrb[70].mxu0  ;;  %v11514_v3 = vld [vmem:[#allocation8 + $0x40] sm:$0xff]  ;;  %16030 = vmatprep.subr.bf16.mxu1 %v16029_v28  ;;  %v16063_v58 = vpack.c.bf16 %v11520_v29, %v11516_v53  ;;  %v11547_v28 = vld [vmem:[#allocation8 + $0x148] sm:$0xff] }
0x1a11   : > { %v11266_v13 = vadd.f32 %v15288_v8, %v21009_v20  ;;  %11311 = vadd.xlane.f32.xlu1 %v21076_v35  ;;  %v11219_v57 = vpop.f32.mrb[71].mxu0  ;;  %v11523_v8 = vld [vmem:[#allocation8 + $0x88] sm:$0xff]  ;;  %v11550_v53 = vld [vmem:[#allocation8 + $0x160] sm:$0xff] }
0x1a12   : > { %v11265_v25 = vadd.f32 %v21009_v20, %v11219_v57  ;;  %11309 = vadd.xlane.f32.xlu0 %v21079_v33  ;;  %v21100_v20 = vsub.f32 %v21026_v5, %v11321_v45  ;;  %v11325_v5 = vmul.f32 0.0078125, %v11300_v0  ;;  %v11525_v57 = vld [vmem:[#allocation8 + $0x98] sm:$0xff]  ;;  %16064 = vmatpush1.bf16.msra.mxu0 %v16063_v58  ;;  %v11531_v0 = vld [vmem:[#allocation8 + $0xc8] sm:$0xff] }
0x1a13   : > { %v21089_v27 = vadd.f32 %v17518_v26, %v11266_v13  ;;  %v11527_v13 = vld [vmem:[#allocation8 + $0xa8] sm:$0xff]  ;;  %v11529_v45 = vld [vmem:[#allocation8 + $0xb8] sm:$0xff]  ;;  %v11526_v26 = vld [vmem:[#allocation8 + $0xa0] sm:$0xff] }
0x1a14   : > { %v21095_v10 = vadd.f32 %v17519_v60, %v11265_v25  ;;  %v11353_v56 = vmul.f32 %v21100_v20, %v21100_v20  ;;  %v21120_v15 = vsub.f32 %v21046_v51, %v11325_v5  ;;  %v11518_v51 = vld [vmem:[#allocation8 + $0x60] sm:$0xff]  ;;  %v16033_v25 = vpack.c.bf16 %v11527_v13, %v11523_v8  ;;  %v11552_v8 = vld [vmem:[#allocation8 + $0x170] sm:$0xff] }
0x1a15   : > { %11315 = vadd.xlane.f32.xlu1 %v21089_v27  ;;  %v16031_v43 = vpack.c.bf16 %v11518_v51, %v11514_v3  ;;  %v16065_v2 = vpack.c.bf16 %v11529_v45, %v11525_v57  ;;  %v16035_v60 = vpack.c.bf16 %v11526_v26, %v11522_v18  ;;  %v11549_v3 = vld [vmem:[#allocation8 + $0x158] sm:$0xff]  ;;  %v16045_v51 = vpack.c.bf16 %v11551_v47, %v11547_v28  ;;  %v11555_v57 = vld [vmem:[#allocation8 + $0x188] sm:$0xff]  ;;  %v11554_v26 = vld [vmem:[#allocation8 + $0x180] sm:$0xff] }
0x1a16   : > { %11313 = vadd.xlane.f32.xlu0 %v21095_v10  ;;  %v11357_v34 = vmul.f32 %v21120_v15, %v21120_v15  ;;  %v16077_v29 = vpack.c.bf16 %v11553_v49, %v11549_v3  ;;  %v11561_v18 = vld [vmem:[#allocation8 + $0x1b8] sm:$0xff] }
0x1a17   : > { %16032 = vmatpush1.bf16.msra.mxu1 %v16031_v43  ;;  %16066 = vmatprep.subr.bf16.mxu0 %v16065_v2  ;;  %v11546_v43 = vld [vmem:[#allocation8 + $0x140] sm:$0xff] }
0x1a18   : > { %16034 = vmatprep.subr.bf16.mxu1 %v16033_v25  ;;  %v16047_v58 = vpack.c.bf16 %v11550_v53, %v11546_v43  ;;  %v11557_v25 = vld [vmem:[#allocation8 + $0x198] sm:$0xff]  ;;  %v11558_v2 = vld [vmem:[#allocation8 + $0x1a0] sm:$0xff] }
0x1a19   : > { %11368 = vadd.xlane.f32.xlu1 %v11351_v16  ;;  %v11528_v16 = vld [vmem:[#allocation8 + $0xb0] sm:$0xff] }
0x1a1a   : > { %11366 = vadd.xlane.f32.xlu0 %v11350_v30  ;;  %v16067_v55 = vpack.c.bf16 %v11528_v16, %v11524_v7  ;;  %v11535_v30 = vld [vmem:[#allocation8 + $0xe8] sm:$0xff]  ;;  %v16051_v7 = vpack.c.bf16 %v11558_v2, %v11554_v26  ;;  %v11556_v16 = vld [vmem:[#allocation8 + $0x190] sm:$0xff] }
0x1a1b   : > { %16036 = vmatpush1.bf16.msra.mxu1 %v16035_v60  ;;  %v16037_v5 = vpack.c.bf16 %v11535_v30, %v11531_v0  ;;  %v16081_v60 = vpack.c.bf16 %v11561_v18, %v11557_v25  ;;  %v11563_v30 = vld [vmem:[#allocation8 + $0x1c8] sm:$0xff] }
0x1a1c   : > { %16068 = vmatpush1.bf16.msra.mxu0 %v16067_v55  ;;  %v11560_v55 = vld [vmem:[#allocation8 + $0x1b0] sm:$0xff] }
0x1a1d   : > { %11372 = vadd.xlane.f32.xlu1 %v11353_v56  ;;  %v11537_v56 = vld [vmem:[#allocation8 + $0xf8] sm:$0xff]  ;;  %16038 = vmatprep.subr.bf16.mxu1 %v16037_v5  ;;  %v16083_v0 = vpack.c.bf16 %v11560_v55, %v11556_v16 }
0x1a1e   : > { %11370 = vadd.xlane.f32.xlu0 %v11352_v37  ;;  %v16069_v48 = vpack.c.bf16 %v11537_v56, %v11533_v52  ;;  %v11532_v37 = vld [vmem:[#allocation8 + $0xd0] sm:$0xff]  ;;  %v11567_v52 = vld [vmem:[#allocation8 + $0x1e8] sm:$0xff]  ;;  %v11565_v5 = vld [vmem:[#allocation8 + $0x1d8] sm:$0xff] }
0x1a1f   : > { %v16071_v6 = vpack.c.bf16 %v11536_v36, %v11532_v37  ;;  %16040 = vmatpush1.bf16.msra.mxu1 %v16039_v38  ;;  %v16053_v56 = vpack.c.bf16 %v11567_v52, %v11563_v30  ;;  %v16085_v38 = vpack.c.bf16 %v11569_v17, %v11565_v5  ;;  %v11564_v36 = vld [vmem:[#allocation8 + $0x1d0] sm:$0xff] }
0x1a20   : > { %16070 = vmatprep.subr.bf16.mxu0 %v16069_v48  ;;  %16042 = vmatprep.subr.bf16.mxu1 %v16041_v19  ;;  %v11566_v48 = vld [vmem:[#allocation8 + $0x1e0] sm:$0xff] }
0x1a21   : > { %11376 = vadd.xlane.f32.xlu1 %v11355_v42  ;;  %16072 = vmatpush1.bf16.msra.mxu0 %v16071_v6  ;;  %v16073_v42 = vpack.c.bf16 %v11545_v46, %v11541_v14  ;;  %v16055_v37 = vpack.c.bf16 %v11566_v48, %v11562_v12  ;;  %v11568_v6 = vld [vmem:[#allocation8 + $0x1f0] sm:$0xff] }
0x1a22   : > { %11374 = vadd.xlane.f32.xlu0 %v11354_v39  ;;  %v16075_v39 = vpack.c.bf16 %v11544_v1, %v11540_v62  ;;  %v16087_v41 = vpack.c.bf16 %v11568_v6, %v11564_v36 }
0x1a23   : > { %16074 = vmatprep.subr.bf16.mxu0 %v16073_v42  ;;  %16044 = vmatpush1.bf16.msra.mxu1 %v16043_v23 }
0x1a24   : > { %16046 = vmatprep.subr.bf16.mxu1 %v16045_v51 }
0x1a25   : > { %11380 = vadd.xlane.f32.xlu1 %v11357_v34  ;;  %16076 = vmatpush1.bf16.msra.mxu0 %v16075_v39  ;;  %v11548_v34 = vld [vmem:[#allocation8 + $0x150] sm:$0xff] }
0x1a26   : > { %11378 = vadd.xlane.f32.xlu0 %v11356_v54  ;;  %v16079_v13 = vpack.c.bf16 %v11552_v8, %v11548_v34  ;;  %16078 = vmatprep.subr.bf16.mxu0 %v16077_v29  ;;  %v11559_v54 = vld [vmem:[#allocation8 + $0x1a8] sm:$0xff] }
0x1a27   : > { %16048 = vmatpush1.bf16.msra.mxu1 %v16047_v58  ;;  %v16049_v45 = vpack.c.bf16 %v11559_v54, %v11555_v57 }
0x1a29   : > { %16080 = vmatpush1.bf16.msra.mxu0 %v16079_v13  ;;  %16050 = vmatprep.subr.bf16.mxu1 %v16049_v45 }
0x1a2a   : > { %16082 = vmatprep.subr.bf16.mxu0 %v16081_v60 }
0x1a2b   : > { %16052 = vmatpush1.bf16.msra.mxu1 %v16051_v7 }
0x1a2c   : > { %16054 = vmatprep.subr.bf16.mxu1 %v16053_v56 }
0x1a2d   : > { %16084 = vmatpush1.bf16.msra.mxu0 %v16083_v0 }
0x1a2e   : > { %16086 = vmatprep.subr.bf16.mxu0 %v16085_v38 }
0x1a2f   : > { %16056 = vmatpush1.bf16.msra.mxu1 %v16055_v37 }
0x1a31   : > { %16088 = vmatpush1.bf16.msra.mxu0 %v16087_v41  ;;  %v21176_v41 = vld [vmem:[%s21706_s8] ss:$0 sm:$0xff] }
0x1a96   : > { %v11304_v22 = vpop.xlane.xlu1 %11303 }
0x1a97   : > { %v11327_v14 = vmul.f32 0.0078125, %v11304_v22  ;;  %v11302_v19 = vpop.xlane.xlu0 %11301 }
0x1a98   : > { %v11326_v46 = vmul.f32 0.0078125, %v11302_v19 }
0x1a99   : > { %v21134_v63 = vsub.f32 %v21056_v21, %v11327_v14 }
0x1a9a   : > { %v21137_v9 = vsub.f32 %v21059_v4, %v11326_v46  ;;  %v11308_v42 = vpop.xlane.xlu1 %11307  ;;  %v21183_v46 = vld [vmem:[%s21707_s9] ss:$0 sm:$0xff] }
0x1a9b   : > { %v11329_v23 = vmul.f32 0.0078125, %v11308_v42  ;;  %v11306_v62 = vpop.xlane.xlu0 %11305  ;;  %v11359_v1 = vmul.f32 %v21134_v63, %v21134_v63 }
0x1a9c   : > { %v11328_v39 = vmul.f32 0.0078125, %v11306_v62  ;;  %v11358_v28 = vmul.f32 %v21137_v9, %v21137_v9 }
0x1a9d   : > { %v21144_v47 = vsub.f32 %v21066_v44, %v11329_v23  ;;  %11384 = vadd.xlane.f32.xlu1 %v11359_v1 }
0x1a9e   : > { %v21147_v21 = vsub.f32 %v21069_v40, %v11328_v39  ;;  %v11312_v3 = vpop.xlane.xlu1 %11311  ;;  %11382 = vadd.xlane.f32.xlu0 %v11358_v28 }
0x1a9f   : > { %v11331_v4 = vmul.f32 0.0078125, %v11312_v3  ;;  %v11310_v51 = vpop.xlane.xlu0 %11309  ;;  %v11361_v49 = vmul.f32 %v21144_v47, %v21144_v47 }
0x1aa0   : > { %v11330_v43 = vmul.f32 0.0078125, %v11310_v51  ;;  %v11360_v53 = vmul.f32 %v21147_v21, %v21147_v21 }
0x1aa1   : > { %v21154_v29 = vsub.f32 %v21076_v35, %v11331_v4  ;;  %11388 = vadd.xlane.f32.xlu1 %v11361_v49 }
0x1aa2   : > { %v21157_v44 = vsub.f32 %v21079_v33, %v11330_v43  ;;  %v11316_v40 = vpop.xlane.xlu1 %11315  ;;  %11386 = vadd.xlane.f32.xlu0 %v11360_v53 }
0x1aa3   : > { %v11333_v58 = vmul.f32 0.0078125, %v11316_v40  ;;  %v11314_v34 = vpop.xlane.xlu0 %11313  ;;  %v11363_v8 = vmul.f32 %v21154_v29, %v21154_v29 }
0x1aa4   : > { %v11332_v13 = vmul.f32 0.0078125, %v11314_v34  ;;  %v11362_v57 = vmul.f32 %v21157_v44, %v21157_v44 }
0x1aa5   : > { %v21164_v54 = vsub.f32 %v21089_v27, %v11333_v58  ;;  %11392 = vadd.xlane.f32.xlu1 %v11363_v8 }
0x1aa6   : > { %v21167_v35 = vsub.f32 %v21095_v10, %v11332_v13  ;;  %v11369_v33 = vpop.xlane.xlu1 %11368  ;;  %11390 = vadd.xlane.f32.xlu0 %v11362_v57 }
0x1aa7   : > { %v11399_v25 = vmul.f32 0.0078125, %v11369_v33  ;;  %v11367_v45 = vpop.xlane.xlu0 %11366  ;;  %v11365_v18 = vmul.f32 %v21164_v54, %v21164_v54 }
0x1aa8   : > { %v11398_v26 = vmul.f32 0.0078125, %v11367_v45  ;;  %v11364_v2 = vmul.f32 %v21167_v35, %v21167_v35 }
0x1aa9   : > { %v11415_v60 = vadd.f32 1e-05, %v11399_v25  ;;  %11396 = vadd.xlane.f32.xlu1 %v11365_v18 }
0x1aaa   : > { %v11414_v7 = vadd.f32 1e-05, %v11398_v26  ;;  %v11373_v27 = vpop.xlane.xlu1 %11372  ;;  %11394 = vadd.xlane.f32.xlu0 %v11364_v2  ;;  %v11994_v2 = vld [vmem:[#allocation10 + $0x80] sm:$0xff] }
0x1aab   : > { %17440 = vrsqrt.f32 %v11415_v60  ;;  %v11401_v16 = vmul.f32 0.0078125, %v11373_v27  ;;  %v11371_v10 = vpop.xlane.xlu0 %11370  ;;  %v11995_v60 = vld [vmem:[#allocation10 + $0x88] sm:$0xff] }
0x1aac   : > { %17442 = vrsqrt.f32 %v11414_v7  ;;  %v11400_v55 = vmul.f32 0.0078125, %v11371_v10  ;;  %v12026_v7 = vld [vmem:[#allocation10 + $0x180] sm:$0xff]  ;;  %v16089_v27 = vpack.c.bf16 %v11995_v60, %v11994_v2  ;;  %v12017_v2 = vld [vmem:[#allocation10 + $0x138] sm:$0xff] }
0x1aad   : > { %v11417_v0 = vadd.f32 1e-05, %v11401_v16  ;;  %v12027_v16 = vld [vmem:[#allocation10 + $0x188] sm:$0xff]  ;;  %v11978_v10 = vld [vmem:[#allocation10] sm:$0xff] }
0x1aae   : > { %v11416_v30 = vadd.f32 1e-05, %v11400_v55  ;;  %v11377_v52 = vpop.xlane.xlu1 %11376  ;;  %v11979_v55 = vld [vmem:[#allocation10 + $0x8] sm:$0xff]  ;;  %16090 = vmatprep.subr.bf16.mxu1 %v16089_v27  ;;  %v12002_v60 = vld [vmem:[#allocation10 + $0xc0] sm:$0xff] }
0x1aaf   : > { %v11375_v5 = vpop.xlane.xlu0 %11374  ;;  %v11403_v17 = vmul.f32 0.0078125, %v11377_v52  ;;  %v12010_v52 = vld [vmem:[#allocation10 + $0x100] sm:$0xff] }
0x1ab0   : > { %17444 = vrsqrt.f32 %v11416_v30  ;;  %v11402_v56 = vmul.f32 0.0078125, %v11375_v5  ;;  %v16091_v30 = vpack.c.bf16 %v11979_v55, %v11978_v10  ;;  %v12011_v5 = vld [vmem:[#allocation10 + $0x108] sm:$0xff]  ;;  %v12034_v27 = vld [vmem:[#allocation10 + $0x1c0] sm:$0xff] }
0x1ab1   : > { %17446 = vrsqrt.f32 %v11417_v0  ;;  %v11419_v36 = vadd.f32 1e-05, %v11403_v17  ;;  %v16121_v0 = vpack.c.bf16 %v12027_v16, %v12026_v7  ;;  %v16123_v17 = vpack.c.bf16 %v12011_v5, %v12010_v52  ;;  %v12003_v7 = vld [vmem:[#allocation10 + $0xc8] sm:$0xff]  ;;  %v12018_v5 = vld [vmem:[#allocation10 + $0x140] sm:$0xff] }
0x1ab2   : > { %v11418_v12 = vadd.f32 1e-05, %v11402_v56  ;;  %v11381_v14 = vpop.xlane.xlu1 %11380  ;;  %v11996_v56 = vld [vmem:[#allocation10 + $0x90] sm:$0xff]  ;;  %v12035_v16 = vld [vmem:[#allocation10 + $0x1c8] sm:$0xff] }
0x1ab3   : > { %v11379_v48 = vpop.xlane.xlu0 %11378  ;;  %v11405_v62 = vmul.f32 0.0078125, %v11381_v14  ;;  %16122 = vmatprep.subr.bf16.mxu0 %v16121_v0  ;;  %v12012_v14 = vld [vmem:[#allocation10 + $0x110] sm:$0xff]  ;;  %v16105_v0 = vpack.c.bf16 %v12003_v7, %v12002_v60  ;;  %v11987_v52 = vld [vmem:[#allocation10 + $0x48] sm:$0xff] }
0x1ab4   : > { %17448 = vrsqrt.f32 %v11418_v12  ;;  %v11404_v6 = vmul.f32 0.0078125, %v11379_v48  ;;  %v11997_v12 = vld [vmem:[#allocation10 + $0x98] sm:$0xff]  ;;  %v12028_v48 = vld [vmem:[#allocation10 + $0x190] sm:$0xff] }
0x1ab5   : > { %v17441_v38 = vpop.eup %17440  ;;  %17450 = vrsqrt.f32 %v11419_v36 }
0x1ab6   : > { %v17443_v37 = vpop.eup %17442  ;;  %v11447_v19 = vmul.f32 %v17441_v38, %v21086_v32  ;;  %v11420_v1 = vadd.f32 1e-05, %v11404_v6  ;;  %v11421_v32 = vadd.f32 1e-05, %v11405_v62  ;;  %v12029_v38 = vld [vmem:[#allocation10 + $0x198] sm:$0xff]  ;;  %v11980_v6 = vld [vmem:[#allocation10 + $0x10] sm:$0xff] }
0x1ab7   : > { %v11446_v22 = vmul.f32 %v17443_v37, %v21092_v59  ;;  %v16093_v37 = vpack.c.bf16 %v11997_v12, %v11996_v56  ;;  %v16125_v36 = vpack.c.bf16 %v12029_v38, %v12028_v48  ;;  %v11999_v62 = vld [vmem:[#allocation10 + $0xa8] sm:$0xff]  ;;  %v16137_v56 = vpack.c.bf16 %v12035_v16, %v12034_v27  ;;  %v12004_v12 = vld [vmem:[#allocation10 + $0xd0] sm:$0xff]  ;;  %v12005_v48 = vld [vmem:[#allocation10 + $0xd8] sm:$0xff] }
0x1ab8   : > { %v11469_v28 = vmul.f32 %v21176_v41, %v11447_v19  ;;  %17452 = vrsqrt.f32 %v11420_v1  ;;  %v12036_v38 = vld [vmem:[#allocation10 + $0x1d0] sm:$0xff]  ;;  %v12025_v16 = vld [vmem:[#allocation10 + $0x178] sm:$0xff] }
0x1ab9   : > { %v11468_v42 = vmul.f32 %v21176_v41, %v11446_v22  ;;  %17454 = vrsqrt.f32 %v11421_v32  ;;  %v11981_v22 = vld [vmem:[#allocation10 + $0x18] sm:$0xff]  ;;  %v11982_v32 = vld [vmem:[#allocation10 + $0x20] sm:$0xff]  ;;  %v12024_v27 = vld [vmem:[#allocation10 + $0x170] sm:$0xff] }
0x1aba   : > { %v17445_v23 = vpop.eup %17444  ;;  %v21196_v4 = vadd.f32 %v21183_v46, %v11469_v28  ;;  %v16095_v19 = vpack.c.bf16 %v11981_v22, %v11980_v6  ;;  %v16109_v22 = vpack.c.bf16 %v12005_v48, %v12004_v12 }
0x1abb   : > { %v21187_v39 = vadd.f32 %v21183_v46, %v11468_v42  ;;  %v11448_v59 = vmul.f32 %v17445_v23, %v21105_v11  ;;  %v17447_v3 = vpop.eup %17446  ;;  %v12013_v42 = vld [vmem:[#allocation10 + $0x118] sm:$0xff]  ;;  %v11998_v23 = vld [vmem:[#allocation10 + $0xa0] sm:$0xff] }
0x1abc   : > { %v11449_v49 = vmul.f32 %v17447_v3, %v21100_v20  ;;  %v16127_v1 = vpack.c.bf16 %v12013_v42, %v12012_v14  ;;  %v16097_v28 = vpack.c.bf16 %v11999_v62, %v11998_v23  ;;  %v12031_v3 = vld [vmem:[#allocation10 + $0x1a8] sm:$0xff]  ;;  %v11988_v14 = vld [vmem:[#allocation10 + $0x50] sm:$0xff]  ;;  %v12021_v62 = vld [vmem:[#allocation10 + $0x158] sm:$0xff] }
0x1abd   : > { %11657 = vmatmul.mubr.f32.vlgmr.msra.gmra.mrb[168].mxu1 %v21187_v39  ;;  %11818 = vmatmul.mubr.f32.vlgmr.msra.gmra.mrb[152].mxu0 %v21187_v39  ;;  %v11470_v51 = vmul.f32 %v21176_v41, %v11448_v59  ;;  %v12030_v59 = vld [vmem:[#allocation10 + $0x1a0] sm:$0xff]  ;;  %v12020_v42 = vld [vmem:[#allocation10 + $0x150] sm:$0xff] }
0x1abe   : > { %11662 = vmatprep.mubr.f32.mxu1 %v21931_v61  ;;  %11823 = vmatprep.mubr.f32.mxu0 %v21931_v61  ;;  %v17449_v43 = vpop.eup %17448  ;;  %v11471_v53 = vmul.f32 %v21176_v41, %v11449_v49  ;;  %v11983_v49 = vld [vmem:[#allocation10 + $0x28] sm:$0xff] }
0x1abf   : > { %v21205_v11 = vadd.f32 %v21183_v46, %v11470_v51  ;;  %v11450_v40 = vmul.f32 %v17449_v43, %v21115_v31  ;;  %v17451_v58 = vpop.eup %17450  ;;  %16092 = vmatpush3.bf16.msra.mxu1 %v16091_v30  ;;  %16124 = vmatpush3.bf16.msra.mxu0 %v16123_v17  ;;  %v16129_v51 = vpack.c.bf16 %v12031_v3, %v12030_v59  ;;  %v12014_v43 = vld [vmem:[#allocation10 + $0x120] sm:$0xff]  ;;  %v12019_v17 = vld [vmem:[#allocation10 + $0x148] sm:$0xff] }
0x1ac0   : > { %v21214_v20 = vadd.f32 %v21183_v46, %v11471_v53  ;;  %v11451_v8 = vmul.f32 %v17451_v58, %v21110_v24  ;;  %16094 = vmatprep.subr.bf16.mxu1 %v16093_v37  ;;  %16126 = vmatprep.subr.bf16.mxu0 %v16125_v36  ;;  %v12015_v53 = vld [vmem:[#allocation10 + $0x128] sm:$0xff]  ;;  %v12000_v58 = vld [vmem:[#allocation10 + $0xb0] sm:$0xff]  ;;  %v11986_v30 = vld [vmem:[#allocation10 + $0x40] sm:$0xff]  ;;  %v16139_v6 = vpack.c.bf16 %v12019_v17, %v12018_v5 }
0x1ac1   : > { %11663 = vmatmul.mubr.f32.gmra.mrb[170].mxu1 %v21196_v4  ;;  %11824 = vmatmul.mubr.f32.gmra.mrb[154].mxu0 %v21196_v4  ;;  %v11472_v34 = vmul.f32 %v21176_v41, %v11450_v40  ;;  %v16099_v40 = vpack.c.bf16 %v11983_v49, %v11982_v32  ;;  %v12037_v37 = vld [vmem:[#allocation10 + $0x1d8] sm:$0xff]  ;;  %v16107_v36 = vpack.c.bf16 %v11987_v52, %v11986_v30  ;;  %v12038_v59 = vld [vmem:[#allocation10 + $0x1e0] sm:$0xff]  ;;  %v12039_v3 = vld [vmem:[#allocation10 + $0x1e8] sm:$0xff] }
0x1ac2   : > { %11668 = vmatprep.mubr.f32.mxu1 %v21931_v61  ;;  %11829 = vmatprep.mubr.f32.mxu0 %v21931_v61  ;;  %v17453_v13 = vpop.eup %17452  ;;  %v11473_v57 = vmul.f32 %v21176_v41, %v11451_v8  ;;  %v12032_v8 = vld [vmem:[#allocation10 + $0x1b0] sm:$0xff]  ;;  %v16141_v23 = vpack.c.bf16 %v12037_v37, %v12036_v38 }
0x1ac3   : > { %v21223_v31 = vadd.f32 %v21183_v46, %v11472_v34  ;;  %v11452_v33 = vmul.f32 %v17453_v13, %v21125_v50  ;;  %v17455_v25 = vpop.eup %17454  ;;  %16096 = vmatpush3.bf16.msra.mxu1 %v16095_v19  ;;  %v12001_v34 = vld [vmem:[#allocation10 + $0xb8] sm:$0xff]  ;;  %16128 = vmatpush3.bf16.msra.mxu0 %v16127_v1  ;;  %v16131_v13 = vpack.c.bf16 %v12015_v53, %v12014_v43  ;;  %v12006_v1 = vld [vmem:[#allocation10 + $0xe0] sm:$0xff] }
0x1ac4   : > { %v21232_v24 = vadd.f32 %v21183_v46, %v11473_v57  ;;  %v11453_v18 = vmul.f32 %v17455_v25, %v21120_v15  ;;  %16098 = vmatprep.subr.bf16.mxu1 %v16097_v28  ;;  %v16101_v57 = vpack.c.bf16 %v12001_v34, %v12000_v58  ;;  %v11984_v25 = vld [vmem:[#allocation10 + $0x30] sm:$0xff]  ;;  %16130 = vmatprep.subr.bf16.mxu0 %v16129_v51  ;;  %v11989_v19 = vld [vmem:[#allocation10 + $0x58] sm:$0xff]  ;;  %v12007_v28 = vld [vmem:[#allocation10 + $0xe8] sm:$0xff] }
0x1ac5   : > { %11669 = vmatmul.mubr.f32.gmra.mrb[172].mxu1 %v21205_v11  ;;  %11830 = vmatmul.mubr.f32.gmra.mrb[156].mxu0 %v21205_v11  ;;  %v11474_v45 = vmul.f32 %v21176_v41, %v11452_v33  ;;  %v12033_v33 = vld [vmem:[#allocation10 + $0x1b8] sm:$0xff]  ;;  %v16111_v32 = vpack.c.bf16 %v11989_v19, %v11988_v14  ;;  %v16143_v51 = vpack.c.bf16 %v12021_v62, %v12020_v42  ;;  %v11990_v53 = vld [vmem:[#allocation10 + $0x60] sm:$0xff] }
0x1ac6   : > { %11674 = vmatprep.mubr.f32.mxu1 %v21931_v61  ;;  %11835 = vmatprep.mubr.f32.mxu0 %v21931_v61  ;;  %v11475_v26 = vmul.f32 %v21176_v41, %v11453_v18  ;;  %v16133_v18 = vpack.c.bf16 %v12033_v33, %v12032_v8  ;;  %v16113_v49 = vpack.c.bf16 %v12007_v28, %v12006_v1  ;;  %v12022_v58 = vld [vmem:[#allocation10 + $0x160] sm:$0xff]  ;;  %v12023_v8 = vld [vmem:[#allocation10 + $0x168] sm:$0xff]  ;;  %v12009_v33 = vld [vmem:[#allocation10 + $0xf8] sm:$0xff] }
0x1ac7   : > { %v21241_v50 = vadd.f32 %v21183_v46, %v11474_v45  ;;  %v11985_v45 = vld [vmem:[#allocation10 + $0x38] sm:$0xff]  ;;  %16100 = vmatpush3.bf16.msra.mxu1 %v16099_v40  ;;  %16132 = vmatpush3.bf16.msra.mxu0 %v16131_v13  ;;  %v16145_v43 = vpack.c.bf16 %v12039_v3, %v12038_v59  ;;  %v11991_v40 = vld [vmem:[#allocation10 + $0x68] sm:$0xff]  ;;  %v16147_v13 = vpack.c.bf16 %v12023_v8, %v12022_v58 }
0x1ac8   : > { %v21249_v15 = vadd.f32 %v21183_v46, %v11475_v26  ;;  %v12016_v26 = vld [vmem:[#allocation10 + $0x130] sm:$0xff]  ;;  %v16103_v10 = vpack.c.bf16 %v11985_v45, %v11984_v25  ;;  %16102 = vmatprep.subr.bf16.mxu1 %v16101_v57  ;;  %16134 = vmatprep.subr.bf16.mxu0 %v16133_v18  ;;  %v16115_v34 = vpack.c.bf16 %v11991_v40, %v11990_v53  ;;  %v12041_v18 = vld [vmem:[#allocation10 + $0x1f8] sm:$0xff] }
0x1ac9   : > { %11675 = vmatmul.mubr.f32.gmra.mrb[174].mxu1 %v21214_v20  ;;  %11836 = vmatmul.mubr.f32.gmra.mrb[158].mxu0 %v21214_v20  ;;  %v16135_v55 = vpack.c.bf16 %v12017_v2, %v12016_v26  ;;  %v12008_v57 = vld [vmem:[#allocation10 + $0xf0] sm:$0xff]  ;;  %v11993_v2 = vld [vmem:[#allocation10 + $0x78] sm:$0xff] }
0x1aca   : > { %11680 = vmatprep.mubr.f32.mxu1 %v21931_v61  ;;  %11841 = vmatprep.mubr.f32.mxu0 %v21931_v61  ;;  %v12040_v25 = vld [vmem:[#allocation10 + $0x1f0] sm:$0xff]  ;;  %v16117_v45 = vpack.c.bf16 %v12009_v33, %v12008_v57 }
0x1acb   : > { %16104 = vmatpush3.bf16.msra.mxu1 %v16103_v10  ;;  %16136 = vmatpush3.bf16.msra.mxu0 %v16135_v55  ;;  %v11992_v26 = vld [vmem:[#allocation10 + $0x70] sm:$0xff]  ;;  %v16149_v60 = vpack.c.bf16 %v12041_v18, %v12040_v25  ;;  %v16151_v10 = vpack.c.bf16 %v12025_v16, %v12024_v27 }
0x1acc   : > { %16106 = vmatprep.subr.bf16.mxu1 %v16105_v0  ;;  %16138 = vmatprep.subr.bf16.mxu0 %v16137_v56  ;;  %v16119_v7 = vpack.c.bf16 %v11993_v2, %v11992_v26 }
0x1acd   : > { %11681 = vmatmul.mubr.f32.gmra.mrb[176].mxu1 %v21223_v31  ;;  %11842 = vmatmul.mubr.f32.gmra.mrb[160].mxu0 %v21223_v31 }
0x1ace   : > { %11686 = vmatprep.mubr.f32.mxu1 %v21931_v61  ;;  %11847 = vmatprep.mubr.f32.mxu0 %v21931_v61 }
0x1acf   : > { %16108 = vmatpush3.bf16.msra.mxu1 %v16107_v36  ;;  %16140 = vmatpush3.bf16.msra.mxu0 %v16139_v6 }
0x1ad0   : > { %16110 = vmatprep.subr.bf16.mxu1 %v16109_v22  ;;  %16142 = vmatprep.subr.bf16.mxu0 %v16141_v23 }
0x1ad1   : > { %11687 = vmatmul.mubr.f32.gmra.mrb[178].mxu1 %v21232_v24  ;;  %11848 = vmatmul.mubr.f32.gmra.mrb[162].mxu0 %v21232_v24 }
0x1ad2   : > { %11692 = vmatprep.mubr.f32.mxu1 %v21931_v61  ;;  %11853 = vmatprep.mubr.f32.mxu0 %v21931_v61 }
0x1ad3   : > { %16112 = vmatpush3.bf16.msra.mxu1 %v16111_v32  ;;  %16144 = vmatpush3.bf16.msra.mxu0 %v16143_v51 }
0x1ad4   : > { %16114 = vmatprep.subr.bf16.mxu1 %v16113_v49  ;;  %16146 = vmatprep.subr.bf16.mxu0 %v16145_v43 }
0x1ad5   : > { %11693 = vmatmul.mubr.f32.gmra.mrb[180].mxu1 %v21241_v50  ;;  %11854 = vmatmul.mubr.f32.gmra.mrb[164].mxu0 %v21241_v50 }
0x1ad6   : > { %11698 = vmatprep.mubr.f32.mxu1 %v21931_v61  ;;  %11859 = vmatprep.mubr.f32.mxu0 %v21931_v61 }
0x1ad7   : > { %16116 = vmatpush3.bf16.msra.mxu1 %v16115_v34  ;;  %16148 = vmatpush3.bf16.msra.mxu0 %v16147_v13 }
0x1ad8   : > { %16118 = vmatprep.subr.bf16.mxu1 %v16117_v45  ;;  %16150 = vmatprep.subr.bf16.mxu0 %v16149_v60 }
0x1ad9   : > { %11699 = vmatmul.mubr.f32.gmra.mrb[182].mxu1 %v21249_v15  ;;  %11860 = vmatmul.mubr.f32.gmra.mrb[166].mxu0 %v21249_v15 }
0x1ada   : > { %11704 = vmatprep.mubr.f32.mxu1 %v21931_v61  ;;  %11865 = vmatprep.mubr.f32.mxu0 %v21931_v61 }
0x1adb   : > { %16120 = vmatpush3.bf16.msra.mxu1 %v16119_v7  ;;  %16152 = vmatpush3.bf16.msra.mxu0 %v16151_v10 }
0x1b2a   : > { %v11385_v55 = vpop.xlane.xlu1 %11384 }
0x1b2b   : > { %v11407_v0 = vmul.f32 0.0078125, %v11385_v55  ;;  %v11383_v30 = vpop.xlane.xlu0 %11382 }
0x1b2c   : > { %v11406_v52 = vmul.f32 0.0078125, %v11383_v30 }
0x1b2d   : > { %v11423_v5 = vadd.f32 1e-05, %v11407_v0 }
0x1b2e   : > { %v11422_v56 = vadd.f32 1e-05, %v11406_v52  ;;  %v11389_v17 = vpop.xlane.xlu1 %11388  ;;  %v21932_v52 = vld [vmem:[#allocation46_spill] sm:$0xff] }
0x1b2f   : > { %17456 = vrsqrt.f32 %v11423_v5  ;;  %v11409_v12 = vmul.f32 0.0078125, %v11389_v17  ;;  %v11387_v48 = vpop.xlane.xlu0 %11386  ;;  %v11574_v5 = vsub.s32 0, %v21932_v52  ;;  %v11578_v17 = vsub.s32 1, %v21932_v52 }
0x1b30   : > { %17458 = vrsqrt.f32 %v11422_v56  ;;  %v11408_v38 = vmul.f32 0.0078125, %v11387_v48  ;;  %v11582_v56 = vsub.s32 2, %v21932_v52 }
0x1b31   : > { %v11425_v37 = vadd.f32 1e-05, %v11409_v12  ;;  %v11586_v12 = vsub.s32 3, %v21932_v52 }
0x1b32   : > { %v11424_v36 = vadd.f32 1e-05, %v11408_v38  ;;  %v11393_v6 = vpop.xlane.xlu1 %11392 }
0x1b33   : > { %v11391_v22 = vpop.xlane.xlu0 %11390  ;;  %v11411_v19 = vmul.f32 0.0078125, %v11393_v6 }
0x1b34   : > { %17460 = vrsqrt.f32 %v11424_v36  ;;  %v11410_v14 = vmul.f32 0.0078125, %v11391_v22 }
0x1b35   : > { %17462 = vrsqrt.f32 %v11425_v37  ;;  %v11427_v28 = vadd.f32 1e-05, %v11411_v19 }
0x1b36   : > { %v11426_v42 = vadd.f32 1e-05, %v11410_v14  ;;  %v11397_v3 = vpop.xlane.xlu1 %11396 }
0x1b37   : > { %v11395_v23 = vpop.xlane.xlu0 %11394  ;;  %v11413_v53 = vmul.f32 0.0078125, %v11397_v3 }
0x1b38   : > { %17464 = vrsqrt.f32 %v11426_v42  ;;  %v11412_v59 = vmul.f32 0.0078125, %v11395_v23 }
0x1b39   : > { %v17457_v62 = vpop.eup %17456  ;;  %17466 = vrsqrt.f32 %v11427_v28 }
0x1b3a   : > { %v17459_v1 = vpop.eup %17458  ;;  %v11455_v51 = vmul.f32 %v17457_v62, %v21134_v63  ;;  %v11428_v40 = vadd.f32 1e-05, %v11412_v59 }
0x1b3b   : > { %v11454_v32 = vmul.f32 %v17459_v1, %v21137_v9  ;;  %v11429_v9 = vadd.f32 1e-05, %v11413_v53 }
0x1b3c   : > { %v11477_v34 = vmul.f32 %v21176_v41, %v11455_v51  ;;  %17468 = vrsqrt.f32 %v11428_v40 }
0x1b3d   : > { %v11476_v49 = vmul.f32 %v21176_v41, %v11454_v32  ;;  %17470 = vrsqrt.f32 %v11429_v9 }
0x1b3e   : > { %v17461_v43 = vpop.eup %17460  ;;  %v21268_v63 = vadd.f32 %v21183_v46, %v11477_v34 }
0x1b3f   : > { %v21259_v58 = vadd.f32 %v21183_v46, %v11476_v49  ;;  %v11456_v8 = vmul.f32 %v17461_v43, %v21147_v21  ;;  %v17463_v13 = vpop.eup %17462 }
0x1b40   : > { %v11457_v33 = vmul.f32 %v17463_v13, %v21144_v47 }
0x1b41   : > { %11705 = vmatmul.mubr.f32.gmra.mrb[184].mxu1 %v21259_v58  ;;  %11866 = vmatmul.mubr.f32.gmra.mrb[168].mxu0 %v21259_v58  ;;  %v11478_v57 = vmul.f32 %v21176_v41, %v11456_v8 }
0x1b42   : > { %11710 = vmatprep.mubr.f32.mxu1 %v21931_v61  ;;  %11871 = vmatprep.mubr.f32.mxu0 %v21931_v61  ;;  %v17465_v25 = vpop.eup %17464  ;;  %v11479_v45 = vmul.f32 %v21176_v41, %v11457_v33 }
0x1b43   : > { %v21277_v21 = vadd.f32 %v21183_v46, %v11478_v57  ;;  %v11458_v18 = vmul.f32 %v17465_v25, %v21157_v44  ;;  %v17467_v26 = vpop.eup %17466 }
0x1b44   : > { %v21286_v47 = vadd.f32 %v21183_v46, %v11479_v45  ;;  %v11459_v60 = vmul.f32 %v17467_v26, %v21154_v29 }
0x1b45   : > { %11711 = vmatmul.mubr.f32.gmra.mrb[186].mxu1 %v21268_v63  ;;  %11872 = vmatmul.mubr.f32.gmra.mrb[170].mxu0 %v21268_v63  ;;  %v11480_v2 = vmul.f32 %v21176_v41, %v11458_v18 }
0x1b46   : > { %11716 = vmatprep.mubr.f32.mxu1 %v21931_v61  ;;  %11877 = vmatprep.mubr.f32.mxu0 %v21931_v61  ;;  %v17469_v7 = vpop.eup %17468  ;;  %v11481_v27 = vmul.f32 %v21176_v41, %v11459_v60 }
0x1b47   : > { %v21295_v44 = vadd.f32 %v21183_v46, %v11480_v2  ;;  %v11460_v16 = vmul.f32 %v17469_v7, %v21167_v35  ;;  %v17471_v10 = vpop.eup %17470 }
0x1b48   : > { %v21304_v29 = vadd.f32 %v21183_v46, %v11481_v27  ;;  %v11461_v0 = vmul.f32 %v17471_v10, %v21164_v54 }
0x1b49   : > { %11717 = vmatmul.mubr.f32.gmra.mrb[188].mxu1 %v21277_v21  ;;  %11878 = vmatmul.mubr.f32.gmra.mrb[172].mxu0 %v21277_v21  ;;  %v11482_v55 = vmul.f32 %v21176_v41, %v11460_v16 }
0x1b4a   : > { %11722 = vmatprep.mubr.f32.mxu1 %v21931_v61  ;;  %11883 = vmatprep.mubr.f32.mxu0 %v21931_v61  ;;  %v11483_v30 = vmul.f32 %v21176_v41, %v11461_v0  ;;  %v11570_v41 = vld [vmem:[%s21703_s5] sm:$0xf] }
0x1b4b   : > { %v21313_v35 = vadd.f32 %v21183_v46, %v11482_v55  ;;  %v21336_v48 = vrot.slane %v11570_v41, %v11578_v17  ;;  %v21338_v38 = vrot.slane %v11570_v41, %v11586_v12 }
0x1b4c   : > { %v21321_v54 = vadd.f32 %v21183_v46, %v11483_v30  ;;  %v21334_v46 = vrot.slane %v11570_v41, %v11582_v56 }
0x1b4d   : > { %11723 = vmatmul.mubr.f32.gmra.mrb[190].mxu1 %v21286_v47  ;;  %11884 = vmatmul.mubr.f32.gmra.mrb[174].mxu0 %v21286_v47 }
0x1b4e   : > { %11728 = vmatprep.mubr.f32.mxu1 %v21931_v61  ;;  %11889 = vmatprep.mubr.f32.mxu0 %v21931_v61 }
0x1b51   : > { %11729 = vmatmul.mubr.f32.gmra.mrb[192].mxu1 %v21295_v44  ;;  %11890 = vmatmul.mubr.f32.gmra.mrb[176].mxu0 %v21295_v44 }
0x1b52   : > { %11734 = vmatprep.mubr.f32.mxu1 %v21931_v61  ;;  %11895 = vmatprep.mubr.f32.mxu0 %v21931_v61 }
0x1b55   : > { %11735 = vmatmul.mubr.f32.gmra.mrb[194].mxu1 %v21304_v29  ;;  %11896 = vmatmul.mubr.f32.gmra.mrb[178].mxu0 %v21304_v29 }
0x1b56   : > { %11740 = vmatprep.mubr.f32.mxu1 %v21931_v61  ;;  %11901 = vmatprep.mubr.f32.mxu0 %v21931_v61 }
0x1b59   : > { %11741 = vmatmul.mubr.f32.gmra.mrb[196].mxu1 %v21313_v35  ;;  %11902 = vmatmul.mubr.f32.gmra.mrb[180].mxu0 %v21313_v35 }
0x1b5a   : > { %11746 = vmatprep.mubr.f32.mxu1 %v21931_v61  ;;  %11907 = vmatprep.mubr.f32.mxu0 %v21931_v61  ;;  %v21332_v61 = vrot.slane %v11570_v41, %v11574_v5 }
0x1b5d   : > { %11747 = vmatmul.mubr.f32.gmra.mrb[198].mxu1 %v21321_v54  ;;  %11908 = vmatmul.mubr.f32.gmra.mrb[182].mxu0 %v21321_v54 }
0x1b90   : > { %v11658_v37 = vpop.f32.mrb[168].mxu1  ;;  %v11819_v36 = vpop.f32.mrb[152].mxu0 }
0x1b91   : > { %v11659_v6 = vadd.f32 %v11658_v37, %v21332_v61  ;;  %v11820_v22 = vadd.f32 %v11819_v36, %v21334_v46  ;;  %v11660_v14 = vpop.f32.mrb[169].mxu1  ;;  %v11821_v19 = vpop.f32.mrb[153].mxu0 }
0x1b92   : > { %v11661_v42 = vadd.f32 %v11660_v14, %v21336_v48  ;;  %v11822_v23 = vadd.f32 %v11821_v19, %v21338_v38 }
0x1b93   : > { %v11914_v3 = vmax.f32 %v11659_v6, 0.0  ;;  %v11916_v32 = vmax.f32 %v11820_v22, 0.0 }
0x1b94   : > { %v11915_v62 = vmax.f32 %v11661_v42, 0.0  ;;  %v11917_v1 = vmax.f32 %v11822_v23, 0.0  ;;  %v11664_v28 = vpop.f32.mrb[170].mxu1  ;;  %v11825_v59 = vpop.f32.mrb[154].mxu0 }
0x1b95   : > { %v11665_v51 = vadd.f32 %v11664_v28, %v21332_v61  ;;  %v11826_v49 = vadd.f32 %v11825_v59, %v21334_v46  ;;  %v11666_v43 = vpop.f32.mrb[171].mxu1  ;;  %v11827_v53 = vpop.f32.mrb[155].mxu0 }
0x1b96   : > { %v11667_v40 = vadd.f32 %v11666_v43, %v21336_v48  ;;  %v11828_v34 = vadd.f32 %v11827_v53, %v21338_v38  ;;  %12113 = vmatprep.mubr.f32.mxu1 %v11915_v62  ;;  %12258 = vmatprep.mubr.f32.mxu0 %v11917_v1 }
0x1b97   : > { %12114 = vmatmul.mubr.f32.vlgmr.msra.gmra.mrb[200].mxu1 %v11914_v3  ;;  %12259 = vmatmul.mubr.f32.vlgmr.msra.gmra.mrb[184].mxu0 %v11916_v32  ;;  %v11918_v33 = vmax.f32 %v11665_v51, 0.0  ;;  %v11920_v25 = vmax.f32 %v11826_v49, 0.0 }
0x1b98   : > { %v11919_v8 = vmax.f32 %v11667_v40, 0.0  ;;  %v11921_v13 = vmax.f32 %v11828_v34, 0.0  ;;  %v11670_v9 = vpop.f32.mrb[172].mxu1  ;;  %v11831_v57 = vpop.f32.mrb[156].mxu0 }
0x1b99   : > { %v11671_v45 = vadd.f32 %v11670_v9, %v21332_v61  ;;  %v11832_v18 = vadd.f32 %v11831_v57, %v21334_v46  ;;  %v11672_v26 = vpop.f32.mrb[173].mxu1  ;;  %v11833_v2 = vpop.f32.mrb[157].mxu0 }
0x1b9a   : > { %v11673_v60 = vadd.f32 %v11672_v26, %v21336_v48  ;;  %v11834_v7 = vadd.f32 %v11833_v2, %v21338_v38  ;;  %12118 = vmatprep.mubr.f32.mxu1 %v11919_v8  ;;  %12263 = vmatprep.mubr.f32.mxu0 %v11921_v13 }
0x1b9b   : > { %12119 = vmatmul.mubr.f32.gmra.mrb[202].mxu1 %v11918_v33  ;;  %12264 = vmatmul.mubr.f32.gmra.mrb[186].mxu0 %v11920_v25  ;;  %v11922_v0 = vmax.f32 %v11671_v45, 0.0  ;;  %v11924_v30 = vmax.f32 %v11832_v18, 0.0 }
0x1b9c   : > { %v11923_v27 = vmax.f32 %v11673_v60, 0.0  ;;  %v11925_v16 = vmax.f32 %v11834_v7, 0.0  ;;  %v11676_v10 = vpop.f32.mrb[174].mxu1  ;;  %v11837_v55 = vpop.f32.mrb[158].mxu0 }
0x1b9d   : > { %v11677_v52 = vadd.f32 %v11676_v10, %v21332_v61  ;;  %v11838_v5 = vadd.f32 %v11837_v55, %v21334_v46  ;;  %v11678_v56 = vpop.f32.mrb[175].mxu1  ;;  %v11839_v41 = vpop.f32.mrb[159].mxu0 }
0x1b9e   : > { %v11679_v17 = vadd.f32 %v11678_v56, %v21336_v48  ;;  %v11840_v12 = vadd.f32 %v11839_v41, %v21338_v38  ;;  %12123 = vmatprep.mubr.f32.mxu1 %v11923_v27  ;;  %12268 = vmatprep.mubr.f32.mxu0 %v11925_v16 }
0x1b9f   : > { %12124 = vmatmul.mubr.f32.gmra.mrb[204].mxu1 %v11922_v0  ;;  %12269 = vmatmul.mubr.f32.gmra.mrb[188].mxu0 %v11924_v30  ;;  %v11926_v14 = vmax.f32 %v11677_v52, 0.0  ;;  %v11928_v19 = vmax.f32 %v11838_v5, 0.0 }
0x1ba0   : > { %v11927_v37 = vmax.f32 %v11679_v17, 0.0  ;;  %v11929_v36 = vmax.f32 %v11840_v12, 0.0  ;;  %v11682_v6 = vpop.f32.mrb[176].mxu1  ;;  %v11843_v22 = vpop.f32.mrb[160].mxu0 }
0x1ba1   : > { %v11683_v42 = vadd.f32 %v11682_v6, %v21332_v61  ;;  %v11844_v23 = vadd.f32 %v11843_v22, %v21334_v46  ;;  %v11684_v62 = vpop.f32.mrb[177].mxu1  ;;  %v11845_v1 = vpop.f32.mrb[161].mxu0 }
0x1ba2   : > { %v11685_v28 = vadd.f32 %v11684_v62, %v21336_v48  ;;  %v11846_v59 = vadd.f32 %v11845_v1, %v21338_v38  ;;  %12128 = vmatprep.mubr.f32.mxu1 %v11927_v37  ;;  %12273 = vmatprep.mubr.f32.mxu0 %v11929_v36 }
0x1ba3   : > { %12129 = vmatmul.mubr.f32.gmra.mrb[206].mxu1 %v11926_v14  ;;  %12274 = vmatmul.mubr.f32.gmra.mrb[190].mxu0 %v11928_v19  ;;  %v11930_v43 = vmax.f32 %v11683_v42, 0.0  ;;  %v11932_v53 = vmax.f32 %v11844_v23, 0.0 }
0x1ba4   : > { %v11931_v3 = vmax.f32 %v11685_v28, 0.0  ;;  %v11933_v32 = vmax.f32 %v11846_v59, 0.0  ;;  %v11688_v51 = vpop.f32.mrb[178].mxu1  ;;  %v11849_v49 = vpop.f32.mrb[162].mxu0 }
0x1ba5   : > { %v11689_v40 = vadd.f32 %v11688_v51, %v21332_v61  ;;  %v11850_v34 = vadd.f32 %v11849_v49, %v21334_v46  ;;  %v11690_v8 = vpop.f32.mrb[179].mxu1  ;;  %v11851_v13 = vpop.f32.mrb[163].mxu0 }
0x1ba6   : > { %v11691_v9 = vadd.f32 %v11690_v8, %v21336_v48  ;;  %v11852_v57 = vadd.f32 %v11851_v13, %v21338_v38  ;;  %12133 = vmatprep.mubr.f32.mxu1 %v11931_v3  ;;  %12278 = vmatprep.mubr.f32.mxu0 %v11933_v32 }
0x1ba7   : > { %12134 = vmatmul.mubr.f32.gmra.mrb[208].mxu1 %v11930_v43  ;;  %12279 = vmatmul.mubr.f32.gmra.mrb[192].mxu0 %v11932_v53  ;;  %v11934_v26 = vmax.f32 %v11689_v40, 0.0  ;;  %v11936_v2 = vmax.f32 %v11850_v34, 0.0 }
0x1ba8   : > { %v11935_v33 = vmax.f32 %v11691_v9, 0.0  ;;  %v11937_v25 = vmax.f32 %v11852_v57, 0.0  ;;  %v11694_v45 = vpop.f32.mrb[180].mxu1  ;;  %v11855_v18 = vpop.f32.mrb[164].mxu0 }
0x1ba9   : > { %v11695_v60 = vadd.f32 %v11694_v45, %v21332_v61  ;;  %v11856_v7 = vadd.f32 %v11855_v18, %v21334_v46  ;;  %v11696_v27 = vpop.f32.mrb[181].mxu1  ;;  %v11857_v16 = vpop.f32.mrb[165].mxu0 }
0x1baa   : > { %v11697_v10 = vadd.f32 %v11696_v27, %v21336_v48  ;;  %v11858_v55 = vadd.f32 %v11857_v16, %v21338_v38  ;;  %12138 = vmatprep.mubr.f32.mxu1 %v11935_v33  ;;  %12283 = vmatprep.mubr.f32.mxu0 %v11937_v25 }
0x1bab   : > { %12139 = vmatmul.mubr.f32.gmra.mrb[210].mxu1 %v11934_v26  ;;  %12284 = vmatmul.mubr.f32.gmra.mrb[194].mxu0 %v11936_v2  ;;  %v11938_v56 = vmax.f32 %v11695_v60, 0.0  ;;  %v11940_v41 = vmax.f32 %v11856_v7, 0.0 }
0x1bac   : > { %v11939_v0 = vmax.f32 %v11697_v10, 0.0  ;;  %v11941_v30 = vmax.f32 %v11858_v55, 0.0  ;;  %v11700_v52 = vpop.f32.mrb[182].mxu1  ;;  %v11861_v5 = vpop.f32.mrb[166].mxu0 }
0x1bad   : > { %v11701_v17 = vadd.f32 %v11700_v52, %v21332_v61  ;;  %v11862_v12 = vadd.f32 %v11861_v5, %v21334_v46  ;;  %v11702_v37 = vpop.f32.mrb[183].mxu1  ;;  %v11863_v36 = vpop.f32.mrb[167].mxu0 }
0x1bae   : > { %v11703_v6 = vadd.f32 %v11702_v37, %v21336_v48  ;;  %v11864_v22 = vadd.f32 %v11863_v36, %v21338_v38  ;;  %12143 = vmatprep.mubr.f32.mxu1 %v11939_v0  ;;  %12288 = vmatprep.mubr.f32.mxu0 %v11941_v30 }
0x1baf   : > { %12144 = vmatmul.mubr.f32.gmra.mrb[212].mxu1 %v11938_v56  ;;  %12289 = vmatmul.mubr.f32.gmra.mrb[196].mxu0 %v11940_v41  ;;  %v11942_v42 = vmax.f32 %v11701_v17, 0.0  ;;  %v11944_v23 = vmax.f32 %v11862_v12, 0.0 }
0x1bb0   : > { %v11943_v14 = vmax.f32 %v11703_v6, 0.0  ;;  %v11945_v19 = vmax.f32 %v11864_v22, 0.0 }
0x1bb2   : > { %12148 = vmatprep.mubr.f32.mxu1 %v11943_v14  ;;  %12293 = vmatprep.mubr.f32.mxu0 %v11945_v19 }
0x1bb3   : > { %12149 = vmatmul.mubr.f32.gmra.mrb[214].mxu1 %v11942_v42  ;;  %12294 = vmatmul.mubr.f32.gmra.mrb[198].mxu0 %v11944_v23 }
0x1c14   : > { %v11706_v62 = vpop.f32.mrb[184].mxu1  ;;  %v11867_v1 = vpop.f32.mrb[168].mxu0 }
0x1c15   : > { %v11707_v28 = vadd.f32 %v11706_v62, %v21332_v61  ;;  %v11868_v59 = vadd.f32 %v11867_v1, %v21334_v46  ;;  %v11708_v3 = vpop.f32.mrb[185].mxu1  ;;  %v11869_v32 = vpop.f32.mrb[169].mxu0 }
0x1c16   : > { %v11709_v51 = vadd.f32 %v11708_v3, %v21336_v48  ;;  %v11870_v49 = vadd.f32 %v11869_v32, %v21338_v38 }
0x1c17   : > { %v11946_v8 = vmax.f32 %v11707_v28, 0.0  ;;  %v11948_v13 = vmax.f32 %v11868_v59, 0.0 }
0x1c18   : > { %v11947_v43 = vmax.f32 %v11709_v51, 0.0  ;;  %v11949_v53 = vmax.f32 %v11870_v49, 0.0  ;;  %v11712_v40 = vpop.f32.mrb[186].mxu1  ;;  %v11873_v34 = vpop.f32.mrb[170].mxu0 }
0x1c19   : > { %v11713_v9 = vadd.f32 %v11712_v40, %v21332_v61  ;;  %v11874_v57 = vadd.f32 %v11873_v34, %v21334_v46  ;;  %v11714_v33 = vpop.f32.mrb[187].mxu1  ;;  %v11875_v25 = vpop.f32.mrb[171].mxu0 }
0x1c1a   : > { %v11715_v45 = vadd.f32 %v11714_v33, %v21336_v48  ;;  %v11876_v18 = vadd.f32 %v11875_v25, %v21338_v38  ;;  %12153 = vmatprep.mubr.f32.mxu1 %v11947_v43  ;;  %12298 = vmatprep.mubr.f32.mxu0 %v11949_v53 }
0x1c1b   : > { %12154 = vmatmul.mubr.f32.gmra.mrb[216].mxu1 %v11946_v8  ;;  %12299 = vmatmul.mubr.f32.gmra.mrb[200].mxu0 %v11948_v13  ;;  %v11950_v27 = vmax.f32 %v11713_v9, 0.0  ;;  %v11952_v16 = vmax.f32 %v11874_v57, 0.0 }
0x1c1c   : > { %v11951_v26 = vmax.f32 %v11715_v45, 0.0  ;;  %v11953_v2 = vmax.f32 %v11876_v18, 0.0  ;;  %v11718_v60 = vpop.f32.mrb[188].mxu1  ;;  %v11879_v7 = vpop.f32.mrb[172].mxu0 }
0x1c1d   : > { %v11719_v10 = vadd.f32 %v11718_v60, %v21332_v61  ;;  %v11880_v55 = vadd.f32 %v11879_v7, %v21334_v46  ;;  %v11720_v0 = vpop.f32.mrb[189].mxu1  ;;  %v11881_v30 = vpop.f32.mrb[173].mxu0 }
0x1c1e   : > { %v11721_v52 = vadd.f32 %v11720_v0, %v21336_v48  ;;  %v11882_v5 = vadd.f32 %v11881_v30, %v21338_v38  ;;  %12158 = vmatprep.mubr.f32.mxu1 %v11951_v26  ;;  %12303 = vmatprep.mubr.f32.mxu0 %v11953_v2 }
0x1c1f   : > { %12159 = vmatmul.mubr.f32.gmra.mrb[218].mxu1 %v11950_v27  ;;  %12304 = vmatmul.mubr.f32.gmra.mrb[202].mxu0 %v11952_v16  ;;  %v11954_v37 = vmax.f32 %v11719_v10, 0.0  ;;  %v11956_v36 = vmax.f32 %v11880_v55, 0.0 }
0x1c20   : > { %v11955_v56 = vmax.f32 %v11721_v52, 0.0  ;;  %v11957_v41 = vmax.f32 %v11882_v5, 0.0  ;;  %v11724_v17 = vpop.f32.mrb[190].mxu1  ;;  %v11885_v12 = vpop.f32.mrb[174].mxu0 }
0x1c21   : > { %v11725_v6 = vadd.f32 %v11724_v17, %v21332_v61  ;;  %v11886_v22 = vadd.f32 %v11885_v12, %v21334_v46  ;;  %v11726_v14 = vpop.f32.mrb[191].mxu1  ;;  %v11887_v19 = vpop.f32.mrb[175].mxu0 }
0x1c22   : > { %v11727_v42 = vadd.f32 %v11726_v14, %v21336_v48  ;;  %v11888_v23 = vadd.f32 %v11887_v19, %v21338_v38  ;;  %12163 = vmatprep.mubr.f32.mxu1 %v11955_v56  ;;  %12308 = vmatprep.mubr.f32.mxu0 %v11957_v41 }
0x1c23   : > { %12164 = vmatmul.mubr.f32.gmra.mrb[220].mxu1 %v11954_v37  ;;  %12309 = vmatmul.mubr.f32.gmra.mrb[204].mxu0 %v11956_v36  ;;  %v11958_v3 = vmax.f32 %v11725_v6, 0.0  ;;  %v11960_v32 = vmax.f32 %v11886_v22, 0.0 }
0x1c24   : > { %v11959_v62 = vmax.f32 %v11727_v42, 0.0  ;;  %v11961_v1 = vmax.f32 %v11888_v23, 0.0  ;;  %v11730_v28 = vpop.f32.mrb[192].mxu1  ;;  %v11891_v59 = vpop.f32.mrb[176].mxu0 }
0x1c25   : > { %v11731_v51 = vadd.f32 %v11730_v28, %v21332_v61  ;;  %v11892_v49 = vadd.f32 %v11891_v59, %v21334_v46  ;;  %v11732_v43 = vpop.f32.mrb[193].mxu1  ;;  %v11893_v53 = vpop.f32.mrb[177].mxu0 }
0x1c26   : > { %v11733_v40 = vadd.f32 %v11732_v43, %v21336_v48  ;;  %v11894_v34 = vadd.f32 %v11893_v53, %v21338_v38  ;;  %12168 = vmatprep.mubr.f32.mxu1 %v11959_v62  ;;  %12313 = vmatprep.mubr.f32.mxu0 %v11961_v1 }
0x1c27   : > { %12169 = vmatmul.mubr.f32.gmra.mrb[222].mxu1 %v11958_v3  ;;  %12314 = vmatmul.mubr.f32.gmra.mrb[206].mxu0 %v11960_v32  ;;  %v11962_v33 = vmax.f32 %v11731_v51, 0.0  ;;  %v11964_v25 = vmax.f32 %v11892_v49, 0.0 }
0x1c28   : > { %v11963_v8 = vmax.f32 %v11733_v40, 0.0  ;;  %v11965_v13 = vmax.f32 %v11894_v34, 0.0  ;;  %v11736_v9 = vpop.f32.mrb[194].mxu1  ;;  %v11897_v57 = vpop.f32.mrb[178].mxu0 }
0x1c29   : > { %v11737_v45 = vadd.f32 %v11736_v9, %v21332_v61  ;;  %v11898_v18 = vadd.f32 %v11897_v57, %v21334_v46  ;;  %v11738_v26 = vpop.f32.mrb[195].mxu1  ;;  %v11899_v2 = vpop.f32.mrb[179].mxu0 }
0x1c2a   : > { %v11739_v60 = vadd.f32 %v11738_v26, %v21336_v48  ;;  %v11900_v7 = vadd.f32 %v11899_v2, %v21338_v38  ;;  %12173 = vmatprep.mubr.f32.mxu1 %v11963_v8  ;;  %12318 = vmatprep.mubr.f32.mxu0 %v11965_v13 }
0x1c2b   : > { %12174 = vmatmul.mubr.f32.gmra.mrb[224].mxu1 %v11962_v33  ;;  %12319 = vmatmul.mubr.f32.gmra.mrb[208].mxu0 %v11964_v25  ;;  %v11966_v0 = vmax.f32 %v11737_v45, 0.0  ;;  %v11968_v30 = vmax.f32 %v11898_v18, 0.0 }
0x1c2c   : > { %v11967_v27 = vmax.f32 %v11739_v60, 0.0  ;;  %v11969_v16 = vmax.f32 %v11900_v7, 0.0  ;;  %v11742_v10 = vpop.f32.mrb[196].mxu1  ;;  %v11903_v55 = vpop.f32.mrb[180].mxu0 }
0x1c2d   : > { %v11743_v52 = vadd.f32 %v11742_v10, %v21332_v61  ;;  %v11904_v5 = vadd.f32 %v11903_v55, %v21334_v46  ;;  %v11744_v56 = vpop.f32.mrb[197].mxu1  ;;  %v11905_v41 = vpop.f32.mrb[181].mxu0 }
0x1c2e   : > { %v11745_v17 = vadd.f32 %v11744_v56, %v21336_v48  ;;  %v11906_v12 = vadd.f32 %v11905_v41, %v21338_v38  ;;  %12178 = vmatprep.mubr.f32.mxu1 %v11967_v27  ;;  %12323 = vmatprep.mubr.f32.mxu0 %v11969_v16 }
0x1c2f   : > { %12179 = vmatmul.mubr.f32.gmra.mrb[226].mxu1 %v11966_v0  ;;  %12324 = vmatmul.mubr.f32.gmra.mrb[210].mxu0 %v11968_v30  ;;  %v11970_v14 = vmax.f32 %v11743_v52, 0.0  ;;  %v11972_v19 = vmax.f32 %v11904_v5, 0.0 }
0x1c30   : > { %v11971_v37 = vmax.f32 %v11745_v17, 0.0  ;;  %v11973_v36 = vmax.f32 %v11906_v12, 0.0  ;;  %v11748_v6 = vpop.f32.mrb[198].mxu1  ;;  %v11909_v22 = vpop.f32.mrb[182].mxu0 }
0x1c31   : > { %v11749_v42 = vadd.f32 %v11748_v6, %v21332_v61  ;;  %v11910_v23 = vadd.f32 %v11909_v22, %v21334_v46  ;;  %v11750_v62 = vpop.f32.mrb[199].mxu1  ;;  %v11911_v1 = vpop.f32.mrb[183].mxu0 }
0x1c32   : > { %v11751_v28 = vadd.f32 %v11750_v62, %v21336_v48  ;;  %v11912_v59 = vadd.f32 %v11911_v1, %v21338_v38  ;;  %12183 = vmatprep.mubr.f32.mxu1 %v11971_v37  ;;  %12328 = vmatprep.mubr.f32.mxu0 %v11973_v36  ;;  %v21407_v48 = vld [vmem:[%s21705_s7] ss:$0 sm:$0xff] }
0x1c33   : > { %12184 = vmatmul.mubr.f32.gmra.mrb[228].mxu1 %v11970_v14  ;;  %12329 = vmatmul.mubr.f32.gmra.mrb[212].mxu0 %v11972_v19  ;;  %v11974_v51 = vmax.f32 %v11749_v42, 0.0  ;;  %v11976_v49 = vmax.f32 %v11910_v23, 0.0 }
0x1c34   : > { %v11975_v3 = vmax.f32 %v11751_v28, 0.0  ;;  %v11977_v32 = vmax.f32 %v11912_v59, 0.0 }
0x1c36   : > { %12188 = vmatprep.mubr.f32.mxu1 %v11975_v3  ;;  %12333 = vmatprep.mubr.f32.mxu0 %v11977_v32 }
0x1c37   : > { %12189 = vmatmul.mubr.f32.gmra.mrb[230].mxu1 %v11974_v51  ;;  %12334 = vmatmul.mubr.f32.gmra.mrb[214].mxu0 %v11976_v49 }
0x1c6a   : > { %v13985_v61 = vpop.f32.mrb[200].mxu1  ;;  %v14065_v46 = vpop.f32.mrb[184].mxu0 }
0x1c6b   : > { %v13986_v38 = vpop.f32.mrb[201].mxu1  ;;  %v14066_v43 = vpop.f32.mrb[185].mxu0 }
0x1c6c   : > { %v13987_v53 = vadd.f32 %v13986_v38, %v13985_v61  ;;  %v14067_v40 = vadd.f32 %v14066_v43, %v14065_v46 }
0x1c6e   : > { %v12116_v34 = vadd.f32 %v13987_v53, %v21407_v48  ;;  %v13988_v8 = vpop.f32.mrb[202].mxu1  ;;  %v14068_v13 = vpop.f32.mrb[186].mxu0 }
0x1c6f   : > { %v13989_v9 = vpop.f32.mrb[203].mxu1  ;;  %v14069_v57 = vpop.f32.mrb[187].mxu0 }
0x1c70   : > { %v12261_v33 = vadd.f32 %v14067_v40, %v12116_v34  ;;  %v13990_v25 = vadd.f32 %v13989_v9, %v13988_v8  ;;  %v14070_v45 = vadd.f32 %v14069_v57, %v14068_v13 }
0x1c72   : > { %v12121_v18 = vadd.f32 %v13990_v25, %v21407_v48  ;;  %v13991_v26 = vpop.f32.mrb[204].mxu1  ;;  %v14071_v2 = vpop.f32.mrb[188].mxu0  ;;  %v21412_v60 = vadd.f32 %v12261_v33, %v21187_v39 }
0x1c73   : > { %v13992_v7 = vpop.f32.mrb[205].mxu1  ;;  %v14072_v27 = vpop.f32.mrb[189].mxu0 }
0x1c74   : > { %v12266_v16 = vadd.f32 %v14070_v45, %v12121_v18  ;;  %v13993_v10 = vadd.f32 %v13992_v7, %v13991_v26  ;;  %v14073_v55 = vadd.f32 %v14072_v27, %v14071_v2  ;;  %12357 = vadd.xlane.f32.xlu0 %v21412_v60 }
0x1c76   : > { %v12126_v0 = vadd.f32 %v13993_v10, %v21407_v48  ;;  %v13994_v30 = vpop.f32.mrb[206].mxu1  ;;  %v14074_v52 = vpop.f32.mrb[190].mxu0  ;;  %v21417_v5 = vadd.f32 %v12266_v16, %v21196_v4 }
0x1c77   : > { %v13995_v56 = vpop.f32.mrb[207].mxu1  ;;  %v14075_v41 = vpop.f32.mrb[191].mxu0 }
0x1c78   : > { %v12271_v17 = vadd.f32 %v14073_v55, %v12126_v0  ;;  %v13996_v12 = vadd.f32 %v13995_v56, %v13994_v30  ;;  %v14076_v39 = vadd.f32 %v14075_v41, %v14074_v52  ;;  %12359 = vadd.xlane.f32.xlu1 %v21417_v5 }
0x1c7a   : > { %v12131_v37 = vadd.f32 %v13996_v12, %v21407_v48  ;;  %v13997_v36 = vpop.f32.mrb[208].mxu1  ;;  %v14077_v6 = vpop.f32.mrb[192].mxu0  ;;  %v21422_v22 = vadd.f32 %v12271_v17, %v21205_v11 }
0x1c7b   : > { %v13998_v14 = vpop.f32.mrb[209].mxu1  ;;  %v14078_v19 = vpop.f32.mrb[193].mxu0 }
0x1c7c   : > { %v12276_v42 = vadd.f32 %v14076_v39, %v12131_v37  ;;  %v13999_v23 = vadd.f32 %v13998_v14, %v13997_v36  ;;  %v14079_v4 = vadd.f32 %v14078_v19, %v14077_v6  ;;  %12361 = vadd.xlane.f32.xlu0 %v21422_v22 }
0x1c7e   : > { %v12136_v62 = vadd.f32 %v13999_v23, %v21407_v48  ;;  %v14000_v1 = vpop.f32.mrb[210].mxu1  ;;  %v14080_v28 = vpop.f32.mrb[194].mxu0  ;;  %v21427_v59 = vadd.f32 %v12276_v42, %v21214_v20 }
0x1c7f   : > { %v14001_v3 = vpop.f32.mrb[211].mxu1  ;;  %v14081_v32 = vpop.f32.mrb[195].mxu0 }
0x1c80   : > { %v12281_v51 = vadd.f32 %v14079_v4, %v12136_v62  ;;  %v14002_v49 = vadd.f32 %v14001_v3, %v14000_v1  ;;  %v14082_v11 = vadd.f32 %v14081_v32, %v14080_v28  ;;  %12363 = vadd.xlane.f32.xlu1 %v21427_v59 }
0x1c82   : > { %v12141_v61 = vadd.f32 %v14002_v49, %v21407_v48  ;;  %v14003_v46 = vpop.f32.mrb[212].mxu1  ;;  %v14083_v38 = vpop.f32.mrb[196].mxu0  ;;  %v21432_v43 = vadd.f32 %v12281_v51, %v21223_v31 }
0x1c83   : > { %v14004_v53 = vpop.f32.mrb[213].mxu1  ;;  %v14084_v40 = vpop.f32.mrb[197].mxu0 }
0x1c84   : > { %v12286_v34 = vadd.f32 %v14082_v11, %v12141_v61  ;;  %v14005_v8 = vadd.f32 %v14004_v53, %v14003_v46  ;;  %v14085_v20 = vadd.f32 %v14084_v40, %v14083_v38  ;;  %12365 = vadd.xlane.f32.xlu0 %v21432_v43 }
0x1c86   : > { %v12146_v13 = vadd.f32 %v14005_v8, %v21407_v48  ;;  %v14006_v9 = vpop.f32.mrb[214].mxu1  ;;  %v14086_v57 = vpop.f32.mrb[198].mxu0  ;;  %v21437_v33 = vadd.f32 %v12286_v34, %v21232_v24 }
0x1c87   : > { %v14007_v25 = vpop.f32.mrb[215].mxu1  ;;  %v14087_v45 = vpop.f32.mrb[199].mxu0 }
0x1c88   : > { %v12291_v18 = vadd.f32 %v14085_v20, %v12146_v13  ;;  %v14008_v26 = vadd.f32 %v14007_v25, %v14006_v9  ;;  %v14088_v31 = vadd.f32 %v14087_v45, %v14086_v57  ;;  %12367 = vadd.xlane.f32.xlu1 %v21437_v33 }
0x1c8a   : > { %v12151_v2 = vadd.f32 %v14008_v26, %v21407_v48  ;;  %v21442_v7 = vadd.f32 %v12291_v18, %v21241_v50 }
0x1c8c   : > { %v12296_v27 = vadd.f32 %v14088_v31, %v12151_v2  ;;  %12369 = vadd.xlane.f32.xlu0 %v21442_v7 }
0x1c8e   : > { %v21446_v16 = vadd.f32 %v12296_v27, %v21249_v15 }
0x1c90   : > { %12371 = vadd.xlane.f32.xlu1 %v21446_v16 }
0x1cee   : > { %v14009_v24 = vpop.f32.mrb[216].mxu1  ;;  %v14089_v10 = vpop.f32.mrb[200].mxu0 }
0x1cef   : > { %v14010_v55 = vpop.f32.mrb[217].mxu1  ;;  %v14090_v0 = vpop.f32.mrb[201].mxu0 }
0x1cf0   : > { %v14011_v30 = vadd.f32 %v14010_v55, %v14009_v24  ;;  %v14091_v52 = vadd.f32 %v14090_v0, %v14089_v10 }
0x1cf2   : > { %v12156_v56 = vadd.f32 %v14011_v30, %v21407_v48  ;;  %v14012_v41 = vpop.f32.mrb[218].mxu1  ;;  %v14092_v17 = vpop.f32.mrb[202].mxu0 }
0x1cf3   : > { %v14013_v50 = vpop.f32.mrb[219].mxu1  ;;  %v14093_v12 = vpop.f32.mrb[203].mxu0 }
0x1cf4   : > { %v12301_v39 = vadd.f32 %v14091_v52, %v12156_v56  ;;  %v14014_v37 = vadd.f32 %v14013_v50, %v14012_v41  ;;  %v14094_v36 = vadd.f32 %v14093_v12, %v14092_v17 }
0x1cf6   : > { %v12161_v15 = vadd.f32 %v14014_v37, %v21407_v48  ;;  %v14015_v6 = vpop.f32.mrb[220].mxu1  ;;  %v14095_v14 = vpop.f32.mrb[204].mxu0  ;;  %v21452_v19 = vadd.f32 %v12301_v39, %v21259_v58 }
0x1cf7   : > { %v14016_v42 = vpop.f32.mrb[221].mxu1  ;;  %v14096_v23 = vpop.f32.mrb[205].mxu0 }
0x1cf8   : > { %v12306_v4 = vadd.f32 %v14094_v36, %v12161_v15  ;;  %v14017_v62 = vadd.f32 %v14016_v42, %v14015_v6  ;;  %v14097_v1 = vadd.f32 %v14096_v23, %v14095_v14  ;;  %12373 = vadd.xlane.f32.xlu0 %v21452_v19 }
0x1cfa   : > { %v12166_v28 = vadd.f32 %v14017_v62, %v21407_v48  ;;  %v14018_v3 = vpop.f32.mrb[222].mxu1  ;;  %v14098_v32 = vpop.f32.mrb[206].mxu0  ;;  %v21457_v51 = vadd.f32 %v12306_v4, %v21268_v63 }
0x1cfb   : > { %v14019_v49 = vpop.f32.mrb[223].mxu1  ;;  %v14099_v11 = vpop.f32.mrb[207].mxu0 }
0x1cfc   : > { %v12311_v61 = vadd.f32 %v14097_v1, %v12166_v28  ;;  %v14020_v46 = vadd.f32 %v14019_v49, %v14018_v3  ;;  %v14100_v58 = vadd.f32 %v14099_v11, %v14098_v32  ;;  %12375 = vadd.xlane.f32.xlu1 %v21457_v51 }
0x1cfe   : > { %v12171_v38 = vadd.f32 %v14020_v46, %v21407_v48  ;;  %v14021_v53 = vpop.f32.mrb[224].mxu1  ;;  %v14101_v40 = vpop.f32.mrb[208].mxu0  ;;  %v21462_v34 = vadd.f32 %v12311_v61, %v21277_v21 }
0x1cff   : > { %v14022_v8 = vpop.f32.mrb[225].mxu1  ;;  %v14102_v20 = vpop.f32.mrb[209].mxu0 }
0x1d00   : > { %v12316_v13 = vadd.f32 %v14100_v58, %v12171_v38  ;;  %v14023_v9 = vadd.f32 %v14022_v8, %v14021_v53  ;;  %v14103_v63 = vadd.f32 %v14102_v20, %v14101_v40  ;;  %12377 = vadd.xlane.f32.xlu0 %v21462_v34 }
0x1d01   : > { %v12358_v24 = vpop.xlane.xlu0 %12357 }
0x1d02   : > { %v12176_v57 = vadd.f32 %v14023_v9, %v21407_v48  ;;  %v14024_v25 = vpop.f32.mrb[226].mxu1  ;;  %v14104_v45 = vpop.f32.mrb[210].mxu0  ;;  %v21467_v18 = vadd.f32 %v12316_v13, %v21286_v47  ;;  %v12389_v50 = vmul.f32 0.0078125, %v12358_v24 }
0x1d03   : > { %v14025_v26 = vpop.f32.mrb[227].mxu1  ;;  %v14105_v31 = vpop.f32.mrb[211].mxu0 }
0x1d04   : > { %v12321_v2 = vadd.f32 %v14103_v63, %v12176_v57  ;;  %v14026_v27 = vadd.f32 %v14025_v26, %v14024_v25  ;;  %v14106_v21 = vadd.f32 %v14105_v31, %v14104_v45  ;;  %12379 = vadd.xlane.f32.xlu1 %v21467_v18  ;;  %v21481_v62 = vsub.f32 %v21412_v60, %v12389_v50 }
0x1d05   : > { %v12360_v12 = vpop.xlane.xlu1 %12359 }
0x1d06   : > { %v12181_v10 = vadd.f32 %v14026_v27, %v21407_v48  ;;  %v14027_v55 = vpop.f32.mrb[228].mxu1  ;;  %v14107_v0 = vpop.f32.mrb[212].mxu0  ;;  %v21472_v30 = vadd.f32 %v12321_v2, %v21295_v44  ;;  %v12390_v1 = vmul.f32 0.0078125, %v12360_v12  ;;  %v12421_v46 = vmul.f32 %v21481_v62, %v21481_v62 }
0x1d07   : > { %v14028_v52 = vpop.f32.mrb[229].mxu1  ;;  %v14108_v56 = vpop.f32.mrb[213].mxu0 }
0x1d08   : > { %v12326_v41 = vadd.f32 %v14106_v21, %v12181_v10  ;;  %v14029_v47 = vadd.f32 %v14028_v52, %v14027_v55  ;;  %v14109_v17 = vadd.f32 %v14108_v56, %v14107_v0  ;;  %12381 = vadd.xlane.f32.xlu0 %v21472_v30  ;;  %v21489_v11 = vsub.f32 %v21417_v5, %v12390_v1 }
0x1d09   : > { %v12362_v39 = vpop.xlane.xlu0 %12361 }
0x1d0a   : > { %v12186_v37 = vadd.f32 %v14029_v47, %v21407_v48  ;;  %v14030_v36 = vpop.f32.mrb[230].mxu1  ;;  %v14110_v15 = vpop.f32.mrb[214].mxu0  ;;  %v21477_v6 = vadd.f32 %v12326_v41, %v21304_v29  ;;  %v12391_v28 = vmul.f32 0.0078125, %v12362_v39  ;;  %v12422_v5 = vmul.f32 %v21489_v11, %v21489_v11 }
0x1d0b   : > { %v14031_v14 = vpop.f32.mrb[231].mxu1  ;;  %v14111_v44 = vpop.f32.mrb[215].mxu0 }
0x1d0c   : > { %v12331_v42 = vadd.f32 %v14109_v17, %v12186_v37  ;;  %v14032_v23 = vadd.f32 %v14031_v14, %v14030_v36  ;;  %v14112_v4 = vadd.f32 %v14111_v44, %v14110_v15  ;;  %12383 = vadd.xlane.f32.xlu1 %v21477_v6  ;;  %v21494_v60 = vsub.f32 %v21422_v22, %v12391_v28 }
0x1d0d   : > { %v12364_v49 = vpop.xlane.xlu1 %12363 }
0x1d0e   : > { %v12191_v3 = vadd.f32 %v14032_v23, %v21407_v48  ;;  %v21485_v32 = vadd.f32 %v12331_v42, %v21313_v35  ;;  %v12392_v58 = vmul.f32 0.0078125, %v12364_v49  ;;  %v12423_v8 = vmul.f32 %v21494_v60, %v21494_v60 }
0x1d10   : > { %v12336_v29 = vadd.f32 %v14112_v4, %v12191_v3  ;;  %12385 = vadd.xlane.f32.xlu0 %v21485_v32  ;;  %v21503_v53 = vsub.f32 %v21427_v59, %v12392_v58 }
0x1d11   : > { %v12366_v61 = vpop.xlane.xlu0 %12365 }
0x1d12   : > { %v12393_v38 = vmul.f32 0.0078125, %v12366_v61  ;;  %v21497_v48 = vadd.f32 %v12336_v29, %v21321_v54  ;;  %v12424_v9 = vmul.f32 %v21503_v53, %v21503_v53 }
0x1d14   : > { %12387 = vadd.xlane.f32.xlu1 %v21497_v48  ;;  %12437 = vadd.xlane.f32.xlu0 %v12421_v46  ;;  %v21506_v40 = vsub.f32 %v21432_v43, %v12393_v38 }
0x1d15   : > { %v12368_v35 = vpop.xlane.xlu1 %12367 }
0x1d16   : > { %v12394_v22 = vmul.f32 0.0078125, %v12368_v35  ;;  %v12425_v59 = vmul.f32 %v21506_v40, %v21506_v40 }
0x1d18   : > { %12439 = vadd.xlane.f32.xlu1 %v12422_v5  ;;  %12441 = vadd.xlane.f32.xlu0 %v12423_v8  ;;  %v21511_v20 = vsub.f32 %v21437_v33, %v12394_v22 }
0x1d19   : > { %v12370_v54 = vpop.xlane.xlu0 %12369 }
0x1d1a   : > { %v12395_v13 = vmul.f32 0.0078125, %v12370_v54  ;;  %v12426_v25 = vmul.f32 %v21511_v20, %v21511_v20 }
0x1d1c   : > { %v21518_v43 = vsub.f32 %v21442_v7, %v12395_v13  ;;  %12443 = vadd.xlane.f32.xlu1 %v12424_v9  ;;  %12445 = vadd.xlane.f32.xlu0 %v12425_v59 }
0x1d1d   : > { %v12372_v63 = vpop.xlane.xlu1 %12371 }
0x1d1e   : > { %v12396_v57 = vmul.f32 0.0078125, %v12372_v63  ;;  %v12427_v33 = vmul.f32 %v21518_v43, %v21518_v43 }
0x1d20   : > { %v21525_v45 = vsub.f32 %v21446_v16, %v12396_v57  ;;  %12447 = vadd.xlane.f32.xlu1 %v12426_v25  ;;  %12449 = vadd.xlane.f32.xlu0 %v12427_v33  ;;  %v21572_v57 = vld [vmem:[%s21933_s14] ss:$0 sm:$0xff]  ;;  %s17668_s14 = scalar_lea.vmem %s17667_s1, 4096 }
0x1d21   : > { %p17670_p2 = scmp.lt.s32.totalorder %s17668_s14, %s17662_s16 }
0x1d22   : > { %v12428_v26 = vmul.f32 %v21525_v45, %v21525_v45 }
0x1d23   : > { %p17671_p1 = por %p17670_p2, %p17669_p12 }
0x1d24   : > { %12451 = vadd.xlane.f32.xlu1 %v12428_v26 }
0x1d25   : > { %p17672_p13 = pnand %p17671_p1, %p17665_p7 }
0x1d85   : > { %v12374_v7 = vpop.xlane.xlu0 %12373 }
0x1d86   : > { %v12397_v31 = vmul.f32 0.0078125, %v12374_v7 }
0x1d88   : > { %v21530_v2 = vsub.f32 %v21452_v19, %v12397_v31  ;;  %v21578_v31 = vld [vmem:[%s21934_s18] ss:$0 sm:$0xff] }
0x1d89   : > { %v12376_v27 = vpop.xlane.xlu1 %12375 }
0x1d8a   : > { %v12398_v21 = vmul.f32 0.0078125, %v12376_v27  ;;  %v12429_v24 = vmul.f32 %v21530_v2, %v21530_v2 }
0x1d8c   : > { %v21535_v10 = vsub.f32 %v21457_v51, %v12398_v21  ;;  %12453 = vadd.xlane.f32.xlu0 %v12429_v24 }
0x1d8d   : > { %v12378_v16 = vpop.xlane.xlu0 %12377 }
0x1d8e   : > { %v12399_v55 = vmul.f32 0.0078125, %v12378_v16  ;;  %v12430_v0 = vmul.f32 %v21535_v10, %v21535_v10 }
0x1d90   : > { %v21540_v52 = vsub.f32 %v21462_v34, %v12399_v55  ;;  %12455 = vadd.xlane.f32.xlu1 %v12430_v0 }
0x1d91   : > { %v12380_v19 = vpop.xlane.xlu1 %12379 }
0x1d92   : > { %v12400_v56 = vmul.f32 0.0078125, %v12380_v19  ;;  %v12431_v41 = vmul.f32 %v21540_v52, %v21540_v52 }
0x1d94   : > { %v21545_v47 = vsub.f32 %v21467_v18, %v12400_v56  ;;  %12457 = vadd.xlane.f32.xlu0 %v12431_v41 }
0x1d95   : > { %v12382_v51 = vpop.xlane.xlu0 %12381 }
0x1d96   : > { %v12401_v17 = vmul.f32 0.0078125, %v12382_v51  ;;  %v12432_v50 = vmul.f32 %v21545_v47, %v21545_v47 }
0x1d98   : > { %v21550_v12 = vsub.f32 %v21472_v30, %v12401_v17  ;;  %12459 = vadd.xlane.f32.xlu1 %v12432_v50 }
0x1d99   : > { %v12384_v34 = vpop.xlane.xlu1 %12383 }
0x1d9a   : > { %v12402_v39 = vmul.f32 0.0078125, %v12384_v34  ;;  %v12433_v37 = vmul.f32 %v21550_v12, %v21550_v12 }
0x1d9c   : > { %v21555_v36 = vsub.f32 %v21477_v6, %v12402_v39  ;;  %12461 = vadd.xlane.f32.xlu0 %v12433_v37 }
0x1d9d   : > { %v12386_v18 = vpop.xlane.xlu0 %12385 }
0x1d9e   : > { %v12403_v15 = vmul.f32 0.0078125, %v12386_v18  ;;  %v12434_v14 = vmul.f32 %v21555_v36, %v21555_v36 }
0x1da0   : > { %v21560_v44 = vsub.f32 %v21485_v32, %v12403_v15  ;;  %12463 = vadd.xlane.f32.xlu1 %v12434_v14 }
0x1da1   : > { %v12388_v30 = vpop.xlane.xlu1 %12387  ;;  %v12438_v42 = vpop.xlane.xlu0 %12437 }
0x1da2   : > { %v12404_v23 = vmul.f32 0.0078125, %v12388_v30  ;;  %v12469_v4 = vmul.f32 0.0078125, %v12438_v42  ;;  %v12435_v1 = vmul.f32 %v21560_v44, %v21560_v44 }
0x1da4   : > { %v21565_v6 = vsub.f32 %v21497_v48, %v12404_v23  ;;  %v12485_v28 = vadd.f32 1e-05, %v12469_v4  ;;  %12465 = vadd.xlane.f32.xlu0 %v12435_v1 }
0x1da5   : > { %v12440_v3 = vpop.xlane.xlu1 %12439  ;;  %v12442_v49 = vpop.xlane.xlu0 %12441 }
0x1da6   : > { %17472 = vrsqrt.f32 %v12485_v28  ;;  %v12470_v29 = vmul.f32 0.0078125, %v12440_v3  ;;  %v12471_v61 = vmul.f32 0.0078125, %v12442_v49  ;;  %v12436_v32 = vmul.f32 %v21565_v6, %v21565_v6 }
0x1da8   : > { %v12486_v46 = vadd.f32 1e-05, %v12470_v29  ;;  %v12487_v58 = vadd.f32 1e-05, %v12471_v61  ;;  %12467 = vadd.xlane.f32.xlu1 %v12436_v32 }
0x1da9   : > { %v12444_v38 = vpop.xlane.xlu1 %12443  ;;  %v12446_v35 = vpop.xlane.xlu0 %12445 }
0x1daa   : > { %17474 = vrsqrt.f32 %v12486_v46  ;;  %v12472_v5 = vmul.f32 0.0078125, %v12444_v38  ;;  %v12473_v22 = vmul.f32 0.0078125, %v12446_v35 }
0x1dab   : > { %17476 = vrsqrt.f32 %v12487_v58 }
0x1dac   : > { %v12488_v48 = vadd.f32 1e-05, %v12472_v5  ;;  %v12489_v8 = vadd.f32 1e-05, %v12473_v22 }
0x1dad   : > { %v12448_v54 = vpop.xlane.xlu1 %12447  ;;  %v12450_v13 = vpop.xlane.xlu0 %12449 }
0x1dae   : > { %17478 = vrsqrt.f32 %v12488_v48  ;;  %v12474_v9 = vmul.f32 0.0078125, %v12448_v54  ;;  %v12475_v59 = vmul.f32 0.0078125, %v12450_v13 }
0x1daf   : > { %17480 = vrsqrt.f32 %v12489_v8 }
0x1db0   : > { %v17473_v63 = vpop.eup %17472  ;;  %v12490_v25 = vadd.f32 1e-05, %v12474_v9  ;;  %v12491_v33 = vadd.f32 1e-05, %v12475_v59 }
0x1db1   : > { %v12517_v26 = vmul.f32 %v17473_v63, %v21481_v62  ;;  %v12452_v7 = vpop.xlane.xlu1 %12451 }
0x1db2   : > { %17482 = vrsqrt.f32 %v12490_v25  ;;  %v12476_v27 = vmul.f32 0.0078125, %v12452_v7 }
0x1db3   : > { %v12539_v21 = vmul.f32 %v21572_v57, %v12517_v26  ;;  %17484 = vrsqrt.f32 %v12491_v33 }
0x1db4   : > { %v17475_v24 = vpop.eup %17474  ;;  %v12492_v16 = vadd.f32 1e-05, %v12476_v27 }
0x1db5   : > { %v17477_v55 = vpop.eup %17476  ;;  %v12561_v0 = vadd.f32 %v21578_v31, %v12539_v21  ;;  %v12518_v19 = vmul.f32 %v17475_v24, %v21489_v11 }
0x1db6   : > { %v12519_v62 = vmul.f32 %v17477_v55, %v21494_v60  ;;  %17486 = vrsqrt.f32 %v12492_v16 }
0x1db7   : > { %12577 = vst [vmem:[%s21586_s13] sm:$0xff] %v12561_v0  ;;  %v12540_v56 = vmul.f32 %v21572_v57, %v12518_v19 }
0x1db8   : > { %v17479_v41 = vpop.eup %17478  ;;  %v12541_v51 = vmul.f32 %v21572_v57, %v12519_v62 }
0x1db9   : > { %v17481_v17 = vpop.eup %17480  ;;  %v12562_v50 = vadd.f32 %v21578_v31, %v12540_v56  ;;  %v12520_v11 = vmul.f32 %v17479_v41, %v21503_v53 }
0x1dba   : > { %v12563_v60 = vadd.f32 %v21578_v31, %v12541_v51  ;;  %v12521_v34 = vmul.f32 %v17481_v17, %v21506_v40 }
0x1dbb   : > { %12578 = vst [vmem:[%s21586_s13 + $0x8] sm:$0xff] %v12562_v50  ;;  %v12542_v39 = vmul.f32 %v21572_v57, %v12520_v11 }
0x1dbc   : > { %v17483_v37 = vpop.eup %17482  ;;  %12579 = vst [vmem:[%s21586_s13 + $0x10] sm:$0xff] %v12563_v60  ;;  %v12543_v18 = vmul.f32 %v21572_v57, %v12521_v34 }
0x1dbd   : > { %v17485_v15 = vpop.eup %17484  ;;  %v12564_v14 = vadd.f32 %v21578_v31, %v12542_v39  ;;  %v12522_v53 = vmul.f32 %v17483_v37, %v21511_v20 }
0x1dbe   : > { %v12565_v30 = vadd.f32 %v21578_v31, %v12543_v18  ;;  %v12523_v42 = vmul.f32 %v17485_v15, %v21518_v43 }
0x1dbf   : > { %12580 = vst [vmem:[%s21586_s13 + $0x18] sm:$0xff] %v12564_v14  ;;  %v12544_v40 = vmul.f32 %v21572_v57, %v12522_v53 }
0x1dc0   : > { %v17487_v23 = vpop.eup %17486  ;;  %12581 = vst [vmem:[%s21586_s13 + $0x20] sm:$0xff] %v12565_v30  ;;  %v12545_v4 = vmul.f32 %v21572_v57, %v12523_v42 }
0x1dc1   : > { %v12566_v1 = vadd.f32 %v21578_v31, %v12544_v40  ;;  %v12524_v28 = vmul.f32 %v17487_v23, %v21525_v45 }
0x1dc2   : > { %v12567_v3 = vadd.f32 %v21578_v31, %v12545_v4 }
0x1dc3   : > { %12582 = vst [vmem:[%s21586_s13 + $0x28] sm:$0xff] %v12566_v1  ;;  %v12546_v20 = vmul.f32 %v21572_v57, %v12524_v28 }
0x1dc4   : > { %12583 = vst [vmem:[%s21586_s13 + $0x30] sm:$0xff] %v12567_v3 }
0x1dc5   : > { %v12568_v49 = vadd.f32 %v21578_v31, %v12546_v20 }
0x1dc7   : > { %12584 = vst [vmem:[%s21586_s13 + $0x38] sm:$0xff] %v12568_v49 }
0x1e19   : > { %v12454_v43 = vpop.xlane.xlu0 %12453 }
0x1e1a   : > { %v12477_v29 = vmul.f32 0.0078125, %v12454_v43 }
0x1e1c   : > { %v12493_v61 = vadd.f32 1e-05, %v12477_v29 }
0x1e1d   : > { %v12456_v32 = vpop.xlane.xlu1 %12455 }
0x1e1e   : > { %17488 = vrsqrt.f32 %v12493_v61  ;;  %v12478_v46 = vmul.f32 0.0078125, %v12456_v32 }
0x1e20   : > { %v12494_v58 = vadd.f32 1e-05, %v12478_v46 }
0x1e21   : > { %v12458_v38 = vpop.xlane.xlu0 %12457 }
0x1e22   : > { %17490 = vrsqrt.f32 %v12494_v58  ;;  %v12479_v35 = vmul.f32 0.0078125, %v12458_v38 }
0x1e24   : > { %v12495_v45 = vadd.f32 1e-05, %v12479_v35 }
0x1e25   : > { %v12460_v5 = vpop.xlane.xlu1 %12459 }
0x1e26   : > { %17492 = vrsqrt.f32 %v12495_v45  ;;  %v12480_v22 = vmul.f32 0.0078125, %v12460_v5 }
0x1e28   : > { %v17489_v48 = vpop.eup %17488  ;;  %v12496_v8 = vadd.f32 1e-05, %v12480_v22 }
0x1e29   : > { %v12525_v54 = vmul.f32 %v17489_v48, %v21530_v2  ;;  %v12462_v13 = vpop.xlane.xlu0 %12461 }
0x1e2a   : > { %17494 = vrsqrt.f32 %v12496_v8  ;;  %v12481_v9 = vmul.f32 0.0078125, %v12462_v13 }
0x1e2b   : > { %v12547_v59 = vmul.f32 %v21572_v57, %v12525_v54 }
0x1e2c   : > { %v17491_v63 = vpop.eup %17490  ;;  %v12497_v25 = vadd.f32 1e-05, %v12481_v9 }
0x1e2d   : > { %v12569_v33 = vadd.f32 %v21578_v31, %v12547_v59  ;;  %v12526_v26 = vmul.f32 %v17491_v63, %v21535_v10  ;;  %v12464_v7 = vpop.xlane.xlu1 %12463 }
0x1e2e   : > { %17496 = vrsqrt.f32 %v12497_v25  ;;  %v12482_v27 = vmul.f32 0.0078125, %v12464_v7 }
0x1e2f   : > { %12585 = vst [vmem:[%s21586_s13 + $0x40] sm:$0xff] %v12569_v33  ;;  %v12548_v21 = vmul.f32 %v21572_v57, %v12526_v26 }
0x1e30   : > { %v17493_v24 = vpop.eup %17492  ;;  %v12498_v2 = vadd.f32 1e-05, %v12482_v27 }
0x1e31   : > { %v12570_v16 = vadd.f32 %v21578_v31, %v12548_v21  ;;  %v12527_v55 = vmul.f32 %v17493_v24, %v21540_v52  ;;  %v12466_v0 = vpop.xlane.xlu0 %12465 }
0x1e32   : > { %17498 = vrsqrt.f32 %v12498_v2  ;;  %v12483_v19 = vmul.f32 0.0078125, %v12466_v0 }
0x1e33   : > { %12586 = vst [vmem:[%s21586_s13 + $0x48] sm:$0xff] %v12570_v16  ;;  %v12549_v10 = vmul.f32 %v21572_v57, %v12527_v55 }
0x1e34   : > { %v17495_v62 = vpop.eup %17494  ;;  %v12499_v56 = vadd.f32 1e-05, %v12483_v19 }
0x1e35   : > { %v12571_v41 = vadd.f32 %v21578_v31, %v12549_v10  ;;  %v12528_v51 = vmul.f32 %v17495_v62, %v21545_v47  ;;  %v12468_v17 = vpop.xlane.xlu1 %12467 }
0x1e36   : > { %17500 = vrsqrt.f32 %v12499_v56  ;;  %v12484_v50 = vmul.f32 0.0078125, %v12468_v17 }
0x1e37   : > { %12587 = vst [vmem:[%s21586_s13 + $0x50] sm:$0xff] %v12571_v41  ;;  %v12550_v52 = vmul.f32 %v21572_v57, %v12528_v51 }
0x1e38   : > { %v17497_v11 = vpop.eup %17496  ;;  %v12500_v60 = vadd.f32 1e-05, %v12484_v50 }
0x1e39   : > { %v12572_v34 = vadd.f32 %v21578_v31, %v12550_v52  ;;  %v12529_v39 = vmul.f32 %v17497_v11, %v21550_v12 }
0x1e3a   : > { %17502 = vrsqrt.f32 %v12500_v60 }
0x1e3b   : > { %12588 = vst [vmem:[%s21586_s13 + $0x58] sm:$0xff] %v12572_v34  ;;  %v12551_v47 = vmul.f32 %v21572_v57, %v12529_v39 }
0x1e3c   : > { %v17499_v37 = vpop.eup %17498 }
0x1e3d   : > { %v12573_v18 = vadd.f32 %v21578_v31, %v12551_v47  ;;  %v12530_v15 = vmul.f32 %v17499_v37, %v21555_v36 }
0x1e3f   : > { %12589 = vst [vmem:[%s21586_s13 + $0x60] sm:$0xff] %v12573_v18  ;;  %v12552_v14 = vmul.f32 %v21572_v57, %v12530_v15 }
0x1e40   : > { %v17501_v53 = vpop.eup %17500 }
0x1e41   : > { %v12574_v12 = vadd.f32 %v21578_v31, %v12552_v14  ;;  %v12531_v30 = vmul.f32 %v17501_v53, %v21560_v44 }
0x1e43   : > { %12590 = vst [vmem:[%s21586_s13 + $0x68] sm:$0xff] %v12574_v12  ;;  %v12553_v42 = vmul.f32 %v21572_v57, %v12531_v30 }
0x1e44   : > { %v17503_v40 = vpop.eup %17502 }
0x1e45   : > { %v12575_v23 = vadd.f32 %v21578_v31, %v12553_v42  ;;  %v12532_v4 = vmul.f32 %v17503_v40, %v21565_v6 }
0x1e47   : > { %12591 = vst [vmem:[%s21586_s13 + $0x70] sm:$0xff] %v12575_v23  ;;  %v12554_v36 = vmul.f32 %v21572_v57, %v12532_v4 }
0x1e49   : > { %v12576_v44 = vadd.f32 %v21578_v31, %v12554_v36 }
0x1e4b   : > { %12592 = vst [vmem:[%s21586_s13 + $0x78] sm:$0xff] %v12576_v44 }
0x1e4c   : > { %17675 = shalt.err (!%p17672_p13)
}
0x1e4d   : > { %s17676_s26 = scalar_lea.hbm %s21650_s11, 2048  ;;  %s17680_s13 = scalar_lea.hbm %s21935_s29, 4096 }
0x1e4e   : > { %p17677_p9 = scmp.ne.s32.totalorder %s21650_s11, %s17676_s26  ;;  %p17681_p4 = scmp.lt.u32.totalorder %s21650_s11, %s21935_s29 }
0x1e4f   : > { %p17682_p8 = scmp.lt.u32.totalorder %s17680_s13, %s17676_s26  ;;  %p17684_p3 = scmp.lt.u32.totalorder %s17676_s26, %s21650_s11 }
0x1e50   : > { %p17678_p0 = pnand %p17677_p9, %p17987_p10 }
0x1e51   : > { %p17683_p6 = por %p17682_p8, %p17681_p4 }
0x1e52   : > { %p17679_p11 = pneg %p17678_p0 }
0x1e53   : > { %p17685_p5 = por %p17684_p3, %p17683_p6 }
0x1e55   : > { %p17686_p7 = pnand %p17685_p5, %p17679_p11 }
0x1e57   : > { %17689 = shalt.err (!%p17686_p7)
}
0x1e58   : > { %s17758_s27 = smov 128   ;;  %s17759_s16 = smov 8  }
0x1e59   : > { %16283 = dma.vmem_to_hbm [thread:$0]  (%p17987_p10), %s21652_s28, 2048, %s21650_s11, %s12594_s10, %s17758_s27, %s17758_s27, %s17759_s16  }
0x1e5a PF: > { %s21936_s25 = sld [smem:[#allocation16_spill]]  ;;  %s21937_s1 = sld [smem:[#allocation17_spill]] }
0x1e5b   : > { %p21939_p2 = scmp.ge.s32.totalorder %s17736_s24, 2 }
0x1e60   : > { %s12623_s14 = sand.u32 1, %s21936_s25   ;;  %p21938_p12 = scmp.ne.s32.totalorder %s21937_s1, 0 }
0x1e61   : > { %s12624_s26 = scalar_lea.sflag [#allocation4], %s12623_s14 }
0x1e62   : > { %p16303_p1 = pnand %p21939_p2, %p21938_p12 }
0x1e64   : > { %17719 = dma.done.wait (!%p16303_p1), %s12624_s26, 2048  }
0x1e65   : > { %17721 = vsyncadd (!%p16303_p1), %s12624_s26, 4294965248  ;;  %p27_p13 = scmp.ge.s32.totalorder %s17977_s30, 4   ;;  %s21940_s21 = smov %s17728_s22 }
0x1e66   : > { %s21941_s22 = smov %s17732_s23  ;;  %s21942_s23 = smov %s17993_s20 }
0x1e67   : > { %s21943_s24 = smov %s17977_s30  ;;  %29 = sbr.rel (!%p27_p13) target bundleno = 12 (0xc), region = 129 }
0x1e6e   :  { %12629 = vsyncpa [#allocation3], 1 }
0x1e6f   :  { %12631 = vsyncpa [#allocation3 + $0x1], 1 }
0x1e70   :  { %12632 = vsyncpa [#allocation6], 1 }
0x1e71   :  { %12633 = vsyncpa [#allocation9], 1 }
0x1e72   :  { %12634 = vsyncpa [#allocation4], 1 }
0x1e73   :  { %12636 = vsyncpa [#allocation4 + $0x1], 1 }

</bundles_post_ra>
